<compile_context>
chip_gen: v5e
topology: v5e:2x2
jax: 0.10.0
libtpu: 0.0.40
codegen_flags: <defaults>
</compile_context>

<pallas_src>
import functools

import numpy as np
import jax
import jax.numpy as jnp
from jax.experimental import pallas as pl
from jax.experimental.pallas import tpu as pltpu


# -----------------------------------------------------------------------------
# Pallas kernel: whole residual block for Bn batch elements per grid step.
# -----------------------------------------------------------------------------
def _resblock_kernel(xp_ref, w1_ref, b1_ref, w2_ref, wb_ref, bo_ref, out_ref,
                     y1p_ref, *, Bn, H, W, Cin, Cp):
    M = Bn * H * W
    Hh, Wh = H // 2, W // 2
    cdt = y1p_ref.dtype                                   # bf16 matmul-operand dtype

    # ---- conv1 (3x3, pad 1): 9 accumulating MXU dots over shifted windows of padded x
    acc1 = jnp.zeros((M, Cp), jnp.float32)
    for t in range(9):
        dy, dx = divmod(t, 3)
        piece = xp_ref[:, dy:dy + H, dx:dx + W, :].reshape(M, Cin)
        acc1 = acc1 + jnp.dot(piece, w1_ref[t],
                              preferred_element_type=jnp.float32)
    y1 = jnp.maximum(acc1 + b1_ref[...], 0.0)             # (M, Cp) f32

    # ---- stage relu(conv1) into the zero-haloed scratch.
    #      Only the 1-px halo is zeroed; the interior is fully overwritten every step,
    #      so the batch grid axis can stay "parallel".
    y1p_ref[:, 0:1, :, :] = jnp.zeros((Bn, 1, W + 2, Cp), cdt)
    y1p_ref[:, H + 1:H + 2, :, :] = jnp.zeros((Bn, 1, W + 2, Cp), cdt)
    y1p_ref[:, 1:H + 1, 0:1, :] = jnp.zeros((Bn, H, 1, Cp), cdt)
    y1p_ref[:, 1:H + 1, W + 1:W + 2, :] = jnp.zeros((Bn, H, 1, Cp), cdt)
    y1p_ref[:, 1:H + 1, 1:W + 1, :] = y1.reshape(Bn, H, W, Cp).astype(cdt)

    # ---- conv2 (3x3, pad 1) + bypass 1x1 conv: 10 accumulating dots, no concat ----
    #      (center taps of the padded input are exactly the raw x for the bypass)
    xc = xp_ref[:, 1:H + 1, 1:W + 1, :].reshape(M, Cin)
    acc2 = jnp.dot(xc, wb_ref[...], preferred_element_type=jnp.float32)
    for t in range(9):
        dy, dx = divmod(t, 3)
        piece = y1p_ref[:, dy:dy + H, dx:dx + W, :].reshape(M, Cp)
        acc2 = acc2 + jnp.dot(piece, w2_ref[t],
                              preferred_element_type=jnp.float32)

    # ---- AvgPool2d(2) fully in-register (no scratch round trip) ----
    #      pool(conv2(y1) + b2) + pool(x) @ Wb + bb == pool(acc2) + (b2 + bb)
    s = acc2.reshape(Bn * Hh, 2, W, Cp)
    sh = s[:, 0] + s[:, 1]                                # pool along H (plane select)
    sw = sh.reshape(Bn * Hh, Wh, 2, Cp)
    pooled = (sw[:, :, 0, :] + sw[:, :, 1, :]) * 0.25     # pool along W
    out_ref[...] = (pooled.reshape(Bn, Hh, Wh, Cp)
                    + bo_ref[...]).astype(out_ref.dtype)  # + (b2 + bb)


def _pick_batch_block(N, H, W, Cin, Cp, budget_bytes=16 << 20):
    """Largest Bn (divisor of N) within a conservative VMEM budget, >= 2 grid steps."""
    Hh, Wh = H // 2, W // 2
    per_img = (
        2 * (H + 2) * (W + 2) * Cin * 2     # padded-x input block, double buffered (bf16)
        + 2 * Hh * Wh * Cp * 4              # output block, double buffered (f32)
        + (H + 2) * (W + 2) * Cp * 2        # zero-haloed relu(conv1) scratch (bf16)
        + 6 * H * W * Cp * 4                # f32 accumulators / temporaries headroom
    )
    bn = int(max(1, min(N, budget_bytes // max(per_img, 1))))
    if N >= 2:
        bn = min(bn, max(1, N // 2))        # keep >= 2 grid steps (v7x megacore)
    while N % bn:
        bn -= 1
    return max(bn, 1)


# -----------------------------------------------------------------------------
# Wrapper: NCHW input + spectral-normalized OIHW params -> NCHW output.
# -----------------------------------------------------------------------------
def first_resblock_discriminator(x_nchw, params_oihw, *, matmul_dtype=jnp.bfloat16):
    """x_nchw: (N, Cin, H, W) float32.  Returns (N, Cout, H//2, W//2) float32."""
    w1, b1, w2, b2, wb, bb = params_oihw                # OIHW weights (post spectral norm)
    N, Cin, H, W = x_nchw.shape
    Cout = w1.shape[0]
    assert H % 2 == 0 and W % 2 == 0
    Hh, Wh = H // 2, W // 2
    Cp = ((Cout + 127) // 128) * 128                    # lane-dense output channels
    pc = Cp - Cout

    # NHWC + 1-px zero halo + bf16 cast (one fused XLA pass; no wrapper-side im2col)
    x_nhwc = jnp.transpose(x_nchw, (0, 2, 3, 1))
    xp = jnp.pad(x_nhwc, ((0, 0), (1, 1), (1, 1), (0, 0))).astype(matmul_dtype)

    # Packed, channel-padded weights (tap-major: t = ky*3 + kx).
    w1p = jnp.pad(jnp.transpose(w1, (2, 3, 1, 0)).reshape(9, Cin, Cout),
                  ((0, 0), (0, 0), (0, pc))).astype(matmul_dtype)         # (9, Cin, Cp)
    w2p = jnp.pad(jnp.transpose(w2, (2, 3, 1, 0)).reshape(9, Cout, Cout),
                  ((0, 0), (0, pc), (0, pc))).astype(matmul_dtype)        # (9, Cp, Cp)
    wbp = jnp.pad(jnp.transpose(wb[:, :, 0, 0], (1, 0)),
                  ((0, 0), (0, pc))).astype(matmul_dtype)                 # (Cin, Cp)
    b1p = jnp.pad(b1, (0, pc)).reshape(1, Cp).astype(jnp.float32)
    bop = jnp.pad(b2 + bb, (0, pc)).reshape(1, Cp).astype(jnp.float32)    # pool-commuting bias

    Bn = _pick_batch_block(N, H, W, Cin, Cp)
    grid = (N // Bn,)

    kernel = functools.partial(_resblock_kernel, Bn=Bn, H=H, W=W, Cin=Cin, Cp=Cp)

    out_nhwc = pl.pallas_call(
        kernel,
        out_shape=jax.ShapeDtypeStruct((N, Hh, Wh, Cp), jnp.float32),
        grid=grid,
        in_specs=[
            pl.BlockSpec((Bn, H + 2, W + 2, Cin), lambda g: (g, 0, 0, 0)),  # padded x (bf16)
            pl.BlockSpec((9, Cin, Cp), lambda g: (0, 0, 0)),                # conv1 taps
            pl.BlockSpec((1, Cp), lambda g: (0, 0)),                        # b1
            pl.BlockSpec((9, Cp, Cp), lambda g: (0, 0, 0)),                 # conv2 taps
            pl.BlockSpec((Cin, Cp), lambda g: (0, 0)),                      # bypass 1x1
            pl.BlockSpec((1, Cp), lambda g: (0, 0)),                        # b2 + bb
        ],
        out_specs=pl.BlockSpec((Bn, Hh, Wh, Cp), lambda g: (g, 0, 0, 0)),
        scratch_shapes=[
            pltpu.VMEM((Bn, H + 2, W + 2, Cp), matmul_dtype),   # zero-haloed relu(conv1)
        ],
        compiler_params=pltpu.CompilerParams(
            dimension_semantics=("parallel",),
            vmem_limit_bytes=48 * 1024 * 1024,
        ),
    )(xp, w1p, b1p, w2p, wbp, bop)

    out_nhwc = out_nhwc[..., :Cout]                      # drop lane padding
    return jnp.transpose(out_nhwc, (0, 3, 1, 2))         # NHWC -> NCHW


# -----------------------------------------------------------------------------
# Deterministic parameter construction (matches the PyTorch __init__ + SpectralNorm)
# -----------------------------------------------------------------------------
def _l2normalize(v, eps=1e-12):
    return v / (jnp.linalg.norm(v) + eps)


def _spectral_norm(w_oihw, u0, v0, power_iterations=1):
    """Mirrors SpectralNorm._update_u_v starting from the random u/v init."""
    h = w_oihw.shape[0]
    w_mat = w_oihw.reshape(h, -1)
    u, v = u0, v0
    for _ in range(power_iterations):
        v = _l2normalize(w_mat.T @ u)
        u = _l2normalize(w_mat @ v)
    sigma = u @ (w_mat @ v)
    return w_oihw / sigma


def _xavier_uniform(key, shape, gain):
    fan_in = shape[1] * shape[2] * shape[3]
    fan_out = shape[0] * shape[2] * shape[3]
    bound = gain * np.sqrt(6.0 / (fan_in + fan_out))
    return jax.random.uniform(key, shape, jnp.float32, -bound, bound)


def make_params(key, in_channels, out_channels):
    ks = jax.random.split(key, 12)
    w1 = _xavier_uniform(ks[0], (out_channels, in_channels, 3, 3), 1.0)
    w2 = _xavier_uniform(ks[1], (out_channels, out_channels, 3, 3), 1.0)
    wb = _xavier_uniform(ks[2], (out_channels, in_channels, 1, 1), float(np.sqrt(2.0)))
    b1 = jax.random.uniform(ks[3], (out_channels,), jnp.float32,
                            -1.0 / np.sqrt(in_channels * 9), 1.0 / np.sqrt(in_channels * 9))
    b2 = jax.random.uniform(ks[4], (out_channels,), jnp.float32,
                            -1.0 / np.sqrt(out_channels * 9), 1.0 / np.sqrt(out_channels * 9))
    bb = jax.random.uniform(ks[5], (out_channels,), jnp.float32,
                            -1.0 / np.sqrt(in_channels), 1.0 / np.sqrt(in_channels))
    sn = []
    for w, ku, kv in ((w1, ks[6], ks[7]), (w2, ks[8], ks[9]), (wb, ks[10], ks[11])):
        h = w.shape[0]
        wdt = int(np.prod(w.shape[1:]))
        u = _l2normalize(jax.random.normal(ku, (h,), jnp.float32))
        v = _l2normalize(jax.random.normal(kv, (wdt,), jnp.float32))
        sn.append(_spectral_norm(w, u, v))
    w1_sn, w2_sn, wb_sn = sn
    return (w1_sn, b1, w2_sn, b2, wb_sn, bb)


# -----------------------------------------------------------------------------
# Pure-JAX reference (f32, HIGHEST precision) for correctness checking
# -----------------------------------------------------------------------------
def reference_forward(x_nchw, params_oihw):
    w1, b1, w2, b2, wb, bb = params_oihw
    dn = ("NCHW", "OIHW", "NCHW")
    prec = jax.lax.Precision.HIGHEST
    conv = lambda x, w, pad: jax.lax.conv_general_dilated(
        x, w, (1, 1), ((pad, pad), (pad, pad)), dimension_numbers=dn, precision=prec)
    avgpool = lambda x: x.reshape(x.shape[0], x.shape[1],
                                  x.shape[2] // 2, 2, x.shape[3] // 2, 2).mean(axis=(3, 5))
    y1 = jnp.maximum(conv(x_nchw, w1, 1) + b1[None, :, None, None], 0.0)
    y2 = conv(y1, w2, 1) + b2[None, :, None, None]
    main = avgpool(y2)
    byp = conv(avgpool(x_nchw), wb, 0) + bb[None, :, None, None]
    return main + byp


# -----------------------------------------------------------------------------
if __name__ == "__main__":
    N, Cin, Cout, H, W = 2, 4, 8, 16, 16

    key = jax.random.PRNGKey(0)
    kx, kp = jax.random.split(key)
    x = jax.random.normal(kx, (N, Cin, H, W), jnp.float32)

    params_oihw = make_params(kp, Cin, Cout)

    out = first_resblock_discriminator(x, params_oihw)
    out = jax.block_until_ready(out)

    ref = jax.block_until_ready(reference_forward(x, params_oihw))

    assert out.shape == (N, Cout, H // 2, W // 2), out.shape
    # Matmul operands are bf16 (per the TPU performance guidance); tolerance reflects
    # bf16 operand rounding vs the f32/HIGHEST reference. Structural/packing bugs would
    # produce O(1) errors, far above this bound.
    np.testing.assert_allclose(np.asarray(out), np.asarray(ref), rtol=5e-2, atol=5e-2)

    print("KERNEL_OK")
</pallas_src>

<mosaic_0001>
module attributes {stable_mosaic.version = 11 : i64} {
  func.func @_resblock_kernel(%arg0: i32, %arg1: memref<1x18x18x4xbf16, #tpu.memory_space<vmem>>, %arg2: memref<9x4x128xbf16, #tpu.memory_space<vmem>>, %arg3: memref<1x128xf32, #tpu.memory_space<vmem>>, %arg4: memref<9x128x128xbf16, #tpu.memory_space<vmem>>, %arg5: memref<4x128xbf16, #tpu.memory_space<vmem>>, %arg6: memref<1x128xf32, #tpu.memory_space<vmem>>, %arg7: memref<1x8x8x128xf32, #tpu.memory_space<vmem>>, %arg8: memref<1x18x18x128xbf16, #tpu.memory_space<vmem>>) attributes {dimension_semantics = [#tpu.dimension_semantics<parallel>], iteration_bounds = array<i64: 2>, scalar_prefetch = 0 : i64, scratch_operands = 1 : i64, tpu.core_type = #tpu.core_type<tc>, window_params = [{transform_indices = @transform_0, window_bounds = array<i64: 1, 18, 18, 4>}, {pipeline_mode = #tpu.pipeline_mode<synchronous>, transform_indices = @transform_1, window_bounds = array<i64: 9, 4, 128>}, {pipeline_mode = #tpu.pipeline_mode<synchronous>, transform_indices = @transform_2, window_bounds = array<i64: 1, 128>}, {pipeline_mode = #tpu.pipeline_mode<synchronous>, transform_indices = @transform_3, window_bounds = array<i64: 9, 128, 128>}, {pipeline_mode = #tpu.pipeline_mode<synchronous>, transform_indices = @transform_4, window_bounds = array<i64: 4, 128>}, {pipeline_mode = #tpu.pipeline_mode<synchronous>, transform_indices = @transform_5, window_bounds = array<i64: 1, 128>}, {transform_indices = @transform_6, window_bounds = array<i64: 1, 8, 8, 128>}]} {
    %cst = arith.constant 0.000000e+00 : f32
    %0 = vector.broadcast %cst : f32 to vector<256x128xf32>
    %c0 = arith.constant 0 : index
    %c0_0 = arith.constant 0 : index
    %c0_1 = arith.constant 0 : index
    %c0_2 = arith.constant 0 : index
    %1 = vector.load %arg1[%c0, %c0_0, %c0_1, %c0_2] : memref<1x18x18x4xbf16, #tpu.memory_space<vmem>>, vector<1x16x16x4xbf16>
    %2 = vector.shape_cast %1 : vector<1x16x16x4xbf16> to vector<256x4xbf16>
    %c0_3 = arith.constant 0 : index
    %c0_4 = arith.constant 0 : index
    %c0_5 = arith.constant 0 : index
    %3 = vector.load %arg2[%c0_3, %c0_4, %c0_5] : memref<9x4x128xbf16, #tpu.memory_space<vmem>>, vector<1x4x128xbf16>
    %4 = vector.shape_cast %3 : vector<1x4x128xbf16> to vector<4x128xbf16>
    %cst_6 = arith.constant dense<0.000000e+00> : vector<256x128xf32>
    %5 = tpu.matmul %2, %4, %cst_6 {dimension_numbers = #tpu.dot_dimension_numbers<[1], [0], [0], [1], [0, 0, 1, 1], [], []>} : vector<256x4xbf16>, vector<4x128xbf16>, vector<256x128xf32> -> vector<256x128xf32>
    %6 = arith.addf %0, %5 : vector<256x128xf32>
    %c0_7 = arith.constant 0 : index
    %c0_8 = arith.constant 0 : index
    %c1 = arith.constant 1 : index
    %c0_9 = arith.constant 0 : index
    %7 = vector.load %arg1[%c0_7, %c0_8, %c1, %c0_9] : memref<1x18x18x4xbf16, #tpu.memory_space<vmem>>, vector<1x16x16x4xbf16>
    %8 = vector.shape_cast %7 : vector<1x16x16x4xbf16> to vector<256x4xbf16>
    %c1_10 = arith.constant 1 : index
    %c0_11 = arith.constant 0 : index
    %c0_12 = arith.constant 0 : index
    %9 = vector.load %arg2[%c1_10, %c0_11, %c0_12] : memref<9x4x128xbf16, #tpu.memory_space<vmem>>, vector<1x4x128xbf16>
    %10 = vector.shape_cast %9 : vector<1x4x128xbf16> to vector<4x128xbf16>
    %cst_13 = arith.constant dense<0.000000e+00> : vector<256x128xf32>
    %11 = tpu.matmul %8, %10, %cst_13 {dimension_numbers = #tpu.dot_dimension_numbers<[1], [0], [0], [1], [0, 0, 1, 1], [], []>} : vector<256x4xbf16>, vector<4x128xbf16>, vector<256x128xf32> -> vector<256x128xf32>
    %12 = arith.addf %6, %11 : vector<256x128xf32>
    %c0_14 = arith.constant 0 : index
    %c0_15 = arith.constant 0 : index
    %c2 = arith.constant 2 : index
    %c0_16 = arith.constant 0 : index
    %13 = vector.load %arg1[%c0_14, %c0_15, %c2, %c0_16] : memref<1x18x18x4xbf16, #tpu.memory_space<vmem>>, vector<1x16x16x4xbf16>
    %14 = vector.shape_cast %13 : vector<1x16x16x4xbf16> to vector<256x4xbf16>
    %c2_17 = arith.constant 2 : index
    %c0_18 = arith.constant 0 : index
    %c0_19 = arith.constant 0 : index
    %15 = vector.load %arg2[%c2_17, %c0_18, %c0_19] : memref<9x4x128xbf16, #tpu.memory_space<vmem>>, vector<1x4x128xbf16>
    %16 = vector.shape_cast %15 : vector<1x4x128xbf16> to vector<4x128xbf16>
    %cst_20 = arith.constant dense<0.000000e+00> : vector<256x128xf32>
    %17 = tpu.matmul %14, %16, %cst_20 {dimension_numbers = #tpu.dot_dimension_numbers<[1], [0], [0], [1], [0, 0, 1, 1], [], []>} : vector<256x4xbf16>, vector<4x128xbf16>, vector<256x128xf32> -> vector<256x128xf32>
    %18 = arith.addf %12, %17 : vector<256x128xf32>
    %c0_21 = arith.constant 0 : index
    %c1_22 = arith.constant 1 : index
    %c0_23 = arith.constant 0 : index
    %c0_24 = arith.constant 0 : index
    %19 = vector.load %arg1[%c0_21, %c1_22, %c0_23, %c0_24] : memref<1x18x18x4xbf16, #tpu.memory_space<vmem>>, vector<1x16x16x4xbf16>
    %20 = vector.shape_cast %19 : vector<1x16x16x4xbf16> to vector<256x4xbf16>
    %c3 = arith.constant 3 : index
    %c0_25 = arith.constant 0 : index
    %c0_26 = arith.constant 0 : index
    %21 = vector.load %arg2[%c3, %c0_25, %c0_26] : memref<9x4x128xbf16, #tpu.memory_space<vmem>>, vector<1x4x128xbf16>
    %22 = vector.shape_cast %21 : vector<1x4x128xbf16> to vector<4x128xbf16>
    %cst_27 = arith.constant dense<0.000000e+00> : vector<256x128xf32>
    %23 = tpu.matmul %20, %22, %cst_27 {dimension_numbers = #tpu.dot_dimension_numbers<[1], [0], [0], [1], [0, 0, 1, 1], [], []>} : vector<256x4xbf16>, vector<4x128xbf16>, vector<256x128xf32> -> vector<256x128xf32>
    %24 = arith.addf %18, %23 : vector<256x128xf32>
    %c0_28 = arith.constant 0 : index
    %c1_29 = arith.constant 1 : index
    %c1_30 = arith.constant 1 : index
    %c0_31 = arith.constant 0 : index
    %25 = vector.load %arg1[%c0_28, %c1_29, %c1_30, %c0_31] : memref<1x18x18x4xbf16, #tpu.memory_space<vmem>>, vector<1x16x16x4xbf16>
    %26 = vector.shape_cast %25 : vector<1x16x16x4xbf16> to vector<256x4xbf16>
    %c4 = arith.constant 4 : index
    %c0_32 = arith.constant 0 : index
    %c0_33 = arith.constant 0 : index
    %27 = vector.load %arg2[%c4, %c0_32, %c0_33] : memref<9x4x128xbf16, #tpu.memory_space<vmem>>, vector<1x4x128xbf16>
    %28 = vector.shape_cast %27 : vector<1x4x128xbf16> to vector<4x128xbf16>
    %cst_34 = arith.constant dense<0.000000e+00> : vector<256x128xf32>
    %29 = tpu.matmul %26, %28, %cst_34 {dimension_numbers = #tpu.dot_dimension_numbers<[1], [0], [0], [1], [0, 0, 1, 1], [], []>} : vector<256x4xbf16>, vector<4x128xbf16>, vector<256x128xf32> -> vector<256x128xf32>
    %30 = arith.addf %24, %29 : vector<256x128xf32>
    %c0_35 = arith.constant 0 : index
    %c1_36 = arith.constant 1 : index
    %c2_37 = arith.constant 2 : index
    %c0_38 = arith.constant 0 : index
    %31 = vector.load %arg1[%c0_35, %c1_36, %c2_37, %c0_38] : memref<1x18x18x4xbf16, #tpu.memory_space<vmem>>, vector<1x16x16x4xbf16>
    %32 = vector.shape_cast %31 : vector<1x16x16x4xbf16> to vector<256x4xbf16>
    %c5 = arith.constant 5 : index
    %c0_39 = arith.constant 0 : index
    %c0_40 = arith.constant 0 : index
    %33 = vector.load %arg2[%c5, %c0_39, %c0_40] : memref<9x4x128xbf16, #tpu.memory_space<vmem>>, vector<1x4x128xbf16>
    %34 = vector.shape_cast %33 : vector<1x4x128xbf16> to vector<4x128xbf16>
    %cst_41 = arith.constant dense<0.000000e+00> : vector<256x128xf32>
    %35 = tpu.matmul %32, %34, %cst_41 {dimension_numbers = #tpu.dot_dimension_numbers<[1], [0], [0], [1], [0, 0, 1, 1], [], []>} : vector<256x4xbf16>, vector<4x128xbf16>, vector<256x128xf32> -> vector<256x128xf32>
    %36 = arith.addf %30, %35 : vector<256x128xf32>
    %c0_42 = arith.constant 0 : index
    %c2_43 = arith.constant 2 : index
    %c0_44 = arith.constant 0 : index
    %c0_45 = arith.constant 0 : index
    %37 = vector.load %arg1[%c0_42, %c2_43, %c0_44, %c0_45] : memref<1x18x18x4xbf16, #tpu.memory_space<vmem>>, vector<1x16x16x4xbf16>
    %38 = vector.shape_cast %37 : vector<1x16x16x4xbf16> to vector<256x4xbf16>
    %c6 = arith.constant 6 : index
    %c0_46 = arith.constant 0 : index
    %c0_47 = arith.constant 0 : index
    %39 = vector.load %arg2[%c6, %c0_46, %c0_47] : memref<9x4x128xbf16, #tpu.memory_space<vmem>>, vector<1x4x128xbf16>
    %40 = vector.shape_cast %39 : vector<1x4x128xbf16> to vector<4x128xbf16>
    %cst_48 = arith.constant dense<0.000000e+00> : vector<256x128xf32>
    %41 = tpu.matmul %38, %40, %cst_48 {dimension_numbers = #tpu.dot_dimension_numbers<[1], [0], [0], [1], [0, 0, 1, 1], [], []>} : vector<256x4xbf16>, vector<4x128xbf16>, vector<256x128xf32> -> vector<256x128xf32>
    %42 = arith.addf %36, %41 : vector<256x128xf32>
    %c0_49 = arith.constant 0 : index
    %c2_50 = arith.constant 2 : index
    %c1_51 = arith.constant 1 : index
    %c0_52 = arith.constant 0 : index
    %43 = vector.load %arg1[%c0_49, %c2_50, %c1_51, %c0_52] : memref<1x18x18x4xbf16, #tpu.memory_space<vmem>>, vector<1x16x16x4xbf16>
    %44 = vector.shape_cast %43 : vector<1x16x16x4xbf16> to vector<256x4xbf16>
    %c7 = arith.constant 7 : index
    %c0_53 = arith.constant 0 : index
    %c0_54 = arith.constant 0 : index
    %45 = vector.load %arg2[%c7, %c0_53, %c0_54] : memref<9x4x128xbf16, #tpu.memory_space<vmem>>, vector<1x4x128xbf16>
    %46 = vector.shape_cast %45 : vector<1x4x128xbf16> to vector<4x128xbf16>
    %cst_55 = arith.constant dense<0.000000e+00> : vector<256x128xf32>
    %47 = tpu.matmul %44, %46, %cst_55 {dimension_numbers = #tpu.dot_dimension_numbers<[1], [0], [0], [1], [0, 0, 1, 1], [], []>} : vector<256x4xbf16>, vector<4x128xbf16>, vector<256x128xf32> -> vector<256x128xf32>
    %48 = arith.addf %42, %47 : vector<256x128xf32>
    %c0_56 = arith.constant 0 : index
    %c2_57 = arith.constant 2 : index
    %c2_58 = arith.constant 2 : index
    %c0_59 = arith.constant 0 : index
    %49 = vector.load %arg1[%c0_56, %c2_57, %c2_58, %c0_59] : memref<1x18x18x4xbf16, #tpu.memory_space<vmem>>, vector<1x16x16x4xbf16>
    %50 = vector.shape_cast %49 : vector<1x16x16x4xbf16> to vector<256x4xbf16>
    %c8 = arith.constant 8 : index
    %c0_60 = arith.constant 0 : index
    %c0_61 = arith.constant 0 : index
    %51 = vector.load %arg2[%c8, %c0_60, %c0_61] : memref<9x4x128xbf16, #tpu.memory_space<vmem>>, vector<1x4x128xbf16>
    %52 = vector.shape_cast %51 : vector<1x4x128xbf16> to vector<4x128xbf16>
    %cst_62 = arith.constant dense<0.000000e+00> : vector<256x128xf32>
    %53 = tpu.matmul %50, %52, %cst_62 {dimension_numbers = #tpu.dot_dimension_numbers<[1], [0], [0], [1], [0, 0, 1, 1], [], []>} : vector<256x4xbf16>, vector<4x128xbf16>, vector<256x128xf32> -> vector<256x128xf32>
    %54 = arith.addf %48, %53 : vector<256x128xf32>
    %c0_63 = arith.constant 0 : index
    %c0_64 = arith.constant 0 : index
    %55 = vector.load %arg3[%c0_63, %c0_64] : memref<1x128xf32, #tpu.memory_space<vmem>>, vector<1x128xf32>
    %56 = vector.broadcast %55 : vector<1x128xf32> to vector<256x128xf32>
    %57 = arith.addf %54, %56 : vector<256x128xf32>
    %cst_65 = arith.constant 0.000000e+00 : f32
    %58 = vector.broadcast %cst_65 : f32 to vector<256x128xf32>
    %59 = arith.maximumf %57, %58 : vector<256x128xf32>
    %cst_66 = arith.constant 0.000000e+00 : bf16
    %60 = vector.broadcast %cst_66 : bf16 to vector<1x1x18x128xbf16>
    %c0_67 = arith.constant 0 : index
    %c0_68 = arith.constant 0 : index
    %c0_69 = arith.constant 0 : index
    %c0_70 = arith.constant 0 : index
    %61 = vector.load %arg8[%c0_67, %c0_68, %c0_69, %c0_70] : memref<1x18x18x128xbf16, #tpu.memory_space<vmem>>, vector<1x1x18x128xbf16>
    tpu.vector_store %arg8[%c0_67, %c0_68, %c0_69, %c0_70], %60 {strides = array<i32>} : memref<1x18x18x128xbf16, #tpu.memory_space<vmem>>, vector<1x1x18x128xbf16>,
    %cst_71 = arith.constant 0.000000e+00 : bf16
    %62 = vector.broadcast %cst_71 : bf16 to vector<1x1x18x128xbf16>
    %c0_72 = arith.constant 0 : index
    %c17 = arith.constant 17 : index
    %c0_73 = arith.constant 0 : index
    %c0_74 = arith.constant 0 : index
    %63 = vector.load %arg8[%c0_72, %c17, %c0_73, %c0_74] : memref<1x18x18x128xbf16, #tpu.memory_space<vmem>>, vector<1x1x18x128xbf16>
    tpu.vector_store %arg8[%c0_72, %c17, %c0_73, %c0_74], %62 {strides = array<i32>} : memref<1x18x18x128xbf16, #tpu.memory_space<vmem>>, vector<1x1x18x128xbf16>,
    %cst_75 = arith.constant 0.000000e+00 : bf16
    %64 = vector.broadcast %cst_75 : bf16 to vector<1x16x1x128xbf16>
    %c0_76 = arith.constant 0 : index
    %c1_77 = arith.constant 1 : index
    %c0_78 = arith.constant 0 : index
    %c0_79 = arith.constant 0 : index
    %65 = vector.load %arg8[%c0_76, %c1_77, %c0_78, %c0_79] : memref<1x18x18x128xbf16, #tpu.memory_space<vmem>>, vector<1x16x1x128xbf16>
    tpu.vector_store %arg8[%c0_76, %c1_77, %c0_78, %c0_79], %64 {strides = array<i32>} : memref<1x18x18x128xbf16, #tpu.memory_space<vmem>>, vector<1x16x1x128xbf16>,
    %cst_80 = arith.constant 0.000000e+00 : bf16
    %66 = vector.broadcast %cst_80 : bf16 to vector<1x16x1x128xbf16>
    %c0_81 = arith.constant 0 : index
    %c1_82 = arith.constant 1 : index
    %c17_83 = arith.constant 17 : index
    %c0_84 = arith.constant 0 : index
    %67 = vector.load %arg8[%c0_81, %c1_82, %c17_83, %c0_84] : memref<1x18x18x128xbf16, #tpu.memory_space<vmem>>, vector<1x16x1x128xbf16>
    tpu.vector_store %arg8[%c0_81, %c1_82, %c17_83, %c0_84], %66 {strides = array<i32>} : memref<1x18x18x128xbf16, #tpu.memory_space<vmem>>, vector<1x16x1x128xbf16>,
    %68 = vector.shape_cast %59 : vector<256x128xf32> to vector<1x16x16x128xf32>
    %69 = arith.truncf %68 : vector<1x16x16x128xf32> to vector<1x16x16x128xbf16>
    %c0_85 = arith.constant 0 : index
    %c1_86 = arith.constant 1 : index
    %c1_87 = arith.constant 1 : index
    %c0_88 = arith.constant 0 : index
    %70 = vector.load %arg8[%c0_85, %c1_86, %c1_87, %c0_88] : memref<1x18x18x128xbf16, #tpu.memory_space<vmem>>, vector<1x16x16x128xbf16>
    tpu.vector_store %arg8[%c0_85, %c1_86, %c1_87, %c0_88], %69 {strides = array<i32>} : memref<1x18x18x128xbf16, #tpu.memory_space<vmem>>, vector<1x16x16x128xbf16>,
    %c0_89 = arith.constant 0 : index
    %c1_90 = arith.constant 1 : index
    %c1_91 = arith.constant 1 : index
    %c0_92 = arith.constant 0 : index
    %71 = vector.load %arg1[%c0_89, %c1_90, %c1_91, %c0_92] : memref<1x18x18x4xbf16, #tpu.memory_space<vmem>>, vector<1x16x16x4xbf16>
    %72 = vector.shape_cast %71 : vector<1x16x16x4xbf16> to vector<256x4xbf16>
    %c0_93 = arith.constant 0 : index
    %c0_94 = arith.constant 0 : index
    %73 = vector.load %arg5[%c0_93, %c0_94] : memref<4x128xbf16, #tpu.memory_space<vmem>>, vector<4x128xbf16>
    %cst_95 = arith.constant dense<0.000000e+00> : vector<256x128xf32>
    %74 = tpu.matmul %72, %73, %cst_95 {dimension_numbers = #tpu.dot_dimension_numbers<[1], [0], [0], [1], [0, 0, 1, 1], [], []>} : vector<256x4xbf16>, vector<4x128xbf16>, vector<256x128xf32> -> vector<256x128xf32>
    %c0_96 = arith.constant 0 : index
    %c0_97 = arith.constant 0 : index
    %c0_98 = arith.constant 0 : index
    %c0_99 = arith.constant 0 : index
    %75 = vector.load %arg8[%c0_96, %c0_97, %c0_98, %c0_99] : memref<1x18x18x128xbf16, #tpu.memory_space<vmem>>, vector<1x16x16x128xbf16>
    %76 = vector.shape_cast %75 : vector<1x16x16x128xbf16> to vector<256x128xbf16>
    %c0_100 = arith.constant 0 : index
    %c0_101 = arith.constant 0 : index
    %c0_102 = arith.constant 0 : index
    %77 = vector.load %arg4[%c0_100, %c0_101, %c0_102] : memref<9x128x128xbf16, #tpu.memory_space<vmem>>, vector<1x128x128xbf16>
    %78 = vector.shape_cast %77 : vector<1x128x128xbf16> to vector<128x128xbf16>
    %cst_103 = arith.constant dense<0.000000e+00> : vector<256x128xf32>
    %79 = tpu.matmul %76, %78, %cst_103 {dimension_numbers = #tpu.dot_dimension_numbers<[1], [0], [0], [1], [0, 0, 1, 1], [], []>} : vector<256x128xbf16>, vector<128x128xbf16>, vector<256x128xf32> -> vector<256x128xf32>
    %80 = arith.addf %74, %79 : vector<256x128xf32>
    %c0_104 = arith.constant 0 : index
    %c0_105 = arith.constant 0 : index
    %c1_106 = arith.constant 1 : index
    %c0_107 = arith.constant 0 : index
    %81 = vector.load %arg8[%c0_104, %c0_105, %c1_106, %c0_107] : memref<1x18x18x128xbf16, #tpu.memory_space<vmem>>, vector<1x16x16x128xbf16>
    %82 = vector.shape_cast %81 : vector<1x16x16x128xbf16> to vector<256x128xbf16>
    %c1_108 = arith.constant 1 : index
    %c0_109 = arith.constant 0 : index
    %c0_110 = arith.constant 0 : index
    %83 = vector.load %arg4[%c1_108, %c0_109, %c0_110] : memref<9x128x128xbf16, #tpu.memory_space<vmem>>, vector<1x128x128xbf16>
    %84 = vector.shape_cast %83 : vector<1x128x128xbf16> to vector<128x128xbf16>
    %cst_111 = arith.constant dense<0.000000e+00> : vector<256x128xf32>
    %85 = tpu.matmul %82, %84, %cst_111 {dimension_numbers = #tpu.dot_dimension_numbers<[1], [0], [0], [1], [0, 0, 1, 1], [], []>} : vector<256x128xbf16>, vector<128x128xbf16>, vector<256x128xf32> -> vector<256x128xf32>
    %86 = arith.addf %80, %85 : vector<256x128xf32>
    %c0_112 = arith.constant 0 : index
    %c0_113 = arith.constant 0 : index
    %c2_114 = arith.constant 2 : index
    %c0_115 = arith.constant 0 : index
    %87 = vector.load %arg8[%c0_112, %c0_113, %c2_114, %c0_115] : memref<1x18x18x128xbf16, #tpu.memory_space<vmem>>, vector<1x16x16x128xbf16>
    %88 = vector.shape_cast %87 : vector<1x16x16x128xbf16> to vector<256x128xbf16>
    %c2_116 = arith.constant 2 : index
    %c0_117 = arith.constant 0 : index
    %c0_118 = arith.constant 0 : index
    %89 = vector.load %arg4[%c2_116, %c0_117, %c0_118] : memref<9x128x128xbf16, #tpu.memory_space<vmem>>, vector<1x128x128xbf16>
    %90 = vector.shape_cast %89 : vector<1x128x128xbf16> to vector<128x128xbf16>
    %cst_119 = arith.constant dense<0.000000e+00> : vector<256x128xf32>
    %91 = tpu.matmul %88, %90, %cst_119 {dimension_numbers = #tpu.dot_dimension_numbers<[1], [0], [0], [1], [0, 0, 1, 1], [], []>} : vector<256x128xbf16>, vector<128x128xbf16>, vector<256x128xf32> -> vector<256x128xf32>
    %92 = arith.addf %86, %91 : vector<256x128xf32>
    %c0_120 = arith.constant 0 : index
    %c1_121 = arith.constant 1 : index
    %c0_122 = arith.constant 0 : index
    %c0_123 = arith.constant 0 : index
    %93 = vector.load %arg8[%c0_120, %c1_121, %c0_122, %c0_123] : memref<1x18x18x128xbf16, #tpu.memory_space<vmem>>, vector<1x16x16x128xbf16>
    %94 = vector.shape_cast %93 : vector<1x16x16x128xbf16> to vector<256x128xbf16>
    %c3_124 = arith.constant 3 : index
    %c0_125 = arith.constant 0 : index
    %c0_126 = arith.constant 0 : index
    %95 = vector.load %arg4[%c3_124, %c0_125, %c0_126] : memref<9x128x128xbf16, #tpu.memory_space<vmem>>, vector<1x128x128xbf16>
    %96 = vector.shape_cast %95 : vector<1x128x128xbf16> to vector<128x128xbf16>
    %cst_127 = arith.constant dense<0.000000e+00> : vector<256x128xf32>
    %97 = tpu.matmul %94, %96, %cst_127 {dimension_numbers = #tpu.dot_dimension_numbers<[1], [0], [0], [1], [0, 0, 1, 1], [], []>} : vector<256x128xbf16>, vector<128x128xbf16>, vector<256x128xf32> -> vector<256x128xf32>
    %98 = arith.addf %92, %97 : vector<256x128xf32>
    %c0_128 = arith.constant 0 : index
    %c1_129 = arith.constant 1 : index
    %c1_130 = arith.constant 1 : index
    %c0_131 = arith.constant 0 : index
    %99 = vector.load %arg8[%c0_128, %c1_129, %c1_130, %c0_131] : memref<1x18x18x128xbf16, #tpu.memory_space<vmem>>, vector<1x16x16x128xbf16>
    %100 = vector.shape_cast %99 : vector<1x16x16x128xbf16> to vector<256x128xbf16>
    %c4_132 = arith.constant 4 : index
    %c0_133 = arith.constant 0 : index
    %c0_134 = arith.constant 0 : index
    %101 = vector.load %arg4[%c4_132, %c0_133, %c0_134] : memref<9x128x128xbf16, #tpu.memory_space<vmem>>, vector<1x128x128xbf16>
    %102 = vector.shape_cast %101 : vector<1x128x128xbf16> to vector<128x128xbf16>
    %cst_135 = arith.constant dense<0.000000e+00> : vector<256x128xf32>
    %103 = tpu.matmul %100, %102, %cst_135 {dimension_numbers = #tpu.dot_dimension_numbers<[1], [0], [0], [1], [0, 0, 1, 1], [], []>} : vector<256x128xbf16>, vector<128x128xbf16>, vector<256x128xf32> -> vector<256x128xf32>
    %104 = arith.addf %98, %103 : vector<256x128xf32>
    %c0_136 = arith.constant 0 : index
    %c1_137 = arith.constant 1 : index
    %c2_138 = arith.constant 2 : index
    %c0_139 = arith.constant 0 : index
    %105 = vector.load %arg8[%c0_136, %c1_137, %c2_138, %c0_139] : memref<1x18x18x128xbf16, #tpu.memory_space<vmem>>, vector<1x16x16x128xbf16>
    %106 = vector.shape_cast %105 : vector<1x16x16x128xbf16> to vector<256x128xbf16>
    %c5_140 = arith.constant 5 : index
    %c0_141 = arith.constant 0 : index
    %c0_142 = arith.constant 0 : index
    %107 = vector.load %arg4[%c5_140, %c0_141, %c0_142] : memref<9x128x128xbf16, #tpu.memory_space<vmem>>, vector<1x128x128xbf16>
    %108 = vector.shape_cast %107 : vector<1x128x128xbf16> to vector<128x128xbf16>
    %cst_143 = arith.constant dense<0.000000e+00> : vector<256x128xf32>
    %109 = tpu.matmul %106, %108, %cst_143 {dimension_numbers = #tpu.dot_dimension_numbers<[1], [0], [0], [1], [0, 0, 1, 1], [], []>} : vector<256x128xbf16>, vector<128x128xbf16>, vector<256x128xf32> -> vector<256x128xf32>
    %110 = arith.addf %104, %109 : vector<256x128xf32>
    %c0_144 = arith.constant 0 : index
    %c2_145 = arith.constant 2 : index
    %c0_146 = arith.constant 0 : index
    %c0_147 = arith.constant 0 : index
    %111 = vector.load %arg8[%c0_144, %c2_145, %c0_146, %c0_147] : memref<1x18x18x128xbf16, #tpu.memory_space<vmem>>, vector<1x16x16x128xbf16>
    %112 = vector.shape_cast %111 : vector<1x16x16x128xbf16> to vector<256x128xbf16>
    %c6_148 = arith.constant 6 : index
    %c0_149 = arith.constant 0 : index
    %c0_150 = arith.constant 0 : index
    %113 = vector.load %arg4[%c6_148, %c0_149, %c0_150] : memref<9x128x128xbf16, #tpu.memory_space<vmem>>, vector<1x128x128xbf16>
    %114 = vector.shape_cast %113 : vector<1x128x128xbf16> to vector<128x128xbf16>
    %cst_151 = arith.constant dense<0.000000e+00> : vector<256x128xf32>
    %115 = tpu.matmul %112, %114, %cst_151 {dimension_numbers = #tpu.dot_dimension_numbers<[1], [0], [0], [1], [0, 0, 1, 1], [], []>} : vector<256x128xbf16>, vector<128x128xbf16>, vector<256x128xf32> -> vector<256x128xf32>
    %116 = arith.addf %110, %115 : vector<256x128xf32>
    %c0_152 = arith.constant 0 : index
    %c2_153 = arith.constant 2 : index
    %c1_154 = arith.constant 1 : index
    %c0_155 = arith.constant 0 : index
    %117 = vector.load %arg8[%c0_152, %c2_153, %c1_154, %c0_155] : memref<1x18x18x128xbf16, #tpu.memory_space<vmem>>, vector<1x16x16x128xbf16>
    %118 = vector.shape_cast %117 : vector<1x16x16x128xbf16> to vector<256x128xbf16>
    %c7_156 = arith.constant 7 : index
    %c0_157 = arith.constant 0 : index
    %c0_158 = arith.constant 0 : index
    %119 = vector.load %arg4[%c7_156, %c0_157, %c0_158] : memref<9x128x128xbf16, #tpu.memory_space<vmem>>, vector<1x128x128xbf16>
    %120 = vector.shape_cast %119 : vector<1x128x128xbf16> to vector<128x128xbf16>
    %cst_159 = arith.constant dense<0.000000e+00> : vector<256x128xf32>
    %121 = tpu.matmul %118, %120, %cst_159 {dimension_numbers = #tpu.dot_dimension_numbers<[1], [0], [0], [1], [0, 0, 1, 1], [], []>} : vector<256x128xbf16>, vector<128x128xbf16>, vector<256x128xf32> -> vector<256x128xf32>
    %122 = arith.addf %116, %121 : vector<256x128xf32>
    %c0_160 = arith.constant 0 : index
    %c2_161 = arith.constant 2 : index
    %c2_162 = arith.constant 2 : index
    %c0_163 = arith.constant 0 : index
    %123 = vector.load %arg8[%c0_160, %c2_161, %c2_162, %c0_163] : memref<1x18x18x128xbf16, #tpu.memory_space<vmem>>, vector<1x16x16x128xbf16>
    %124 = vector.shape_cast %123 : vector<1x16x16x128xbf16> to vector<256x128xbf16>
    %c8_164 = arith.constant 8 : index
    %c0_165 = arith.constant 0 : index
    %c0_166 = arith.constant 0 : index
    %125 = vector.load %arg4[%c8_164, %c0_165, %c0_166] : memref<9x128x128xbf16, #tpu.memory_space<vmem>>, vector<1x128x128xbf16>
    %126 = vector.shape_cast %125 : vector<1x128x128xbf16> to vector<128x128xbf16>
    %cst_167 = arith.constant dense<0.000000e+00> : vector<256x128xf32>
    %127 = tpu.matmul %124, %126, %cst_167 {dimension_numbers = #tpu.dot_dimension_numbers<[1], [0], [0], [1], [0, 0, 1, 1], [], []>} : vector<256x128xbf16>, vector<128x128xbf16>, vector<256x128xf32> -> vector<256x128xf32>
    %128 = arith.addf %122, %127 : vector<256x128xf32>
    %129 = vector.shape_cast %128 : vector<256x128xf32> to vector<8x2x16x128xf32>
    %130 = vector.extract_strided_slice %129 {offsets = [0, 0, 0, 0], sizes = [8, 1, 16, 128], strides = [1, 1, 1, 1]} : vector<8x2x16x128xf32> to vector<8x1x16x128xf32>
    %131 = vector.shape_cast %130 : vector<8x1x16x128xf32> to vector<8x16x128xf32>
    %132 = vector.extract_strided_slice %129 {offsets = [0, 1, 0, 0], sizes = [8, 1, 16, 128], strides = [1, 1, 1, 1]} : vector<8x2x16x128xf32> to vector<8x1x16x128xf32>
    %133 = vector.shape_cast %132 : vector<8x1x16x128xf32> to vector<8x16x128xf32>
    %134 = arith.addf %131, %133 : vector<8x16x128xf32>
    %135 = vector.shape_cast %134 : vector<8x16x128xf32> to vector<8x8x2x128xf32>
    %136 = vector.extract_strided_slice %135 {offsets = [0, 0, 0, 0], sizes = [8, 8, 1, 128], strides = [1, 1, 1, 1]} : vector<8x8x2x128xf32> to vector<8x8x1x128xf32>
    %137 = vector.shape_cast %136 : vector<8x8x1x128xf32> to vector<8x8x128xf32>
    %138 = vector.extract_strided_slice %135 {offsets = [0, 0, 1, 0], sizes = [8, 8, 1, 128], strides = [1, 1, 1, 1]} : vector<8x8x2x128xf32> to vector<8x8x1x128xf32>
    %139 = vector.shape_cast %138 : vector<8x8x1x128xf32> to vector<8x8x128xf32>
    %140 = arith.addf %137, %139 : vector<8x8x128xf32>
    %cst_168 = arith.constant 2.500000e-01 : f32
    %141 = vector.broadcast %cst_168 : f32 to vector<8x8x128xf32>
    %142 = arith.mulf %140, %141 : vector<8x8x128xf32>
    %143 = vector.shape_cast %142 : vector<8x8x128xf32> to vector<1x8x8x128xf32>
    %c0_169 = arith.constant 0 : index
    %c0_170 = arith.constant 0 : index
    %144 = vector.load %arg6[%c0_169, %c0_170] : memref<1x128xf32, #tpu.memory_space<vmem>>, vector<1x128xf32>
    %145 = vector.shape_cast %144 : vector<1x128xf32> to vector<1x1x1x128xf32>
    %146 = vector.broadcast %145 : vector<1x1x1x128xf32> to vector<1x8x8x128xf32>
    %147 = arith.addf %143, %146 : vector<1x8x8x128xf32>
    %c0_171 = arith.constant 0 : index
    %c0_172 = arith.constant 0 : index
    %c0_173 = arith.constant 0 : index
    %c0_174 = arith.constant 0 : index
    %148 = vector.load %arg7[%c0_171, %c0_172, %c0_173, %c0_174] : memref<1x8x8x128xf32, #tpu.memory_space<vmem>>, vector<1x8x8x128xf32>
    tpu.vector_store %arg7[%c0_171, %c0_172, %c0_173, %c0_174], %147 {strides = array<i32>} : memref<1x8x8x128xf32, #tpu.memory_space<vmem>>, vector<1x8x8x128xf32>,
    return
  }
  func.func @transform_0(%arg0: i32) -> (i32, i32, i32, i32) {
    %c0_i32 = arith.constant 0 : i32
    %c0_i32_0 = arith.constant 0 : i32
    %c0_i32_1 = arith.constant 0 : i32
    %c0_i32_2 = arith.constant 0 : i32
    return %arg0, %c0_i32, %c0_i32_0, %c0_i32_1 : i32, i32, i32, i32
  }
  func.func @transform_1(%arg0: i32) -> (i32, i32, i32) {
    %c0_i32 = arith.constant 0 : i32
    %c0_i32_0 = arith.constant 0 : i32
    %c0_i32_1 = arith.constant 0 : i32
    %c0_i32_2 = arith.constant 0 : i32
    return %c0_i32, %c0_i32_0, %c0_i32_1 : i32, i32, i32
  }
  func.func @transform_2(%arg0: i32) -> (i32, i32) {
    %c0_i32 = arith.constant 0 : i32
    %c0_i32_0 = arith.constant 0 : i32
    %c0_i32_1 = arith.constant 0 : i32
    return %c0_i32, %c0_i32_0 : i32, i32
  }
  func.func @transform_3(%arg0: i32) -> (i32, i32, i32) {
    %c0_i32 = arith.constant 0 : i32
    %c0_i32_0 = arith.constant 0 : i32
    %c0_i32_1 = arith.constant 0 : i32
    %c0_i32_2 = arith.constant 0 : i32
    return %c0_i32, %c0_i32_0, %c0_i32_1 : i32, i32, i32
  }
  func.func @transform_4(%arg0: i32) -> (i32, i32) {
    %c0_i32 = arith.constant 0 : i32
    %c0_i32_0 = arith.constant 0 : i32
    %c0_i32_1 = arith.constant 0 : i32
    return %c0_i32, %c0_i32_0 : i32, i32
  }
  func.func @transform_5(%arg0: i32) -> (i32, i32) {
    %c0_i32 = arith.constant 0 : i32
    %c0_i32_0 = arith.constant 0 : i32
    %c0_i32_1 = arith.constant 0 : i32
    return %c0_i32, %c0_i32_0 : i32, i32
  }
  func.func @transform_6(%arg0: i32) -> (i32, i32, i32, i32) {
    %c0_i32 = arith.constant 0 : i32
    %c0_i32_0 = arith.constant 0 : i32
    %c0_i32_1 = arith.constant 0 : i32
    %c0_i32_2 = arith.constant 0 : i32
    return %arg0, %c0_i32, %c0_i32_0, %c0_i32_1 : i32, i32, i32, i32
  }
}

</mosaic_0001>

<bundles_post_ra>
// kernel: tpu_custom_call.1
= control target key start
LH: loop header
LB: loop body
LE: loop exit
PB: predicated region body
PF: predicated region fallthrough
CT: control target
= control target key end

     0   :  { %11 = vsyncpa [#allocation4], 0  ;;  %s16230_s0 = inlined_call_operand.vmem [shape: bf16[2,18,18,4], index: 0, kind: input, shape index: {}]   ;;  %s16231_s1 = inlined_call_operand.vmem [shape: bf16[9,4,128], index: 1, kind: input, shape index: {}]   ;;  %s16232_s2 = inlined_call_operand.vmem [shape: f32[1,128], index: 2, kind: input, shape index: {}]   ;;  %s16233_s3 = inlined_call_operand.hbm [shape: bf16[9,128,128], index: 3, kind: input, shape index: {}]   ;;  %s16234_s4 = inlined_call_operand.vmem [shape: bf16[4,128], index: 4, kind: input, shape index: {}]   ;;  %s16235_s5 = inlined_call_operand.vmem [shape: f32[1,128], index: 5, kind: input, shape index: {}]   ;;  %s16236_s6 = inlined_call_operand.hbm [shape: f32[2,8,8,128], index: 6, kind: output, shape index: {}]  }
   0x1   :  { %12 = vsyncpa [#allocation5], 0 }
   0x2   :  { %14 = vsyncpa [#allocation5 + $0x1], 0  ;;  %s12163_s21 = smov 0   ;;  %s12165_s22 = smov 0  }
   0x3   :  { %s12167_s23 = smov 0   ;;  %s12169_s24 = smov 0  }
   0x4 LB: > { %s12184_s25 = sadd.s32 4294967295, %s12120_s24   ;;  %s10506_s26 = sadd.s32 4294967294, %s12120_s24   ;;  %s12120_s24 = sphi %s12169_s24, %s16598_s24   ;;  %s12116_s23 = sphi %s12167_s23, %s16597_s23   ;;  %s12112_s22 = sphi %s12165_s22, %s16596_s22   ;;  %s12108_s21 = sphi %s12163_s21, %s16595_s21  }
   0x5   : > { %s12188_s27 = sadd.s32 1, %s12120_s24   ;;  %s158_s28 = sadd.s32 1, %s12116_s23 }
   0x6   : > { %s155_s29 = ssub.s32 %s12120_s24, %s12188_s27  ;;  %p168_p0 = scmp.ne.s32.totalorder %s12116_s23, %s12112_s22 }
   0x7   : > { %p156_p1 = scmp.eq.s32.totalorder %s155_s29, 0  ;;  %p169_p2 = scmp.eq.s32.totalorder %s12184_s25, 1 }
   0x8   : > { %p174_p3 = scmp.ne.s32.totalorder %s12112_s22, %s12108_s21  ;;  %p175_p4 = scmp.eq.s32.totalorder %s10506_s26, 1 }
   0x9   : > { %s12199_s30 = scalar_select %p156_p1, %s12116_s23, %s158_s28  }
   0xa   : > { %p12201_p5 = por %p169_p2, %p168_p0  ;;  %p12205_p6 = por %p175_p4, %p174_p3 }
   0xb   : > { %p10507_p7 = scmp.ge.s32.totalorder %s12120_s24, 1  ;;  %p182_p8 = scmp.lt.s32.totalorder %s12120_s24, 3 }
   0xc   : > { %p11946_p9 = scmp.eq.s32.totalorder %s12184_s25, 0  ;;  %s199_s11 = sshll.u32 %s16233_s3, 4  ;;  %s200_s11 = int_to_ptr.hbm [resolvable:$true] %s199_s11 }
   0xd   : > { %p183_p10 = pnand %p10507_p7, %p182_p8  ;;  %s12122_s12 = smov [#allocation3]  }
   0xe   : > { %s201_s13 = sshll.u32 %s12122_s12, 4  ;;  %s12123_s14 = smov 64   ;;  %s202_s13 = int_to_ptr.vmem [resolvable:$true] %s201_s13 }
   0xf   : > { %p11938_p11 = pneg %p183_p10  ;;  %s12124_s15 = smov 4  }
  0x10   : > { %231 = sbr.rel (%p183_p10) target bundleno = 1564 (0x61c), region = 44 }
  0x11   : > { %p11939_p12 = pnand %p11946_p9, %p11938_p11 }
  0x13   : > { %11941 = dma.hbm_to_vmem [thread:$0]  (!%p11939_p12), %s200_s11, 9216, %s202_s13, [#allocation4], %s12123_s14, %s12123_s14, %s12124_s15  }
  0x15   : > { %12099 = dma.done.wait (%p11946_p9), [#allocation4], 9216  }
  0x16   : > { %12101 = vsyncadd (%p11946_p9), [#allocation4], 4294958080  ;;  %p262_p13 = scmp.lt.s32.totalorder %s12184_s25, 1  ;;  %vm803_vm0 = vcmask 1041408   ;;  %vm1164_vm1 = vcmask 1042432   ;;  %vm1165_vm2 = vcmask 1046532  }
  0x17   : > { %vm754_vm3 = vcmask 31744   ;;  %vm317_vm4 = vsmask.f32 3328  ;;  %vm318_vm5 = vsmask.f32 7440  ;;  %vm12237_vm6 = vmor %vm1164_vm1, %vm1165_vm2  ;;  %vm4255_vm8 = vcmask 1040384  }
  0x18   : > { %s263_s16 = scalar_select %p262_p13, %s12184_s25, 1  ;;  %v10627_v0 = vld [vmem:[%s16231_s1 + $0x4] sm:$0x3]  ;;  %v10514_v10 = vld [vmem:[%s16231_s1 + $0x2] sm:$0x3]  ;;  %vm12265_vm7 = vmor %vm317_vm4, %vm318_vm5  ;;  %vm4710_vm13 = vcmask 1043456  }
  0x19   : > { %v12234_v3 = vsel %vm803_vm0, %v10627_v0, 0  ;;  %v300_v11 = vld [vmem:[%s16231_s1] sm:$0x3]  ;;  %v805_v14 = vsel %vm803_vm0, %v10514_v10, 0  ;;  %v10805_v43 = vld [vmem:[%s16231_s1 + $0x8] sm:$0x3] }
  0x1a   : > { %s11931_s17 = smul.u32 216, %s263_s16  ;;  %1387 = vmatpush.bf16.msra.mxu2 %v12234_v3  ;;  %v1025_v15 = vsel %vm803_vm0, %v300_v11, 0  ;;  %814 = vmatpush.bf16.msra.mxu0 %v805_v14  ;;  %v2319_v59 = vsel %vm803_vm0, %v10805_v43, 0  ;;  %vm4256_vm9 = vsmask.f32 256  ;;  %vm10337_vm1 = vcmask 1041409  }
  0x1b   : > { %11928 = vmatpush.bf16.msra.mxu3 %v805_v14  ;;  %1034 = vmatpush.bf16.msra.mxu1 %v1025_v15  ;;  %vm13587_vm10 = vmand %vm4255_vm8, %vm4256_vm9  ;;  %vm4306_vm11 = vsmask.f32 7938  ;;  %vm4388_vm14 = vsmask.f32 4368  ;;  %vm10339_vm2 = vcmask 1042434   ;;  %s259_s19 = sand.u32 1, %s12112_s22  }
  0x1c   : > { %s12226_s20 = scalar_lea.vmem %s16230_s0, %s11931_s17  ;;  %vm13626_vm12 = vmand %vm4255_vm8, %vm4306_vm11  ;;  %vm10343_vm4 = vcmask 1044484   ;;  %s10512_s26 = sshll.u32 %s259_s19, 6  ;;  %vm10345_vm5 = vcmask 1045509   ;;  %vm10347_vm8 = vcmask 1046534  }
  0x1d   : > { %v269_v1 = vld [vmem:[%s12226_s20 + $0x4] sm:$0xf]  ;;  %v301_v2 = vld [vmem:[%s12226_s20 + $0x8] sm:$0x1]  ;;  %v1116_v4 = vld [vmem:[%s12226_s20] sm:$0xe] }
  0x1e   : > { %v1169_v6 = vrot.slane %v269_v1, 5  ;;  %v1172_v7 = vrot.slane %v301_v2, 5  ;;  %v330_v8 = vshll.u32 %v269_v1, 16  ;;  %v10611_v9 = vrot.slane %v1116_v4, 9  ;;  %v268_v16 = vld [vmem:[%s12226_s20] sm:$0xf]  ;;  %2328 = vmatpush.bf16.msrb.mxu0 %v2319_v59  ;;  %vm13797_vm15 = vmand %vm4710_vm13, %vm4306_vm11 }
  0x1f   : > { %v334_v12 = vshrl.u32 %v269_v1, 16  ;;  %v321_v19 = vshrl.u32 %v268_v16, 16  ;;  %v324_v20 = vshll.u32 %v268_v16, 16  ;;  %v292_v22 = vld [vmem:[%s12226_s20 + $0x90] sm:$0xf]  ;;  %v11759_v23 = vld [vmem:[%s12226_s20] sm:$0xff]  ;;  %11929 = vmatpush.bf16.msrb.mxu3 %v1025_v15 }
  0x20   : > { %v1171_v13 = vrot.slane %v1169_v6, 4  ;;  %v332_v17 = vrot.slane %v330_v8, 5  ;;  %v1170_v18 = vsel %vm12237_vm6, %v10611_v9, %v1169_v6  ;;  %v340_v26 = vshll.u32 %v301_v2, 16  ;;  %v12258_v27 = vld [vmem:[%s12226_s20 + $0x94] sm:$0xf]  ;;  %10595 = vmatmul.msk.bf16.vlgmr.msra.gmra.mxu1 %vm754_vm3, %v11759_v23  ;;  %s15883_s28 = scalar_lea.vmem [#allocation6], %s10512_s26 }
  0x21   : > { %v336_v21 = vrot.slane %v334_v12, 4  ;;  %v1281_v25 = vunpack.c.l.b16 %v1170_v18  ;;  %v609_v28 = vshrl.u32 %v292_v22, 16  ;;  %v323_v30 = vrot.slane %v321_v19, 4  ;;  %v12261_v33 = vld [vmem:[%s12226_s20 + $0x98] sm:$0x1]  ;;  %s11927_s10 = sshll.u32 %s12184_s25, 6 }
  0x22   : > { %v1173_v24 = vsel %vm12237_vm6, %v1171_v13, %v1172_v7  ;;  %v326_v31 = vrot.slane %v324_v20, 5  ;;  %v342_v35 = vrot.slane %v340_v26, 5  ;;  %v612_v37 = vshll.u32 %v292_v22, 16  ;;  %v1117_v47 = vld [vmem:[%s12226_s20 + $0xc] sm:$0xe]  ;;  %s10428_s13 = scalar_lea.hbm %s16236_s6, %s11927_s10  ;;  %s10429_s25 = sshll.u32 %s15883_s28, 4  ;;  %s10430_s25 = int_to_ptr.vmem [resolvable:$true] %s10429_s25 }
  0x23   : > { %v1282_v29 = vunpack.c.l.b16 %v1173_v24  ;;  %v337_v32 = vor.u32 %v336_v21, %v332_v17  ;;  %v611_v36 = vrot.slane %v609_v28, 4  ;;  %v618_v38 = vshll.u32 %v12258_v27, 16  ;;  %v271_v51 = vld [vmem:[%s12226_s20 + $0x10] sm:$0xf]  ;;  %v302_v52 = vld [vmem:[%s12226_s20 + $0x14] sm:$0x1] }
  0x24   : > { %v327_v40 = vor.u32 %v326_v31, %v323_v30  ;;  %v622_v42 = vshrl.u32 %v12258_v27, 16  ;;  %v614_v44 = vrot.slane %v612_v37, 5  ;;  %v628_v46 = vshll.u32 %v12261_v33, 16  ;;  %v270_v56 = vld [vmem:[%s12226_s20 + $0xc] sm:$0xf]  ;;  %s10417_s14 = scalar_lea.sflag [#allocation5], %s259_s19 }
  0x25   : > { %v1313_v39 = vpack.c.b16 %v1282_v29, %v1281_v25  ;;  %v338_v41 = vrot.slane %v337_v32, 4  ;;  %v620_v45 = vrot.slane %v618_v38, 5  ;;  %v10612_v60 = vrot.slane %v1117_v47, 9  ;;  %v294_v11 = vld [vmem:[%s12226_s20 + $0x9c] sm:$0xf]  ;;  %s12074_s26 = scalar_lea.hbm %s16236_s6, 128 }
  0x26   : > { %v328_v48 = vrot.slane %v327_v40, 4  ;;  %v624_v50 = vrot.slane %v622_v42, 4  ;;  %v615_v54 = vor.u32 %v614_v44, %v611_v36  ;;  %v630_v55 = vrot.slane %v628_v46, 5  ;;  %v12292_v12 = vld [vmem:[%s12226_s20 + $0xa0] sm:$0xf] }
  0x27   : > { %10628 = vmatmul.msk.bf16.vlgmr.msra.gmra.mxu2 %vm754_vm3, %v1313_v39  ;;  %v343_v49 = vsel %vm12265_vm7, %v338_v41, %v342_v35  ;;  %v1176_v63 = vrot.slane %v271_v51, 5  ;;  %v1179_v0 = vrot.slane %v302_v52, 5  ;;  %v345_v2 = vshrl.u32 %v270_v56, 16  ;;  %v12300_v24 = vld [vmem:[%s12226_s20 + $0xa4] sm:$0x1]  ;;  %v11760_v39 = vld [vmem:[%s12226_s20 + $0xc] sm:$0xff] }
  0x28   : > { %v707_v53 = vunpack.c.l.b16 %v343_v49  ;;  %v333_v57 = vsel %vm12265_vm7, %v328_v48, %v332_v17  ;;  %v625_v58 = vor.u32 %v624_v50, %v620_v45  ;;  %v616_v62 = vrot.slane %v615_v54, 4  ;;  %v273_v31 = vld [vmem:[%s12226_s20 + $0x1c] sm:$0xf]  ;;  %v1118_v32 = vld [vmem:[%s12226_s20 + $0x18] sm:$0xe] }
  0x29   : > { %v706_v61 = vunpack.c.l.b16 %v333_v57  ;;  %v348_v4 = vshll.u32 %v270_v56, 16  ;;  %v354_v6 = vshll.u32 %v271_v51, 16  ;;  %v1177_v9 = vsel %vm12237_vm6, %v10612_v60, %v1176_v63  ;;  %v303_v40 = vld [vmem:[%s12226_s20 + $0x20] sm:$0x1] }
  0x2a   : > { %v626_v1 = vrot.slane %v625_v58, 4  ;;  %v621_v8 = vsel %vm12265_vm7, %v616_v62, %v620_v45  ;;  %v1178_v10 = vrot.slane %v1176_v63, 4  ;;  %v1283_v15 = vunpack.c.l.b16 %v1177_v9 }
  0x2b   : > { %v738_v7 = vpack.c.b16 %v707_v53, %v706_v61  ;;  %v730_v14 = vunpack.c.l.b16 %v621_v8  ;;  %v347_v16 = vrot.slane %v345_v2, 4  ;;  %v350_v19 = vrot.slane %v348_v4, 5  ;;  %v272_v53 = vld [vmem:[%s12226_s20 + $0x18] sm:$0xf] }
  0x2c   : > { %v631_v13 = vsel %vm12265_vm7, %v626_v1, %v630_v55  ;;  %v1180_v18 = vsel %vm12237_vm6, %v1178_v10, %v1179_v0  ;;  %v356_v20 = vrot.slane %v354_v6, 5  ;;  %v358_v22 = vshrl.u32 %v271_v51, 16  ;;  %v296_v10 = vld [vmem:[%s12226_s20 + $0xa8] sm:$0xf] }
  0x2d   : > { %10515 = vmatmul.msk.bf16.vlgmr.msra.gmra.mxu0 %vm754_vm3, %v738_v7  ;;  %v731_v17 = vunpack.c.l.b16 %v631_v13  ;;  %v1284_v21 = vunpack.c.l.b16 %v1180_v18  ;;  %v364_v23 = vshll.u32 %v302_v52, 16  ;;  %v633_v25 = vshrl.u32 %v294_v11, 16 }
  0x2e   : > { %v351_v28 = vor.u32 %v350_v19, %v347_v16  ;;  %v636_v29 = vshll.u32 %v294_v11, 16  ;;  %v642_v30 = vshll.u32 %v12292_v12, 16  ;;  %v360_v36 = vrot.slane %v358_v22, 4  ;;  %v12326_v11 = vld [vmem:[%s12226_s20 + $0xac] sm:$0xf] }
  0x2f   : > { %v750_v26 = vpack.c.b16 %v731_v17, %v730_v14  ;;  %v1314_v35 = vpack.c.b16 %v1284_v21, %v1283_v15  ;;  %v366_v37 = vrot.slane %v364_v23, 5  ;;  %v635_v38 = vrot.slane %v633_v25, 4  ;;  %v12331_v22 = vld [vmem:[%s12226_s20 + $0xb0] sm:$0x1] }
  0x30   : > { %v352_v41 = vrot.slane %v351_v28, 4  ;;  %v638_v42 = vrot.slane %v636_v29, 5  ;;  %v644_v43 = vrot.slane %v642_v30, 5  ;;  %v646_v44 = vshrl.u32 %v12292_v12, 16  ;;  %10596 = vmatmul.msk.bf16.gmra.mxu1 %vm754_vm3, %v11760_v39  ;;  %v274_v39 = vld [vmem:[%s12226_s20 + $0x24] sm:$0xf] }
  0x31   : > { %10527 = vmatmul.msk.bf16.vlgmr.msra.gmra.mxu3 %vm754_vm3, %v750_v26  ;;  %v361_v45 = vor.u32 %v360_v36, %v356_v20  ;;  %v652_v46 = vshll.u32 %v12300_v24, 16  ;;  %v10613_v47 = vrot.slane %v1118_v32, 9  ;;  %v1183_v48 = vrot.slane %v273_v31, 5 }
  0x32   : > { %11930 = vmatpush.bf16.msra.mxu3 %v12234_v3  ;;  %v357_v49 = vsel %vm12265_vm7, %v352_v41, %v356_v20  ;;  %v639_v50 = vor.u32 %v638_v42, %v635_v38  ;;  %v648_v51 = vrot.slane %v646_v44, 4  ;;  %v1186_v52 = vrot.slane %v303_v40, 5 }
  0x33   : > { %v362_v54 = vrot.slane %v361_v45, 4  ;;  %v708_v55 = vunpack.c.l.b16 %v357_v49  ;;  %v654_v56 = vrot.slane %v652_v46, 5  ;;  %v1184_v59 = vsel %vm12237_vm6, %v10613_v47, %v1183_v48  ;;  %v304_v45 = vld [vmem:[%s12226_s20 + $0x2c] sm:$0x1]  ;;  %v1119_v46 = vld [vmem:[%s12226_s20 + $0x24] sm:$0xe] }
  0x34   : > { %v640_v57 = vrot.slane %v639_v50, 4  ;;  %v649_v58 = vor.u32 %v648_v51, %v644_v43  ;;  %v1185_v3 = vrot.slane %v1183_v48, 4  ;;  %v369_v61 = vshrl.u32 %v272_v53, 16  ;;  %v11761_v49 = vld [vmem:[%s12226_s20 + $0x18] sm:$0xff] }
  0x35   : > { %v367_v60 = vsel %vm12265_vm7, %v362_v54, %v366_v37  ;;  %v372_v62 = vshll.u32 %v272_v53, 16  ;;  %v378_v63 = vshll.u32 %v273_v31, 16  ;;  %v1285_v7 = vunpack.c.l.b16 %v1184_v59 }
  0x36   : > { %v709_v0 = vunpack.c.l.b16 %v367_v60  ;;  %v645_v1 = vsel %vm12265_vm7, %v640_v57, %v644_v43  ;;  %v650_v2 = vrot.slane %v649_v58, 4  ;;  %v1187_v4 = vsel %vm12237_vm6, %v1185_v3, %v1186_v52 }
  0x37   : > { %10629 = vmatmul.msk.bf16.gmra.mxu2 %vm754_vm3, %v1314_v35  ;;  %v732_v6 = vunpack.c.l.b16 %v645_v1  ;;  %v371_v8 = vrot.slane %v369_v61, 4  ;;  %v374_v9 = vrot.slane %v372_v62, 5  ;;  %v380_v15 = vrot.slane %v378_v63, 5  ;;  %v298_v62 = vld [vmem:[%s12226_s20 + $0xb4] sm:$0xf] }
  0x38   : > { %v739_v13 = vpack.c.b16 %v709_v0, %v708_v55  ;;  %v655_v14 = vsel %vm12265_vm7, %v650_v2, %v654_v56  ;;  %v382_v16 = vshrl.u32 %v273_v31, 16  ;;  %v1286_v18 = vunpack.c.l.b16 %v1187_v4  ;;  %v275_v31 = vld [vmem:[%s12226_s20 + $0x28] sm:$0xf]  ;;  %v12352_v1 = vld [vmem:[%s12226_s20 + $0xb8] sm:$0xf] }
  0x39   : > { %v733_v17 = vunpack.c.l.b16 %v655_v14  ;;  %v375_v19 = vor.u32 %v374_v9, %v371_v8  ;;  %v388_v20 = vshll.u32 %v303_v40, 16  ;;  %v657_v23 = vshrl.u32 %v296_v10, 16 }
  0x3a   : > { %v384_v21 = vrot.slane %v382_v16, 4  ;;  %v660_v25 = vshll.u32 %v296_v10, 16  ;;  %v666_v26 = vshll.u32 %v12326_v11, 16  ;;  %v670_v32 = vshrl.u32 %v12326_v11, 16 }
  0x3b   : > { %v751_v28 = vpack.c.b16 %v733_v17, %v732_v6  ;;  %v376_v29 = vrot.slane %v375_v19, 4  ;;  %v390_v30 = vrot.slane %v388_v20, 5  ;;  %v659_v36 = vrot.slane %v657_v23, 4 }
  0x3c   : > { %v385_v35 = vor.u32 %v384_v21, %v380_v15  ;;  %v662_v37 = vrot.slane %v660_v25, 5  ;;  %v668_v38 = vrot.slane %v666_v26, 5  ;;  %v672_v40 = vrot.slane %v670_v32, 4 }
  0x3d   : > { %10516 = vmatmul.msk.bf16.gmra.mxu0 %vm754_vm3, %v739_v13  ;;  %v676_v41 = vshll.u32 %v12331_v22, 16  ;;  %v381_v42 = vsel %vm12265_vm7, %v376_v29, %v380_v15  ;;  %v1190_v47 = vrot.slane %v275_v31, 5  ;;  %v393_v50 = vshrl.u32 %v274_v39, 16 }
  0x3e   : > { %v386_v43 = vrot.slane %v385_v35, 4  ;;  %v663_v44 = vor.u32 %v662_v37, %v659_v36  ;;  %v673_v48 = vor.u32 %v672_v40, %v668_v38  ;;  %v1315_v51 = vpack.c.b16 %v1286_v18, %v1285_v7 }
  0x3f   : > { %v678_v54 = vrot.slane %v676_v41, 5  ;;  %v710_v55 = vunpack.c.l.b16 %v381_v42  ;;  %v10614_v57 = vrot.slane %v1119_v46, 9  ;;  %v1193_v58 = vrot.slane %v304_v45, 5  ;;  %v277_v41 = vld [vmem:[%s12226_s20 + $0x34] sm:$0xf]  ;;  %v11762_v46 = vld [vmem:[%s12226_s20 + $0x24] sm:$0xff] }
  0x40   : > { %v391_v52 = vsel %vm12265_vm7, %v386_v43, %v390_v30  ;;  %v664_v53 = vrot.slane %v663_v44, 4  ;;  %v674_v56 = vrot.slane %v673_v48, 4  ;;  %v1192_v3 = vrot.slane %v1190_v47, 4  ;;  %10597 = vmatmul.msk.bf16.gmra.mxu1 %vm754_vm3, %v11761_v49  ;;  %v276_v43 = vld [vmem:[%s12226_s20 + $0x30] sm:$0xf] }
  0x41   : > { %10528 = vmatmul.msk.bf16.gmra.mxu3 %vm754_vm3, %v751_v28  ;;  %v711_v59 = vunpack.c.l.b16 %v391_v52  ;;  %v396_v60 = vshll.u32 %v274_v39, 16  ;;  %v402_v61 = vshll.u32 %v275_v31, 16  ;;  %v395_v0 = vrot.slane %v393_v50, 4  ;;  %v12364_v28 = vld [vmem:[%s12226_s20 + $0xbc] sm:$0x1] }
  0x42   : > { %v669_v63 = vsel %vm12265_vm7, %v664_v53, %v668_v38  ;;  %v679_v2 = vsel %vm12265_vm7, %v674_v56, %v678_v54  ;;  %v406_v7 = vshrl.u32 %v275_v31, 16  ;;  %v1191_v8 = vsel %vm12237_vm6, %v10614_v57, %v1190_v47  ;;  %v305_v47 = vld [vmem:[%s12226_s20 + $0x38] sm:$0x1]  ;;  %v1120_v52 = vld [vmem:[%s12226_s20 + $0x30] sm:$0xe] }
  0x43   : > { %v398_v4 = vrot.slane %v396_v60, 5  ;;  %v404_v6 = vrot.slane %v402_v61, 5  ;;  %v681_v9 = vshrl.u32 %v298_v62, 16  ;;  %v684_v10 = vshll.u32 %v298_v62, 16 }
  0x44   : > { %v740_v13 = vpack.c.b16 %v711_v59, %v710_v55  ;;  %v1194_v14 = vsel %vm12237_vm6, %v1192_v3, %v1193_v58  ;;  %v408_v15 = vrot.slane %v406_v7, 4  ;;  %v690_v16 = vshll.u32 %v12352_v1, 16 }
  0x45   : > { %v734_v17 = vunpack.c.l.b16 %v669_v63  ;;  %v735_v18 = vunpack.c.l.b16 %v679_v2  ;;  %v399_v19 = vor.u32 %v398_v4, %v395_v0  ;;  %v694_v20 = vshrl.u32 %v12352_v1, 16 }
  0x46   : > { %v409_v21 = vor.u32 %v408_v15, %v404_v6  ;;  %v412_v23 = vshll.u32 %v304_v45, 16  ;;  %v683_v25 = vrot.slane %v681_v9, 4  ;;  %v686_v26 = vrot.slane %v684_v10, 5 }
  0x47   : > { %10630 = vmatmul.msk.bf16.gmra.mxu2 %vm754_vm3, %v1315_v51  ;;  %v692_v29 = vrot.slane %v690_v16, 5  ;;  %v696_v30 = vrot.slane %v694_v20, 4  ;;  %v752_v32 = vpack.c.b16 %v735_v18, %v734_v17  ;;  %v1287_v31 = vunpack.c.l.b16 %v1191_v8  ;;  %v279_v20 = vld [vmem:[%s12226_s20 + $0x40] sm:$0xf] }
  0x48   : > { %v1288_v35 = vunpack.c.l.b16 %v1194_v14  ;;  %v400_v36 = vrot.slane %v399_v19, 4  ;;  %v410_v37 = vrot.slane %v409_v21, 4  ;;  %v414_v38 = vrot.slane %v412_v23, 5 }
  0x49   : > { %v687_v39 = vor.u32 %v686_v26, %v683_v25  ;;  %v700_v40 = vshll.u32 %v12364_v28, 16  ;;  %v697_v42 = vor.u32 %v696_v30, %v692_v29  ;;  %v1197_v48 = vrot.slane %v277_v41, 5  ;;  %v278_v26 = vld [vmem:[%s12226_s20 + $0x3c] sm:$0xf] }
  0x4a   : > { %v1316_v44 = vpack.c.b16 %v1288_v35, %v1287_v31  ;;  %v405_v45 = vsel %vm12265_vm7, %v400_v36, %v404_v6  ;;  %v415_v49 = vsel %vm12265_vm7, %v410_v37, %v414_v38  ;;  %v417_v53 = vshrl.u32 %v276_v43, 16 }
  0x4b   : > { %v688_v50 = vrot.slane %v687_v39, 4  ;;  %v702_v51 = vrot.slane %v700_v40, 5  ;;  %v698_v54 = vrot.slane %v697_v42, 4  ;;  %v420_v55 = vshll.u32 %v276_v43, 16 }
  0x4c   : > { %v426_v56 = vshll.u32 %v277_v41, 16  ;;  %v430_v57 = vshrl.u32 %v277_v41, 16  ;;  %v712_v58 = vunpack.c.l.b16 %v405_v45  ;;  %v10615_v59 = vrot.slane %v1120_v52, 9  ;;  %v306_v41 = vld [vmem:[%s12226_s20 + $0x44] sm:$0x1] }
  0x4d   : > { %10517 = vmatmul.msk.bf16.gmra.mxu0 %vm754_vm3, %v740_v13  ;;  %v1200_v3 = vrot.slane %v305_v47, 5  ;;  %v713_v60 = vunpack.c.l.b16 %v415_v49  ;;  %v693_v61 = vsel %vm12265_vm7, %v688_v50, %v692_v29  ;;  %v1199_v62 = vrot.slane %v1197_v48, 4  ;;  %v11763_v29 = vld [vmem:[%s12226_s20 + $0x30] sm:$0xff] }
  0x4e   : > { %v419_v63 = vrot.slane %v417_v53, 4  ;;  %v703_v0 = vsel %vm12265_vm7, %v698_v54, %v702_v51  ;;  %v422_v2 = vrot.slane %v420_v55, 5  ;;  %v428_v4 = vrot.slane %v426_v56, 5 }
  0x4f   : > { %v432_v6 = vrot.slane %v430_v57, 4  ;;  %v741_v7 = vpack.c.b16 %v713_v60, %v712_v58  ;;  %v736_v8 = vunpack.c.l.b16 %v693_v61  ;;  %v737_v9 = vunpack.c.l.b16 %v703_v0  ;;  %v11771_v57 = vld [vmem:[%s12226_s20 + $0x90] sm:$0xff]  ;;  %v11764_v0 = vld [vmem:[%s12226_s20 + $0x3c] sm:$0xff] }
  0x50   : > { %10598 = vmatmul.msk.bf16.gmra.mxu1 %vm754_vm3, %v11762_v46  ;;  %v1198_v10 = vsel %vm12237_vm6, %v10615_v59, %v1197_v48  ;;  %v1201_v13 = vsel %vm12237_vm6, %v1199_v62, %v1200_v3  ;;  %v423_v14 = vor.u32 %v422_v2, %v419_v63  ;;  %v436_v16 = vshll.u32 %v305_v47, 16  ;;  %v280_v62 = vld [vmem:[%s12226_s20 + $0x48] sm:$0xf]  ;;  %v281_v63 = vld [vmem:[%s12226_s20 + $0x4c] sm:$0xf] }
  0x51   : > { %10529 = vmatmul.msk.bf16.gmra.mxu3 %vm754_vm3, %v752_v32  ;;  %v433_v15 = vor.u32 %v432_v6, %v428_v4  ;;  %v753_v17 = vpack.c.b16 %v737_v9, %v736_v8  ;;  %v1289_v18 = vunpack.c.l.b16 %v1198_v10  ;;  %v1290_v19 = vunpack.c.l.b16 %v1201_v13  ;;  %v1121_v32 = vld [vmem:[%s12226_s20 + $0x3c] sm:$0xe]  ;;  %v1122_v9 = vld [vmem:[%s12226_s20 + $0x48] sm:$0xe] }
  0x52   : > { %v424_v21 = vrot.slane %v423_v14, 4  ;;  %v438_v25 = vrot.slane %v436_v16, 5  ;;  %v1204_v31 = vrot.slane %v279_v20, 5  ;;  %v441_v35 = vshrl.u32 %v278_v26, 16 }
  0x53   : > { %v434_v23 = vrot.slane %v433_v15, 4  ;;  %v1317_v30 = vpack.c.b16 %v1290_v19, %v1289_v18  ;;  %v444_v36 = vshll.u32 %v278_v26, 16  ;;  %v450_v39 = vshll.u32 %v279_v20, 16  ;;  %v307_v15 = vld [vmem:[%s12226_s20 + $0x50] sm:$0x1] }
  0x54   : > { %v429_v37 = vsel %vm12265_vm7, %v424_v21, %v428_v4  ;;  %v454_v40 = vshrl.u32 %v279_v20, 16  ;;  %v10616_v42 = vrot.slane %v1121_v32, 9  ;;  %v443_v45 = vrot.slane %v441_v35, 4 }
  0x55   : > { %v439_v38 = vsel %vm12265_vm7, %v434_v23, %v438_v25  ;;  %v714_v43 = vunpack.c.l.b16 %v429_v37  ;;  %v446_v46 = vrot.slane %v444_v36, 5  ;;  %v1206_v47 = vrot.slane %v1204_v31, 4  ;;  %v11772_v37 = vld [vmem:[%s12226_s20 + $0x9c] sm:$0xff] }
  0x56   : > { %v1207_v48 = vrot.slane %v306_v41, 5  ;;  %v452_v49 = vrot.slane %v450_v39, 5  ;;  %v456_v50 = vrot.slane %v454_v40, 4  ;;  %v1205_v53 = vsel %vm12237_vm6, %v10616_v42, %v1204_v31 }
  0x57   : > { %10631 = vmatmul.msk.bf16.gmra.mxu2 %vm754_vm3, %v1316_v44  ;;  %v715_v44 = vunpack.c.l.b16 %v439_v38  ;;  %v447_v52 = vor.u32 %v446_v46, %v443_v45  ;;  %v460_v56 = vshll.u32 %v306_v41, 16  ;;  %v1291_v58 = vunpack.c.l.b16 %v1205_v53  ;;  %v11765_v45 = vld [vmem:[%s12226_s20 + $0x48] sm:$0xff] }
  0x58   : > { %v1208_v54 = vsel %vm12237_vm6, %v1206_v47, %v1207_v48  ;;  %v457_v55 = vor.u32 %v456_v50, %v452_v49  ;;  %v465_v6 = vshrl.u32 %v280_v62, 16  ;;  %v1211_v10 = vrot.slane %v281_v63, 5 }
  0x59   : > { %v742_v51 = vpack.c.b16 %v715_v44, %v714_v43  ;;  %v1292_v59 = vunpack.c.l.b16 %v1208_v54  ;;  %v448_v3 = vrot.slane %v447_v52, 4  ;;  %v462_v61 = vrot.slane %v460_v56, 5  ;;  %v282_v43 = vld [vmem:[%s12226_s20 + $0x54] sm:$0xf]  ;;  %v283_v44 = vld [vmem:[%s12226_s20 + $0x58] sm:$0xf] }
  0x5a   : > { %v458_v60 = vrot.slane %v457_v55, 4  ;;  %v474_v13 = vshll.u32 %v281_v63, 16  ;;  %v478_v14 = vshrl.u32 %v281_v63, 16  ;;  %v10617_v18 = vrot.slane %v1122_v9, 9  ;;  %v308_v55 = vld [vmem:[%s12226_s20 + $0x5c] sm:$0x1] }
  0x5b   : > { %v1318_v2 = vpack.c.b16 %v1292_v59, %v1291_v58  ;;  %v453_v4 = vsel %vm12265_vm7, %v448_v3, %v452_v49  ;;  %v467_v19 = vrot.slane %v465_v6, 4  ;;  %v1213_v21 = vrot.slane %v1211_v10, 4 }
  0x5c   : > { %v463_v8 = vsel %vm12265_vm7, %v458_v60, %v462_v61  ;;  %v716_v16 = vunpack.c.l.b16 %v453_v4  ;;  %v1214_v23 = vrot.slane %v307_v15, 5  ;;  %v476_v25 = vrot.slane %v474_v13, 5 }
  0x5d   : > { %10518 = vmatmul.msk.bf16.gmra.mxu0 %vm754_vm3, %v741_v7  ;;  %v468_v7 = vshll.u32 %v280_v62, 16  ;;  %v480_v26 = vrot.slane %v478_v14, 4  ;;  %v1212_v32 = vsel %vm12237_vm6, %v10617_v18, %v1211_v10  ;;  %v484_v36 = vshll.u32 %v307_v15, 16 }
  0x5e   : > { %v1215_v31 = vsel %vm12237_vm6, %v1213_v21, %v1214_v23  ;;  %v1293_v38 = vunpack.c.l.b16 %v1212_v32  ;;  %v489_v48 = vshrl.u32 %v282_v43, 16  ;;  %v492_v49 = vshll.u32 %v282_v43, 16  ;;  %v11766_v32 = vld [vmem:[%s12226_s20 + $0x54] sm:$0xff] }
  0x5f   : > { %v470_v20 = vrot.slane %v468_v7, 5  ;;  %v481_v35 = vor.u32 %v480_v26, %v476_v25  ;;  %v1294_v39 = vunpack.c.l.b16 %v1215_v31  ;;  %v486_v42 = vrot.slane %v484_v36, 5  ;;  %v284_v26 = vld [vmem:[%s12226_s20 + $0x60] sm:$0xf] }
  0x60   : > { %10599 = vmatmul.msk.bf16.gmra.mxu1 %vm754_vm3, %v11763_v29  ;;  %v1218_v52 = vrot.slane %v283_v44, 5  ;;  %v498_v53 = vshll.u32 %v283_v44, 16  ;;  %v502_v54 = vshrl.u32 %v283_v44, 16  ;;  %v1253_v56 = vrot.slane %v12258_v27, 5  ;;  %v309_v44 = vld [vmem:[%s12226_s20 + $0x68] sm:$0x1] }
  0x61   : > { %10530 = vmatmul.msk.bf16.gmra.mxu3 %vm754_vm3, %v753_v17  ;;  %v717_v17 = vunpack.c.l.b16 %v463_v8  ;;  %v482_v41 = vrot.slane %v481_v35, 4  ;;  %v1319_v46 = vpack.c.b16 %v1294_v39, %v1293_v38  ;;  %v491_v3 = vrot.slane %v489_v48, 4  ;;  %v1128_v8 = vld [vmem:[%s12226_s20 + $0x90] sm:$0xe]  ;;  %v10676_v38 = vld [vmem:[%s16231_s1 + $0x6] sm:$0x3] }
  0x62   : > { %v494_v60 = vrot.slane %v492_v49, 5  ;;  %v1220_v61 = vrot.slane %v1218_v52, 4  ;;  %v1221_v62 = vrot.slane %v308_v55, 5  ;;  %v500_v63 = vrot.slane %v498_v53, 5 }
  0x63   : > { %v743_v29 = vpack.c.b16 %v717_v17, %v716_v16  ;;  %v487_v50 = vsel %vm12265_vm7, %v482_v41, %v486_v42  ;;  %v1256_v4 = vrot.slane %v12261_v33, 5  ;;  %v508_v13 = vshll.u32 %v308_v55, 16  ;;  %v11773_v17 = vld [vmem:[%s12226_s20 + $0xa8] sm:$0xff] }
  0x64   : > { %v719_v58 = vunpack.c.l.b16 %v487_v50  ;;  %v495_v7 = vor.u32 %v494_v60, %v491_v3  ;;  %v1222_v9 = vsel %vm12237_vm6, %v1220_v61, %v1221_v62  ;;  %v10623_v14 = vrot.slane %v1128_v8, 9  ;;  %v11774_v60 = vld [vmem:[%s12226_s20 + $0xb4] sm:$0xff] }
  0x65   : > { %v1296_v18 = vunpack.c.l.b16 %v1222_v9  ;;  %v513_v36 = vshrl.u32 %v284_v26, 16  ;;  %v1665_v42 = vsel %vm803_vm0, %v10676_v38, 0 }
  0x66   : > { %v1254_v16 = vsel %vm12237_vm6, %v10623_v14, %v1253_v56 }
  0x67   : > { %10632 = vmatmul.msk.bf16.gmra.mxu2 %vm754_vm3, %v1317_v30  ;;  %v471_v30 = vor.u32 %v470_v20, %v467_v19  ;;  %v496_v19 = vrot.slane %v495_v7, 4  ;;  %v1305_v20 = vunpack.c.l.b16 %v1254_v16  ;;  %v515_v48 = vrot.slane %v513_v36, 4 }
  0x69   : > { %v472_v40 = vrot.slane %v471_v30, 4  ;;  %v501_v35 = vsel %vm12265_vm7, %v496_v19, %v500_v63  ;;  %v1125_v19 = vld [vmem:[%s12226_s20 + $0x6c] sm:$0xe] }
  0x6a   : > { %v10620_v36 = vrot.slane %v1125_v19, 9 }
  0x6b   : > { %v477_v47 = vsel %vm12265_vm7, %v472_v40, %v476_v25  ;;  %v510_v25 = vrot.slane %v508_v13, 5 }
  0x6d   : > { %10519 = vmatmul.msk.bf16.gmra.mxu0 %vm754_vm3, %v742_v51  ;;  %v1123_v51 = vld [vmem:[%s12226_s20 + $0x54] sm:$0xe] }
  0x6e   : > { %v10618_v59 = vrot.slane %v1123_v51, 9 }
  0x70   : > { %10600 = vmatmul.msk.bf16.gmra.mxu1 %vm754_vm3, %v11764_v0  ;;  %v504_v0 = vrot.slane %v502_v54, 4  ;;  %v1219_v27 = vsel %vm12237_vm6, %v10618_v59, %v1218_v52  ;;  %v1228_v54 = vrot.slane %v309_v44, 5 }
  0x71   : > { %10607 = vmatmul.msk.bf16.vlgmr.msrb.gmra.mxu3 %vm754_vm3, %v11771_v57  ;;  %v718_v57 = vunpack.c.l.b16 %v477_v47  ;;  %v1295_v15 = vunpack.c.l.b16 %v1219_v27  ;;  %v11767_v27 = vld [vmem:[%s12226_s20 + $0x60] sm:$0xff] }
  0x72   : > { %v505_v10 = vor.u32 %v504_v0, %v500_v63  ;;  %1674 = vmatpush.bf16.msrb.mxu3 %v1665_v42 }
  0x73   : > { %v744_v6 = vpack.c.b16 %v719_v58, %v718_v57  ;;  %v1320_v31 = vpack.c.b16 %v1296_v18, %v1295_v15  ;;  %v532_v58 = vshll.u32 %v309_v44, 16  ;;  %v310_v18 = vld [vmem:[%s12226_s20 + $0x74] sm:$0x1] }
  0x74   : > { %v506_v23 = vrot.slane %v505_v10, 4  ;;  %v1235_v38 = vrot.slane %v310_v18, 5 }
  0x76   : > { %v511_v39 = vsel %vm12265_vm7, %v506_v23, %v510_v25 }
  0x77   : > { %10633 = vmatmul.msk.bf16.gmra.mxu2 %vm754_vm3, %v1318_v2  ;;  %v1255_v2 = vrot.slane %v1253_v56, 4  ;;  %v721_v47 = vunpack.c.l.b16 %v511_v39 }
  0x79   : > { %v1257_v33 = vsel %vm12237_vm6, %v1255_v2, %v1256_v4  ;;  %v534_v2 = vrot.slane %v532_v58, 5  ;;  %v286_v4 = vld [vmem:[%s12226_s20 + $0x6c] sm:$0xf]  ;;  %v289_v58 = vld [vmem:[%s12226_s20 + $0x7c] sm:$0xf] }
  0x7a   : > { %v1306_v21 = vunpack.c.l.b16 %v1257_v33  ;;  %v537_v9 = vshrl.u32 %v286_v4, 16  ;;  %v540_v10 = vshll.u32 %v286_v4, 16 }
  0x7c   : > { %v12452_v30 = vpack.c.b16 %v1306_v21, %v1305_v20  ;;  %v10903_v20 = vld [vmem:[%s16231_s1 + $0xc] sm:$0x3]  ;;  %v539_v23 = vrot.slane %v537_v9, 4  ;;  %v542_v25 = vrot.slane %v540_v10, 5  ;;  %v1239_v10 = vrot.slane %v289_v58, 5 }
  0x7d   : > { %10520 = vmatmul.msk.bf16.gmra.mxu0 %vm754_vm3, %v743_v29  ;;  %v285_v29 = vld [vmem:[%s12226_s20 + $0x64] sm:$0xf] }
  0x7e   : > { %v522_v40 = vshll.u32 %v285_v29, 16  ;;  %v526_v41 = vshrl.u32 %v285_v29, 16  ;;  %v1225_v43 = vrot.slane %v285_v29, 5  ;;  %v10854_v29 = vld [vmem:[%s16231_s1 + $0xa] sm:$0x3]  ;;  %v543_v42 = vor.u32 %v542_v25, %v539_v23 }
  0x7f   : > { %v1241_v25 = vrot.slane %v1239_v10, 4 }
  0x80   : > { %10601 = vmatmul.msk.bf16.gmra.mxu1 %vm754_vm3, %v11765_v45  ;;  %v1124_v45 = vld [vmem:[%s12226_s20 + $0x60] sm:$0xe]  ;;  %v524_v50 = vrot.slane %v522_v40, 5  ;;  %v528_v51 = vrot.slane %v526_v41, 4  ;;  %v1227_v53 = vrot.slane %v1225_v43, 4 }
  0x81   : > { %10608 = vmatmul.msk.bf16.gmra.mxu3 %vm754_vm3, %v11772_v37  ;;  %v516_v37 = vshll.u32 %v284_v26, 16  ;;  %v10619_v52 = vrot.slane %v1124_v45, 9  ;;  %v3004_v26 = vsel %vm803_vm0, %v10903_v20, 0  ;;  %v556_v45 = vshll.u32 %v310_v18, 16 }
  0x82   : > { %v529_v57 = vor.u32 %v528_v51, %v524_v50  ;;  %v1229_v3 = vsel %vm12237_vm6, %v1227_v53, %v1228_v54  ;;  %3013 = vmatpush.bf16.msrb.mxu2 %v3004_v26  ;;  %v1129_v51 = vld [vmem:[%s12226_s20 + $0x9c] sm:$0xe]  ;;  %v288_v53 = vld [vmem:[%s12226_s20 + $0x78] sm:$0xf] }
  0x83   : > { %v518_v49 = vrot.slane %v516_v37, 5  ;;  %v1226_v59 = vsel %vm12237_vm6, %v10619_v52, %v1225_v43  ;;  %v1298_v63 = vunpack.c.l.b16 %v1229_v3  ;;  %v1260_v52 = vrot.slane %v12292_v12, 5 }
  0x84   : > { %v1297_v62 = vunpack.c.l.b16 %v1226_v59  ;;  %v530_v0 = vrot.slane %v529_v57, 4  ;;  %v558_v57 = vrot.slane %v556_v45, 5  ;;  %v11768_v59 = vld [vmem:[%s12226_s20 + $0x6c] sm:$0xff]  ;;  %v10624_v3 = vrot.slane %v1129_v51, 9 }
  0x85   : > { %v519_v56 = vor.u32 %v518_v49, %v515_v48 }
  0x86   : > { %v1321_v13 = vpack.c.b16 %v1298_v63, %v1297_v62  ;;  %v535_v14 = vsel %vm12265_vm7, %v530_v0, %v534_v2  ;;  %v570_v0 = vshll.u32 %v289_v58, 16  ;;  %v574_v2 = vshrl.u32 %v289_v58, 16 }
  0x87   : > { %10634 = vmatmul.msk.bf16.gmra.mxu2 %vm754_vm3, %v1319_v46  ;;  %v720_v46 = vunpack.c.l.b16 %v501_v35  ;;  %v520_v61 = vrot.slane %v519_v56, 4  ;;  %v723_v21 = vunpack.c.l.b16 %v535_v14  ;;  %v2717_v35 = vsel %vm803_vm0, %v10854_v29, 0 }
  0x88   : > { %2726 = vmatpush.bf16.msrb.mxu1 %v2717_v35  ;;  %v1261_v14 = vsel %vm12237_vm6, %v10624_v3, %v1260_v52  ;;  %v572_v20 = vrot.slane %v570_v0, 5 }
  0x89   : > { %v745_v55 = vpack.c.b16 %v721_v47, %v720_v46  ;;  %v525_v8 = vsel %vm12265_vm7, %v520_v61, %v524_v50  ;;  %v544_v50 = vrot.slane %v543_v42, 4  ;;  %v564_v61 = vshll.u32 %v288_v53, 16 }
  0x8a   : > { %v1307_v29 = vunpack.c.l.b16 %v1261_v14  ;;  %v312_v14 = vld [vmem:[%s12226_s20 + $0x8c] sm:$0x1] }
  0x8d   : > { %10521 = vmatmul.msk.bf16.gmra.mxu0 %vm754_vm3, %v744_v6  ;;  %v287_v6 = vld [vmem:[%s12226_s20 + $0x70] sm:$0xf] }
  0x8e   : > { %v546_v15 = vshll.u32 %v287_v6, 16  ;;  %v550_v16 = vshrl.u32 %v287_v6, 16  ;;  %v1232_v33 = vrot.slane %v287_v6, 5 }
  0x90   : > { %10602 = vmatmul.msk.bf16.gmra.mxu1 %vm754_vm3, %v11766_v32  ;;  %v548_v32 = vrot.slane %v546_v15, 5  ;;  %v1234_v37 = vrot.slane %v1232_v33, 4  ;;  %v1233_v47 = vsel %vm12237_vm6, %v10620_v36, %v1232_v33  ;;  %v311_v15 = vld [vmem:[%s12226_s20 + $0x80] sm:$0x1] }
  0x91   : > { %10609 = vmatmul.msk.bf16.gmra.mxu3 %vm754_vm3, %v11773_v17  ;;  %v722_v17 = vunpack.c.l.b16 %v525_v8  ;;  %v1299_v54 = vunpack.c.l.b16 %v1233_v47  ;;  %v1263_v8 = vrot.slane %v12300_v24, 5  ;;  %v1242_v26 = vrot.slane %v311_v15, 5 }
  0x92   : > { %v1236_v48 = vsel %vm12237_vm6, %v1234_v37, %v1235_v38  ;;  %v549_v12 = vsel %vm12265_vm7, %v544_v50, %v548_v32  ;;  %v1267_v47 = vrot.slane %v12326_v11, 5 }
  0x93   : > { %v746_v40 = vpack.c.b16 %v723_v21, %v722_v17  ;;  %v566_v17 = vrot.slane %v564_v61, 5  ;;  %v576_v21 = vrot.slane %v574_v2, 4 }
  0x94   : > { %v1269_v3 = vrot.slane %v1267_v47, 4 }
  0x95   : > { %v577_v38 = vor.u32 %v576_v21, %v572_v20 }
  0x97   : > { %10635 = vmatmul.msk.bf16.gmra.mxu2 %vm754_vm3, %v1320_v31  ;;  %v552_v31 = vrot.slane %v550_v16, 4  ;;  %v1126_v16 = vld [vmem:[%s12226_s20 + $0x78] sm:$0xe]  ;;  %v578_v51 = vrot.slane %v577_v38, 4 }
  0x98   : > { %v10621_v23 = vrot.slane %v1126_v16, 9 }
  0x99   : > { %v553_v44 = vor.u32 %v552_v31, %v548_v32 }
  0x9a   : > { %v1240_v42 = vsel %vm12237_vm6, %v10621_v23, %v1239_v10  ;;  %v1249_v23 = vrot.slane %v312_v14, 5 }
  0x9b   : > { %v554_v56 = vrot.slane %v553_v44, 4 }
  0x9d   : > { %10522 = vmatmul.msk.bf16.gmra.mxu0 %vm754_vm3, %v745_v55  ;;  %v1036_v7 = vpop.f32.mrf.mxu1  ;;  %v1300_v55 = vunpack.c.l.b16 %v1236_v48 }
  0x9f   : > { %v1322_v6 = vpack.c.b16 %v1300_v55, %v1299_v54  ;;  %v1301_v54 = vunpack.c.l.b16 %v1240_v42  ;;  %v10757_v42 = vld [vmem:[%s12226_s20 + $0xc] sm:$0xf] }
  0xa0   : > { %10603 = vmatmul.msk.bf16.gmra.mxu1 %vm754_vm3, %v11767_v27  ;;  %v559_v27 = vsel %vm12265_vm7, %v554_v56, %v558_v57  ;;  %v291_v56 = vld [vmem:[%s12226_s20 + $0x88] sm:$0xf] }
  0xa1   : > { %10610 = vmatmul.msk.bf16.gmra.mxu3 %vm754_vm3, %v11774_v60  ;;  %v561_v60 = vshrl.u32 %v288_v53, 16  ;;  %v725_v19 = vunpack.c.l.b16 %v559_v27  ;;  %v290_v53 = vld [vmem:[%s12226_s20 + $0x84] sm:$0xf]  ;;  %v594_v0 = vshll.u32 %v291_v56, 16  ;;  %v598_v2 = vshrl.u32 %v291_v56, 16 }
  0xa2   : > { %v585_v11 = vshrl.u32 %v290_v53, 16 }
  0xa3   : > { %v563_v33 = vrot.slane %v561_v60, 4  ;;  %v1270_v60 = vrot.slane %v12331_v22, 5  ;;  %v1246_v22 = vrot.slane %v291_v56, 5 }
  0xa4   : > { %v587_v16 = vrot.slane %v585_v11, 4 }
  0xa5   : > { %v1038_v41 = vpop.f32.mrf.mxu1  ;;  %v567_v32 = vor.u32 %v566_v17, %v563_v33 }
  0xa7   : > { %10636 = vmatmul.msk.bf16.gmra.mxu2 %vm754_vm3, %v1321_v13  ;;  %v724_v13 = vunpack.c.l.b16 %v549_v12  ;;  %v568_v45 = vrot.slane %v567_v32, 4  ;;  %v588_v12 = vshll.u32 %v290_v53, 16 }
  0xa9   : > { %v747_v35 = vpack.c.b16 %v725_v19, %v724_v13  ;;  %v573_v58 = vsel %vm12265_vm7, %v568_v45, %v572_v20  ;;  %v1271_v13 = vsel %vm12237_vm6, %v1269_v3, %v1270_v60  ;;  %v590_v17 = vrot.slane %v588_v12, 5  ;;  %v11770_v60 = vld [vmem:[%s12226_s20 + $0x84] sm:$0xff] }
  0xaa   : > { %v1389_v39 = vpop.f32.mrf.mxu2  ;;  %v816_v43 = vpop.f32.mrf.mxu0  ;;  %v596_v19 = vrot.slane %v594_v0, 5  ;;  %v600_v20 = vrot.slane %v598_v2, 4  ;;  %v1277_v0 = vrot.slane %v12364_v28, 5  ;;  %v11032_v2 = vld [vmem:[%s16231_s1 + $0xe] sm:$0x3] }
  0xab   : > { %v1037_v46 = vadd.f32 %v1036_v7, %v816_v43  ;;  %v1262_v7 = vrot.slane %v1260_v52, 4  ;;  %v1243_v43 = vsel %vm12237_vm6, %v1241_v25, %v1242_v26  ;;  %v1310_v26 = vunpack.c.l.b16 %v1271_v13 }
  0xac   : > { %v1302_v55 = vunpack.c.l.b16 %v1243_v43 }
  0xad   : > { %v12498_v49 = vadd.f32 %v1389_v39, %v1037_v46  ;;  %10523 = vmatmul.msk.bf16.gmra.mxu0 %vm754_vm3, %v746_v40  ;;  %v1041_v63 = vpop.f32.mrf.mxu1  ;;  %v1264_v24 = vsel %vm12237_vm6, %v1262_v7, %v1263_v8  ;;  %v580_v39 = vshll.u32 %v311_v15, 16  ;;  %v1130_v46 = vld [vmem:[%s12226_s20 + $0xa8] sm:$0xe]  ;;  %v1127_v15 = vld [vmem:[%s12226_s20 + $0x84] sm:$0xe] }
  0xae   : > { %v1308_v36 = vunpack.c.l.b16 %v1264_v24  ;;  %v10625_v57 = vrot.slane %v1130_v46, 9  ;;  %v10622_v21 = vrot.slane %v1127_v15, 9  ;;  %v1248_v24 = vrot.slane %v1246_v22, 4  ;;  %v10822_v15 = vld [vmem:[%s12226_s20 + $0xc] sm:$0xe] }
  0xaf   : > { %v582_v52 = vrot.slane %v580_v39, 5  ;;  %v1274_v46 = vrot.slane %v12352_v1, 5 }
  0xb0   : > { %10604 = vmatmul.msk.bf16.gmra.mxu1 %vm754_vm3, %v11768_v59  ;;  %v1326_v50 = vpack.c.b16 %v1308_v36, %v1307_v29  ;;  %v11769_v59 = vld [vmem:[%s12226_s20 + $0x78] sm:$0xff]  ;;  %v1268_v7 = vsel %vm12237_vm6, %v10625_v57, %v1267_v47  ;;  %v601_v36 = vor.u32 %v600_v20, %v596_v19  ;;  %v10758_v47 = vld [vmem:[%s12226_s20 + $0x10] sm:$0xf]  ;;  %v1837_v57 = vshrl.u32 %v10757_v42, 16  ;;  %v10759_v20 = vld [vmem:[%s12226_s20 + $0x14] sm:$0x1] }
  0xb1   : > { %10640 = vmatmul.msk.bf16.vlgmr.msra.gmra.mxu3 %vm754_vm3, %v12452_v30  ;;  %v1309_v25 = vunpack.c.l.b16 %v1268_v7  ;;  %v1850_v3 = vshrl.u32 %v10758_v47, 16  ;;  %v1276_v12 = vrot.slane %v1274_v46, 4  ;;  %v3658_v7 = vsel %vm803_vm0, %v11032_v2, 0 }
  0xb2   : > { %v1391_v62 = vpop.f32.mrf.mxu2  ;;  %v818_v4 = vpop.f32.mrf.mxu0  ;;  %3667 = vmatpush.bf16.msra.mxu3 %v3658_v7 }
  0xb3   : > { %v1039_v9 = vadd.f32 %v1038_v41, %v818_v4  ;;  %v1327_v45 = vpack.c.b16 %v1310_v26, %v1309_v25  ;;  %v2511_v26 = vrot.slane %v10759_v20, 5 }
  0xb4   : > { %v12513_v30 = vpop.f32.mrf.mxu3 }
  0xb5   : > { %v12520_v18 = vadd.f32 %v1391_v62, %v1039_v9  ;;  %v1043_v37 = vpop.f32.mrf.mxu1  ;;  %v726_v9 = vunpack.c.l.b16 %v573_v58  ;;  %v1840_v58 = vshll.u32 %v10757_v42, 16 }
  0xb7   : > { %10637 = vmatmul.msk.bf16.gmra.mxu2 %vm754_vm3, %v1322_v6  ;;  %v1323_v6 = vpack.c.b16 %v1302_v55, %v1301_v54  ;;  %v1131_v54 = vld [vmem:[%s12226_s20 + $0xb4] sm:$0xe] }
  0xb8   : > { %v10626_v11 = vrot.slane %v1131_v54, 9 }
  0xba   : > { %v1394_v31 = vpop.f32.mrf.mxu2  ;;  %v821_v40 = vpop.f32.mrf.mxu0 }
  0xbb   : > { %v1042_v41 = vadd.f32 %v1041_v63, %v821_v40  ;;  %v583_v63 = vsel %vm12265_vm7, %v578_v51, %v582_v52  ;;  %v1247_v40 = vsel %vm12237_vm6, %v10622_v21, %v1246_v22  ;;  %v602_v52 = vrot.slane %v601_v36, 4 }
  0xbc   : > { %v12529_v44 = vpop.f32.mrf.mxu3  ;;  %v727_v10 = vunpack.c.l.b16 %v583_v63  ;;  %v1303_v55 = vunpack.c.l.b16 %v1247_v40  ;;  %v2508_v22 = vrot.slane %v10758_v47, 5  ;;  %v1856_v36 = vshll.u32 %v10759_v20, 16 }
  0xbd   : > { %v12533_v48 = vadd.f32 %v1394_v31, %v1042_v41  ;;  %10524 = vmatmul.msk.bf16.gmra.mxu0 %vm754_vm3, %v747_v35  ;;  %v1046_v62 = vpop.f32.mrf.mxu1  ;;  %v591_v35 = vor.u32 %v590_v17, %v587_v16  ;;  %v1250_v41 = vsel %vm12237_vm6, %v1248_v24, %v1249_v23  ;;  %v11081_v24 = vld [vmem:[%s16231_s1 + $0x10] sm:$0x3]  ;;  %v10838_v23 = vrot.slane %v10822_v15, 9 }
  0xbe   : > { %v748_v32 = vpack.c.b16 %v727_v10, %v726_v9  ;;  %v1304_v56 = vunpack.c.l.b16 %v1250_v41  ;;  %v1842_v10 = vrot.slane %v1840_v58, 5  ;;  %v2510_v25 = vrot.slane %v2508_v22, 4 }
  0xbf   : > { %v592_v51 = vrot.slane %v591_v35, 4  ;;  %v2509_v42 = vsel %vm12237_vm6, %v10838_v23, %v2508_v22 }
  0xc0   : > { %10605 = vmatmul.msk.bf16.gmra.mxu1 %vm754_vm3, %v11769_v59  ;;  %v1846_v59 = vshll.u32 %v10758_v47, 16 }
  0xc1   : > { %10641 = vmatmul.msk.bf16.gmra.mxu3 %vm754_vm3, %v1326_v50 }
  0xc2   : > { %v1396_v61 = vpop.f32.mrf.mxu2  ;;  %v823_v4 = vpop.f32.mrf.mxu0  ;;  %v1848_v13 = vrot.slane %v1846_v59, 5 }
  0xc3   : > { %v1044_v27 = vadd.f32 %v1043_v37, %v823_v4  ;;  %v604_v37 = vshll.u32 %v312_v14, 16  ;;  %v1852_v14 = vrot.slane %v1850_v3, 4  ;;  %v10761_v3 = vld [vmem:[%s12226_s20 + $0x1c] sm:$0xf] }
  0xc4   : > { %v12547_v8 = vpop.f32.mrf.mxu3 }
  0xc5   : > { %v12554_v33 = vadd.f32 %v1396_v61, %v1044_v27  ;;  %v1048_v31 = vpop.f32.mrf.mxu1  ;;  %v606_v53 = vrot.slane %v604_v37, 5  ;;  %v1839_v27 = vrot.slane %v1837_v57, 4  ;;  %v1853_v35 = vor.u32 %v1852_v14, %v1848_v13  ;;  %v10760_v57 = vld [vmem:[%s12226_s20 + $0x18] sm:$0xf]  ;;  %v10762_v14 = vld [vmem:[%s12226_s20 + $0x20] sm:$0x1] }
  0xc7   : > { %10638 = vmatmul.msk.bf16.gmra.mxu2 %vm754_vm3, %v1323_v6  ;;  %v607_v63 = vsel %vm12265_vm7, %v602_v52, %v606_v53  ;;  %v1324_v6 = vpack.c.b16 %v1304_v56, %v1303_v55  ;;  %v1854_v52 = vrot.slane %v1853_v35, 4  ;;  %v1858_v53 = vrot.slane %v1856_v36, 5 }
  0xc8   : > { %v729_v17 = vunpack.c.l.b16 %v607_v63  ;;  %v2620_v55 = vunpack.c.l.b16 %v2509_v42  ;;  %v1870_v63 = vshll.u32 %v10761_v3, 16 }
  0xca   : > { %v1399_v29 = vpop.f32.mrf.mxu2  ;;  %v826_v38 = vpop.f32.mrf.mxu0 }
  0xcb   : > { %v1047_v39 = vadd.f32 %v1046_v62, %v826_v38  ;;  %v597_v62 = vsel %vm12265_vm7, %v592_v51, %v596_v19  ;;  %v1275_v19 = vsel %vm12237_vm6, %v10626_v11, %v1274_v46  ;;  %v1859_v11 = vsel %vm12265_vm7, %v1854_v52, %v1858_v53  ;;  %v11775_v52 = vld [vmem:[%s12226_s20 + $0xc] sm:$0xff] }
  0xcc   : > { %v12562_v43 = vpop.f32.mrf.mxu3  ;;  %v728_v28 = vunpack.c.l.b16 %v597_v62  ;;  %v1311_v37 = vunpack.c.l.b16 %v1275_v19  ;;  %v1864_v62 = vshll.u32 %v10760_v57, 16 }
  0xcd   : > { %v12566_v50 = vadd.f32 %v1399_v29, %v1047_v39  ;;  %10525 = vmatmul.msk.bf16.gmra.mxu0 %vm754_vm3, %v748_v32  ;;  %v1051_v61 = vpop.f32.mrf.mxu1  ;;  %v1278_v29 = vsel %vm12237_vm6, %v1276_v12, %v1277_v0  ;;  %v4056_v32 = vsel %vm803_vm0, %v11081_v24, 0  ;;  %v1874_v12 = vshrl.u32 %v10761_v3, 16 }
  0xce   : > { %4065 = vmatpush.bf16.msra.mxu0 %v4056_v32  ;;  %v749_v39 = vpack.c.b16 %v729_v17, %v728_v28  ;;  %v1312_v40 = vunpack.c.l.b16 %v1278_v29  ;;  %v1866_v28 = vrot.slane %v1864_v62, 5  ;;  %v1872_v17 = vrot.slane %v1870_v63, 5 }
  0xcf   : > { %v1876_v19 = vrot.slane %v1874_v12, 4  ;;  %v1880_v29 = vshll.u32 %v10762_v14, 16 }
  0xd0   : > { %10606 = vmatmul.msk.bf16.gmra.mxu1 %vm754_vm3, %v11770_v60  ;;  %v1328_v59 = vpack.c.b16 %v1312_v40, %v1311_v37 }
  0xd1   : > { %10642 = vmatmul.msk.bf16.gmra.mxu3 %vm754_vm3, %v1327_v45  ;;  %v2512_v45 = vsel %vm12237_vm6, %v2510_v25, %v2511_v26  ;;  %v2518_v25 = vrot.slane %v10762_v14, 5  ;;  %v1877_v36 = vor.u32 %v1876_v19, %v1872_v17 }
  0xd2   : > { %v1401_v1 = vpop.f32.mrf.mxu2  ;;  %v828_v4 = vpop.f32.mrf.mxu0  ;;  %v2621_v56 = vunpack.c.l.b16 %v2512_v45 }
  0xd3   : > { %v1049_v9 = vadd.f32 %v1048_v31, %v828_v4  ;;  %v1843_v31 = vor.u32 %v1842_v10, %v1839_v27  ;;  %v2515_v27 = vrot.slane %v10761_v3, 5  ;;  %v10823_v10 = vld [vmem:[%s12226_s20 + $0x18] sm:$0xe] }
  0xd4   : > { %v12582_v16 = vpop.f32.mrf.mxu3  ;;  %v10839_v24 = vrot.slane %v10823_v10, 9 }
  0xd5   : > { %v12588_v21 = vadd.f32 %v1401_v1, %v1049_v9  ;;  %v1053_v41 = vpop.f32.mrf.mxu1  ;;  %v1844_v51 = vrot.slane %v1843_v31, 4  ;;  %v1861_v1 = vshrl.u32 %v10760_v57, 16  ;;  %v2223_v9 = vunpack.c.l.b16 %v1859_v11 }
  0xd6   : > { %v2517_v23 = vrot.slane %v2515_v27, 4  ;;  %v2516_v37 = vsel %vm12237_vm6, %v10839_v24, %v2515_v27 }
  0xd7   : > { %10639 = vmatmul.msk.bf16.gmra.mxu2 %vm754_vm3, %v1324_v6  ;;  %v1849_v60 = vsel %vm12265_vm7, %v1844_v51, %v1848_v13  ;;  %v11791_v6 = vld [vmem:[%s12226_s20 + $0x18] sm:$0xff]  ;;  %v1863_v15 = vrot.slane %v1861_v1, 4  ;;  %v2622_v45 = vunpack.c.l.b16 %v2516_v37 }
  0xd8   : > { %v2222_v22 = vunpack.c.l.b16 %v1849_v60 }
  0xd9   : > { %v1867_v35 = vor.u32 %v1866_v28, %v1863_v15  ;;  %v10765_v28 = vld [vmem:[%s12226_s20 + $0x2c] sm:$0x1] }
  0xda   : > { %v1404_v38 = vpop.f32.mrf.mxu2  ;;  %v831_v46 = vpop.f32.mrf.mxu0  ;;  %v2254_v26 = vpack.c.b16 %v2223_v9, %v2222_v22  ;;  %v10824_v9 = vld [vmem:[%s12226_s20 + $0x24] sm:$0xe] }
  0xdb   : > { %v1052_v47 = vadd.f32 %v1051_v61, %v831_v46  ;;  %v2652_v61 = vpack.c.b16 %v2621_v56, %v2620_v55  ;;  %v1868_v53 = vrot.slane %v1867_v35, 4  ;;  %v1878_v55 = vrot.slane %v1877_v36, 4 }
  0xdc   : > { %v12601_v54 = vpop.f32.mrf.mxu3  ;;  %v1882_v56 = vrot.slane %v1880_v29, 5  ;;  %v10840_v19 = vrot.slane %v10824_v9, 9  ;;  %v10825_v9 = vld [vmem:[%s12226_s20 + $0x30] sm:$0xe] }
  0xdd   : > { %v12604_v58 = vadd.f32 %v1404_v38, %v1052_v47  ;;  %10526 = vmatmul.msk.bf16.gmra.mxu0 %vm754_vm3, %v749_v39  ;;  %v1056_v2 = vpop.f32.mrf.mxu1  ;;  %v2519_v38 = vsel %vm12237_vm6, %v2517_v23, %v2518_v25  ;;  %v10764_v47 = vld [vmem:[%s12226_s20 + $0x28] sm:$0xf]  ;;  %v1873_v62 = vsel %vm12265_vm7, %v1868_v53, %v1872_v17  ;;  %v2525_v25 = vrot.slane %v10765_v28, 5  ;;  %v10766_v53 = vld [vmem:[%s12226_s20 + $0x30] sm:$0xf] }
  0xde   : > { %v2623_v46 = vunpack.c.l.b16 %v2519_v38  ;;  %v1894_v3 = vshll.u32 %v10764_v47, 16  ;;  %v1898_v60 = vshrl.u32 %v10764_v47, 16  ;;  %v1883_v63 = vsel %vm12265_vm7, %v1878_v55, %v1882_v56 }
  0xdf   : > { %v2224_v14 = vunpack.c.l.b16 %v1873_v62  ;;  %v2225_v15 = vunpack.c.l.b16 %v1883_v63 }
  0xe0   : > { %10855 = vmatmul.msk.bf16.vlgmr.msrb.gmra.mxu1 %vm754_vm3, %v2652_v61  ;;  %v2653_v11 = vpack.c.b16 %v2623_v46, %v2622_v45  ;;  %v1900_v22 = vrot.slane %v1898_v60, 4 }
  0xe1   : > { %10643 = vmatmul.msk.bf16.gmra.mxu3 %vm754_vm3, %v1328_v59  ;;  %v2255_v35 = vpack.c.b16 %v2225_v15, %v2224_v14  ;;  %v10768_v14 = vld [vmem:[%s12226_s20 + $0x38] sm:$0x1] }
  0xe2   : > { %v1406_v0 = vpop.f32.mrf.mxu2  ;;  %v833_v4 = vpop.f32.mrf.mxu0 }
  0xe3   : > { %v1054_v7 = vadd.f32 %v1053_v41, %v833_v4  ;;  %v10763_v41 = vld [vmem:[%s12226_s20 + $0x24] sm:$0xf]  ;;  %v2522_v4 = vrot.slane %v10764_v47, 5 }
  0xe4   : > { %v12615_v13 = vpop.f32.mrf.mxu3  ;;  %v1885_v57 = vshrl.u32 %v10763_v41, 16  ;;  %v1888_v59 = vshll.u32 %v10763_v41, 16 }
  0xe5   : > { %v12619_v20 = vadd.f32 %v1406_v0, %v1054_v7  ;;  %v1058_v31 = vpop.f32.mrf.mxu1  ;;  %v11792_v0 = vld [vmem:[%s12226_s20 + $0x24] sm:$0xff]  ;;  %v1896_v7 = vrot.slane %v1894_v3, 5  ;;  %v2524_v23 = vrot.slane %v2522_v4, 4  ;;  %v2523_v37 = vsel %vm12237_vm6, %v10840_v19, %v2522_v4 }
  0xe6   : > { %v1890_v27 = vrot.slane %v1888_v59, 5  ;;  %v2624_v47 = vunpack.c.l.b16 %v2523_v37  ;;  %v10767_v59 = vld [vmem:[%s12226_s20 + $0x34] sm:$0xf] }
  0xe7   : > { %10968 = vmatmul.msk.bf16.vlgmr.msrb.gmra.mxu2 %vm754_vm3, %v11791_v6  ;;  %v1901_v29 = vor.u32 %v1900_v22, %v1896_v7  ;;  %v1922_v62 = vshrl.u32 %v10767_v59, 16  ;;  %v2529_v4 = vrot.slane %v10767_v59, 5 }
  0xe9   : > { %v1902_v41 = vrot.slane %v1901_v29, 4  ;;  %v1924_v19 = vrot.slane %v1922_v62, 4  ;;  %v2531_v29 = vrot.slane %v2529_v4, 4 }
  0xea   : > { %v1409_v32 = vpop.f32.mrf.mxu2  ;;  %v836_v39 = vpop.f32.mrf.mxu0 }
  0xeb   : > { %v1057_v40 = vadd.f32 %v1056_v2, %v836_v39  ;;  %v1887_v2 = vrot.slane %v1885_v57, 4  ;;  %v11776_v57 = vld [vmem:[%s12226_s20 + $0x18] sm:$0xff] }
  0xec   : > { %v12627_v42 = vpop.f32.mrf.mxu3 }
  0xed   : > { %v12630_v51 = vadd.f32 %v1409_v32, %v1057_v40  ;;  %10806 = vmatmul.msk.bf16.vlgmr.msrb.gmra.mxu0 %vm754_vm3, %v2254_v26  ;;  %v1061_v61 = vpop.f32.mrf.mxu1  ;;  %v1891_v26 = vor.u32 %v1890_v27, %v1887_v2  ;;  %v1904_v32 = vshll.u32 %v10765_v28, 16  ;;  %v11793_v2 = vld [vmem:[%s12226_s20 + $0x30] sm:$0xff] }
  0xef   : > { %v1892_v40 = vrot.slane %v1891_v26, 4  ;;  %v1906_v45 = vrot.slane %v1904_v32, 5  ;;  %v2532_v32 = vrot.slane %v10768_v14, 5 }
  0xf0   : > { %10856 = vmatmul.msk.bf16.gmra.mxu1 %vm754_vm3, %v2653_v11  ;;  %v1909_v11 = vshrl.u32 %v10766_v53, 16 }
  0xf1   : > { %10741 = vmatmul.msk.bf16.vlgmr.msrb.gmra.mxu3 %vm754_vm3, %v11775_v52  ;;  %v1897_v3 = vsel %vm12265_vm7, %v1892_v40, %v1896_v7  ;;  %v1907_v60 = vsel %vm12265_vm7, %v1902_v41, %v1906_v45  ;;  %v10769_v45 = vld [vmem:[%s12226_s20 + $0x3c] sm:$0xf] }
  0xf2   : > { %v1411_v1 = vpop.f32.mrf.mxu2  ;;  %v838_v12 = vpop.f32.mrf.mxu0  ;;  %v2226_v27 = vunpack.c.l.b16 %v1897_v3  ;;  %v2227_v7 = vunpack.c.l.b16 %v1907_v60  ;;  %v1911_v22 = vrot.slane %v1909_v11, 4  ;;  %v11777_v60 = vld [vmem:[%s12226_s20 + $0x24] sm:$0xff] }
  0xf3   : > { %v1059_v6 = vadd.f32 %v1058_v31, %v838_v12 }
  0xf4   : > { %v1096_v10 = vpop.f32.mrf.mxu3 }
  0xf5   : > { %v12644_v17 = vadd.f32 %v1096_v10, %v12513_v30  ;;  %v12646_v24 = vadd.f32 %v1411_v1, %v1059_v6  ;;  %v1063_v36 = vpop.f32.mrf.mxu1  ;;  %v2526_v30 = vsel %vm12237_vm6, %v2524_v23, %v2525_v25  ;;  %v10841_v23 = vrot.slane %v10825_v9, 9 }
  0xf6   : > { %v2625_v52 = vunpack.c.l.b16 %v2526_v30 }
  0xf7   : > { %10969 = vmatmul.msk.bf16.gmra.mxu2 %vm754_vm3, %v11792_v0 }
  0xf8   : > { %v2654_v1 = vpack.c.b16 %v2625_v52, %v2624_v47 }
  0xfa   : > { %v1414_v31 = vpop.f32.mrf.mxu2  ;;  %v841_v38 = vpop.f32.mrf.mxu0 }
  0xfb   : > { %v1062_v39 = vadd.f32 %v1061_v61, %v841_v38  ;;  %v1912_v61 = vshll.u32 %v10766_v53, 16 }
  0xfc   : > { %v1098_v46 = vpop.f32.mrf.mxu3 }
  0xfd   : > { %v12655_v55 = vadd.f32 %v1098_v46, %v12529_v44  ;;  %v12657_v56 = vadd.f32 %v1414_v31, %v1062_v39  ;;  %10807 = vmatmul.msk.bf16.gmra.mxu0 %vm754_vm3, %v2255_v35  ;;  %v1918_v44 = vshll.u32 %v10767_v59, 16  ;;  %v1066_v12 = vpop.f32.mrf.mxu1  ;;  %v1914_v15 = vrot.slane %v1912_v61, 5 }
  0xfe   : > { %v2256_v31 = vpack.c.b16 %v2227_v7, %v2226_v27  ;;  %v1928_v35 = vshll.u32 %v10768_v14, 16  ;;  %v2530_v39 = vsel %vm12237_vm6, %v10841_v23, %v2529_v4  ;;  %v1933_v61 = vshrl.u32 %v10769_v45, 16  ;;  %v11794_v27 = vld [vmem:[%s12226_s20 + $0x3c] sm:$0xff] }
  0xff   : > { %v1920_v28 = vrot.slane %v1918_v44, 5  ;;  %v1915_v30 = vor.u32 %v1914_v15, %v1911_v22  ;;  %v2626_v52 = vunpack.c.l.b16 %v2530_v39  ;;  %v1936_v44 = vshll.u32 %v10769_v45, 16 }
 0x100   : > { %10857 = vmatmul.msk.bf16.gmra.mxu1 %vm754_vm3, %v2654_v1  ;;  %v1930_v47 = vrot.slane %v1928_v35, 5  ;;  %v1935_v7 = vrot.slane %v1933_v61, 4 }
 0x101   : > { %10742 = vmatmul.msk.bf16.gmra.mxu3 %vm754_vm3, %v11776_v57  ;;  %v1925_v38 = vor.u32 %v1924_v19, %v1920_v28  ;;  %v10770_v57 = vld [vmem:[%s12226_s20 + $0x40] sm:$0xf]  ;;  %v1916_v11 = vrot.slane %v1915_v30, 4  ;;  %v10826_v19 = vld [vmem:[%s12226_s20 + $0x3c] sm:$0xe] }
 0x102   : > { %v1416_v63 = vpop.f32.mrf.mxu2  ;;  %v843_v0 = vpop.f32.mrf.mxu0  ;;  %v1942_v62 = vshll.u32 %v10770_v57, 16  ;;  %v2536_v22 = vrot.slane %v10770_v57, 5  ;;  %v10842_v35 = vrot.slane %v10826_v19, 9 }
 0x103   : > { %v1064_v6 = vadd.f32 %v1063_v36, %v843_v0  ;;  %v1926_v1 = vrot.slane %v1925_v38, 4 }
 0x104   : > { %v1101_v10 = vpop.f32.mrf.mxu3  ;;  %v1944_v14 = vrot.slane %v1942_v62, 5  ;;  %v2538_v30 = vrot.slane %v2536_v22, 4 }
 0x105   : > { %v12672_v25 = vadd.f32 %v1101_v10, %v12547_v8  ;;  %v12674_v26 = vadd.f32 %v1416_v63, %v1064_v6  ;;  %v1068_v37 = vpop.f32.mrf.mxu1  ;;  %v2533_v8 = vsel %vm12237_vm6, %v2531_v29, %v2532_v32  ;;  %v1946_v63 = vshrl.u32 %v10770_v57, 16 }
 0x106   : > { %v2627_v53 = vunpack.c.l.b16 %v2533_v8  ;;  %v1931_v4 = vsel %vm12265_vm7, %v1926_v1, %v1930_v47  ;;  %v1938_v10 = vrot.slane %v1936_v44, 5  ;;  %v10772_v44 = vld [vmem:[%s12226_s20 + $0x48] sm:$0xf] }
 0x107   : > { %10970 = vmatmul.msk.bf16.gmra.mxu2 %vm754_vm3, %v11793_v2  ;;  %v1948_v15 = vrot.slane %v1946_v63, 4  ;;  %v2229_v32 = vunpack.c.l.b16 %v1931_v4  ;;  %v1957_v4 = vshrl.u32 %v10772_v44, 16 }
 0x109   : > { %v1949_v39 = vor.u32 %v1948_v15, %v1944_v14  ;;  %v11795_v15 = vld [vmem:[%s12226_s20 + $0x48] sm:$0xff] }
 0x10a   : > { %v1419_v36 = vpop.f32.mrf.mxu2  ;;  %v846_v40 = vpop.f32.mrf.mxu0 }
 0x10b   : > { %v1067_v41 = vadd.f32 %v1066_v12, %v846_v40  ;;  %v2655_v12 = vpack.c.b16 %v2627_v53, %v2626_v52  ;;  %v1950_v57 = vrot.slane %v1949_v39, 4 }
 0x10c   : > { %v1103_v46 = vpop.f32.mrf.mxu3 }
 0x10d   : > { %v12684_v59 = vadd.f32 %v1103_v46, %v12562_v43  ;;  %v12686_v3 = vadd.f32 %v1419_v36, %v1067_v41  ;;  %10808 = vmatmul.msk.bf16.gmra.mxu0 %vm754_vm3, %v2256_v31  ;;  %v1071_v2 = vpop.f32.mrf.mxu1  ;;  %v1921_v43 = vsel %vm12265_vm7, %v1916_v11, %v1920_v28  ;;  %v10771_v31 = vld [vmem:[%s12226_s20 + $0x44] sm:$0x1]  ;;  %v2537_v46 = vsel %vm12237_vm6, %v10842_v35, %v2536_v22 }
 0x10e   : > { %v2228_v29 = vunpack.c.l.b16 %v1921_v43  ;;  %v2539_v38 = vrot.slane %v10771_v31, 5  ;;  %v1952_v8 = vshll.u32 %v10771_v31, 16  ;;  %v2628_v1 = vunpack.c.l.b16 %v2537_v46  ;;  %v10827_v31 = vld [vmem:[%s12226_s20 + $0x48] sm:$0xe] }
 0x110   : > { %10858 = vmatmul.msk.bf16.gmra.mxu1 %vm754_vm3, %v2655_v12  ;;  %v2257_v41 = vpack.c.b16 %v2229_v32, %v2228_v29  ;;  %v11778_v12 = vld [vmem:[%s12226_s20 + $0x30] sm:$0xff]  ;;  %v1959_v32 = vrot.slane %v1957_v4, 4  ;;  %v10776_v4 = vld [vmem:[%s12226_s20 + $0x58] sm:$0xf] }
 0x111   : > { %10743 = vmatmul.msk.bf16.gmra.mxu3 %vm754_vm3, %v11777_v60  ;;  %v1954_v60 = vrot.slane %v1952_v8, 5  ;;  %v10843_v8 = vrot.slane %v10827_v31, 9 }
 0x112   : > { %v1421_v0 = vpop.f32.mrf.mxu2  ;;  %v848_v6 = vpop.f32.mrf.mxu0 }
 0x113   : > { %v1069_v9 = vadd.f32 %v1068_v37, %v848_v6  ;;  %v1939_v37 = vor.u32 %v1938_v10, %v1935_v7  ;;  %v1955_v43 = vsel %vm12265_vm7, %v1950_v57, %v1954_v60 }
 0x114   : > { %v1106_v23 = vpop.f32.mrf.mxu3 }
 0x115   : > { %v12700_v28 = vadd.f32 %v1106_v23, %v12582_v16  ;;  %v12702_v36 = vadd.f32 %v1421_v0, %v1069_v9  ;;  %v1073_v45 = vpop.f32.mrf.mxu1  ;;  %v2540_v16 = vsel %vm12237_vm6, %v2538_v30, %v2539_v38  ;;  %v1940_v53 = vrot.slane %v1939_v37, 4  ;;  %v10773_v0 = vld [vmem:[%s12226_s20 + $0x4c] sm:$0xf]  ;;  %v10774_v30 = vld [vmem:[%s12226_s20 + $0x50] sm:$0x1] }
 0x116   : > { %v2629_v61 = vunpack.c.l.b16 %v2540_v16  ;;  %v1970_v7 = vshrl.u32 %v10773_v0, 16  ;;  %v2543_v19 = vrot.slane %v10773_v0, 5 }
 0x117   : > { %10971 = vmatmul.msk.bf16.gmra.mxu2 %vm754_vm3, %v11794_v27  ;;  %v1960_v27 = vshll.u32 %v10772_v44, 16  ;;  %v10775_v44 = vld [vmem:[%s12226_s20 + $0x54] sm:$0xf] }
 0x118   : > { %v2656_v6 = vpack.c.b16 %v2629_v61, %v2628_v1  ;;  %v1972_v39 = vrot.slane %v1970_v7, 4  ;;  %v2545_v46 = vrot.slane %v2543_v19, 4 }
 0x119   : > { %v1962_v38 = vrot.slane %v1960_v27, 5 }
 0x11a   : > { %v1424_v40 = vpop.f32.mrf.mxu2  ;;  %v851_v47 = vpop.f32.mrf.mxu0 }
 0x11b   : > { %v1072_v52 = vadd.f32 %v1071_v2, %v851_v47  ;;  %v1945_v2 = vsel %vm12265_vm7, %v1940_v53, %v1944_v14  ;;  %v2231_v14 = vunpack.c.l.b16 %v1955_v43  ;;  %v1976_v47 = vshll.u32 %v10774_v30, 16 }
 0x11c   : > { %v1108_v11 = vpop.f32.mrf.mxu3  ;;  %v2230_v29 = vunpack.c.l.b16 %v1945_v2  ;;  %v1963_v57 = vor.u32 %v1962_v38, %v1959_v32  ;;  %v2550_v38 = vrot.slane %v10776_v4, 5 }
 0x11d   : > { %v12711_v62 = vadd.f32 %v1108_v11, %v12601_v54  ;;  %v12713_v63 = vadd.f32 %v1424_v40, %v1072_v52  ;;  %10809 = vmatmul.msk.bf16.gmra.mxu0 %vm754_vm3, %v2257_v41  ;;  %v1966_v54 = vshll.u32 %v10773_v0, 16  ;;  %v1076_v9 = vpop.f32.mrf.mxu1  ;;  %v2544_v11 = vsel %vm12237_vm6, %v10843_v8, %v2543_v19 }
 0x11e   : > { %v2258_v16 = vpack.c.b16 %v2231_v14, %v2230_v29  ;;  %v1978_v0 = vrot.slane %v1976_v47, 5  ;;  %v2630_v2 = vunpack.c.l.b16 %v2544_v11  ;;  %v1964_v7 = vrot.slane %v1963_v57, 4 }
 0x11f   : > { %v1968_v37 = vrot.slane %v1966_v54, 5  ;;  %v11779_v54 = vld [vmem:[%s12226_s20 + $0x3c] sm:$0xff]  ;;  %v1994_v19 = vshrl.u32 %v10776_v4, 16 }
 0x120   : > { %10859 = vmatmul.msk.bf16.gmra.mxu1 %vm754_vm3, %v2656_v6 }
 0x121   : > { %10744 = vmatmul.msk.bf16.gmra.mxu3 %vm754_vm3, %v11778_v12  ;;  %v1973_v60 = vor.u32 %v1972_v39, %v1968_v37 }
 0x122   : > { %v1426_v22 = vpop.f32.mrf.mxu2  ;;  %v853_v10 = vpop.f32.mrf.mxu0 }
 0x123   : > { %v1074_v23 = vadd.f32 %v1073_v45, %v853_v10  ;;  %v2546_v45 = vrot.slane %v10774_v30, 5  ;;  %v1981_v10 = vshrl.u32 %v10775_v44, 16 }
 0x124   : > { %v1111_v35 = vpop.f32.mrf.mxu3 }
 0x125   : > { %v12728_v40 = vadd.f32 %v1111_v35, %v12615_v13  ;;  %v12730_v41 = vadd.f32 %v1426_v22, %v1074_v23  ;;  %v1078_v53 = vpop.f32.mrf.mxu1  ;;  %v2547_v13 = vsel %vm12237_vm6, %v2545_v46, %v2546_v45  ;;  %v1974_v22 = vrot.slane %v1973_v60, 4  ;;  %v11796_v35 = vld [vmem:[%s12226_s20 + $0x54] sm:$0xff]  ;;  %v10777_v60 = vld [vmem:[%s12226_s20 + $0x5c] sm:$0x1] }
 0x126   : > { %v2631_v43 = vunpack.c.l.b16 %v2547_v13  ;;  %v1983_v30 = vrot.slane %v1981_v10, 4  ;;  %v1996_v45 = vrot.slane %v1994_v19, 4 }
 0x127   : > { %10972 = vmatmul.msk.bf16.gmra.mxu2 %vm754_vm3, %v11795_v15  ;;  %v1984_v15 = vshll.u32 %v10775_v44, 16  ;;  %v1979_v32 = vsel %vm12265_vm7, %v1974_v22, %v1978_v0 }
 0x128   : > { %v2657_v23 = vpack.c.b16 %v2631_v43, %v2630_v2  ;;  %v2233_v57 = vunpack.c.l.b16 %v1979_v32 }
 0x129   : > { %v1986_v8 = vrot.slane %v1984_v15, 5 }
 0x12a   : > { %v1429_v52 = vpop.f32.mrf.mxu2  ;;  %v856_v1 = vpop.f32.mrf.mxu0 }
 0x12b   : > { %v1077_v61 = vadd.f32 %v1076_v9, %v856_v1  ;;  %v1990_v9 = vshll.u32 %v10776_v4, 16  ;;  %v2552_v1 = vrot.slane %v2550_v38, 4 }
 0x12c   : > { %v1113_v12 = vpop.f32.mrf.mxu3 }
 0x12d   : > { %v12740_v6 = vadd.f32 %v1113_v12, %v12627_v42  ;;  %v12742_v27 = vadd.f32 %v1429_v52, %v1077_v61  ;;  %10810 = vmatmul.msk.bf16.gmra.mxu0 %vm754_vm3, %v2258_v16  ;;  %v1081_v14 = vpop.f32.mrf.mxu1  ;;  %v1969_v42 = vsel %vm12265_vm7, %v1964_v7, %v1968_v37  ;;  %v1992_v46 = vrot.slane %v1990_v9, 5  ;;  %v10828_v16 = vld [vmem:[%s12226_s20 + $0x54] sm:$0xe] }
 0x12e   : > { %v2232_v52 = vunpack.c.l.b16 %v1969_v42  ;;  %v10844_v11 = vrot.slane %v10828_v16, 9  ;;  %v2553_v61 = vrot.slane %v10777_v60, 5  ;;  %v2000_v12 = vshll.u32 %v10777_v60, 16 }
 0x12f   : > { %v1997_v44 = vor.u32 %v1996_v45, %v1992_v46 }
 0x130   : > { %10860 = vmatmul.msk.bf16.gmra.mxu1 %vm754_vm3, %v2657_v23  ;;  %v2259_v2 = vpack.c.b16 %v2233_v57, %v2232_v52  ;;  %v2551_v4 = vsel %vm12237_vm6, %v10844_v11, %v2550_v38  ;;  %v2002_v15 = vrot.slane %v2000_v12, 5  ;;  %v11797_v57 = vld [vmem:[%s12226_s20 + $0x60] sm:$0xff]  ;;  %v10780_v12 = vld [vmem:[%s12226_s20 + $0x68] sm:$0x1] }
 0x131   : > { %10745 = vmatmul.msk.bf16.gmra.mxu3 %vm754_vm3, %v11779_v54  ;;  %v1998_v10 = vrot.slane %v1997_v44, 4  ;;  %v2632_v19 = vunpack.c.l.b16 %v2551_v4 }
 0x132   : > { %v1431_v29 = vpop.f32.mrf.mxu2  ;;  %v858_v31 = vpop.f32.mrf.mxu0 }
 0x133   : > { %v1079_v39 = vadd.f32 %v1078_v53, %v858_v31  ;;  %v1987_v53 = vor.u32 %v1986_v8, %v1983_v30  ;;  %v11780_v31 = vld [vmem:[%s12226_s20 + $0x48] sm:$0xff]  ;;  %v2003_v30 = vsel %vm12265_vm7, %v1998_v10, %v2002_v15  ;;  %v2024_v15 = vshll.u32 %v10780_v12, 16 }
 0x134   : > { %v1449_v47 = vpop.f32.mrf.mxu3 }
 0x135   : > { %v12756_v37 = vadd.f32 %v1449_v47, %v12644_v17  ;;  %v12758_v13 = vadd.f32 %v1431_v29, %v1079_v39  ;;  %v1083_v43 = vpop.f32.mrf.mxu1  ;;  %v2554_v17 = vsel %vm12237_vm6, %v2552_v1, %v2553_v61  ;;  %v1988_v22 = vrot.slane %v1987_v53, 4  ;;  %v10778_v29 = vld [vmem:[%s12226_s20 + $0x60] sm:$0xf] }
 0x136   : > { %v2633_v23 = vunpack.c.l.b16 %v2554_v17  ;;  %v2005_v38 = vshrl.u32 %v10778_v29, 16  ;;  %v2008_v8 = vshll.u32 %v10778_v29, 16  ;;  %v10829_v53 = vld [vmem:[%s12226_s20 + $0x60] sm:$0xe] }
 0x137   : > { %10973 = vmatmul.msk.bf16.gmra.mxu2 %vm754_vm3, %v11796_v35  ;;  %v10779_v35 = vld [vmem:[%s12226_s20 + $0x64] sm:$0xf]  ;;  %v10845_v17 = vrot.slane %v10829_v53, 9 }
 0x138   : > { %v2658_v39 = vpack.c.b16 %v2633_v23, %v2632_v19  ;;  %v2018_v45 = vshrl.u32 %v10779_v35, 16  ;;  %v2557_v60 = vrot.slane %v10779_v35, 5  ;;  %v2007_v61 = vrot.slane %v2005_v38, 4 }
 0x13a   : > { %v1434_v0 = vpop.f32.mrf.mxu2  ;;  %v861_v54 = vpop.f32.mrf.mxu0  ;;  %v2020_v4 = vrot.slane %v2018_v45, 4  ;;  %v10782_v45 = vld [vmem:[%s12226_s20 + $0x70] sm:$0xf] }
 0x13b   : > { %v1082_v7 = vadd.f32 %v1081_v14, %v861_v54  ;;  %v1993_v14 = vsel %vm12265_vm7, %v1988_v22, %v1992_v46  ;;  %v2235_v46 = vunpack.c.l.b16 %v2003_v30  ;;  %v2559_v22 = vrot.slane %v2557_v60, 4  ;;  %v10781_v30 = vld [vmem:[%s12226_s20 + $0x6c] sm:$0xf] }
 0x13c   : > { %v1451_v9 = vpop.f32.mrf.mxu3  ;;  %v2234_v1 = vunpack.c.l.b16 %v1993_v14 }
 0x13d   : > { %v12767_v42 = vadd.f32 %v1451_v9, %v12655_v55  ;;  %v12769_v32 = vadd.f32 %v1434_v0, %v1082_v7  ;;  %10811 = vmatmul.msk.bf16.gmra.mxu0 %vm754_vm3, %v2259_v2  ;;  %v2014_v55 = vshll.u32 %v10779_v35, 16  ;;  %v1086_v47 = vpop.f32.mrf.mxu1  ;;  %v2010_v0 = vrot.slane %v2008_v8, 5 }
 0x13e   : > { %v2260_v10 = vpack.c.b16 %v2235_v46, %v2234_v1  ;;  %v2029_v1 = vshrl.u32 %v10781_v30, 16  ;;  %v2032_v46 = vshll.u32 %v10781_v30, 16 }
 0x13f   : > { %v2016_v2 = vrot.slane %v2014_v55, 5  ;;  %v2011_v23 = vor.u32 %v2010_v0, %v2007_v61  ;;  %v2042_v61 = vshrl.u32 %v10782_v45, 16 }
 0x140   : > { %10861 = vmatmul.msk.bf16.gmra.mxu1 %vm754_vm3, %v2658_v39  ;;  %v2026_v39 = vrot.slane %v2024_v15, 5  ;;  %v2034_v15 = vrot.slane %v2032_v46, 5 }
 0x141   : > { %10746 = vmatmul.msk.bf16.gmra.mxu3 %vm754_vm3, %v11780_v31  ;;  %v2021_v29 = vor.u32 %v2020_v4, %v2016_v2  ;;  %v2558_v31 = vsel %vm12237_vm6, %v10845_v17, %v2557_v60  ;;  %v2012_v60 = vrot.slane %v2011_v23, 4  ;;  %v11798_v17 = vld [vmem:[%s12226_s20 + $0x6c] sm:$0xff]  ;;  %v2044_v23 = vrot.slane %v2042_v61, 4 }
 0x142   : > { %v1436_v16 = vpop.f32.mrf.mxu2  ;;  %v863_v52 = vpop.f32.mrf.mxu0  ;;  %v2634_v8 = vunpack.c.l.b16 %v2558_v31 }
 0x143   : > { %v1084_v11 = vadd.f32 %v1083_v43, %v863_v52  ;;  %v2560_v43 = vrot.slane %v10780_v12, 5 }
 0x144   : > { %v1454_v44 = vpop.f32.mrf.mxu3 }
 0x145   : > { %v12784_v54 = vadd.f32 %v1454_v44, %v12672_v25  ;;  %v12786_v7 = vadd.f32 %v1436_v16, %v1084_v11  ;;  %v1088_v19 = vpop.f32.mrf.mxu1  ;;  %v2561_v25 = vsel %vm12237_vm6, %v2559_v22, %v2560_v43  ;;  %v2022_v11 = vrot.slane %v2021_v29, 4  ;;  %v10830_v29 = vld [vmem:[%s12226_s20 + $0x6c] sm:$0xe] }
 0x146   : > { %v2635_v55 = vunpack.c.l.b16 %v2561_v25  ;;  %v2031_v22 = vrot.slane %v2029_v1, 4  ;;  %v2564_v43 = vrot.slane %v10782_v45, 5  ;;  %v10846_v30 = vrot.slane %v10830_v29, 9 }
 0x147   : > { %10974 = vmatmul.msk.bf16.gmra.mxu2 %vm754_vm3, %v11797_v57  ;;  %v11781_v57 = vld [vmem:[%s12226_s20 + $0x54] sm:$0xff]  ;;  %v2027_v0 = vsel %vm12265_vm7, %v2022_v11, %v2026_v39 }
 0x148   : > { %v2659_v53 = vpack.c.b16 %v2635_v55, %v2634_v8  ;;  %v2566_v39 = vrot.slane %v2564_v43, 4  ;;  %v2565_v1 = vsel %vm12237_vm6, %v10846_v30, %v2564_v43  ;;  %v10785_v43 = vld [vmem:[%s12226_s20 + $0x7c] sm:$0xf] }
 0x14a   : > { %v1439_v9 = vpop.f32.mrf.mxu2  ;;  %v866_v35 = vpop.f32.mrf.mxu0 }
 0x14b   : > { %v1087_v14 = vadd.f32 %v1086_v47, %v866_v35  ;;  %v2038_v47 = vshll.u32 %v10782_v45, 16  ;;  %v2237_v35 = vunpack.c.l.b16 %v2027_v0  ;;  %v2636_v0 = vunpack.c.l.b16 %v2565_v1 }
 0x14c   : > { %v1456_v38 = vpop.f32.mrf.mxu3 }
 0x14d   : > { %v12796_v16 = vadd.f32 %v1456_v38, %v12684_v59  ;;  %v12798_v52 = vadd.f32 %v1439_v9, %v1087_v14  ;;  %10812 = vmatmul.msk.bf16.gmra.mxu0 %vm754_vm3, %v2260_v10  ;;  %v1091_v12 = vpop.f32.mrf.mxu1  ;;  %v2017_v59 = vsel %vm12265_vm7, %v2012_v60, %v2016_v2  ;;  %v2040_v9 = vrot.slane %v2038_v47, 5  ;;  %v10783_v14 = vld [vmem:[%s12226_s20 + $0x74] sm:$0x1] }
 0x14e   : > { %v2236_v25 = vunpack.c.l.b16 %v2017_v59  ;;  %v2567_v8 = vrot.slane %v10783_v14, 5  ;;  %v2048_v45 = vshll.u32 %v10783_v14, 16 }
 0x14f   : > { %v2045_v55 = vor.u32 %v2044_v23, %v2040_v9 }
 0x150   : > { %10862 = vmatmul.msk.bf16.gmra.mxu1 %vm754_vm3, %v2659_v53  ;;  %v2261_v60 = vpack.c.b16 %v2237_v35, %v2236_v25  ;;  %v2066_v35 = vshrl.u32 %v10785_v43, 16 }
 0x151   : > { %10747 = vmatmul.msk.bf16.gmra.mxu3 %vm754_vm3, %v11781_v57  ;;  %v2046_v53 = vrot.slane %v2045_v55, 4 }
 0x152   : > { %v1441_v44 = vpop.f32.mrf.mxu2  ;;  %v868_v4 = vpop.f32.mrf.mxu0 }
 0x153   : > { %v1089_v10 = vadd.f32 %v1088_v19, %v868_v4  ;;  %v2035_v19 = vor.u32 %v2034_v15, %v2031_v22  ;;  %v11782_v15 = vld [vmem:[%s12226_s20 + $0x60] sm:$0xff] }
 0x154   : > { %v1459_v31 = vpop.f32.mrf.mxu3 }
 0x155   : > { %v12812_v2 = vadd.f32 %v1459_v31, %v12700_v28  ;;  %v12814_v38 = vadd.f32 %v1441_v44, %v1089_v10  ;;  %v1093_v11 = vpop.f32.mrf.mxu1  ;;  %v2568_v28 = vsel %vm12237_vm6, %v2566_v39, %v2567_v8  ;;  %v2036_v61 = vrot.slane %v2035_v19, 4  ;;  %v11799_v8 = vld [vmem:[%s12226_s20 + $0x78] sm:$0xff] }
 0x156   : > { %v2050_v44 = vrot.slane %v2048_v45, 5  ;;  %v2637_v4 = vunpack.c.l.b16 %v2568_v28  ;;  %v2571_v19 = vrot.slane %v10785_v43, 5  ;;  %v10786_v28 = vld [vmem:[%s12226_s20 + $0x80] sm:$0x1] }
 0x157   : > { %10975 = vmatmul.msk.bf16.gmra.mxu2 %vm754_vm3, %v11798_v17  ;;  %v10784_v17 = vld [vmem:[%s12226_s20 + $0x78] sm:$0xf] }
 0x158   : > { %v2051_v23 = vsel %vm12265_vm7, %v2046_v53, %v2050_v44  ;;  %v2053_v29 = vshrl.u32 %v10784_v17, 16  ;;  %v2660_v31 = vpack.c.b16 %v2637_v4, %v2636_v0  ;;  %v2056_v25 = vshll.u32 %v10784_v17, 16 }
 0x159   : > { %v2239_v45 = vunpack.c.l.b16 %v2051_v23  ;;  %v2573_v0 = vrot.slane %v2571_v19, 4  ;;  %v2574_v4 = vrot.slane %v10786_v28, 5 }
 0x15a   : > { %v1444_v57 = vpop.f32.mrf.mxu2  ;;  %v871_v46 = vpop.f32.mrf.mxu0 }
 0x15b   : > { %v1092_v47 = vadd.f32 %v1091_v12, %v871_v46  ;;  %v2041_v12 = vsel %vm12265_vm7, %v2036_v61, %v2040_v9  ;;  %v2058_v46 = vrot.slane %v2056_v25, 5  ;;  %v2068_v61 = vrot.slane %v2066_v35, 4 }
 0x15c   : > { %v1461_v59 = vpop.f32.mrf.mxu3  ;;  %v2238_v9 = vunpack.c.l.b16 %v2041_v12 }
 0x15d   : > { %v12823_v22 = vadd.f32 %v1461_v59, %v12711_v62  ;;  %v12825_v10 = vadd.f32 %v1444_v57, %v1092_v47  ;;  %10813 = vmatmul.msk.bf16.gmra.mxu0 %vm754_vm3, %v2261_v60  ;;  %v2062_v62 = vshll.u32 %v10785_v43, 16  ;;  %v12835_v30 = vpop.f32.mrf.mxu1  ;;  %v2055_v57 = vrot.slane %v2053_v29, 4  ;;  %v10831_v60 = vld [vmem:[%s12226_s20 + $0x78] sm:$0xe] }
 0x15e   : > { %v10847_v53 = vrot.slane %v10831_v60, 9  ;;  %v2072_v43 = vshll.u32 %v10786_v28, 16  ;;  %v11783_v60 = vld [vmem:[%s12226_s20 + $0x6c] sm:$0xff] }
 0x15f   : > { %v2064_v47 = vrot.slane %v2062_v62, 5  ;;  %v2059_v23 = vor.u32 %v2058_v46, %v2055_v57  ;;  %v2575_v62 = vsel %vm12237_vm6, %v2573_v0, %v2574_v4 }
 0x160   : > { %10863 = vmatmul.msk.bf16.gmra.mxu1 %vm754_vm3, %v2660_v31  ;;  %v11830_v31 = vld [vmem:[#allocation3 + $0x38] sm:$0xff]  ;;  %v2572_v25 = vsel %vm12237_vm6, %v10847_v53, %v2571_v19  ;;  %v2074_v19 = vrot.slane %v2072_v43, 5  ;;  %v11800_v43 = vld [vmem:[%s12226_s20 + $0x84] sm:$0xff] }
 0x161   : > { %10748 = vmatmul.msk.bf16.gmra.mxu3 %vm754_vm3, %v11782_v15  ;;  %v2262_v15 = vpack.c.b16 %v2239_v45, %v2238_v9  ;;  %v2069_v29 = vor.u32 %v2068_v61, %v2064_v47  ;;  %5449 = vmatpush.bf16.msra.mxu1 %v11830_v31  ;;  %v10788_v9 = vld [vmem:[%s12226_s20 + $0x88] sm:$0xf]  ;;  %v2060_v57 = vrot.slane %v2059_v23, 4 }
 0x162   : > { %v1446_v14 = vpop.f32.mrf.mxu2  ;;  %v873_v39 = vpop.f32.mrf.mxu0  ;;  %v2086_v61 = vshll.u32 %v10788_v9, 16  ;;  %v2090_v53 = vshrl.u32 %v10788_v9, 16  ;;  %v2578_v23 = vrot.slane %v10788_v9, 5 }
 0x163   : > { %v1094_v55 = vadd.f32 %v1093_v11, %v873_v39  ;;  %v5256_v11 = vld [vmem:[%s16234_s4] sm:$0x3]  ;;  %v2638_v39 = vunpack.c.l.b16 %v2572_v25 }
 0x164   : > { %v1464_v1 = vpop.f32.mrf.mxu3  ;;  %v5635_v17 = vsel %vm803_vm0, %v5256_v11, 0  ;;  %v2088_v25 = vrot.slane %v2086_v61, 5  ;;  %vm13840_vm0 = vmor %vm4256_vm9, %vm4388_vm14  ;;  %vm10349_vm9 = vcmask 1047559  }
 0x165   : > { %v12842_v44 = vadd.f32 %v1464_v1, %v12728_v40  ;;  %v12844_v59 = vadd.f32 %v1446_v14, %v1094_v55  ;;  %5644 = vmatpush.bf16.msra.mxu2 %v5635_v17  ;;  %v12851_v12 = vpop.f32.mrf.mxu1  ;;  %v10787_v55 = vld [vmem:[%s12226_s20 + $0x84] sm:$0xf]  ;;  %v2070_v1 = vrot.slane %v2069_v29, 4 }
 0x166   : > { %v2077_v28 = vshrl.u32 %v10787_v55, 16  ;;  %v2080_v46 = vshll.u32 %v10787_v55, 16 }
 0x167   : > { %10976 = vmatmul.msk.bf16.gmra.mxu2 %vm754_vm3, %v11799_v8  ;;  %v2639_v8 = vunpack.c.l.b16 %v2575_v62  ;;  %v2075_v4 = vsel %vm12265_vm7, %v2070_v1, %v2074_v19  ;;  %v2092_v62 = vrot.slane %v2090_v53, 4  ;;  %v2580_v1 = vrot.slane %v2578_v23, 4 }
 0x168   : > { %v2079_v29 = vrot.slane %v2077_v28, 4  ;;  %v2082_v31 = vrot.slane %v2080_v46, 5  ;;  %v2241_v55 = vunpack.c.l.b16 %v2075_v4 }
 0x169   : > { %v2661_v11 = vpack.c.b16 %v2639_v8, %v2638_v39  ;;  %v2093_v28 = vor.u32 %v2092_v62, %v2088_v25 }
 0x16a   : > { %v3015_v40 = vpop.f32.mrf.mxu2  ;;  %v2330_v35 = vpop.f32.mrf.mxu0  ;;  %v2083_v9 = vor.u32 %v2082_v31, %v2079_v29 }
 0x16b   : > { %v2094_v29 = vrot.slane %v2093_v28, 4 }
 0x16c   : > { %v1466_v14 = vpop.f32.mrf.mxu3 }
 0x16d   : > { %v12860_v45 = vadd.f32 %v1466_v14, %v12740_v6  ;;  %10814 = vmatmul.msk.bf16.gmra.mxu0 %vm754_vm3, %v2262_v15  ;;  %v2065_v6 = vsel %vm12265_vm7, %v2060_v57, %v2064_v47  ;;  %v12871_v17 = vpop.f32.mrf.mxu1  ;;  %v10832_v14 = vld [vmem:[%s12226_s20 + $0x84] sm:$0xe] }
 0x16e   : > { %v2240_v8 = vunpack.c.l.b16 %v2065_v6  ;;  %v10848_v57 = vrot.slane %v10832_v14, 9 }
 0x16f   : > { %16260 = vst [vmem:[#allocation9_spill] sm:$0xff] %v12860_v45 }
 0x170   : > { %10864 = vmatmul.msk.bf16.gmra.mxu1 %vm754_vm3, %v2661_v11  ;;  %v2263_v6 = vpack.c.b16 %v2241_v55, %v2240_v8  ;;  %v11784_v55 = vld [vmem:[%s12226_s20 + $0x78] sm:$0xff] }
 0x171   : > { %10749 = vmatmul.msk.bf16.gmra.mxu3 %vm754_vm3, %v11783_v60  ;;  %v10789_v60 = vld [vmem:[%s12226_s20 + $0x8c] sm:$0x1] }
 0x172   : > { %v12865_v0 = vpop.f32.mrf.mxu2  ;;  %v2332_v15 = vpop.f32.mrf.mxu0  ;;  %v2581_v19 = vrot.slane %v10789_v60, 5  ;;  %v2096_v46 = vshll.u32 %v10789_v60, 16 }
 0x174   : > { %v1676_v39 = vpop.f32.mrf.mxu3  ;;  %v2582_v4 = vsel %vm12237_vm6, %v2580_v1, %v2581_v19  ;;  %v2098_v31 = vrot.slane %v2096_v46, 5 }
 0x175   : > { %v1756_v47 = vadd.f32 %v1676_v39, %v12498_v49  ;;  %v12882_v11 = vpop.f32.mrf.mxu1  ;;  %v2579_v49 = vsel %vm12237_vm6, %v10848_v57, %v2578_v23  ;;  %v2641_v14 = vunpack.c.l.b16 %v2582_v4  ;;  %v10790_v39 = vld [vmem:[%s12226_s20 + $0x90] sm:$0xf]  ;;  %v10791_v23 = vld [vmem:[%s12226_s20 + $0x94] sm:$0xf] }
 0x176   : > { %v2101_v57 = vshrl.u32 %v10790_v39, 16  ;;  %v2104_v19 = vshll.u32 %v10790_v39, 16  ;;  %v2114_v28 = vshrl.u32 %v10791_v23, 16 }
 0x177   : > { %10977 = vmatmul.msk.bf16.gmra.mxu2 %vm754_vm3, %v11800_v43  ;;  %v2410_v45 = vadd.f32 %v2330_v35, %v1756_v47  ;;  %v2084_v43 = vrot.slane %v2083_v9, 4  ;;  %v2110_v9 = vshll.u32 %v10791_v23, 16 }
 0x178   : > { %v2116_v39 = vrot.slane %v2114_v28, 4 }
 0x179   : > { %v2808_v61 = vadd.f32 %v12835_v30, %v2410_v45  ;;  %v2640_v45 = vunpack.c.l.b16 %v2579_v49  ;;  %v2089_v47 = vsel %vm12265_vm7, %v2084_v43, %v2088_v25  ;;  %v11801_v25 = vld [vmem:[%s12226_s20 + $0x90] sm:$0xff] }
 0x17a   : > { %v12880_v53 = vpop.f32.mrf.mxu2  ;;  %v2335_v35 = vpop.f32.mrf.mxu0  ;;  %v2242_v49 = vunpack.c.l.b16 %v2089_v47  ;;  %v10833_v43 = vld [vmem:[%s12226_s20 + $0x90] sm:$0xe] }
 0x17b   : > { %v12888_v62 = vadd.f32 %v3015_v40, %v2808_v61  ;;  %v2099_v40 = vsel %vm12265_vm7, %v2094_v29, %v2098_v31  ;;  %v2662_v1 = vpack.c.b16 %v2641_v14, %v2640_v45  ;;  %v2106_v45 = vrot.slane %v2104_v19, 5 }
 0x17c   : > { %v1678_v30 = vpop.f32.mrf.mxu3  ;;  %v2243_v4 = vunpack.c.l.b16 %v2099_v40  ;;  %v2112_v14 = vrot.slane %v2110_v9, 5 }
 0x17d   : > { %v1757_v8 = vadd.f32 %v1678_v30, %v12520_v18  ;;  %10815 = vmatmul.msk.bf16.gmra.mxu0 %vm754_vm3, %v2263_v6  ;;  %v2585_v6 = vrot.slane %v10791_v23, 5  ;;  %v10792_v30 = vld [vmem:[%s12226_s20 + $0x98] sm:$0x1] }
 0x17e   : > { %v2588_v23 = vrot.slane %v10792_v30, 5  ;;  %v2264_v40 = vpack.c.b16 %v2243_v4, %v2242_v49  ;;  %v2117_v9 = vor.u32 %v2116_v39, %v2112_v14  ;;  %v10793_v49 = vld [vmem:[%s12226_s20 + $0x9c] sm:$0xf] }
 0x17f   : > { %v2411_v60 = vadd.f32 %v2332_v15, %v1757_v8  ;;  %v12903_v15 = vpop.f32.mrf.mxu1 }
 0x180   : > { %10865 = vmatmul.msk.bf16.gmra.mxu1 %vm754_vm3, %v2662_v1 }
 0x181   : > { %v2809_v18 = vadd.f32 %v12851_v12, %v2411_v60  ;;  %10750 = vmatmul.msk.bf16.gmra.mxu3 %vm754_vm3, %v11784_v55  ;;  %v2103_v12 = vrot.slane %v2101_v57, 4  ;;  %v10849_v55 = vrot.slane %v10833_v43, 9  ;;  %v2587_v60 = vrot.slane %v2585_v6, 4 }
 0x182   : > { %v12901_v46 = vpop.f32.mrf.mxu2  ;;  %v2337_v61 = vpop.f32.mrf.mxu0 }
 0x183   : > { %v12908_v29 = vadd.f32 %v12865_v0, %v2809_v18  ;;  %v2107_v0 = vor.u32 %v2106_v45, %v2103_v12  ;;  %v2120_v18 = vshll.u32 %v10792_v30, 16  ;;  %v2586_v28 = vsel %vm12237_vm6, %v10849_v55, %v2585_v6  ;;  %v10794_v30 = vld [vmem:[%s12226_s20 + $0xa0] sm:$0xf]  ;;  %v11785_v45 = vld [vmem:[%s12226_s20 + $0x84] sm:$0xff] }
 0x184   : > { %v1681_v31 = vpop.f32.mrf.mxu3  ;;  %v2642_v43 = vunpack.c.l.b16 %v2586_v28  ;;  %v2118_v6 = vrot.slane %v2117_v9, 4  ;;  %v2125_v55 = vshrl.u32 %v10793_v49, 16 }
 0x185   : > { %v1758_v8 = vadd.f32 %v1681_v31, %v12533_v48  ;;  %v11829_v48 = vld [vmem:[#allocation3 + $0x30] sm:$0xff]  ;;  %v2108_v39 = vrot.slane %v2107_v0, 4 }
 0x186   : > { %5450 = vmatpush.bf16.msra.mxu1 %v11829_v48  ;;  %v2127_v9 = vrot.slane %v2125_v55, 4 }
 0x187   : > { %10978 = vmatmul.msk.bf16.gmra.mxu2 %vm754_vm3, %v11801_v25  ;;  %v2412_v47 = vadd.f32 %v2335_v35, %v1758_v8  ;;  %v12917_v19 = vpop.f32.mrf.mxu1  ;;  %v2589_v25 = vsel %vm12237_vm6, %v2587_v60, %v2588_v23  ;;  %v2122_v8 = vrot.slane %v2120_v18, 5  ;;  %v2128_v23 = vshll.u32 %v10793_v49, 16  ;;  %v11802_v18 = vld [vmem:[%s12226_s20 + $0x9c] sm:$0xff] }
 0x188   : > { %v2643_v31 = vunpack.c.l.b16 %v2589_v25  ;;  %v2592_v25 = vrot.slane %v10794_v30, 5 }
 0x189   : > { %v2810_v1 = vadd.f32 %v12871_v17, %v2412_v47  ;;  %v2134_v47 = vshll.u32 %v10794_v30, 16  ;;  %v2130_v49 = vrot.slane %v2128_v23, 5 }
 0x18a   : > { %v12915_v57 = vpop.f32.mrf.mxu2  ;;  %v2340_v35 = vpop.f32.mrf.mxu0 }
 0x18b   : > { %v12925_v4 = vadd.f32 %v12880_v53, %v2810_v1  ;;  %v2138_v53 = vshrl.u32 %v10794_v30, 16  ;;  %v2663_v1 = vpack.c.b16 %v2643_v31, %v2642_v43  ;;  %v10834_v43 = vld [vmem:[%s12226_s20 + $0x9c] sm:$0xe]  ;;  %v2131_v55 = vor.u32 %v2130_v49, %v2127_v9 }
 0x18c   : > { %v1683_v17 = vpop.f32.mrf.mxu3 }
 0x18d   : > { %16261 = vst [vmem:[#allocation10_spill] sm:$0xff] %v12925_v4  ;;  %v1759_v12 = vadd.f32 %v1683_v17, %v12554_v33  ;;  %10816 = vmatmul.msk.bf16.gmra.mxu0 %vm754_vm3, %v2264_v40  ;;  %v2113_v33 = vsel %vm12265_vm7, %v2108_v39, %v2112_v14  ;;  %v2123_v40 = vsel %vm12265_vm7, %v2118_v6, %v2122_v8  ;;  %v2136_v17 = vrot.slane %v2134_v47, 5  ;;  %v10795_v39 = vld [vmem:[%s12226_s20 + $0xa4] sm:$0x1] }
 0x18e   : > { %v2245_v14 = vunpack.c.l.b16 %v2123_v40  ;;  %v10850_v8 = vrot.slane %v10834_v43, 9  ;;  %v2595_v4 = vrot.slane %v10795_v39, 5  ;;  %v2144_v47 = vshll.u32 %v10795_v39, 16 }
 0x18f   : > { %v2413_v60 = vadd.f32 %v2337_v61, %v1759_v12  ;;  %v12939_v0 = vpop.f32.mrf.mxu1  ;;  %v2132_v40 = vrot.slane %v2131_v55, 4 }
 0x190   : > { %10866 = vmatmul.msk.bf16.gmra.mxu1 %vm754_vm3, %v2663_v1  ;;  %v2146_v9 = vrot.slane %v2144_v47, 5 }
 0x191   : > { %v2811_v48 = vadd.f32 %v12882_v11, %v2413_v60  ;;  %10751 = vmatmul.msk.bf16.gmra.mxu3 %vm754_vm3, %v11785_v45  ;;  %v2140_v11 = vrot.slane %v2138_v53, 4  ;;  %v2244_v45 = vunpack.c.l.b16 %v2113_v33  ;;  %v2594_v60 = vrot.slane %v2592_v25, 4 }
 0x192   : > { %v12933_v28 = vpop.f32.mrf.mxu2  ;;  %v2342_v61 = vpop.f32.mrf.mxu0 }
 0x193   : > { %v12944_v31 = vadd.f32 %v12901_v46, %v2811_v48  ;;  %v2141_v23 = vor.u32 %v2140_v11, %v2136_v17  ;;  %v2265_v48 = vpack.c.b16 %v2245_v14, %v2244_v45  ;;  %v2596_v33 = vsel %vm12237_vm6, %v2594_v60, %v2595_v4  ;;  %v11786_v14 = vld [vmem:[%s12226_s20 + $0x90] sm:$0xff] }
 0x194   : > { %v1686_v12 = vpop.f32.mrf.mxu3  ;;  %v2645_v43 = vunpack.c.l.b16 %v2596_v33  ;;  %v2137_v4 = vsel %vm12265_vm7, %v2132_v40, %v2136_v17  ;;  %v11803_v17 = vld [vmem:[%s12226_s20 + $0xa8] sm:$0xff] }
 0x195   : > { %v1760_v6 = vadd.f32 %v1686_v12, %v12566_v50  ;;  %v2593_v50 = vsel %vm12237_vm6, %v10850_v8, %v2592_v25  ;;  %v10796_v12 = vld [vmem:[%s12226_s20 + $0xa8] sm:$0xf]  ;;  %v10797_v25 = vld [vmem:[%s12226_s20 + $0xac] sm:$0xf] }
 0x196   : > { %v2644_v11 = vunpack.c.l.b16 %v2593_v50  ;;  %v2152_v60 = vshll.u32 %v10796_v12, 16  ;;  %v2162_v55 = vshrl.u32 %v10797_v25, 16  ;;  %v10835_v33 = vld [vmem:[%s12226_s20 + $0xa8] sm:$0xe] }
 0x197   : > { %10979 = vmatmul.msk.bf16.gmra.mxu2 %vm754_vm3, %v11802_v18  ;;  %v2414_v30 = vadd.f32 %v2340_v35, %v1760_v6  ;;  %v12953_v1 = vpop.f32.mrf.mxu1  ;;  %v2142_v18 = vrot.slane %v2141_v23, 4  ;;  %v2149_v6 = vshrl.u32 %v10796_v12, 16 }
 0x198   : > { %v2664_v8 = vpack.c.b16 %v2645_v43, %v2644_v11  ;;  %v2164_v43 = vrot.slane %v2162_v55, 4 }
 0x199   : > { %v2812_v46 = vadd.f32 %v12903_v15, %v2414_v30  ;;  %v2158_v30 = vshll.u32 %v10797_v25, 16 }
 0x19a   : > { %v12951_v53 = vpop.f32.mrf.mxu2  ;;  %v2345_v35 = vpop.f32.mrf.mxu0 }
 0x19b   : > { %v12960_v49 = vadd.f32 %v12915_v57, %v2812_v46  ;;  %v2147_v57 = vsel %vm12265_vm7, %v2142_v18, %v2146_v9  ;;  %v2599_v46 = vrot.slane %v10797_v25, 5  ;;  %v10798_v9 = vld [vmem:[%s12226_s20 + $0xb0] sm:$0x1]  ;;  %v2160_v11 = vrot.slane %v2158_v30, 5 }
 0x19c   : > { %v1688_v15 = vpop.f32.mrf.mxu3  ;;  %v2247_v50 = vunpack.c.l.b16 %v2147_v57  ;;  %v2602_v25 = vrot.slane %v10798_v9, 5  ;;  %v2168_v57 = vshll.u32 %v10798_v9, 16 }
 0x19d   : > { %v1761_v45 = vadd.f32 %v1688_v15, %v12588_v21  ;;  %10817 = vmatmul.msk.bf16.gmra.mxu0 %vm754_vm3, %v2265_v48  ;;  %v2246_v48 = vunpack.c.l.b16 %v2137_v4  ;;  %v2154_v15 = vrot.slane %v2152_v60, 5  ;;  %v2165_v30 = vor.u32 %v2164_v43, %v2160_v11 }
 0x19e   : > { %v2170_v43 = vrot.slane %v2168_v57, 5  ;;  %v11804_v57 = vld [vmem:[%s12226_s20 + $0xb4] sm:$0xff] }
 0x19f   : > { %v2415_v39 = vadd.f32 %v2342_v61, %v1761_v45  ;;  %v12975_v61 = vpop.f32.mrf.mxu1  ;;  %v10851_v45 = vrot.slane %v10835_v33, 9  ;;  %v2266_v4 = vpack.c.b16 %v2247_v50, %v2246_v48 }
 0x1a0   : > { %10867 = vmatmul.msk.bf16.gmra.mxu1 %vm754_vm3, %v2664_v8 }
 0x1a1   : > { %v2813_v21 = vadd.f32 %v12917_v19, %v2415_v39  ;;  %10752 = vmatmul.msk.bf16.gmra.mxu3 %vm754_vm3, %v11786_v14  ;;  %v2151_v19 = vrot.slane %v2149_v6, 4  ;;  %v2601_v14 = vrot.slane %v2599_v46, 4  ;;  %v2600_v55 = vsel %vm12237_vm6, %v10851_v45, %v2599_v46 }
 0x1a2   : > { %v12973_v23 = vpop.f32.mrf.mxu2  ;;  %v2347_v47 = vpop.f32.mrf.mxu0  ;;  %v2646_v50 = vunpack.c.l.b16 %v2600_v55  ;;  %v2166_v46 = vrot.slane %v2165_v30, 4 }
 0x1a3   : > { %v12980_v40 = vadd.f32 %v12933_v28, %v2813_v21  ;;  %v2155_v28 = vor.u32 %v2154_v15, %v2151_v19  ;;  %v2603_v21 = vsel %vm12237_vm6, %v2601_v14, %v2602_v25  ;;  %v11787_v19 = vld [vmem:[%s12226_s20 + $0x9c] sm:$0xff] }
 0x1a4   : > { %v1691_v18 = vpop.f32.mrf.mxu3  ;;  %v2647_v33 = vunpack.c.l.b16 %v2603_v21 }
 0x1a5   : > { %v1762_v12 = vadd.f32 %v1691_v18, %v12604_v58  ;;  %v11828_v58 = vld [vmem:[#allocation3 + $0x28] sm:$0xff]  ;;  %v10800_v18 = vld [vmem:[%s12226_s20 + $0xb8] sm:$0xf]  ;;  %v2156_v15 = vrot.slane %v2155_v28, 4 }
 0x1a6   : > { %5451 = vmatpush.bf16.msra.mxu1 %v11828_v58  ;;  %v2182_v25 = vshll.u32 %v10800_v18, 16  ;;  %v2606_v55 = vrot.slane %v10800_v18, 5 }
 0x1a7   : > { %10980 = vmatmul.msk.bf16.gmra.mxu2 %vm754_vm3, %v11803_v17  ;;  %v2416_v39 = vadd.f32 %v2345_v35, %v1762_v12  ;;  %v12989_v60 = vpop.f32.mrf.mxu1  ;;  %v10799_v17 = vld [vmem:[%s12226_s20 + $0xb4] sm:$0xf] }
 0x1a8   : > { %v2173_v12 = vshrl.u32 %v10799_v17, 16  ;;  %v2176_v14 = vshll.u32 %v10799_v17, 16  ;;  %v2184_v17 = vrot.slane %v2182_v25, 5 }
 0x1a9   : > { %v2814_v8 = vadd.f32 %v12939_v0, %v2416_v39  ;;  %v2665_v39 = vpack.c.b16 %v2647_v33, %v2646_v50 }
 0x1aa   : > { %v12987_v6 = vpop.f32.mrf.mxu2  ;;  %v2350_v35 = vpop.f32.mrf.mxu0  ;;  %v2175_v30 = vrot.slane %v2173_v12, 4  ;;  %v2178_v21 = vrot.slane %v2176_v14, 5 }
 0x1ab   : > { %v12997_v48 = vadd.f32 %v12951_v53, %v2814_v8  ;;  %v2186_v53 = vshrl.u32 %v10800_v18, 16 }
 0x1ac   : > { %v1693_v0 = vpop.f32.mrf.mxu3  ;;  %v2179_v12 = vor.u32 %v2178_v21, %v2175_v30 }
 0x1ad   : > { %v1763_v9 = vadd.f32 %v1693_v0, %v12619_v20  ;;  %10818 = vmatmul.msk.bf16.gmra.mxu0 %vm754_vm3, %v2266_v4  ;;  %v2161_v20 = vsel %vm12265_vm7, %v2156_v15, %v2160_v11  ;;  %v2171_v4 = vsel %vm12265_vm7, %v2166_v46, %v2170_v43  ;;  %v10836_v0 = vld [vmem:[%s12226_s20 + $0xb4] sm:$0xe]  ;;  %v2608_v43 = vrot.slane %v2606_v55, 4 }
 0x1ae   : > { %v2249_v11 = vunpack.c.l.b16 %v2171_v4  ;;  %v10852_v46 = vrot.slane %v10836_v0, 9  ;;  %v2180_v4 = vrot.slane %v2179_v12, 4 }
 0x1af   : > { %v2417_v45 = vadd.f32 %v2347_v47, %v1763_v9  ;;  %v13011_v28 = vpop.f32.mrf.mxu1  ;;  %v2248_v9 = vunpack.c.l.b16 %v2161_v20 }
 0x1b0   : > { %10868 = vmatmul.msk.bf16.gmra.mxu1 %vm754_vm3, %v2665_v39 }
 0x1b1   : > { %v2815_v8 = vadd.f32 %v12953_v1, %v2417_v45  ;;  %10753 = vmatmul.msk.bf16.gmra.mxu3 %vm754_vm3, %v11787_v19  ;;  %v2188_v1 = vrot.slane %v2186_v53, 4  ;;  %v10801_v19 = vld [vmem:[%s12226_s20 + $0xbc] sm:$0x1] }
 0x1b2   : > { %v13005_v58 = vpop.f32.mrf.mxu2  ;;  %v2352_v47 = vpop.f32.mrf.mxu0  ;;  %v2609_v45 = vrot.slane %v10801_v19, 5  ;;  %v2192_v25 = vshll.u32 %v10801_v19, 16 }
 0x1b3   : > { %v13016_v50 = vadd.f32 %v12973_v23, %v2815_v8  ;;  %v2189_v14 = vor.u32 %v2188_v1, %v2184_v17  ;;  %v2267_v8 = vpack.c.b16 %v2249_v11, %v2248_v9  ;;  %v11788_v11 = vld [vmem:[%s12226_s20 + $0xa8] sm:$0xff] }
 0x1b4   : > { %v1696_v33 = vpop.f32.mrf.mxu3  ;;  %v2610_v20 = vsel %vm12237_vm6, %v2608_v43, %v2609_v45  ;;  %v2194_v30 = vrot.slane %v2192_v25, 5 }
 0x1b5   : > { %16262 = vst [vmem:[#allocation11_spill] sm:$0xff] %v13016_v50  ;;  %v1764_v15 = vadd.f32 %v1696_v33, %v12630_v51  ;;  %v2607_v51 = vsel %vm12237_vm6, %v10852_v46, %v2606_v55  ;;  %v2649_v0 = vunpack.c.l.b16 %v2610_v20  ;;  %v10802_v33 = vld [vmem:[%s12226_s20 + $0xc0] sm:$0xf]  ;;  %v10803_v55 = vld [vmem:[%s12226_s20 + $0xc4] sm:$0xf] }
 0x1b6   : > { %v2648_v1 = vunpack.c.l.b16 %v2607_v51  ;;  %v2197_v46 = vshrl.u32 %v10802_v33, 16  ;;  %v2200_v45 = vshll.u32 %v10802_v33, 16  ;;  %v2210_v12 = vshrl.u32 %v10803_v55, 16  ;;  %v10837_v20 = vld [vmem:[%s12226_s20 + $0xc0] sm:$0xe] }
 0x1b7   : > { %10981 = vmatmul.msk.bf16.gmra.mxu2 %vm754_vm3, %v11804_v57  ;;  %v2418_v18 = vadd.f32 %v2350_v35, %v1764_v15  ;;  %v13025_v39 = vpop.f32.mrf.mxu1  ;;  %v2190_v57 = vrot.slane %v2189_v14, 4  ;;  %v2185_v15 = vsel %vm12265_vm7, %v2180_v4, %v2184_v17  ;;  %v11805_v17 = vld [vmem:[%s12226_s20 + $0xc0] sm:$0xff] }
 0x1b8   : > { %v2666_v43 = vpack.c.b16 %v2649_v0, %v2648_v1  ;;  %v2212_v0 = vrot.slane %v2210_v12, 4 }
 0x1b9   : > { %v2816_v23 = vadd.f32 %v12975_v61, %v2418_v18  ;;  %v2206_v18 = vshll.u32 %v10803_v55, 16 }
 0x1ba   : > { %v13023_v53 = vpop.f32.mrf.mxu2  ;;  %v2355_v35 = vpop.f32.mrf.mxu0 }
 0x1bb   : > { %v13032_v21 = vadd.f32 %v12987_v6, %v2816_v23  ;;  %v2195_v6 = vsel %vm12265_vm7, %v2190_v57, %v2194_v30  ;;  %v2613_v23 = vrot.slane %v10803_v55, 5  ;;  %v2199_v30 = vrot.slane %v2197_v46, 4 }
 0x1bc   : > { %v1698_v61 = vpop.f32.mrf.mxu3  ;;  %v2251_v51 = vunpack.c.l.b16 %v2195_v6  ;;  %v13056_v1 = vrot.slane %v2206_v18, 5 }
 0x1bd   : > { %16263 = vst [vmem:[#allocation12_spill] sm:$0xff] %v13032_v21  ;;  %v1765_v9 = vadd.f32 %v1698_v61, %v12646_v24  ;;  %10819 = vmatmul.msk.bf16.gmra.mxu0 %vm754_vm3, %v2267_v8  ;;  %v2250_v8 = vunpack.c.l.b16 %v2185_v15  ;;  %v2202_v61 = vrot.slane %v2200_v45, 5 }
 0x1bf   : > { %v2419_v19 = vadd.f32 %v2352_v47, %v1765_v9  ;;  %v13047_v47 = vpop.f32.mrf.mxu1  ;;  %v10853_v9 = vrot.slane %v10837_v20, 9  ;;  %v2268_v6 = vpack.c.b16 %v2251_v51, %v2250_v8 }
 0x1c0   : > { %10869 = vmatmul.msk.bf16.gmra.mxu1 %vm754_vm3, %v2666_v43  ;;  %v2213_v43 = vor.u32 %v2212_v0, %v13056_v1 }
 0x1c1   : > { %v2817_v24 = vadd.f32 %v12989_v60, %v2419_v19  ;;  %10754 = vmatmul.msk.bf16.gmra.mxu3 %vm754_vm3, %v11788_v11  ;;  %v10804_v60 = vld [vmem:[%s12226_s20 + $0xc8] sm:$0x1]  ;;  %v2615_v11 = vrot.slane %v2613_v23, 4  ;;  %v11098_v19 = vld [vmem:[%s12226_s20 + $0xc] sm:$0xf]  ;;  %v2614_v12 = vsel %vm12237_vm6, %v10853_v9, %v2613_v23 }
 0x1c2   : > { %v13045_v14 = vpop.f32.mrf.mxu2  ;;  %v2357_v25 = vpop.f32.mrf.mxu0  ;;  %v2616_v55 = vrot.slane %v10804_v60, 5  ;;  %v4876_v51 = vshll.u32 %v11098_v19, 16  ;;  %v2214_v9 = vrot.slane %v2213_v43, 4  ;;  %v13089_v43 = vld [vmem:[%s12226_s20 + $0x1c] sm:$0xf] }
 0x1c3   : > { %v13052_v4 = vadd.f32 %v13005_v58, %v2817_v24  ;;  %v11099_v58 = vld [vmem:[%s12226_s20 + $0x10] sm:$0xf]  ;;  %v2203_v24 = vor.u32 %v2202_v61, %v2199_v30  ;;  %v2650_v30 = vunpack.c.l.b16 %v2614_v12  ;;  %v11100_v12 = vld [vmem:[%s12226_s20 + $0x14] sm:$0x1] }
 0x1c4   : > { %v1701_v57 = vpop.f32.mrf.mxu3  ;;  %v4882_v20 = vshll.u32 %v11099_v58, 16 }
 0x1c5   : > { %16264 = vst [vmem:[#allocation13_spill] sm:$0xff] %v13052_v4  ;;  %v1766_v33 = vadd.f32 %v1701_v57, %v12657_v56  ;;  %v2216_v4 = vshll.u32 %v10804_v60, 16  ;;  %v11827_v56 = vld [vmem:[#allocation3 + $0x20] sm:$0xff]  ;;  %v4886_v57 = vshrl.u32 %v11099_v58, 16  ;;  %v2204_v23 = vrot.slane %v2203_v24, 4 }
 0x1c6   : > { %5452 = vmatpush.bf16.msra.mxu1 %v11827_v56 }
 0x1c7   : > { %10982 = vmatmul.msk.bf16.gmra.mxu2 %vm754_vm3, %v11805_v17  ;;  %v2420_v15 = vadd.f32 %v2355_v35, %v1766_v33  ;;  %v13066_v18 = vpop.f32.mrf.mxu1  ;;  %v2617_v35 = vsel %vm12237_vm6, %v2615_v11, %v2616_v55  ;;  %v4873_v17 = vshrl.u32 %v11098_v19, 16  ;;  %v11789_v33 = vld [vmem:[%s12226_s20 + $0xb4] sm:$0xff]  ;;  %v4878_v55 = vrot.slane %v4876_v51, 5  ;;  %v11806_v51 = vld [vmem:[%s12226_s20 + $0xcc] sm:$0xff] }
 0x1c8   : > { %v2651_v61 = vunpack.c.l.b16 %v2617_v35  ;;  %v13075_v19 = vrot.slane %v4882_v20, 5  ;;  %v10984_v35 = vld [vmem:[%s12226_s20 + $0x18] sm:$0xf]  ;;  %v4892_v20 = vshll.u32 %v11100_v12, 16 }
 0x1c9   : > { %v2818_v46 = vadd.f32 %v13011_v28, %v2420_v15  ;;  %v2218_v28 = vrot.slane %v2216_v4, 5  ;;  %v4875_v11 = vrot.slane %v4873_v17, 4  ;;  %v4888_v15 = vrot.slane %v4886_v57, 4 }
 0x1ca   : > { %v13064_v45 = vpop.f32.mrf.mxu2  ;;  %v2360_v8 = vpop.f32.mrf.mxu0  ;;  %v2667_v56 = vpack.c.b16 %v2651_v61, %v2650_v30  ;;  %v3176_v57 = vshrl.u32 %v10984_v35, 16 }
 0x1cb   : > { %v13078_v58 = vadd.f32 %v13023_v53, %v2818_v46  ;;  %v2209_v53 = vsel %vm12265_vm7, %v2204_v23, %v13056_v1  ;;  %v4879_v46 = vor.u32 %v4878_v55, %v4875_v11  ;;  %v3185_v1 = vshll.u32 %v13089_v43, 16 }
 0x1cc   : > { %v1703_v60 = vpop.f32.mrf.mxu3 }
 0x1cd   : > { %v1767_v0 = vadd.f32 %v1703_v60, %v12674_v26  ;;  %10820 = vmatmul.msk.bf16.gmra.mxu0 %vm754_vm3, %v2268_v6  ;;  %16265 = vst [vmem:[#allocation14_spill] sm:$0xff] %v13078_v58  ;;  %v3179_v60 = vshll.u32 %v10984_v35, 16  ;;  %v11102_v35 = vld [vmem:[%s12226_s20 + $0x1c] sm:$0xf]  ;;  %v3847_v58 = vrot.slane %v13089_v43, 5 }
 0x1cf   : > { %v2421_v4 = vadd.f32 %v2357_v25, %v1767_v0  ;;  %v13086_v24 = vpop.f32.mrf.mxu1  ;;  %v2219_v25 = vsel %vm12265_vm7, %v2214_v9, %v2218_v28  ;;  %v3189_v0 = vshrl.u32 %v13089_v43, 16  ;;  %v4880_v9 = vrot.slane %v4879_v46, 4  ;;  %v11049_v46 = vld [vmem:[%s12226_s20 + $0x18] sm:$0xe] }
 0x1d0   : > { %10870 = vmatmul.msk.bf16.gmra.mxu1 %vm754_vm3, %v2667_v56  ;;  %v2253_v23 = vunpack.c.l.b16 %v2219_v25  ;;  %v3181_v12 = vrot.slane %v3179_v60, 5  ;;  %v10986_v56 = vld [vmem:[%s12226_s20 + $0x20] sm:$0x1]  ;;  %v4906_v60 = vshll.u32 %v11102_v35, 16 }
 0x1d1   : > { %v2819_v26 = vadd.f32 %v13025_v39, %v2421_v4  ;;  %10755 = vmatmul.msk.bf16.gmra.mxu3 %vm754_vm3, %v11789_v33  ;;  %v4889_v39 = vor.u32 %v4888_v15, %v13075_v19  ;;  %v2252_v33 = vunpack.c.l.b16 %v2209_v53  ;;  %v4894_v15 = vrot.slane %v4892_v20, 5 }
 0x1d2   : > { %v13084_v6 = vpop.f32.mrf.mxu2  ;;  %v2362_v17 = vpop.f32.mrf.mxu0  ;;  %v3178_v4 = vrot.slane %v3176_v57, 4  ;;  %v4885_v57 = vsel %vm12265_vm7, %v4880_v9, %v13075_v19  ;;  %v11790_v9 = vld [vmem:[%s12226_s20 + $0xc0] sm:$0xff] }
 0x1d3   : > { %v13099_v30 = vadd.f32 %v13045_v14, %v2819_v26  ;;  %v4890_v11 = vrot.slane %v4889_v39, 4  ;;  %v11101_v14 = vld [vmem:[%s12226_s20 + $0x18] sm:$0xf]  ;;  %v13109_v26 = vrot.slane %v3185_v1, 5  ;;  %v3195_v1 = vshll.u32 %v10986_v56, 16 }
 0x1d4   : > { %v1706_v61 = vpop.f32.mrf.mxu3  ;;  %v4897_v39 = vshrl.u32 %v11101_v14, 16 }
 0x1d5   : > { %16266 = vst [vmem:[#allocation15_spill] sm:$0xff] %v13099_v30  ;;  %v1768_v28 = vadd.f32 %v1706_v61, %v12686_v3  ;;  %v3191_v30 = vrot.slane %v3189_v0, 4  ;;  %v4910_v61 = vshrl.u32 %v11102_v35, 16  ;;  %v4895_v43 = vsel %vm12265_vm7, %v4890_v11, %v4894_v15  ;;  %v11103_v35 = vld [vmem:[%s12226_s20 + $0x20] sm:$0x1] }
 0x1d6   : > { %v4899_v11 = vrot.slane %v4897_v39, 4  ;;  %v3197_v50 = vrot.slane %v3195_v1, 5 }
 0x1d7   : > { %10983 = vmatmul.msk.bf16.gmra.mxu2 %vm754_vm3, %v11806_v51  ;;  %v2422_v55 = vadd.f32 %v2360_v8, %v1768_v28  ;;  %v2269_v51 = vpack.c.b16 %v2253_v23, %v2252_v33  ;;  %v13115_v25 = vpop.f32.mrf.mxu1  ;;  %v4900_v8 = vshll.u32 %v11101_v14, 16  ;;  %v3192_v33 = vor.u32 %v3191_v30, %v13109_v26 }
 0x1d8   : > { %v11065_v23 = vrot.slane %v11049_v46, 9  ;;  %v3849_v14 = vrot.slane %v3847_v58, 4 }
 0x1d9   : > { %v2820_v3 = vadd.f32 %v13047_v47, %v2422_v55  ;;  %v3182_v47 = vor.u32 %v3181_v12, %v3178_v4  ;;  %v3850_v55 = vrot.slane %v10986_v56, 5  ;;  %v4902_v15 = vrot.slane %v4900_v8, 5 }
 0x1da   : > { %v13113_v53 = vpop.f32.mrf.mxu2  ;;  %v2365_v20 = vpop.f32.mrf.mxu0  ;;  %v5538_v4 = vunpack.c.l.b16 %v4885_v57  ;;  %v5539_v12 = vunpack.c.l.b16 %v4895_v43  ;;  %v3193_v46 = vrot.slane %v3192_v33, 4 }
 0x1db   : > { %v13124_v0 = vadd.f32 %v13064_v45, %v2820_v3  ;;  %v13131_v45 = vrot.slane %v4906_v60, 5  ;;  %v4912_v3 = vrot.slane %v4910_v61, 4  ;;  %v3183_v30 = vrot.slane %v3182_v47, 4 }
 0x1dc   : > { %v1708_v28 = vpop.f32.mrf.mxu3  ;;  %v3851_v56 = vsel %vm12237_vm6, %v3849_v14, %v3850_v55  ;;  %v4916_v60 = vshll.u32 %v11103_v35, 16  ;;  %v5570_v47 = vpack.c.b16 %v5539_v12, %v5538_v4  ;;  %v3198_v14 = vsel %vm12265_vm7, %v3193_v46, %v3197_v50  ;;  %v10989_v35 = vld [vmem:[%s12226_s20 + $0x2c] sm:$0x1]  ;;  %v11050_v46 = vld [vmem:[%s12226_s20 + $0x24] sm:$0xe] }
 0x1dd   : > { %16267 = vst [vmem:[#allocation16_spill] sm:$0xff] %v13124_v0  ;;  %v1769_v19 = vadd.f32 %v1708_v28, %v12702_v36  ;;  %10821 = vmatmul.msk.bf16.gmra.mxu0 %vm754_vm3, %v2269_v51  ;;  %v10987_v0 = vld [vmem:[%s12226_s20 + $0x24] sm:$0xf]  ;;  %v3848_v36 = vsel %vm12237_vm6, %v11065_v23, %v3847_v58  ;;  %v13139_v51 = vld [vmem:[%s12226_s20 + $0x28] sm:$0xf]  ;;  %v4913_v58 = vor.u32 %v4912_v3, %v13131_v45 }
 0x1de   : > { %v3200_v61 = vshrl.u32 %v10987_v0, 16  ;;  %v3203_v1 = vshll.u32 %v10987_v0, 16  ;;  %v3188_v28 = vsel %vm12265_vm7, %v3183_v30, %v13109_v26  ;;  %v3959_v55 = vunpack.c.l.b16 %v3848_v36  ;;  %v11105_v3 = vld [vmem:[%s12226_s20 + $0x28] sm:$0xf] }
 0x1df   : > { %v2423_v21 = vadd.f32 %v2362_v17, %v1769_v19  ;;  %v13145_v57 = vpop.f32.mrf.mxu1  ;;  %v4903_v17 = vor.u32 %v4902_v15, %v4899_v11  ;;  %v3960_v0 = vunpack.c.l.b16 %v3851_v56  ;;  %v4918_v26 = vrot.slane %v4916_v60, 5  ;;  %v11104_v15 = vld [vmem:[%s12226_s20 + $0x24] sm:$0xf] }
 0x1e0   : > { %v3202_v11 = vrot.slane %v3200_v61, 4  ;;  %v3561_v4 = vunpack.c.l.b16 %v3188_v28  ;;  %v4914_v12 = vrot.slane %v4913_v58, 4  ;;  %v3854_v36 = vrot.slane %v13139_v51, 5 }
 0x1e1   : > { %v2821_v39 = vadd.f32 %v13066_v18, %v2423_v21  ;;  %10756 = vmatmul.msk.bf16.gmra.mxu3 %vm754_vm3, %v11790_v9  ;;  %v3209_v21 = vshll.u32 %v13139_v51, 16  ;;  %v3213_v18 = vshrl.u32 %v13139_v51, 16  ;;  %v4904_v9 = vrot.slane %v4903_v17, 4 }
 0x1e2   : > { %v13143_v8 = vpop.f32.mrf.mxu2  ;;  %v2367_v43 = vpop.f32.mrf.mxu0  ;;  %v3562_v56 = vunpack.c.l.b16 %v3198_v14  ;;  %v4921_v17 = vshrl.u32 %v11104_v15, 16  ;;  %v4924_v60 = vshll.u32 %v11104_v15, 16  ;;  %v4934_v28 = vshrl.u32 %v11105_v3, 16 }
 0x1e3   : > { %v13154_v33 = vadd.f32 %v13084_v6, %v2821_v39  ;;  %v3205_v6 = vrot.slane %v3203_v1, 5  ;;  %v13163_v39 = vrot.slane %v3209_v21, 5  ;;  %v3215_v50 = vrot.slane %v3213_v18, 4 }
 0x1e4   : > { %v1711_v23 = vpop.f32.mrf.mxu3  ;;  %v4930_v1 = vshll.u32 %v11105_v3, 16  ;;  %v4919_v51 = vsel %vm12265_vm7, %v4914_v12, %v4918_v26  ;;  %v3219_v14 = vshll.u32 %v10989_v35, 16  ;;  %v4923_v15 = vrot.slane %v4921_v17, 4 }
 0x1e5   : > { %16268 = vst [vmem:[#allocation17_spill] sm:$0xff] %v13154_v33  ;;  %v1770_v19 = vadd.f32 %v1711_v23, %v12713_v63  ;;  %v3991_v63 = vpack.c.b16 %v3960_v0, %v3959_v55  ;;  %v3206_v18 = vor.u32 %v3205_v6, %v3202_v11  ;;  %v11066_v55 = vrot.slane %v11050_v46, 9  ;;  %v11106_v46 = vld [vmem:[%s12226_s20 + $0x2c] sm:$0x1] }
 0x1e6   : > { %v3856_v0 = vrot.slane %v3854_v36, 4  ;;  %v3593_v33 = vpack.c.b16 %v3562_v56, %v3561_v4  ;;  %v4932_v26 = vrot.slane %v4930_v1, 5  ;;  %v4936_v11 = vrot.slane %v4934_v28, 4  ;;  %v10990_v4 = vld [vmem:[%s12226_s20 + $0x30] sm:$0xf] }
 0x1e7   : > { %11242 = vmatmul.msk.bf16.vlgmr.msra.gmra.mxu2 %vm754_vm3, %v5570_v47  ;;  %v2424_v30 = vadd.f32 %v2365_v20, %v1770_v19  ;;  %v4909_v47 = vsel %vm12265_vm7, %v4904_v9, %v13131_v45  ;;  %v13173_v58 = vpop.f32.mrf.mxu1  ;;  %v11826_v20 = vld [vmem:[#allocation3 + $0x18] sm:$0xff]  ;;  %v3857_v19 = vrot.slane %v10989_v35, 5  ;;  %v5541_v6 = vunpack.c.l.b16 %v4919_v51 }
 0x1e8   : > { %5453 = vmatpush.bf16.msra.mxu1 %v11826_v20  ;;  %v5540_v12 = vunpack.c.l.b16 %v4909_v47  ;;  %v3221_v35 = vrot.slane %v3219_v14, 5  ;;  %v3855_v17 = vsel %vm12237_vm6, %v11066_v55, %v3854_v36  ;;  %v4937_v47 = vor.u32 %v4936_v11, %v4932_v26 }
 0x1e9   : > { %v2822_v61 = vadd.f32 %v13086_v24, %v2424_v30  ;;  %v3216_v24 = vor.u32 %v3215_v50, %v13163_v39  ;;  %v4926_v30 = vrot.slane %v4924_v60, 5  ;;  %v3207_v50 = vrot.slane %v3206_v18, 4 }
 0x1ea   : > { %v13168_v23 = vpop.f32.mrf.mxu2  ;;  %v2370_v21 = vpop.f32.mrf.mxu0  ;;  %v3858_v60 = vsel %vm12237_vm6, %v3856_v0, %v3857_v19  ;;  %v4940_v1 = vshll.u32 %v11106_v46, 16  ;;  %v5571_v51 = vpack.c.b16 %v5541_v6, %v5540_v12  ;;  %v3961_v18 = vunpack.c.l.b16 %v3855_v17  ;;  %v11107_v6 = vld [vmem:[%s12226_s20 + $0x30] sm:$0xf]  ;;  %v10992_v17 = vld [vmem:[%s12226_s20 + $0x38] sm:$0x1] }
 0x1eb   : > { %v13179_v45 = vadd.f32 %v13113_v53, %v2822_v61  ;;  %v3217_v53 = vrot.slane %v3216_v24, 4  ;;  %v3212_v36 = vsel %vm12265_vm7, %v3207_v50, %v13163_v39  ;;  %v3962_v14 = vunpack.c.l.b16 %v3858_v60 }
 0x1ec   : > { %v1713_v9 = vpop.f32.mrf.mxu3  ;;  %v3227_v55 = vshll.u32 %v10990_v4, 16  ;;  %v3563_v11 = vunpack.c.l.b16 %v3212_v36  ;;  %v4948_v36 = vshll.u32 %v11107_v6, 16 }
 0x1ed   : > { %16269 = vst [vmem:[#allocation18_spill] sm:$0xff] %v13179_v45  ;;  %v1771_v3 = vadd.f32 %v1713_v9, %v12730_v41  ;;  %11082 = vmatmul.msk.bf16.vlgmr.msra.gmra.mxu0 %vm754_vm3, %v3991_v63  ;;  %v4927_v41 = vor.u32 %v4926_v30, %v4923_v15  ;;  %v4938_v30 = vrot.slane %v4937_v47, 4  ;;  %v3992_v50 = vpack.c.b16 %v3962_v14, %v3961_v18 }
 0x1ee   : > { %v3229_v46 = vrot.slane %v3227_v55, 5  ;;  %v3243_v55 = vshll.u32 %v10992_v17, 16 }
 0x1ef   : > { %v2425_v20 = vadd.f32 %v2367_v43, %v1771_v3  ;;  %v13193_v61 = vpop.f32.mrf.mxu1  ;;  %v13196_v43 = vld [vmem:[%s12226_s20 + $0x34] sm:$0xf]  ;;  %v4928_v19 = vrot.slane %v4927_v41, 4  ;;  %v4942_v3 = vrot.slane %v4940_v1, 5  ;;  %v11051_v1 = vld [vmem:[%s12226_s20 + $0x30] sm:$0xe] }
 0x1f0   : > { %v3233_v9 = vshll.u32 %v13196_v43, 16  ;;  %v3237_v15 = vshrl.u32 %v13196_v43, 16  ;;  %v3861_v41 = vrot.slane %v13196_v43, 5 }
 0x1f1   : > { %v2823_v56 = vadd.f32 %v13115_v25, %v2425_v20  ;;  %11033 = vmatmul.msk.bf16.vlgmr.msra.gmra.mxu3 %vm754_vm3, %v3593_v33  ;;  %v3222_v25 = vsel %vm12265_vm7, %v3217_v53, %v3221_v35  ;;  %v3224_v33 = vshrl.u32 %v10990_v4, 16  ;;  %v11108_v20 = vld [vmem:[%s12226_s20 + $0x34] sm:$0xf]  ;;  %v4933_v53 = vsel %vm12265_vm7, %v4928_v19, %v4932_v26 }
 0x1f2   : > { %v13191_v63 = vpop.f32.mrf.mxu2  ;;  %v2372_v28 = vpop.f32.mrf.mxu0  ;;  %v3564_v12 = vunpack.c.l.b16 %v3222_v25  ;;  %v13215_v60 = vrot.slane %v3233_v9, 5  ;;  %v4954_v18 = vshll.u32 %v11108_v20, 16  ;;  %v4958_v14 = vshrl.u32 %v11108_v20, 16  ;;  %v11109_v20 = vld [vmem:[%s12226_s20 + $0x38] sm:$0x1] }
 0x1f3   : > { %v13204_v24 = vadd.f32 %v13143_v8, %v2823_v56  ;;  %v3226_v35 = vrot.slane %v3224_v33, 4  ;;  %v5542_v33 = vunpack.c.l.b16 %v4933_v53  ;;  %v11067_v9 = vrot.slane %v11051_v1, 9  ;;  %v13238_v53 = vld [vmem:[%s12226_s20 + $0x40] sm:$0xf] }
 0x1f4   : > { %v1716_v0 = vpop.f32.mrf.mxu3  ;;  %v3594_v25 = vpack.c.b16 %v3564_v12, %v3563_v11  ;;  %v13231_v11 = vrot.slane %v4954_v18, 5  ;;  %v4960_v12 = vrot.slane %v4958_v14, 4  ;;  %v3245_v1 = vrot.slane %v3243_v55, 5 }
 0x1f5   : > { %16270 = vst [vmem:[#allocation19_spill] sm:$0xff] %v13204_v24  ;;  %v1772_v39 = vadd.f32 %v1716_v0, %v12742_v27  ;;  %v3239_v27 = vrot.slane %v3237_v15, 4  ;;  %v3230_v43 = vor.u32 %v3229_v46, %v3226_v35  ;;  %v3863_v15 = vrot.slane %v3861_v41, 4  ;;  %v10995_v24 = vld [vmem:[%s12226_s20 + $0x44] sm:$0x1] }
 0x1f7   : > { %11243 = vmatmul.msk.bf16.gmra.mxu2 %vm754_vm3, %v5571_v51  ;;  %v2426_v8 = vadd.f32 %v2370_v21, %v1772_v39  ;;  %v4943_v21 = vsel %vm12265_vm7, %v4938_v30, %v4942_v3  ;;  %v13225_v47 = vpop.f32.mrf.mxu1  ;;  %v4945_v51 = vshrl.u32 %v11107_v6, 16  ;;  %v3240_v19 = vor.u32 %v3239_v27, %v13215_v60 }
 0x1f8   : > { %v5543_v0 = vunpack.c.l.b16 %v4943_v21  ;;  %v3864_v30 = vrot.slane %v10992_v17, 5  ;;  %v4950_v6 = vrot.slane %v4948_v36, 5  ;;  %v3231_v46 = vrot.slane %v3230_v43, 4 }
 0x1f9   : > { %v13219_v4 = vadd.f32 %v13145_v57, %v2426_v8  ;;  %v4947_v3 = vrot.slane %v4945_v51, 4  ;;  %v10993_v8 = vld [vmem:[%s12226_s20 + $0x3c] sm:$0xf]  ;;  %v3241_v21 = vrot.slane %v3240_v19, 4  ;;  %v4964_v43 = vshll.u32 %v11109_v20, 16 }
 0x1fa   : > { %v13221_v56 = vpop.f32.mrf.mxu2  ;;  %v2375_v26 = vpop.f32.mrf.mxu0  ;;  %v5572_v27 = vpack.c.b16 %v5543_v0, %v5542_v33  ;;  %v3865_v17 = vsel %vm12237_vm6, %v3863_v15, %v3864_v30  ;;  %v3248_v51 = vshrl.u32 %v10993_v8, 16  ;;  %v3251_v36 = vshll.u32 %v10993_v8, 16  ;;  %v11110_v15 = vld [vmem:[%s12226_s20 + $0x3c] sm:$0xf] }
 0x1fb   : > { %v4961_v33 = vor.u32 %v4960_v12, %v13231_v11  ;;  %v3246_v0 = vsel %vm12265_vm7, %v3241_v21, %v3245_v1  ;;  %v11111_v12 = vld [vmem:[%s12226_s20 + $0x40] sm:$0xf]  ;;  %v4966_v20 = vrot.slane %v4964_v43, 5  ;;  %v4969_v21 = vshrl.u32 %v11110_v15, 16 }
 0x1fc   : > { %v1718_v57 = vpop.f32.mrf.mxu3  ;;  %v4972_v1 = vshll.u32 %v11110_v15, 16  ;;  %v3267_v43 = vshll.u32 %v10995_v24, 16 }
 0x1fd   : > { %v1773_v39 = vadd.f32 %v1718_v57, %v12758_v13  ;;  %11083 = vmatmul.msk.bf16.gmra.mxu0 %vm754_vm3, %v3992_v50  ;;  %v3862_v13 = vsel %vm12237_vm6, %v11067_v9, %v3861_v41  ;;  %v3257_v41 = vshll.u32 %v13238_v53, 16  ;;  %v3236_v57 = vsel %vm12265_vm7, %v3231_v46, %v13215_v60 }
 0x1fe   : > { %v3963_v19 = vunpack.c.l.b16 %v3862_v13  ;;  %v3964_v9 = vunpack.c.l.b16 %v3865_v17  ;;  %v4962_v8 = vrot.slane %v4961_v33, 4  ;;  %v3566_v13 = vunpack.c.l.b16 %v3246_v0 }
 0x1ff   : > { %v13234_v35 = vadd.f32 %v2372_v28, %v1773_v39  ;;  %v4951_v28 = vor.u32 %v4950_v6, %v4947_v3  ;;  %v13249_v14 = vpop.f32.mrf.mxu1  ;;  %v3250_v3 = vrot.slane %v3248_v51, 4  ;;  %v3253_v6 = vrot.slane %v3251_v36, 5 }
 0x200   : > { %v13264_v45 = vrot.slane %v3257_v41, 5  ;;  %v3993_v17 = vpack.c.b16 %v3964_v9, %v3963_v19  ;;  %v4971_v0 = vrot.slane %v4969_v21, 4  ;;  %v4974_v19 = vrot.slane %v4972_v1, 5 }
 0x201   : > { %11034 = vmatmul.msk.bf16.gmra.mxu3 %vm754_vm3, %v3594_v25  ;;  %v3261_v25 = vshrl.u32 %v13238_v53, 16  ;;  %v4952_v30 = vrot.slane %v4951_v28, 4  ;;  %v4982_v28 = vshrl.u32 %v11111_v12, 16  ;;  %v3254_v33 = vor.u32 %v3253_v6, %v3250_v3  ;;  %v10996_v6 = vld [vmem:[%s12226_s20 + $0x48] sm:$0xf] }
 0x202   : > { %v13243_v50 = vpop.f32.mrf.mxu2  ;;  %v13247_v18 = vpop.f32.mrf.mxu0 }
 0x203   : > { %16271 = vst [vmem:[#allocation20_spill] sm:$0xff] %v13243_v50  ;;  %v3263_v60 = vrot.slane %v3261_v25, 4  ;;  %v3565_v50 = vunpack.c.l.b16 %v3236_v57  ;;  %v4967_v25 = vsel %vm12265_vm7, %v4962_v8, %v4966_v20  ;;  %v3868_v57 = vrot.slane %v13238_v53, 5 }
 0x204   : > { %v1721_v55 = vpop.f32.mrf.mxu3  ;;  %v4984_v3 = vrot.slane %v4982_v28, 4  ;;  %v5545_v53 = vunpack.c.l.b16 %v4967_v25  ;;  %v3255_v8 = vrot.slane %v3254_v33, 4  ;;  %v3269_v20 = vrot.slane %v3267_v43, 5 }
 0x205   : > { %v1774_v39 = vadd.f32 %v1721_v55, %v12769_v32  ;;  %v4978_v32 = vshll.u32 %v11111_v12, 16  ;;  %v3264_v55 = vor.u32 %v3263_v60, %v13264_v45  ;;  %v11112_v60 = vld [vmem:[%s12226_s20 + $0x44] sm:$0x1]  ;;  %v3272_v28 = vshrl.u32 %v10996_v6, 16 }
 0x207   : > { %11244 = vmatmul.msk.bf16.gmra.mxu2 %vm754_vm3, %v5572_v27  ;;  %v2428_v46 = vadd.f32 %v2375_v26, %v1774_v39  ;;  %v4957_v27 = vsel %vm12265_vm7, %v4952_v30, %v13231_v11  ;;  %v11825_v26 = vld [vmem:[#allocation3 + $0x10] sm:$0xff]  ;;  %v3595_v11 = vpack.c.b16 %v3566_v13, %v3565_v50  ;;  %v13279_v39 = vpop.f32.mrf.mxu1  ;;  %v13281_v30 = vrot.slane %v4978_v32, 5 }
 0x208   : > { %5454 = vmatpush.bf16.msra.mxu1 %v11825_v26  ;;  %v5544_v15 = vunpack.c.l.b16 %v4957_v27  ;;  %v3265_v21 = vrot.slane %v3264_v55, 4  ;;  %v3870_v50 = vrot.slane %v3868_v57, 4  ;;  %v3871_v13 = vrot.slane %v10995_v24, 5 }
 0x209   : > { %v13267_v51 = vadd.f32 %v13193_v61, %v2428_v46  ;;  %v11052_v61 = vld [vmem:[%s12226_s20 + $0x3c] sm:$0xe]  ;;  %v13288_v46 = vld [vmem:[%s12226_s20 + $0x4c] sm:$0xf]  ;;  %v4975_v32 = vor.u32 %v4974_v19, %v4971_v0  ;;  %v3275_v26 = vshll.u32 %v10996_v6, 16  ;;  %v3260_v24 = vsel %vm12265_vm7, %v3255_v8, %v13264_v45 }
 0x20a   : > { %v13269_v36 = vpop.f32.mrf.mxu2  ;;  %v2380_v41 = vpop.f32.mrf.mxu0  ;;  %v11068_v1 = vrot.slane %v11052_v61, 9  ;;  %v3285_v33 = vshrl.u32 %v13288_v46, 16  ;;  %v5573_v55 = vpack.c.b16 %v5545_v53, %v5544_v15  ;;  %v3872_v61 = vsel %vm12237_vm6, %v3870_v50, %v3871_v13  ;;  %v11113_v50 = vld [vmem:[%s12226_s20 + $0x48] sm:$0xf] }
 0x20b   : > { %16272 = vst [vmem:[#allocation21_spill] sm:$0xff] %v13269_v36  ;;  %v3270_v0 = vsel %vm12265_vm7, %v3265_v21, %v3269_v20  ;;  %v4976_v19 = vrot.slane %v4975_v32, 4  ;;  %v3567_v20 = vunpack.c.l.b16 %v3260_v24 }
 0x20c   : > { %v1723_v9 = vpop.f32.mrf.mxu3  ;;  %v3287_v45 = vrot.slane %v3285_v33, 4  ;;  %v3568_v32 = vunpack.c.l.b16 %v3270_v0  ;;  %v3875_v33 = vrot.slane %v13288_v46, 5  ;;  %v4996_v0 = vshll.u32 %v11113_v50, 16 }
 0x20d   : > { %v1775_v12 = vadd.f32 %v1723_v9, %v12786_v7  ;;  %11084 = vmatmul.msk.bf16.gmra.mxu0 %vm754_vm3, %v3993_v17  ;;  %v4985_v7 = vor.u32 %v4984_v3, %v13281_v30  ;;  %v4988_v9 = vshll.u32 %v11112_v60, 16  ;;  %v3281_v17 = vshll.u32 %v13288_v46, 16 }
 0x20e   : > { %v3277_v3 = vrot.slane %v3275_v26, 5  ;;  %v3966_v60 = vunpack.c.l.b16 %v3872_v61  ;;  %v4993_v61 = vshrl.u32 %v11113_v50, 16 }
 0x20f   : > { %v13291_v27 = vadd.f32 %v13247_v18, %v1775_v12  ;;  %v3869_v18 = vsel %vm12237_vm6, %v11068_v1, %v3868_v57  ;;  %v4986_v15 = vrot.slane %v4985_v7, 4  ;;  %v4990_v12 = vrot.slane %v4988_v9, 5  ;;  %v10998_v1 = vld [vmem:[%s12226_s20 + $0x50] sm:$0x1]  ;;  %v13313_v21 = vpop.f32.mrf.mxu1  ;;  %v11114_v7 = vld [vmem:[%s12226_s20 + $0x4c] sm:$0xf] }
 0x210   : > { %v13308_v53 = vrot.slane %v3281_v17, 5  ;;  %v3965_v57 = vunpack.c.l.b16 %v3869_v18  ;;  %v3291_v17 = vshll.u32 %v10998_v1, 16  ;;  %v11053_v18 = vld [vmem:[%s12226_s20 + $0x48] sm:$0xe]  ;;  %v4995_v50 = vrot.slane %v4993_v61, 4 }
 0x211   : > { %11035 = vmatmul.msk.bf16.gmra.mxu3 %vm754_vm3, %v3595_v11  ;;  %v3274_v11 = vrot.slane %v3272_v28, 4  ;;  %v4981_v28 = vsel %vm12265_vm7, %v4976_v19, %v13281_v30  ;;  %v5002_v19 = vshll.u32 %v11114_v7, 16 }
 0x212   : > { %v13297_v43 = vpop.f32.mrf.mxu2  ;;  %v2382_v25 = vpop.f32.mrf.mxu0  ;;  %v3288_v9 = vor.u32 %v3287_v45, %v13308_v53 }
 0x213   : > { %16273 = vst [vmem:[#allocation22_spill] sm:$0xff] %v13297_v43  ;;  %v3278_v26 = vor.u32 %v3277_v3, %v3274_v11  ;;  %v5006_v11 = vshrl.u32 %v11114_v7, 16  ;;  %v3596_v3 = vpack.c.b16 %v3568_v32, %v3567_v20  ;;  %v13332_v7 = vrot.slane %v5002_v19, 5 }
 0x214   : > { %v1726_v6 = vpop.f32.mrf.mxu3  ;;  %v3289_v46 = vrot.slane %v3288_v9, 4 }
 0x215   : > { %v1776_v8 = vadd.f32 %v1726_v6, %v12798_v52  ;;  %v4991_v52 = vsel %vm12265_vm7, %v4986_v15, %v4990_v12  ;;  %v5546_v6 = vunpack.c.l.b16 %v4981_v28  ;;  %v3279_v12 = vrot.slane %v3278_v26, 4  ;;  %v11115_v28 = vld [vmem:[%s12226_s20 + $0x50] sm:$0x1]  ;;  %v10999_v26 = vld [vmem:[%s12226_s20 + $0x54] sm:$0xf] }
 0x216   : > { %v5547_v15 = vunpack.c.l.b16 %v4991_v52  ;;  %v5008_v20 = vrot.slane %v5006_v11, 4  ;;  %v5012_v19 = vshll.u32 %v11115_v28, 16  ;;  %v3296_v11 = vshrl.u32 %v10999_v26, 16  ;;  %v11001_v28 = vld [vmem:[%s12226_s20 + $0x5c] sm:$0x1] }
 0x217   : > { %11245 = vmatmul.msk.bf16.gmra.mxu2 %vm754_vm3, %v5573_v55  ;;  %v2430_v13 = vadd.f32 %v2380_v41, %v1776_v8  ;;  %v3994_v41 = vpack.c.b16 %v3966_v60, %v3965_v57  ;;  %v3293_v8 = vrot.slane %v3291_v17, 5  ;;  %v3878_v60 = vrot.slane %v10998_v1, 5  ;;  %v13338_v9 = vpop.f32.mrf.mxu1 }
 0x218   : > { %v5574_v52 = vpack.c.b16 %v5547_v15, %v5546_v6  ;;  %v3284_v17 = vsel %vm12265_vm7, %v3279_v12, %v13308_v53  ;;  %v5009_v53 = vor.u32 %v5008_v20, %v13332_v7  ;;  %v3298_v20 = vrot.slane %v3296_v11, 4 }
 0x219   : > { %v13325_v55 = vadd.f32 %v13249_v14, %v2430_v13  ;;  %v11069_v14 = vrot.slane %v11053_v18, 9  ;;  %v3877_v13 = vrot.slane %v3875_v33, 4 }
 0x21a   : > { %v13327_v24 = vpop.f32.mrf.mxu2  ;;  %v2385_v30 = vpop.f32.mrf.mxu0 }
 0x21b   : > { %16274 = vst [vmem:[#allocation23_spill] sm:$0xff] %v13325_v55  ;;  %v3879_v18 = vsel %vm12237_vm6, %v3877_v13, %v3878_v60  ;;  %v11116_v60 = vld [vmem:[%s12226_s20 + $0x54] sm:$0xf] }
 0x21c   : > { %16275 = vst [vmem:[#allocation24_spill] sm:$0xff] %v13327_v24  ;;  %v1728_v45 = vpop.f32.mrf.mxu3  ;;  %v4998_v24 = vrot.slane %v4996_v0, 5  ;;  %v3968_v13 = vunpack.c.l.b16 %v3879_v18  ;;  %v5020_v18 = vshll.u32 %v11116_v60, 16 }
 0x21d   : > { %v1777_v57 = vadd.f32 %v1728_v45, %v12814_v38  ;;  %11085 = vmatmul.msk.bf16.gmra.mxu0 %vm754_vm3, %v3994_v41  ;;  %v13344_v38 = vld [vmem:[%s12226_s20 + $0x58] sm:$0xf]  ;;  %v3294_v41 = vsel %vm12265_vm7, %v3289_v46, %v3293_v8  ;;  %v13366_v45 = vunpack.c.l.b16 %v3284_v17 }
 0x21e   : > { %v4999_v61 = vor.u32 %v4998_v24, %v4995_v50  ;;  %v3305_v6 = vshll.u32 %v13344_v38, 16  ;;  %v3309_v15 = vshrl.u32 %v13344_v38, 16  ;;  %v2825_v24 = vadd.f32 %v13173_v58, %v13234_v35  ;;  %v11117_v50 = vld [vmem:[%s12226_s20 + $0x58] sm:$0xf] }
 0x21f   : > { %v13334_v32 = vadd.f32 %v2382_v25, %v1777_v57  ;;  %v3876_v25 = vsel %vm12237_vm6, %v11069_v14, %v3875_v33  ;;  %v13362_v33 = vadd.f32 %v13168_v23, %v13219_v4  ;;  %v13368_v46 = vunpack.c.l.b16 %v3294_v41 }
 0x220   : > { %v3967_v14 = vunpack.c.l.b16 %v3876_v25  ;;  %v5000_v57 = vrot.slane %v4999_v61, 4  ;;  %v5010_v23 = vrot.slane %v5009_v53, 4  ;;  %v5014_v4 = vrot.slane %v5012_v19, 5  ;;  %v11824_v19 = vld [vmem:[#allocation3 + $0x8] sm:$0xff] }
 0x221   : > { %11036 = vmatmul.msk.bf16.gmra.mxu3 %vm754_vm3, %v3596_v3  ;;  %v3299_v3 = vshll.u32 %v10999_v26, 16  ;;  %16277 = vst [vmem:[#allocation26_spill] sm:$0xff] %v13362_v33  ;;  %v13375_v26 = vrot.slane %v3305_v6, 5  ;;  %v3311_v17 = vrot.slane %v3309_v15, 4  ;;  %v3882_v41 = vrot.slane %v13344_v38, 5  ;;  %v13388_v38 = vpop.f32.mrf.mxu1  ;;  %5455 = vmatpush.bf16.msra.mxu1 %v11824_v19 }
 0x222   : > { %v13347_v1 = vpop.f32.mrf.mxu2  ;;  %v13355_v0 = vpop.f32.mrf.mxu0  ;;  %v5017_v25 = vshrl.u32 %v11116_v60, 16  ;;  %v5026_v61 = vshll.u32 %v11117_v50, 16  ;;  %v3995_v53 = vpack.c.b16 %v3968_v13, %v3967_v14  ;;  %v5030_v11 = vshrl.u32 %v11117_v50, 16  ;;  %v11002_v60 = vld [vmem:[%s12226_s20 + $0x60] sm:$0xf] }
 0x223   : > { %16276 = vst [vmem:[#allocation25_spill] sm:$0xff] %v13347_v1  ;;  %v3301_v58 = vrot.slane %v3299_v3, 5  ;;  %v5005_v6 = vsel %vm12265_vm7, %v5000_v57, %v13332_v7  ;;  %v3884_v14 = vrot.slane %v3882_v41, 4  ;;  %v13398_v13 = vld [vmem:[%s12226_s20 + $0x64] sm:$0xf]  ;;  %v13401_v50 = vadd.f32 %v13191_v63, %v2825_v24 }
 0x224   : > { %v1731_v12 = vpop.f32.mrf.mxu3  ;;  %v5019_v7 = vrot.slane %v5017_v25, 4  ;;  %v5022_v57 = vrot.slane %v5020_v18, 5  ;;  %v13403_v1 = vrot.slane %v5026_v61, 5  ;;  %v3333_v63 = vshrl.u32 %v13398_v13, 16 }
 0x225   : > { %v1778_v8 = vadd.f32 %v1731_v12, %v12825_v10  ;;  %v11054_v10 = vld [vmem:[%s12226_s20 + $0x54] sm:$0xe]  ;;  %v3302_v15 = vor.u32 %v3301_v58, %v3298_v20  ;;  %16280 = vst [vmem:[#allocation29_spill] sm:$0xff] %v13401_v50  ;;  %v5032_v20 = vrot.slane %v5030_v11, 4  ;;  %v3320_v58 = vshrl.u32 %v11002_v60, 16 }
 0x226   : > { %v5023_v61 = vor.u32 %v5022_v57, %v5019_v7 }
 0x227   : > { %11246 = vmatmul.msk.bf16.gmra.mxu2 %vm754_vm3, %v5574_v52  ;;  %v2432_v35 = vadd.f32 %v2385_v30, %v1778_v8  ;;  %v3597_v30 = vpack.c.b16 %v13368_v46, %v13366_v45  ;;  %v3315_v8 = vshll.u32 %v11001_v28, 16  ;;  %v3312_v45 = vor.u32 %v3311_v17, %v13375_v26 }
 0x228   : > { %v11070_v46 = vrot.slane %v11054_v10, 9  ;;  %v3323_v17 = vshll.u32 %v11002_v60, 16  ;;  %v5548_v10 = vunpack.c.l.b16 %v5005_v6 }
 0x229   : > { %v13380_v12 = vadd.f32 %v13313_v21, %v2432_v35  ;;  %v5015_v21 = vsel %vm12265_vm7, %v5010_v23, %v5014_v4  ;;  %v11118_v4 = vld [vmem:[%s12226_s20 + $0x5c] sm:$0x1]  ;;  %v3313_v25 = vrot.slane %v3312_v45, 4  ;;  %v3317_v18 = vrot.slane %v3315_v8, 5  ;;  %v11004_v8 = vld [vmem:[%s12226_s20 + $0x68] sm:$0x1] }
 0x22a   : > { %v13382_v52 = vpop.f32.mrf.mxu2  ;;  %v13386_v3 = vpop.f32.mrf.mxu0  ;;  %v5549_v19 = vunpack.c.l.b16 %v5015_v21  ;;  %v5033_v21 = vor.u32 %v5032_v20, %v13403_v1  ;;  %v3325_v60 = vrot.slane %v3323_v17, 5  ;;  %v11119_v20 = vld [vmem:[%s12226_s20 + $0x60] sm:$0xf] }
 0x22b   : > { %16278 = vst [vmem:[#allocation27_spill] sm:$0xff] %v13380_v12  ;;  %v3329_v12 = vshll.u32 %v13398_v13, 16 }
 0x22c   : > { %16279 = vst [vmem:[#allocation28_spill] sm:$0xff] %v13382_v52  ;;  %v1733_v35 = vpop.f32.mrf.mxu3  ;;  %v3885_v52 = vrot.slane %v11001_v28, 5  ;;  %v3303_v28 = vrot.slane %v3302_v15, 4  ;;  %v5575_v45 = vpack.c.b16 %v5549_v19, %v5548_v10  ;;  %v3339_v10 = vshll.u32 %v11004_v8, 16  ;;  %v11120_v19 = vld [vmem:[%s12226_s20 + $0x64] sm:$0xf] }
 0x22d   : > { %v1779_v23 = vadd.f32 %v1733_v35, %v12844_v59  ;;  %11086 = vmatmul.msk.bf16.gmra.mxu0 %vm754_vm3, %v3995_v53  ;;  %v3883_v59 = vsel %vm12237_vm6, %v11070_v46, %v3882_v41  ;;  %v5036_v53 = vshll.u32 %v11118_v4, 16  ;;  %v13422_v35 = vrot.slane %v3329_v12, 5 }
 0x22e   : > { %v3886_v6 = vsel %vm12237_vm6, %v3884_v14, %v3885_v52  ;;  %v3335_v41 = vrot.slane %v3333_v63, 4  ;;  %v3318_v46 = vsel %vm12265_vm7, %v3313_v25, %v3317_v18  ;;  %v13429_v14 = vpop.f32.mrf.mxu1  ;;  %v3969_v7 = vunpack.c.l.b16 %v3883_v59  ;;  %v11055_v59 = vld [vmem:[%s12226_s20 + $0x60] sm:$0xe] }
 0x22f   : > { %v13411_v24 = vadd.f32 %v13355_v0, %v1779_v23  ;;  %v3322_v0 = vrot.slane %v3320_v58, 4  ;;  %v3970_v57 = vunpack.c.l.b16 %v3886_v6  ;;  %v5024_v23 = vrot.slane %v5023_v61, 4 }
 0x230   : > { %v5038_v4 = vrot.slane %v5036_v53, 5  ;;  %v5034_v58 = vrot.slane %v5033_v21, 4  ;;  %v3336_v63 = vor.u32 %v3335_v41, %v13422_v35  ;;  %v3572_v18 = vunpack.c.l.b16 %v3318_v46 }
 0x231   : > { %11037 = vmatmul.msk.bf16.gmra.mxu3 %vm754_vm3, %v3597_v30  ;;  %v3308_v30 = vsel %vm12265_vm7, %v3303_v28, %v13375_v26  ;;  %v3326_v17 = vor.u32 %v3325_v60, %v3322_v0  ;;  %v3889_v28 = vrot.slane %v13398_v13, 5  ;;  %v5041_v61 = vshrl.u32 %v11119_v20, 16 }
 0x232   : > { %v13416_v11 = vpop.f32.mrf.mxu2  ;;  %v2392_v15 = vpop.f32.mrf.mxu0  ;;  %v3571_v26 = vunpack.c.l.b16 %v3308_v30  ;;  %v5044_v53 = vshll.u32 %v11119_v20, 16  ;;  %v3996_v6 = vpack.c.b16 %v3970_v57, %v3969_v7  ;;  %v5050_v21 = vshll.u32 %v11120_v19, 16 }
 0x233   : > { %16281 = vst [vmem:[#allocation30_spill] sm:$0xff] %v13416_v11  ;;  %v5054_v0 = vshrl.u32 %v11120_v19, 16  ;;  %v3327_v13 = vrot.slane %v3326_v17, 4  ;;  %v3341_v41 = vrot.slane %v3339_v10, 5  ;;  %v3337_v46 = vrot.slane %v3336_v63, 4 }
 0x234   : > { %v1736_v52 = vpop.f32.mrf.mxu3  ;;  %v3891_v7 = vrot.slane %v3889_v28, 4  ;;  %v5043_v57 = vrot.slane %v5041_v61, 4  ;;  %v3598_v11 = vpack.c.b16 %v3572_v18, %v3571_v26  ;;  %v13456_v17 = vld [vmem:[%s12226_s20 + $0x70] sm:$0xf] }
 0x235   : > { %v1780_v12 = vadd.f32 %v1736_v52, %v12756_v37  ;;  %v5029_v37 = vsel %vm12265_vm7, %v5024_v23, %v13403_v1  ;;  %v11071_v52 = vrot.slane %v11055_v59, 9  ;;  %v3892_v1 = vrot.slane %v11004_v8, 5 }
 0x236   : > { %v5046_v23 = vrot.slane %v5044_v53, 5  ;;  %v5056_v19 = vrot.slane %v5054_v0, 4  ;;  %v2793_v10 = vpop.f32.mrf.mxu1  ;;  %v3332_v8 = vsel %vm12265_vm7, %v3327_v13, %v13422_v35  ;;  %v3342_v63 = vsel %vm12265_vm7, %v3337_v46, %v3341_v41  ;;  %v11122_v41 = vld [vmem:[%s12226_s20 + $0x6c] sm:$0xf] }
 0x237   : > { %11247 = vmatmul.msk.bf16.gmra.mxu2 %vm754_vm3, %v5575_v45  ;;  %v2434_v25 = vadd.f32 %v13386_v3, %v1780_v12  ;;  %v5039_v3 = vsel %vm12265_vm7, %v5034_v58, %v5038_v4  ;;  %v11121_v12 = vld [vmem:[%s12226_s20 + $0x68] sm:$0x1]  ;;  %v5550_v4 = vunpack.c.l.b16 %v5029_v37  ;;  %v3890_v59 = vsel %vm12237_vm6, %v11071_v52, %v3889_v28 }
 0x238   : > { %v5551_v58 = vunpack.c.l.b16 %v5039_v3  ;;  %v5047_v18 = vor.u32 %v5046_v23, %v5043_v57  ;;  %v5060_v61 = vshll.u32 %v11121_v12, 16  ;;  %v3353_v35 = vshll.u32 %v13456_v17, 16  ;;  %v11123_v57 = vld [vmem:[%s12226_s20 + $0x70] sm:$0xf] }
 0x239   : > { %v13443_v60 = vadd.f32 %v13388_v38, %v2434_v25  ;;  %v13450_v38 = vrot.slane %v5050_v21, 5  ;;  %v11005_v25 = vld [vmem:[%s12226_s20 + $0x6c] sm:$0xf]  ;;  %v3357_v21 = vshrl.u32 %v13456_v17, 16  ;;  %v3971_v13 = vunpack.c.l.b16 %v3890_v59 }
 0x23a   : > { %v13445_v45 = vpop.f32.mrf.mxu2  ;;  %v2395_v30 = vpop.f32.mrf.mxu0  ;;  %v3344_v53 = vshrl.u32 %v11005_v25, 16  ;;  %v3347_v37 = vshll.u32 %v11005_v25, 16  ;;  %v5576_v3 = vpack.c.b16 %v5551_v58, %v5550_v4  ;;  %v5048_v52 = vrot.slane %v5047_v18, 4  ;;  %v11007_v4 = vld [vmem:[%s12226_s20 + $0x74] sm:$0x1] }
 0x23b   : > { %16282 = vst [vmem:[#allocation31_spill] sm:$0xff] %v13443_v60  ;;  %v13483_v12 = vrot.slane %v3353_v35, 5  ;;  %v5065_v58 = vshrl.u32 %v11122_v41, 16  ;;  %v5078_v59 = vshrl.u32 %v11123_v57, 16 }
 0x23c   : > { %16283 = vst [vmem:[#allocation32_spill] sm:$0xff] %v13445_v45  ;;  %v1738_v20 = vpop.f32.mrf.mxu3 }
 0x23d   : > { %v1781_v45 = vadd.f32 %v1738_v20, %v12767_v42  ;;  %11087 = vmatmul.msk.bf16.gmra.mxu0 %vm754_vm3, %v3996_v6  ;;  %v3893_v42 = vsel %vm12237_vm6, %v3891_v7, %v3892_v1  ;;  %v5057_v6 = vor.u32 %v5056_v19, %v13450_v38  ;;  %v5062_v7 = vrot.slane %v5060_v61, 5 }
 0x23e   : > { %v3972_v46 = vunpack.c.l.b16 %v3893_v42  ;;  %v3346_v1 = vrot.slane %v3344_v53, 4  ;;  %v3349_v20 = vrot.slane %v3347_v37, 5  ;;  %v3359_v19 = vrot.slane %v3357_v21, 4 }
 0x23f   : > { %v13467_v26 = vadd.f32 %v2392_v15, %v1781_v45  ;;  %v13477_v15 = vunpack.c.l.b16 %v3332_v8  ;;  %v13479_v45 = vunpack.c.l.b16 %v3342_v63  ;;  %v5068_v8 = vshll.u32 %v11122_v41, 16  ;;  %v13500_v41 = vld [vmem:[%s12226_s20 + $0x7c] sm:$0xf] }
 0x240   : > { %v5074_v63 = vshll.u32 %v11123_v57, 16  ;;  %v3997_v61 = vpack.c.b16 %v3972_v46, %v3971_v13  ;;  %v5053_v53 = vsel %vm12265_vm7, %v5048_v52, %v13450_v38  ;;  %v3350_v35 = vor.u32 %v3349_v20, %v3346_v1  ;;  %v11823_v13 = vld [vmem:[#allocation3] sm:$0xff] }
 0x241   : > { %11038 = vmatmul.msk.bf16.gmra.mxu3 %vm754_vm3, %v3598_v11  ;;  %v5058_v11 = vrot.slane %v5057_v6, 4  ;;  %v3599_v18 = vpack.c.b16 %v13479_v45, %v13477_v15  ;;  %v11008_v6 = vld [vmem:[%s12226_s20 + $0x78] sm:$0xf]  ;;  %v3360_v21 = vor.u32 %v3359_v19, %v13483_v12  ;;  %v11056_v45 = vld [vmem:[%s12226_s20 + $0x6c] sm:$0xe]  ;;  %v3896_v38 = vrot.slane %v13456_v17, 5  ;;  %5456 = vmatpush.bf16.msra.mxu1 %v11823_v13 }
 0x242   : > { %v13473_v28 = vpop.f32.mrf.mxu2  ;;  %v13475_v0 = vpop.f32.mrf.mxu0  ;;  %v5067_v46 = vrot.slane %v5065_v58, 4  ;;  %v5070_v52 = vrot.slane %v5068_v8, 5  ;;  %v5080_v1 = vrot.slane %v5078_v59, 4  ;;  %v5552_v20 = vunpack.c.l.b16 %v5053_v53 }
 0x243   : > { %16284 = vst [vmem:[#allocation33_spill] sm:$0xff] %v13473_v28  ;;  %v5063_v37 = vsel %vm12265_vm7, %v5058_v11, %v5062_v7  ;;  %v13510_v7 = vrot.slane %v5074_v63, 5  ;;  %v3371_v11 = vshll.u32 %v11008_v6, 16  ;;  %v3361_v58 = vrot.slane %v3360_v21, 4 }
 0x244   : > { %v1741_v23 = vpop.f32.mrf.mxu3  ;;  %v5553_v19 = vunpack.c.l.b16 %v5063_v37  ;;  %v11072_v28 = vrot.slane %v11056_v45, 9  ;;  %v3898_v59 = vrot.slane %v3896_v38, 4  ;;  %v3899_v53 = vrot.slane %v11007_v4, 5 }
 0x245   : > { %v1782_v25 = vadd.f32 %v1741_v23, %v12784_v54  ;;  %v13494_v54 = vpop.f32.mrf.mxu1  ;;  %v3368_v23 = vshrl.u32 %v11008_v6, 16  ;;  %v5071_v6 = vor.u32 %v5070_v52, %v5067_v46  ;;  %v5081_v37 = vor.u32 %v5080_v1, %v13510_v7 }
 0x246   : > { %v3373_v60 = vrot.slane %v3371_v11, 5  ;;  %v5577_v46 = vpack.c.b16 %v5553_v19, %v5552_v20  ;;  %v3900_v52 = vsel %vm12237_vm6, %v3898_v59, %v3899_v53 }
 0x247   : > { %11248 = vmatmul.msk.bf16.gmra.mxu2 %vm754_vm3, %v5576_v3  ;;  %v2436_v42 = vadd.f32 %v2395_v30, %v1782_v25  ;;  %v3363_v3 = vshll.u32 %v11007_v4, 16  ;;  %v3377_v25 = vshll.u32 %v13500_v41, 16  ;;  %v5072_v1 = vrot.slane %v5071_v6, 4 }
 0x249   : > { %v13502_v30 = vadd.f32 %v2793_v10, %v2436_v42  ;;  %v11124_v10 = vld [vmem:[%s12226_s20 + $0x74] sm:$0x1]  ;;  %v3381_v42 = vshrl.u32 %v13500_v41, 16  ;;  %v3365_v8 = vrot.slane %v3363_v3, 5  ;;  %v13524_v21 = vrot.slane %v3377_v25, 5 }
 0x24a   : > { %v13504_v15 = vpop.f32.mrf.mxu2  ;;  %v13508_v57 = vpop.f32.mrf.mxu0  ;;  %v5084_v13 = vshll.u32 %v11124_v10, 16 }
 0x24b   : > { %16285 = vst [vmem:[#allocation34_spill] sm:$0xff] %v13502_v30  ;;  %v3370_v30 = vrot.slane %v3368_v23, 4  ;;  %v3383_v3 = vrot.slane %v3381_v42, 4  ;;  %v3366_v4 = vsel %vm12265_vm7, %v3361_v58, %v3365_v8  ;;  %v11126_v23 = vld [vmem:[%s12226_s20 + $0x7c] sm:$0xf]  ;;  %v3974_v58 = vunpack.c.l.b16 %v3900_v52 }
 0x24c   : > { %16286 = vst [vmem:[#allocation35_spill] sm:$0xff] %v13504_v15  ;;  %v1743_v17 = vpop.f32.mrf.mxu3  ;;  %v3351_v15 = vrot.slane %v3350_v35, 4  ;;  %v13522_v35 = vld [vmem:[%s12226_s20 + $0x80] sm:$0x1]  ;;  %v5086_v10 = vrot.slane %v5084_v13, 5  ;;  %v13545_v20 = vunpack.c.l.b16 %v3366_v4  ;;  %v5098_v59 = vshll.u32 %v11126_v23, 16 }
 0x24d   : > { %v1783_v63 = vadd.f32 %v1743_v17, %v12796_v16  ;;  %11088 = vmatmul.msk.bf16.gmra.mxu0 %vm754_vm3, %v3997_v61  ;;  %v11125_v61 = vld [vmem:[%s12226_s20 + $0x78] sm:$0xf]  ;;  %v3374_v25 = vor.u32 %v3373_v60, %v3370_v30  ;;  %v5077_v60 = vsel %vm12265_vm7, %v5072_v1, %v13510_v7  ;;  %v3903_v30 = vrot.slane %v13500_v41, 5  ;;  %v11127_v1 = vld [vmem:[%s12226_s20 + $0x80] sm:$0x1] }
 0x24e   : > { %v3356_v16 = vsel %vm12265_vm7, %v3351_v15, %v13483_v12  ;;  %v2798_v12 = vpop.f32.mrf.mxu1  ;;  %v5082_v15 = vrot.slane %v5081_v37, 4  ;;  %v11057_v8 = vld [vmem:[%s12226_s20 + $0x78] sm:$0xe]  ;;  %v5102_v6 = vshrl.u32 %v11126_v23, 16  ;;  %v12125_v52 = vmov 0  }
 0x24f   : > { %v13519_v43 = vadd.f32 %v13475_v0, %v1783_v63  ;;  %v3897_v0 = vsel %vm12237_vm6, %v11072_v28, %v3896_v38  ;;  %v13543_v42 = vunpack.c.l.b16 %v3356_v16  ;;  %v3384_v28 = vor.u32 %v3383_v3, %v13524_v21  ;;  %v11011_v16 = vld [vmem:[%s12226_s20 + $0x84] sm:$0xf]  ;;  %4247 = vst [vmem:[#allocation2] sm:$0xf] %v12125_v52 }
 0x250   : > { %v5089_v38 = vshrl.u32 %v11125_v61, 16  ;;  %v3973_v17 = vunpack.c.l.b16 %v3897_v0  ;;  %v5092_v63 = vshll.u32 %v11125_v61, 16  ;;  %v5087_v37 = vsel %vm12265_vm7, %v5082_v15, %v5086_v10  ;;  %4248 = vst [vmem:[#allocation2 + $0x4] sm:$0xf] %v12125_v52 }
 0x251   : > { %11039 = vmatmul.msk.bf16.gmra.mxu3 %vm754_vm3, %v3599_v18  ;;  %v3387_v18 = vshll.u32 %v13522_v35, 16  ;;  %v3375_v13 = vrot.slane %v3374_v25, 4  ;;  %v3385_v61 = vrot.slane %v3384_v28, 4  ;;  %v3600_v41 = vpack.c.b16 %v13545_v20, %v13543_v42  ;;  %4249 = vst [vmem:[#allocation2 + $0x8] sm:$0x1] %v12125_v52 }
 0x252   : > { %v13533_v45 = vpop.f32.mrf.mxu2  ;;  %v13540_v11 = vpop.f32.mrf.mxu0  ;;  %v5091_v0 = vrot.slane %v5089_v38, 4  ;;  %v3998_v7 = vpack.c.b16 %v3974_v58, %v3973_v17  ;;  %v13562_v23 = vrot.slane %v5098_v59, 5  ;;  %v5104_v25 = vrot.slane %v5102_v6, 4  ;;  %4251 = vst [vmem:[#allocation2 + $0xcc] sm:$0xf] %v12125_v52 }
 0x253   : > { %16287 = vst [vmem:[#allocation36_spill] sm:$0xff] %v13533_v45  ;;  %v3389_v3 = vrot.slane %v3387_v18, 5  ;;  %v13571_v18 = vld [vmem:[%s12226_s20 + $0x88] sm:$0xf]  ;;  %v3392_v28 = vshrl.u32 %v11011_v16, 16  ;;  %v13575_v42 = vunpack.c.l.b16 %v5087_v37  ;;  %v3395_v20 = vshll.u32 %v11011_v16, 16 }
 0x254   : > { %v1746_v19 = vpop.f32.mrf.mxu3  ;;  %v3905_v17 = vrot.slane %v3903_v30, 4  ;;  %v3906_v58 = vrot.slane %v13522_v35, 5  ;;  %4252 = vst [vmem:[#allocation2 + $0xd0] sm:$0xf] %v12125_v52  ;;  %v3401_v35 = vshll.u32 %v13571_v18, 16  ;;  %v5108_v16 = vshll.u32 %v11127_v1, 16 }
 0x255   : > { %v1784_v53 = vadd.f32 %v1746_v19, %v12812_v2  ;;  %v11073_v2 = vrot.slane %v11057_v8, 9  ;;  %4253 = vst [vmem:[#allocation2 + $0xd4] sm:$0x1] %v12125_v52  ;;  %v3910_v1 = vrot.slane %v13571_v18, 5 }
 0x257   : > { %11249 = vmatmul.msk.bf16.gmra.mxu2 %vm754_vm3, %v5577_v46  ;;  %v2438_v4 = vadd.f32 %v13508_v57, %v1784_v53  ;;  %v5094_v46 = vrot.slane %v5092_v63, 5  ;;  %v13568_v57 = vunpack.c.l.b16 %v5077_v60  ;;  %v13582_v19 = vsel %vm12237_vm6, %v11073_v2, %v3903_v30  ;;  %v4258_v63 = vld [vmem:[#allocation2 + $0xc] sm:$0x1]  ;;  %v13591_v53 = vpop.f32.mrf.mxu1 }
 0x258   : > { %v4259_v60 = vsel %vm13587_vm10, 0, %v4258_v63  ;;  %v3405_v30 = vshrl.u32 %v13571_v18, 16  ;;  %v5110_v63 = vrot.slane %v5108_v16, 5  ;;  %v11130_v16 = vld [vmem:[%s12226_s20 + $0x8c] sm:$0x1] }
 0x259   : > { %v13564_v15 = vadd.f32 %v2798_v12, %v2438_v4  ;;  %v3380_v12 = vsel %vm12265_vm7, %v3375_v13, %v13524_v21  ;;  %v3390_v21 = vsel %vm12265_vm7, %v3385_v61, %v3389_v3  ;;  %4260 = vst [vmem:[#allocation2 + $0xc] sm:$0x1] %v4259_v60  ;;  %v5095_v37 = vor.u32 %v5094_v46, %v5091_v0  ;;  %v11807_v0 = vld [vmem:[#allocation2] sm:$0xff] }
 0x25a   : > { %v13566_v10 = vpop.f32.mrf.mxu2  ;;  %v13573_v38 = vpop.f32.mrf.mxu0  ;;  %v5105_v13 = vor.u32 %v5104_v25, %v13562_v23  ;;  %v5578_v3 = vpack.c.b16 %v13575_v42, %v13568_v57  ;;  %v3394_v4 = vrot.slane %v3392_v28, 4  ;;  %v3397_v61 = vrot.slane %v3395_v20, 5  ;;  %v11058_v46 = vld [vmem:[%s12226_s20 + $0x84] sm:$0xe]  ;;  %5457 = vmatmul.bf16.vlgmr.msra.gmra.mxu1 %v11807_v0 }
 0x25b   : > { %16288 = vst [vmem:[#allocation37_spill] sm:$0xff] %v13564_v15  ;;  %v13607_v52 = vunpack.c.l.b16 %v3380_v12  ;;  %v13614_v25 = vunpack.c.l.b16 %v3390_v21  ;;  %v3975_v57 = vunpack.c.l.b16 %v13582_v19  ;;  %v13617_v42 = vrot.slane %v3401_v35, 5  ;;  %v11128_v20 = vld [vmem:[%s12226_s20 + $0x84] sm:$0xf] }
 0x25c   : > { %16289 = vst [vmem:[#allocation38_spill] sm:$0xff] %v13566_v10  ;;  %v1748_v59 = vpop.f32.mrf.mxu3  ;;  %v3407_v28 = vrot.slane %v3405_v30, 4  ;;  %v5096_v18 = vrot.slane %v5095_v37, 4  ;;  %v5113_v19 = vshrl.u32 %v11128_v20, 16  ;;  %v3398_v21 = vor.u32 %v3397_v61, %v3394_v4  ;;  %v4308_v30 = vld [vmem:[#allocation2 + $0x14] sm:$0x1] }
 0x25d   : > { %v1785_v6 = vadd.f32 %v1748_v59, %v12823_v22  ;;  %11089 = vmatmul.msk.bf16.gmra.mxu0 %vm754_vm3, %v3998_v7  ;;  %v3907_v22 = vsel %vm12237_vm6, %v3905_v17, %v3906_v58  ;;  %v11013_v7 = vld [vmem:[%s12226_s20 + $0x8c] sm:$0x1]  ;;  %v5106_v58 = vrot.slane %v5105_v13, 4  ;;  %v5116_v60 = vshll.u32 %v11128_v20, 16 }
 0x25e   : > { %v3912_v10 = vrot.slane %v3910_v1, 4  ;;  %v3913_v45 = vrot.slane %v11013_v7, 5  ;;  %v4309_v37 = vsel %vm13626_vm12, 0, %v4308_v30  ;;  %v3408_v13 = vor.u32 %v3407_v28, %v13617_v42 }
 0x25f   : > { %v13605_v2 = vadd.f32 %v13540_v11, %v1785_v6  ;;  %v11129_v11 = vld [vmem:[%s12226_s20 + $0x88] sm:$0xf]  ;;  %v3411_v6 = vshll.u32 %v11013_v7, 16  ;;  %v5115_v0 = vrot.slane %v5113_v19, 4  ;;  %v5118_v50 = vrot.slane %v5116_v60, 5  ;;  %v2803_v33 = vpop.f32.mrf.mxu1 }
 0x260   : > { %v5122_v35 = vshll.u32 %v11129_v11, 16  ;;  %v3976_v61 = vunpack.c.l.b16 %v3907_v22  ;;  %4310 = vst [vmem:[#allocation2 + $0x14] sm:$0x1] %v4309_v37  ;;  %v3601_v7 = vpack.c.b16 %v13614_v25, %v13607_v52  ;;  %v5101_v28 = vsel %vm12265_vm7, %v5096_v18, %v13562_v23  ;;  %v13650_v60 = vld [vmem:[%s12226_s20 + $0x94] sm:$0xf] }
 0x261   : > { %11040 = vmatmul.msk.bf16.gmra.mxu3 %vm754_vm3, %v3600_v41  ;;  %v5126_v41 = vshrl.u32 %v11129_v11, 16  ;;  %v5111_v19 = vsel %vm12265_vm7, %v5106_v58, %v5110_v63  ;;  %v3413_v22 = vrot.slane %v3411_v6, 5  ;;  %v5119_v25 = vor.u32 %v5118_v50, %v5115_v0 }
 0x262   : > { %v13622_v12 = vpop.f32.mrf.mxu2  ;;  %v13630_v59 = vpop.f32.mrf.mxu0  ;;  %v13637_v20 = vrot.slane %v5122_v35, 5  ;;  %v5132_v30 = vshll.u32 %v11130_v16, 16  ;;  %v3999_v18 = vpack.c.b16 %v3976_v61, %v3975_v57  ;;  %v13665_v6 = vunpack.c.l.b16 %v5111_v19 }
 0x263   : > { %16292 = vst [vmem:[#allocation39_spill] sm:$0xff] %v13622_v12  ;;  %v11074_v12 = vrot.slane %v11058_v46, 9  ;;  %v5128_v11 = vrot.slane %v5126_v41, 4  ;;  %v11014_v46 = vld [vmem:[%s12226_s20 + $0x90] sm:$0xf]  ;;  %v3425_v50 = vshll.u32 %v13650_v60, 16 }
 0x264   : > { %v1751_v15 = vpop.f32.mrf.mxu3  ;;  %v3416_v35 = vshrl.u32 %v11014_v46, 16  ;;  %v3419_v41 = vshll.u32 %v11014_v46, 16  ;;  %v5120_v61 = vrot.slane %v5119_v25, 4  ;;  %v16297_v46 = vld [vmem:[#allocation9_spill] sm:$0xff] }
 0x265   : > { %v1786_v4 = vadd.f32 %v1751_v15, %v12842_v44  ;;  %v3399_v44 = vrot.slane %v3398_v21, 4  ;;  %v3911_v52 = vsel %vm12237_vm6, %v11074_v12, %v3910_v1  ;;  %v5129_v58 = vor.u32 %v5128_v11, %v13637_v20 }
 0x266   : > { %v13663_v21 = vunpack.c.l.b16 %v5101_v28  ;;  %v3977_v57 = vunpack.c.l.b16 %v3911_v52  ;;  %v5134_v11 = vrot.slane %v5132_v30, 5  ;;  %v11838_v52 = vld [vmem:[#allocation3 + $0x78] sm:$0xff]  ;;  %v3917_v30 = vrot.slane %v13650_v60, 5 }
 0x267   : > { %11250 = vmatmul.msk.bf16.gmra.mxu2 %vm754_vm3, %v5578_v3  ;;  %v2440_v15 = vadd.f32 %v13573_v38, %v1786_v4  ;;  %v3409_v3 = vrot.slane %v3408_v13, 4  ;;  %v3914_v38 = vsel %vm12237_vm6, %v3912_v10, %v3913_v45  ;;  %v13668_v13 = vld [vmem:[%s12226_s20 + $0x98] sm:$0x1]  ;;  %v3404_v1 = vsel %vm12265_vm7, %v3399_v44, %v13617_v42  ;;  %6287 = vmatpush.bf16.msrb.mxu3 %v11838_v52  ;;  %v13722_v52 = vld [vmem:[%s16232_s2] ss:$0 sm:$0xff] }
 0x268   : > { %v3418_v45 = vrot.slane %v3416_v35, 4  ;;  %v3421_v10 = vrot.slane %v3419_v41, 5  ;;  %v3978_v0 = vunpack.c.l.b16 %v3914_v38  ;;  %v4261_v4 = vld [vmem:[#allocation2 + $0x18] sm:$0x1]  ;;  %v5130_v42 = vrot.slane %v5129_v58, 4 }
 0x269   : > { %v13654_v37 = vadd.f32 %v2803_v33, %v2440_v15  ;;  %v3429_v33 = vshrl.u32 %v13650_v60, 16  ;;  %v3414_v16 = vsel %vm12265_vm7, %v3409_v3, %v3413_v22  ;;  %v4262_v19 = vsel %vm13587_vm10, 0, %v4261_v4  ;;  %v11059_v35 = vld [vmem:[%s12226_s20 + $0x90] sm:$0xe] }
 0x26a   : > { %v13656_v23 = vpop.f32.mrf.mxu2  ;;  %v13661_v63 = vpop.f32.mrf.mxu0  ;;  %v3435_v44 = vshll.u32 %v13668_v13, 16  ;;  %4263 = vst [vmem:[#allocation2 + $0x18] sm:$0x1] %v4262_v19  ;;  %v13682_v15 = vrot.slane %v3425_v50, 5  ;;  %v5579_v3 = vpack.c.b16 %v13665_v6, %v13663_v21  ;;  %v3422_v25 = vor.u32 %v3421_v10, %v3418_v45 }
 0x26b   : > { %16295 = vst [vmem:[#allocation40_spill] sm:$0xff] %v13654_v37  ;;  %v3431_v22 = vrot.slane %v3429_v33, 4  ;;  %v13693_v38 = vunpack.c.l.b16 %v3414_v16  ;;  %v13695_v58 = vpack.c.b16 %v3978_v0, %v3977_v57  ;;  %v5125_v50 = vsel %vm12265_vm7, %v5120_v61, %v13637_v20  ;;  %v11131_v33 = vld [vmem:[%s12226_s20 + $0x90] sm:$0xf] }
 0x26c   : > { %16296 = vst [vmem:[#allocation41_spill] sm:$0xff] %v13656_v23  ;;  %v1753_v12 = vpop.f32.mrf.mxu3  ;;  %v5135_v21 = vsel %vm12265_vm7, %v5130_v42, %v5134_v11  ;;  %v13707_v60 = vrot.slane %v3435_v44, 5  ;;  %v11075_v6 = vrot.slane %v11059_v35, 9  ;;  %v5140_v20 = vshll.u32 %v11131_v33, 16  ;;  %v11133_v42 = vld [vmem:[%s12226_s20 + $0x98] sm:$0x1] }
 0x26d   : > { %v1787_v28 = vadd.f32 %v1753_v12, %v16297_v46  ;;  %11090 = vmatmul.msk.bf16.gmra.mxu0 %vm754_vm3, %v3999_v18  ;;  %v13691_v18 = vunpack.c.l.b16 %v3404_v1  ;;  %v5137_v1 = vshrl.u32 %v11131_v33, 16  ;;  %v3432_v45 = vor.u32 %v3431_v22, %v13682_v15 }
 0x26e   : > { %v3423_v0 = vrot.slane %v3422_v25, 4  ;;  %v3920_v4 = vrot.slane %v13668_v13, 5  ;;  %v13715_v19 = vunpack.c.l.b16 %v5125_v50  ;;  %v5142_v44 = vrot.slane %v5140_v20, 5  ;;  %v11878_v50 = vld [vmem:[#allocation3 + $0x138] sm:$0xff] }
 0x26f   : > { %v13686_v41 = vadd.f32 %v13630_v59, %v1787_v28  ;;  %v11132_v59 = vld [vmem:[%s12226_s20 + $0x94] sm:$0xf]  ;;  %v5139_v61 = vrot.slane %v5137_v1, 4  ;;  %v4311_v28 = vld [vmem:[#allocation2 + $0x20] sm:$0x1]  ;;  %v5156_v33 = vshll.u32 %v11133_v42, 16  ;;  %v13727_v20 = vunpack.c.l.b16 %v5135_v21  ;;  %7709 = vmatpush.bf16.msrb.mxu2 %v11878_v50 }
 0x270   : > { %v5146_v10 = vshll.u32 %v11132_v59, 16  ;;  %v5150_v16 = vshrl.u32 %v11132_v59, 16  ;;  %v4312_v13 = vsel %vm13626_vm12, 0, %v4311_v28  ;;  %v11846_v59 = vld [vmem:[#allocation3 + $0xb8] sm:$0xff] }
 0x271   : > { %16298 = vst [vmem:[#allocation9_spill] sm:$0xff] %v13686_v41  ;;  %11041 = vmatmul.msk.bf16.gmra.mxu3 %vm754_vm3, %v3601_v7  ;;  %v3919_v7 = vrot.slane %v3917_v30, 4  ;;  %v11870_v1 = vld [vmem:[#allocation3 + $0xf8] sm:$0xff]  ;;  %v5158_v42 = vrot.slane %v5156_v33, 5  ;;  %6713 = vmatpush.bf16.msrb.mxu0 %v11846_v59 }
 0x272   : > { %v13703_v12 = vpop.f32.mrf.mxu2  ;;  %v13709_v57 = vpop.f32.mrf.mxu0  ;;  %v5148_v35 = vrot.slane %v5146_v10, 5  ;;  %v5152_v25 = vrot.slane %v5150_v16, 4  ;;  %4313 = vst [vmem:[#allocation2 + $0x20] sm:$0x1] %v4312_v13  ;;  %v3918_v10 = vsel %vm12237_vm6, %v11075_v6, %v3917_v30  ;;  %v3428_v16 = vsel %vm12265_vm7, %v3423_v0, %v13682_v15  ;;  %7027 = vmatpush.bf16.msrb.mxu1 %v11870_v1 }
 0x273   : > { %16299 = vst [vmem:[#allocation42_spill] sm:$0xff] %v13703_v12  ;;  %v13737_v12 = vld [vmem:[%s12226_s20 + $0xa0] sm:$0xf]  ;;  %v3921_v15 = vsel %vm12237_vm6, %v3919_v7, %v3920_v4  ;;  %v13756_v7 = vld [vmem:[%s12226_s20 + $0xa4] sm:$0x1] }
 0x274   : > { %v3669_v46 = vpop.f32.mrf.mxu3  ;;  %v5153_v28 = vor.u32 %v5152_v25, %v5148_v35  ;;  %v3449_v30 = vshll.u32 %v13737_v12, 16 }
 0x275   : > { %v3749_v22 = vadd.f32 %v3669_v46, %v12888_v62  ;;  %v3433_v62 = vrot.slane %v3432_v45, 4  ;;  %v5143_v46 = vor.u32 %v5142_v44, %v5139_v61  ;;  %v3453_v61 = vshrl.u32 %v13737_v12, 16 }
 0x276   : > { %v5154_v0 = vrot.slane %v5153_v28, 4  ;;  %v13758_v4 = vrot.slane %v3449_v30, 5  ;;  %v13760_v28 = vunpack.c.l.b16 %v3428_v16  ;;  %v3459_v30 = vshll.u32 %v13756_v7, 16 }
 0x277   : > { %11251 = vmatmul.msk.bf16.gmra.mxu2 %vm754_vm3, %v5579_v3  ;;  %v4147_v11 = vadd.f32 %v13661_v63, %v3749_v22  ;;  %v11017_v3 = vld [vmem:[%s12226_s20 + $0x9c] sm:$0xf]  ;;  %v5144_v21 = vrot.slane %v5143_v46, 4  ;;  %v3438_v22 = vsel %vm12265_vm7, %v3433_v62, %v13707_v60  ;;  %v3455_v1 = vrot.slane %v3453_v61, 4  ;;  %v4264_v62 = vld [vmem:[#allocation2 + $0x24] sm:$0x1] }
 0x278   : > { %v3440_v13 = vshrl.u32 %v11017_v3, 16  ;;  %v3443_v45 = vshll.u32 %v11017_v3, 16  ;;  %v5159_v59 = vsel %vm12265_vm7, %v5154_v0, %v5158_v42  ;;  %v3979_v3 = vunpack.c.l.b16 %v3918_v10 }
 0x279   : > { %v4183_v6 = vadd.f32 %v13722_v52, %v4147_v11  ;;  %v5149_v25 = vsel %vm12265_vm7, %v5144_v21, %v5148_v35  ;;  %v3980_v60 = vunpack.c.l.b16 %v3921_v15  ;;  %v4265_v42 = vsel %vm13587_vm10, 0, %v4264_v62 }
 0x27a   : > { %v13741_v63 = vpop.f32.mrf.mxu2  ;;  %v13746_v44 = vpop.f32.mrf.mxu0  ;;  %v3442_v33 = vrot.slane %v3440_v13, 4  ;;  %v3445_v11 = vrot.slane %v3443_v45, 5  ;;  %v13765_v13 = vunpack.c.l.b16 %v3438_v22  ;;  %v11060_v45 = vld [vmem:[%s12226_s20 + $0x9c] sm:$0xe]  ;;  %4266 = vst [vmem:[#allocation2 + $0x24] sm:$0x1] %v4265_v42  ;;  %v13770_v16 = vunpack.c.l.b16 %v5149_v25 }
 0x27b   : > { %16300 = vst [vmem:[#allocation43_spill] sm:$0xff] %v13741_v63  ;;  %v4215_v50 = vmax.f32 %v4183_v6, 0.0  ;;  %v13772_v10 = vunpack.c.l.b16 %v5159_v59  ;;  %v5580_v15 = vpack.c.b16 %v13727_v20, %v13715_v19  ;;  %v13779_v0 = vpack.c.b16 %v3980_v60, %v3979_v3  ;;  %v11134_v25 = vld [vmem:[%s12226_s20 + $0x9c] sm:$0xf]  ;;  %v11135_v42 = vld [vmem:[%s12226_s20 + $0xa0] sm:$0xf] }
 0x27c   : > { %v3671_v46 = vpop.f32.mrf.mxu3  ;;  %v3446_v63 = vor.u32 %v3445_v11, %v3442_v33  ;;  %v11076_v22 = vrot.slane %v11060_v45, 9  ;;  %v5161_v3 = vshrl.u32 %v11134_v25, 16  ;;  %v5174_v23 = vshrl.u32 %v11135_v42, 16 }
 0x27d   : > { %v4356_v35 = vpack.c.bf16 %v4215_v50, %v4215_v50  ;;  %v3750_v21 = vadd.f32 %v3671_v46, %v12908_v29  ;;  %11091 = vmatmul.msk.bf16.gmra.mxu0 %vm754_vm3, %v13695_v58  ;;  %v3456_v58 = vor.u32 %v3455_v1, %v13758_v4  ;;  %v3924_v46 = vrot.slane %v13737_v12, 5  ;;  %v11136_v12 = vld [vmem:[%s12226_s20 + $0xa4] sm:$0x1] }
 0x27e   : > { %v13781_v61 = vrot.slane %v3446_v63, 4  ;;  %v4712_v63 = vld [vmem:[#allocation2 + $0xc] sm:$0xf] }
 0x27f   : > { %v4391_v6 = vshrl.u32 %v4356_v35, 16  ;;  %v4148_v29 = vadd.f32 %v13709_v57, %v3750_v21  ;;  %v4394_v11 = vshll.u32 %v4356_v35, 16  ;;  %v16301_v57 = vpack.c.b16 %v13693_v38, %v13691_v18 }
 0x280   : > { %v13805_v38 = vrot.slane %v3459_v30, 5  ;;  %v3457_v35 = vrot.slane %v3456_v58, 4  ;;  %v3927_v21 = vrot.slane %v13756_v7, 5  ;;  %v13817_v30 = vsel %vm12237_vm6, %v11076_v22, %v3924_v46  ;;  %v16305_v7 = vld [vmem:[#allocation10_spill] sm:$0xff] }
 0x281   : > { %v13784_v33 = vrot.slane %v4391_v6, 7  ;;  %v4184_v50 = vadd.f32 %v13722_v52, %v4148_v29  ;;  %11042 = vmatmul.msk.bf16.gmra.mxu3 %vm754_vm3, %v16301_v57  ;;  %v4314_v6 = vld [vmem:[#allocation2 + $0x2c] sm:$0x1]  ;;  %v3452_v29 = vsel %vm12265_vm7, %v13781_v61, %v13758_v4  ;;  %v5163_v57 = vrot.slane %v5161_v3, 4 }
 0x282   : > { %v13791_v59 = vpop.f32.mrf.mxu2  ;;  %v13801_v1 = vpop.f32.mrf.mxu0  ;;  %v4315_v19 = vsel %vm13626_vm12, 0, %v4314_v6  ;;  %v3926_v4 = vrot.slane %v3924_v46, 4  ;;  %v5170_v22 = vshll.u32 %v11135_v42, 16  ;;  %v13836_v42 = vld [vmem:[%s12226_s20 + $0xac] sm:$0xf] }
 0x283   : > { %16302 = vst [vmem:[#allocation44_spill] sm:$0xff] %v13791_v59  ;;  %v4396_v60 = vor.u32 %v4394_v11, %v13784_v33  ;;  %v4216_v62 = vmax.f32 %v4184_v50, 0.0  ;;  %v5164_v11 = vshll.u32 %v11134_v25, 16  ;;  %v11020_v59 = vld [vmem:[%s12226_s20 + $0xa8] sm:$0xf]  ;;  %v3473_v36 = vshll.u32 %v13836_v42, 16 }
 0x284   : > { %v3674_v45 = vpop.f32.mrf.mxu3  ;;  %4316 = vst [vmem:[#allocation2 + $0x2c] sm:$0x1] %v4315_v19  ;;  %v5172_v6 = vrot.slane %v5170_v22, 5 }
 0x285   : > { %v4713_v58 = vsel %vm13797_vm15, %v4396_v60, %v4712_v63  ;;  %v4357_v50 = vpack.c.bf16 %v4216_v62, %v4216_v62  ;;  %v3751_v18 = vadd.f32 %v3674_v45, %v16305_v7  ;;  %v5166_v61 = vrot.slane %v5164_v11, 5 }
 0x286   : > { %4714 = vst [vmem:[#allocation2 + $0xc] sm:$0xf] %v4713_v58  ;;  %v3462_v63 = vsel %vm12265_vm7, %v3457_v35, %v13805_v38  ;;  %v5180_v60 = vshll.u32 %v11136_v12, 16  ;;  %v4397_v62 = vrot.slane %v13784_v33, 4  ;;  %v5176_v58 = vrot.slane %v5174_v23, 4 }
 0x287   : > { %11252 = vmatmul.msk.bf16.gmra.mxu2 %vm754_vm3, %v5580_v15  ;;  %v4399_v3 = vshrl.u32 %v4357_v50, 16  ;;  %v4149_v25 = vadd.f32 %v13746_v44, %v3751_v18  ;;  %v5167_v45 = vor.u32 %v5166_v61, %v5163_v57  ;;  %v4402_v46 = vshll.u32 %v4357_v50, 16  ;;  %v4716_v18 = vld [vmem:[#allocation2 + $0x14] sm:$0x1] }
 0x288   : > { %v3464_v44 = vshrl.u32 %v11020_v59, 16  ;;  %v5177_v23 = vor.u32 %v5176_v58, %v5172_v6  ;;  %v5182_v35 = vrot.slane %v5180_v60, 5  ;;  %v3467_v12 = vshll.u32 %v11020_v59, 16 }
 0x289   : > { %v4401_v15 = vrot.slane %v4399_v3, 7  ;;  %v4185_v11 = vadd.f32 %v13722_v52, %v4149_v25  ;;  %v5168_v38 = vrot.slane %v5167_v45, 4  ;;  %v3928_v25 = vsel %vm12237_vm6, %v3926_v4, %v3927_v21 }
 0x28a   : > { %v13833_v7 = vpop.f32.mrf.mxu2  ;;  %v13844_v33 = vpop.f32.mrf.mxu0  ;;  %v3466_v22 = vrot.slane %v3464_v44, 4  ;;  %v5178_v37 = vrot.slane %v5177_v23, 4  ;;  %v3469_v41 = vrot.slane %v3467_v12, 5  ;;  %v13856_v21 = vunpack.c.l.b16 %v3452_v29  ;;  %v13873_v44 = vld [vmem:[%s12226_s20 + $0xa8] sm:$0xe] }
 0x28b   : > { %16306 = vst [vmem:[#allocation10_spill] sm:$0xff] %v13833_v7  ;;  %v4404_v57 = vor.u32 %v4402_v46, %v4401_v15  ;;  %v4406_v50 = vrot.slane %v4401_v15, 4  ;;  %v4217_v61 = vmax.f32 %v4185_v11, 0.0  ;;  %v4267_v7 = vld [vmem:[#allocation2 + $0x30] sm:$0x1]  ;;  %v13858_v4 = vunpack.c.l.b16 %v3462_v63  ;;  %v11837_v11 = vld [vmem:[#allocation3 + $0x70] sm:$0xff] }
 0x28c   : > { %v3676_v3 = vpop.f32.mrf.mxu3  ;;  %v4268_v58 = vsel %vm13587_vm10, 0, %v4267_v7  ;;  %v3981_v29 = vunpack.c.l.b16 %v13817_v30  ;;  %v3982_v63 = vunpack.c.l.b16 %v3928_v25  ;;  %v3475_v30 = vrot.slane %v3473_v36, 5  ;;  %6288 = vmatpush.bf16.msrb.mxu3 %v11837_v11 }
 0x28d   : > { %v4405_v55 = vsel %vm13840_vm0, %v4397_v62, %v4404_v57  ;;  %v4717_v59 = vsel %vm13587_vm10, %v4406_v50, %v4716_v18  ;;  %v4358_v60 = vpack.c.bf16 %v4217_v61, %v4217_v61  ;;  %v3752_v45 = vadd.f32 %v3676_v3, %v12944_v31  ;;  %11092 = vmatmul.msk.bf16.gmra.mxu0 %vm754_vm3, %v13779_v0  ;;  %v13868_v0 = vld [vmem:[%s12226_s20 + $0xb0] sm:$0x1] }
 0x28e   : > { %4715 = vst [vmem:[#allocation2 + $0x10] sm:$0xf] %v4405_v55  ;;  %v3470_v62 = vor.u32 %v3469_v41, %v3466_v22  ;;  %v5173_v31 = vsel %vm12265_vm7, %v5168_v38, %v5172_v6  ;;  %v5183_v55 = vsel %vm12265_vm7, %v5178_v37, %v5182_v35  ;;  %v3477_v41 = vshrl.u32 %v13836_v42, 16  ;;  %v11137_v38 = vld [vmem:[%s12226_s20 + $0xa8] sm:$0xf] }
 0x28f   : > { %4718 = vst [vmem:[#allocation2 + $0x14] sm:$0x1] %v4717_v59  ;;  %v4408_v15 = vshrl.u32 %v4358_v60, 16  ;;  %v4150_v46 = vadd.f32 %v13801_v1, %v3752_v45  ;;  %v4411_v18 = vshll.u32 %v4358_v60, 16  ;;  %v16309_v6 = vpack.c.b16 %v13765_v13, %v13760_v28  ;;  %v4719_v35 = vld [vmem:[#allocation2 + $0x18] sm:$0xf] }
 0x290   : > { %4269 = vst [vmem:[#allocation2 + $0x30] sm:$0x1] %v4268_v58  ;;  %v3471_v7 = vrot.slane %v3470_v62, 4  ;;  %v13887_v57 = vunpack.c.l.b16 %v5173_v31  ;;  %v13889_v50 = vunpack.c.l.b16 %v5183_v55  ;;  %v3479_v61 = vrot.slane %v3477_v41, 4  ;;  %v4317_v59 = vld [vmem:[#allocation2 + $0x38] sm:$0x1] }
 0x291   : > { %v13875_v1 = vrot.slane %v4408_v15, 7  ;;  %v4186_v23 = vadd.f32 %v13722_v52, %v4150_v46  ;;  %11043 = vmatmul.msk.bf16.gmra.mxu3 %vm754_vm3, %v16309_v6  ;;  %v3483_v22 = vshll.u32 %v13868_v0, 16  ;;  %v13894_v28 = vadd.f32 %v13225_v47, %v13291_v27  ;;  %v11138_v31 = vld [vmem:[%s12226_s20 + $0xac] sm:$0xf] }
 0x292   : > { %v13882_v37 = vpop.f32.mrf.mxu2  ;;  %v13885_v12 = vpop.f32.mrf.mxu0  ;;  %v3604_v3 = vpack.c.b16 %v13858_v4, %v13856_v21  ;;  %v3476_v60 = vsel %vm12265_vm7, %v3471_v7, %v3475_v30  ;;  %v11077_v45 = vrot.slane %v13873_v44, 9  ;;  %v3931_v58 = vrot.slane %v13836_v42, 5  ;;  %v11877_v42 = vld [vmem:[#allocation3 + $0x130] sm:$0xff] }
 0x293   : > { %16310 = vst [vmem:[#allocation45_spill] sm:$0xff] %v13882_v37  ;;  %v4413_v13 = vor.u32 %v4411_v18, %v13875_v1  ;;  %v4218_v36 = vmax.f32 %v4186_v23, 0.0  ;;  %v5185_v62 = vshrl.u32 %v11137_v38, 16  ;;  %v4318_v11 = vsel %vm13626_vm12, 0, %v4317_v59  ;;  %v11845_v41 = vld [vmem:[#allocation3 + $0xb0] sm:$0xff]  ;;  %7710 = vmatpush.bf16.msrb.mxu2 %v11877_v42 }
 0x294   : > { %v3679_v25 = vpop.f32.mrf.mxu3  ;;  %v16311_v55 = vpack.c.b16 %v13772_v10, %v13770_v16  ;;  %v4002_v7 = vpack.c.b16 %v3982_v63, %v3981_v29  ;;  %v11869_v44 = vld [vmem:[#allocation3 + $0xf0] sm:$0xff]  ;;  %v13915_v23 = vrot.slane %v3483_v22, 5  ;;  %v4414_v6 = vrot.slane %v13875_v1, 4  ;;  %4319 = vst [vmem:[#allocation2 + $0x38] sm:$0x1] %v4318_v11  ;;  %6714 = vmatpush.bf16.msrb.mxu0 %v11845_v41 }
 0x295   : > { %v4720_v47 = vsel %vm13797_vm15, %v4413_v13, %v4719_v35  ;;  %v4359_v27 = vpack.c.bf16 %v4218_v36, %v4218_v36  ;;  %v3753_v15 = vadd.f32 %v3679_v25, %v12960_v49  ;;  %v11808_v46 = vld [vmem:[#allocation2 + $0xc] sm:$0xff]  ;;  %v3480_v49 = vor.u32 %v3479_v61, %v3475_v30  ;;  %7028 = vmatpush.bf16.msrb.mxu1 %v11869_v44  ;;  %v11023_v59 = vld [vmem:[%s12226_s20 + $0xb4] sm:$0xf]  ;;  %v4270_v44 = vld [vmem:[#allocation2 + $0x3c] sm:$0x1] }
 0x296   : > { %4721 = vst [vmem:[#allocation2 + $0x18] sm:$0xf] %v4720_v47  ;;  %5462 = vmatmul.bf16.gmra.mxu1 %v11808_v46  ;;  %v3934_v16 = vrot.slane %v13868_v0, 5  ;;  %v13920_v10 = vunpack.c.l.b16 %v3476_v60  ;;  %v11139_v29 = vld [vmem:[%s12226_s20 + $0xb0] sm:$0x1]  ;;  %v5187_v63 = vrot.slane %v5185_v62, 4  ;;  %v3932_v41 = vsel %vm12237_vm6, %v11077_v45, %v3931_v58 }
 0x297   : > { %11253 = vmatmul.msk.bf16.gmra.mxu2 %vm754_vm3, %v16311_v55  ;;  %v4416_v35 = vshrl.u32 %v4359_v27, 16  ;;  %v4151_v13 = vadd.f32 %v13844_v33, %v3753_v15  ;;  %v5188_v36 = vshll.u32 %v11137_v38, 16  ;;  %v5194_v30 = vshll.u32 %v11138_v31, 16  ;;  %v4723_v47 = vld [vmem:[#allocation2 + $0x20] sm:$0x1] }
 0x298   : > { %v4419_v22 = vshll.u32 %v4359_v27, 16  ;;  %v3933_v33 = vrot.slane %v3931_v58, 4  ;;  %v3481_v0 = vrot.slane %v3480_v49, 4  ;;  %v5198_v11 = vshrl.u32 %v11138_v31, 16  ;;  %v4300_v37 = vld [vmem:[#allocation2 + $0xb4] sm:$0x1] }
 0x299   : > { %v4418_v61 = vrot.slane %v4416_v35, 7  ;;  %v4187_v1 = vadd.f32 %v13722_v52, %v4151_v13  ;;  %v5190_v46 = vrot.slane %v5188_v36, 5  ;;  %v13929_v60 = vrot.slane %v5194_v30, 5 }
 0x29a   : > { %v13924_v25 = vpop.f32.mrf.mxu2  ;;  %v13927_v15 = vpop.f32.mrf.mxu0  ;;  %v5204_v27 = vshll.u32 %v11139_v29, 16  ;;  %v5200_v13 = vrot.slane %v5198_v11, 4  ;;  %v3488_v18 = vshrl.u32 %v11023_v59, 16  ;;  %v13940_v29 = vld [vmem:[%s12226_s20 + $0xb8] sm:$0xf]  ;;  %v3486_v45 = vsel %vm12265_vm7, %v3481_v0, %v13915_v23 }
 0x29b   : > { %v4421_v38 = vor.u32 %v4419_v22, %v4418_v61  ;;  %v4423_v62 = vrot.slane %v4418_v61, 4  ;;  %v4219_v55 = vmax.f32 %v4187_v1, 0.0  ;;  %v5191_v35 = vor.u32 %v5190_v46, %v5187_v63 }
 0x29c   : > { %v3681_v42 = vpop.f32.mrf.mxu3  ;;  %v3935_v58 = vsel %vm12237_vm6, %v3933_v33, %v3934_v16  ;;  %v5201_v63 = vor.u32 %v5200_v13, %v13929_v60  ;;  %v5206_v22 = vrot.slane %v5204_v27, 5  ;;  %v3491_v46 = vshll.u32 %v11023_v59, 16  ;;  %v4320_v13 = vld [vmem:[#allocation2 + $0x44] sm:$0x1] }
 0x29d   : > { %v4422_v49 = vsel %vm13840_vm0, %v4414_v6, %v4421_v38  ;;  %v4724_v36 = vsel %vm13587_vm10, %v4423_v62, %v4723_v47  ;;  %v4360_v31 = vpack.c.bf16 %v4219_v55, %v4219_v55  ;;  %v3754_v30 = vadd.f32 %v3681_v42, %v12980_v40  ;;  %11093 = vmatmul.msk.bf16.gmra.mxu0 %vm754_vm3, %v4002_v7 }
 0x29e   : > { %4722 = vst [vmem:[#allocation2 + $0x1c] sm:$0xf] %v4422_v49  ;;  %v4271_v6 = vsel %vm13587_vm10, 0, %v4270_v44  ;;  %v5192_v61 = vrot.slane %v5191_v35, 4  ;;  %v5202_v1 = vrot.slane %v5201_v63, 4  ;;  %v3490_v47 = vrot.slane %v3488_v18, 4 }
 0x29f   : > { %4725 = vst [vmem:[#allocation2 + $0x20] sm:$0x1] %v4724_v36  ;;  %v4425_v40 = vshrl.u32 %v4360_v31, 16  ;;  %v4152_v7 = vadd.f32 %v13885_v12, %v3754_v30  ;;  %v3497_v23 = vshll.u32 %v13940_v29, 16  ;;  %v4428_v16 = vshll.u32 %v4360_v31, 16 }
 0x2a0   : > { %4272 = vst [vmem:[#allocation2 + $0x3c] sm:$0x1] %v4271_v6  ;;  %v13962_v12 = vld [vmem:[%s12226_s20 + $0xbc] sm:$0x1]  ;;  %v3501_v38 = vshrl.u32 %v13940_v29, 16  ;;  %v3983_v62 = vunpack.c.l.b16 %v3932_v41  ;;  %v3984_v55 = vunpack.c.l.b16 %v3935_v58  ;;  %v3493_v27 = vrot.slane %v3491_v46, 5 }
 0x2a1   : > { %v13952_v0 = vrot.slane %v4425_v40, 7  ;;  %v4188_v33 = vadd.f32 %v13722_v52, %v4152_v7  ;;  %11044 = vmatmul.msk.bf16.gmra.mxu3 %vm754_vm3, %v3604_v3  ;;  %v4726_v18 = vld [vmem:[#allocation2 + $0x24] sm:$0xf]  ;;  %v13967_v42 = vrot.slane %v3497_v23, 5  ;;  %v13970_v4 = vunpack.c.l.b16 %v3486_v45  ;;  %v11062_v63 = vld [vmem:[%s12226_s20 + $0xb4] sm:$0xe] }
 0x2a2   : > { %v13959_v11 = vpop.f32.mrf.mxu2  ;;  %v13965_v59 = vpop.f32.mrf.mxu0  ;;  %v5197_v3 = vsel %vm12265_vm7, %v5192_v61, %v13929_v60  ;;  %v5207_v49 = vsel %vm12265_vm7, %v5202_v1, %v5206_v22  ;;  %v3494_v41 = vor.u32 %v3493_v27, %v3490_v47  ;;  %v3503_v36 = vrot.slane %v3501_v38, 4  ;;  %v11140_v46 = vld [vmem:[%s12226_s20 + $0xb4] sm:$0xf] }
 0x2a3   : > { %16312 = vst [vmem:[#allocation46_spill] sm:$0xff] %v13959_v11  ;;  %v4430_v44 = vor.u32 %v4428_v16, %v13952_v0  ;;  %v4220_v21 = vmax.f32 %v4188_v33, 0.0  ;;  %v3507_v31 = vshll.u32 %v13962_v12, 16  ;;  %v4321_v60 = vsel %vm13626_vm12, 0, %v4320_v13 }
 0x2a4   : > { %v3684_v35 = vpop.f32.mrf.mxu3  ;;  %v13986_v40 = vadd.f32 %v13279_v39, %v13334_v32  ;;  %v16313_v7 = vpack.c.b16 %v13889_v50, %v13887_v57  ;;  %v4003_v61 = vpack.c.b16 %v3984_v55, %v3983_v62  ;;  %v3504_v22 = vor.u32 %v3503_v36, %v13967_v42  ;;  %4322 = vst [vmem:[#allocation2 + $0x44] sm:$0x1] %v4321_v60  ;;  %v11141_v62 = vld [vmem:[%s12226_s20 + $0xb8] sm:$0xf]  ;;  %v16314_v60 = vld [vmem:[#allocation11_spill] sm:$0xff] }
 0x2a5   : > { %v4727_v30 = vsel %vm13797_vm15, %v4430_v44, %v4726_v18  ;;  %v4361_v58 = vpack.c.bf16 %v4220_v21, %v4220_v21  ;;  %v3755_v45 = vadd.f32 %v3684_v35, %v12997_v48  ;;  %v11809_v6 = vld [vmem:[#allocation2 + $0x18] sm:$0xff]  ;;  %v3938_v48 = vrot.slane %v13940_v29, 5 }
 0x2a6   : > { %4728 = vst [vmem:[#allocation2 + $0x24] sm:$0xf] %v4727_v30  ;;  %5467 = vmatmul.bf16.gmra.mxu1 %v11809_v6  ;;  %v3605_v39 = vpack.c.b16 %v13970_v4, %v13920_v10  ;;  %v13997_v32 = vunpack.c.l.b16 %v5197_v3  ;;  %v4431_v57 = vrot.slane %v13952_v0, 4  ;;  %v14001_v50 = vunpack.c.l.b16 %v5207_v49  ;;  %v4730_v10 = vld [vmem:[#allocation2 + $0x2c] sm:$0x1] }
 0x2a7   : > { %11254 = vmatmul.msk.bf16.gmra.mxu2 %vm754_vm3, %v16313_v7  ;;  %v4433_v1 = vshrl.u32 %v4361_v58, 16  ;;  %v4153_v47 = vadd.f32 %v13927_v15, %v3755_v45  ;;  %v14003_v23 = vrot.slane %v3507_v31, 5  ;;  %v11078_v16 = vrot.slane %v11062_v63, 9  ;;  %v11026_v7 = vld [vmem:[%s12226_s20 + $0xc0] sm:$0xf] }
 0x2a8   : > { %v4436_v33 = vshll.u32 %v4361_v58, 16  ;;  %v3495_v18 = vrot.slane %v3494_v41, 4  ;;  %v14011_v27 = vrot.slane %v3504_v22, 4  ;;  %v3940_v44 = vrot.slane %v3938_v48, 4 }
 0x2a9   : > { %v4435_v29 = vrot.slane %v4433_v1, 7  ;;  %v4189_v38 = vadd.f32 %v13722_v52, %v4153_v47  ;;  %v5209_v0 = vshrl.u32 %v11140_v46, 16  ;;  %v5212_v21 = vshll.u32 %v11140_v46, 16  ;;  %v4273_v47 = vld [vmem:[#allocation2 + $0x48] sm:$0x1] }
 0x2aa   : > { %v14006_v15 = vpop.f32.mrf.mxu2  ;;  %v14009_v55 = vpop.f32.mrf.mxu0  ;;  %v3941_v13 = vrot.slane %v13962_v12, 5  ;;  %v3939_v41 = vsel %vm12237_vm6, %v11078_v16, %v3938_v48  ;;  %v5218_v30 = vshll.u32 %v11141_v62, 16  ;;  %v11142_v12 = vld [vmem:[%s12226_s20 + $0xbc] sm:$0x1]  ;;  %v5583_v22 = vpack.c.b16 %v14001_v50, %v13997_v32 }
 0x2ab   : > { %v4438_v4 = vor.u32 %v4436_v33, %v4435_v29  ;;  %v4440_v3 = vrot.slane %v4435_v29, 4  ;;  %v4221_v35 = vmax.f32 %v4189_v38, 0.0  ;;  %v5211_v36 = vrot.slane %v5209_v0, 4  ;;  %v11836_v29 = vld [vmem:[#allocation3 + $0x68] sm:$0xff] }
 0x2ac   : > { %v3686_v49 = vpop.f32.mrf.mxu3  ;;  %v5214_v31 = vrot.slane %v5212_v21, 5  ;;  %v3500_v48 = vsel %vm12265_vm7, %v3495_v18, %v13967_v42  ;;  %v3510_v1 = vsel %vm12265_vm7, %v14011_v27, %v14003_v23  ;;  %v3942_v32 = vsel %vm12237_vm6, %v3940_v44, %v3941_v13  ;;  %v4733_v21 = vld [vmem:[#allocation2 + $0x30] sm:$0xf]  ;;  %6289 = vmatpush.bf16.msrb.mxu3 %v11836_v29  ;;  %v11844_v29 = vld [vmem:[#allocation3 + $0xa8] sm:$0xff] }
 0x2ad   : > { %v4439_v58 = vsel %vm13840_vm0, %v4431_v57, %v4438_v4  ;;  %v4731_v45 = vsel %vm13587_vm10, %v4440_v3, %v4730_v10  ;;  %v4362_v6 = vpack.c.bf16 %v4221_v35, %v4221_v35  ;;  %v3756_v63 = vadd.f32 %v3686_v49, %v16314_v60  ;;  %11094 = vmatmul.msk.bf16.gmra.mxu0 %vm754_vm3, %v4003_v61  ;;  %v14034_v57 = vld [vmem:[%s12226_s20 + $0xc4] sm:$0xf] }
 0x2ae   : > { %4729 = vst [vmem:[#allocation2 + $0x28] sm:$0xf] %v4439_v58  ;;  %v5215_v46 = vor.u32 %v5214_v31, %v5211_v36  ;;  %v4274_v42 = vsel %vm13587_vm10, 0, %v4273_v47  ;;  %v3985_v33 = vunpack.c.l.b16 %v3939_v41  ;;  %v5220_v38 = vrot.slane %v5218_v30, 5  ;;  %6715 = vmatpush.bf16.msrb.mxu0 %v11844_v29 }
 0x2af   : > { %4732 = vst [vmem:[#allocation2 + $0x2c] sm:$0x1] %v4731_v45  ;;  %v4442_v61 = vshrl.u32 %v4362_v6, 16  ;;  %v4154_v16 = vadd.f32 %v13965_v59, %v3756_v63  ;;  %v4445_v50 = vshll.u32 %v4362_v6, 16  ;;  %v5222_v23 = vshrl.u32 %v11141_v62, 16  ;;  %v16315_v63 = vld [vmem:[#allocation12_spill] sm:$0xff] }
 0x2b0   : > { %4275 = vst [vmem:[#allocation2 + $0x48] sm:$0x1] %v4274_v42  ;;  %v5228_v59 = vshll.u32 %v11142_v12, 16  ;;  %v3512_v0 = vshrl.u32 %v11026_v7, 16  ;;  %v3986_v4 = vunpack.c.l.b16 %v3942_v32  ;;  %v5216_v3 = vrot.slane %v5215_v46, 4  ;;  %v11868_v32 = vld [vmem:[#allocation3 + $0xe8] sm:$0xff] }
 0x2b1   : > { %v14041_v18 = vrot.slane %v4442_v61, 7  ;;  %v4190_v10 = vadd.f32 %v13722_v52, %v4154_v16  ;;  %11045 = vmatmul.msk.bf16.gmra.mxu3 %vm754_vm3, %v3605_v39  ;;  %v5224_v35 = vrot.slane %v5222_v23, 4  ;;  %v3515_v13 = vshll.u32 %v11026_v7, 16  ;;  %v14059_v46 = vld [vmem:[%s12226_s20 + $0xc8] sm:$0x1]  ;;  %v11876_v16 = vld [vmem:[#allocation3 + $0x128] sm:$0xff]  ;;  %7029 = vmatpush.bf16.msrb.mxu1 %v11868_v32 }
 0x2b2   : > { %v14045_v27 = vpop.f32.mrf.mxu2  ;;  %v14047_v44 = vpop.f32.mrf.mxu0  ;;  %v14050_v41 = vunpack.c.l.b16 %v3500_v48  ;;  %v3521_v39 = vshll.u32 %v14034_v57, 16  ;;  %v5230_v30 = vrot.slane %v5228_v59, 5  ;;  %v3514_v58 = vrot.slane %v3512_v0, 4  ;;  %v11063_v48 = vld [vmem:[%s12226_s20 + $0xc0] sm:$0xe]  ;;  %7711 = vmatpush.bf16.msrb.mxu2 %v11876_v16 }
 0x2b3   : > { %v4447_v62 = vor.u32 %v4445_v50, %v14041_v18  ;;  %v4222_v49 = vmax.f32 %v4190_v10, 0.0  ;;  %v5225_v31 = vor.u32 %v5224_v35, %v5220_v38  ;;  %v3517_v45 = vrot.slane %v3515_v13, 5  ;;  %v4323_v0 = vld [vmem:[#allocation2 + $0x50] sm:$0x1] }
 0x2b4   : > { %v3689_v36 = vpop.f32.mrf.mxu3  ;;  %v14056_v47 = vunpack.c.l.b16 %v3510_v1  ;;  %v4004_v61 = vpack.c.b16 %v3986_v4, %v3985_v33  ;;  %v5221_v42 = vsel %vm12265_vm7, %v5216_v3, %v5220_v38  ;;  %v4448_v10 = vrot.slane %v14041_v18, 4 }
 0x2b5   : > { %v4734_v6 = vsel %vm13797_vm15, %v4447_v62, %v4733_v21  ;;  %v4363_v60 = vpack.c.bf16 %v4222_v49, %v4222_v49  ;;  %v3757_v12 = vadd.f32 %v3689_v36, %v16315_v63  ;;  %v11810_v7 = vld [vmem:[#allocation2 + $0x24] sm:$0xff]  ;;  %v5226_v50 = vrot.slane %v5225_v31, 4  ;;  %v4737_v62 = vld [vmem:[#allocation2 + $0x38] sm:$0x1] }
 0x2b6   : > { %4735 = vst [vmem:[#allocation2 + $0x30] sm:$0xf] %v4734_v6  ;;  %v3518_v23 = vor.u32 %v3517_v45, %v3514_v58  ;;  %5472 = vmatmul.bf16.gmra.mxu1 %v11810_v7  ;;  %v3523_v21 = vrot.slane %v3521_v39, 5  ;;  %v3525_v38 = vshrl.u32 %v14034_v57, 16  ;;  %v14078_v39 = vunpack.c.l.b16 %v5221_v42  ;;  %v11875_v63 = vld [vmem:[#allocation3 + $0x120] sm:$0xff] }
 0x2b7   : > { %11255 = vmatmul.msk.bf16.gmra.mxu2 %vm754_vm3, %v5583_v22  ;;  %v4450_v59 = vshrl.u32 %v4363_v60, 16  ;;  %v4155_v1 = vadd.f32 %v14009_v55, %v3757_v12  ;;  %v4324_v22 = vsel %vm13626_vm12, 0, %v4323_v0  ;;  %v5231_v33 = vsel %vm12265_vm7, %v5226_v50, %v5230_v30  ;;  %v16316_v50 = vld [vmem:[#allocation13_spill] sm:$0xff] }
 0x2b8   : > { %v3519_v4 = vrot.slane %v3518_v23, 4  ;;  %v4453_v35 = vshll.u32 %v4363_v60, 16  ;;  %4325 = vst [vmem:[#allocation2 + $0x50] sm:$0x1] %v4324_v22  ;;  %v3531_v55 = vshll.u32 %v14059_v46, 16  ;;  %v3527_v36 = vrot.slane %v3525_v38, 4  ;;  %7712 = vmatpush.bf16.msrb.mxu2 %v11875_v63 }
 0x2b9   : > { %v4452_v3 = vrot.slane %v4450_v59, 7  ;;  %v4191_v18 = vadd.f32 %v13722_v52, %v4155_v1  ;;  %v11079_v31 = vrot.slane %v11063_v48, 9  ;;  %v3945_v30 = vrot.slane %v14034_v57, 5  ;;  %v11143_v59 = vld [vmem:[%s12226_s20 + $0xc0] sm:$0xf] }
 0x2ba   : > { %v14073_v13 = vpop.f32.mrf.mxu2  ;;  %v14076_v49 = vpop.f32.mrf.mxu0  ;;  %v14081_v60 = vunpack.c.l.b16 %v5231_v33  ;;  %v3606_v7 = vpack.c.b16 %v14056_v47, %v14050_v41  ;;  %v3524_v16 = vsel %vm12265_vm7, %v3519_v4, %v3523_v21  ;;  %v3528_v29 = vor.u32 %v3527_v36, %v3523_v21  ;;  %v11144_v1 = vld [vmem:[%s12226_s20 + $0xc4] sm:$0xf]  ;;  %v4276_v4 = vld [vmem:[#allocation2 + $0x54] sm:$0x1]  ;;  %v4740_v38 = vld [vmem:[#allocation2 + $0x3c] sm:$0xf] }
 0x2bb   : > { %v4455_v58 = vor.u32 %v4453_v35, %v4452_v3  ;;  %v4457_v45 = vrot.slane %v4452_v3, 4  ;;  %v4223_v6 = vmax.f32 %v4191_v18, 0.0  ;;  %v3533_v32 = vrot.slane %v3531_v55, 5  ;;  %v11835_v55 = vld [vmem:[#allocation3 + $0x60] sm:$0xff] }
 0x2bc   : > { %v3691_v12 = vpop.f32.mrf.mxu3  ;;  %v3529_v41 = vrot.slane %v3528_v29, 4  ;;  %v14097_v47 = vsel %vm12237_vm6, %v11079_v31, %v3945_v30  ;;  %v3947_v0 = vrot.slane %v3945_v30, 4  ;;  %v3948_v21 = vrot.slane %v14059_v46, 5  ;;  %6290 = vmatpush.bf16.msrb.mxu3 %v11835_v55 }
 0x2bd   : > { %v4456_v57 = vsel %vm13840_vm0, %v4448_v10, %v4455_v58  ;;  %v4738_v48 = vsel %vm13587_vm10, %v4457_v45, %v4737_v62  ;;  %v4364_v42 = vpack.c.bf16 %v4223_v6, %v4223_v6  ;;  %v3758_v23 = vadd.f32 %v3691_v12, %v16316_v50  ;;  %11095 = vmatmul.msk.bf16.gmra.mxu0 %vm754_vm3, %v4004_v61  ;;  %v11874_v58 = vld [vmem:[#allocation3 + $0x118] sm:$0xff]  ;;  %v11145_v6 = vld [vmem:[%s12226_s20 + $0xc8] sm:$0x1] }
 0x2be   : > { %4736 = vst [vmem:[#allocation2 + $0x34] sm:$0xf] %v4456_v57  ;;  %v5584_v33 = vpack.c.b16 %v14081_v60, %v14078_v39  ;;  %v14103_v61 = vunpack.c.l.b16 %v3524_v16  ;;  %v3534_v3 = vsel %vm12265_vm7, %v3529_v41, %v3533_v32  ;;  %v3949_v35 = vsel %vm12237_vm6, %v3947_v0, %v3948_v21  ;;  %7713 = vmatpush.bf16.msrb.mxu2 %v11874_v58  ;;  %v11842_v50 = vld [vmem:[#allocation3 + $0x98] sm:$0xff]  ;;  %v11873_v21 = vld [vmem:[#allocation3 + $0x110] sm:$0xff] }
 0x2bf   : > { %4739 = vst [vmem:[#allocation2 + $0x38] sm:$0x1] %v4738_v48  ;;  %v4459_v10 = vshrl.u32 %v4364_v42, 16  ;;  %v4156_v22 = vadd.f32 %v14047_v44, %v3758_v23  ;;  %v4277_v46 = vsel %vm13587_vm10, 0, %v4276_v4  ;;  %v5233_v18 = vshrl.u32 %v11143_v59, 16  ;;  %v11843_v44 = vld [vmem:[#allocation3 + $0xa0] sm:$0xff] }
 0x2c0   : > { %v4462_v39 = vshll.u32 %v4364_v42, 16  ;;  %v3987_v30 = vunpack.c.l.b16 %v14097_v47  ;;  %4278 = vst [vmem:[#allocation2 + $0x54] sm:$0x1] %v4277_v46  ;;  %v5236_v63 = vshll.u32 %v11143_v59, 16  ;;  %v5242_v12 = vshll.u32 %v11144_v1, 16  ;;  %6716 = vmatpush.bf16.msrb.mxu0 %v11843_v44  ;;  %v11834_v42 = vld [vmem:[#allocation3 + $0x58] sm:$0xff] }
 0x2c1   : > { %v14111_v62 = vrot.slane %v4459_v10, 7  ;;  %v4192_v36 = vadd.f32 %v13722_v52, %v4156_v22  ;;  %11046 = vmatmul.msk.bf16.gmra.mxu3 %vm754_vm3, %v3606_v7  ;;  %v5235_v60 = vrot.slane %v5233_v18, 4  ;;  %v5246_v16 = vshrl.u32 %v11144_v1, 16  ;;  %v11029_v48 = vld [vmem:[%s12226_s20 + $0xcc] sm:$0xf]  ;;  %v16317_v22 = vld [vmem:[#allocation14_spill] sm:$0xff] }
 0x2c2   : > { %v14115_v31 = vpop.f32.mrf.mxu2  ;;  %v14118_v45 = vpop.f32.mrf.mxu0  ;;  %v14122_v7 = vunpack.c.l.b16 %v3534_v3  ;;  %v3988_v57 = vunpack.c.l.b16 %v3949_v35  ;;  %v5238_v47 = vrot.slane %v5236_v63, 5  ;;  %v5244_v0 = vrot.slane %v5242_v12, 5  ;;  %v4326_v46 = vld [vmem:[#allocation2 + $0x5c] sm:$0x1]  ;;  %6291 = vmatpush.bf16.msrb.mxu3 %v11834_v42  ;;  %v11841_v12 = vld [vmem:[#allocation3 + $0x90] sm:$0xff]  ;;  %7714 = vmatpush.bf16.msrb.mxu2 %v11873_v21 }
 0x2c3   : > { %v4464_v29 = vor.u32 %v4462_v39, %v14111_v62  ;;  %v4224_v32 = vmax.f32 %v4192_v36, 0.0  ;;  %v4465_v23 = vrot.slane %v14111_v62, 4  ;;  %v5248_v59 = vrot.slane %v5246_v16, 4 }
 0x2c4   : > { %v3694_v41 = vpop.f32.mrf.mxu3  ;;  %v5252_v35 = vshll.u32 %v11145_v6, 16  ;;  %v5239_v18 = vor.u32 %v5238_v47, %v5235_v60  ;;  %v3536_v44 = vshrl.u32 %v11029_v48, 16  ;;  %v3539_v39 = vshll.u32 %v11029_v48, 16  ;;  %v14136_v6 = vld [vmem:[%s12226_s20 + $0xd0] sm:$0xf]  ;;  %6717 = vmatpush.bf16.msrb.mxu0 %v11842_v50  ;;  %v11872_v48 = vld [vmem:[#allocation3 + $0x108] sm:$0xff] }
 0x2c5   : > { %v4741_v1 = vsel %vm13797_vm15, %v4464_v29, %v4740_v38  ;;  %v4365_v10 = vpack.c.bf16 %v4224_v32, %v4224_v32  ;;  %v3759_v4 = vadd.f32 %v3694_v41, %v16317_v22  ;;  %v11811_v3 = vld [vmem:[#allocation2 + $0x30] sm:$0xff]  ;;  %v5249_v55 = vor.u32 %v5248_v59, %v5244_v0 }
 0x2c6   : > { %4742 = vst [vmem:[#allocation2 + $0x3c] sm:$0xf] %v4741_v1  ;;  %5477 = vmatmul.bf16.gmra.mxu1 %v11811_v3  ;;  %v3607_v38 = vpack.c.b16 %v14122_v7, %v14103_v61  ;;  %v4327_v63 = vsel %vm13626_vm12, 0, %v4326_v46  ;;  %v4005_v16 = vpack.c.b16 %v3988_v57, %v3987_v30  ;;  %v5240_v29 = vrot.slane %v5239_v18, 4  ;;  %v4744_v1 = vld [vmem:[#allocation2 + $0x44] sm:$0x1]  ;;  %7715 = vmatpush.bf16.msrb.mxu2 %v11872_v48 }
 0x2c7   : > { %11256 = vmatmul.msk.bf16.gmra.mxu2 %vm754_vm3, %v5584_v33  ;;  %v4467_v36 = vshrl.u32 %v4365_v10, 16  ;;  %v4157_v58 = vadd.f32 %v14076_v49, %v3759_v4  ;;  %v11833_v33 = vld [vmem:[#allocation3 + $0x50] sm:$0xff]  ;;  %v4470_v60 = vshll.u32 %v4365_v10, 16  ;;  %4328 = vst [vmem:[#allocation2 + $0x5c] sm:$0x1] %v4327_v63  ;;  %v5250_v32 = vrot.slane %v5249_v55, 4 }
 0x2c8   : > { %v5254_v47 = vrot.slane %v5252_v35, 5  ;;  %v3538_v59 = vrot.slane %v3536_v44, 4  ;;  %v5245_v50 = vsel %vm12265_vm7, %v5240_v29, %v5244_v0  ;;  %v3541_v30 = vrot.slane %v3539_v39, 5  ;;  %6292 = vmatpush.bf16.msrb.mxu3 %v11833_v33  ;;  %v14150_v35 = vld [vmem:[%s12226_s20 + $0xd4] sm:$0x1]  ;;  %6718 = vmatpush.bf16.msrb.mxu0 %v11841_v12  ;;  %v11832_v46 = vld [vmem:[#allocation3 + $0x48] sm:$0xff] }
 0x2c9   : > { %v4469_v49 = vrot.slane %v4467_v36, 7  ;;  %v4193_v42 = vadd.f32 %v13722_v52, %v4157_v58  ;;  %v3545_v57 = vshll.u32 %v14136_v6, 16  ;;  %v3549_v21 = vshrl.u32 %v14136_v6, 16  ;;  %v11840_v18 = vld [vmem:[#allocation3 + $0x88] sm:$0xff]  ;;  %v11871_v58 = vld [vmem:[#allocation3 + $0x100] sm:$0xff]  ;;  %v16318_v12 = vld [vmem:[#allocation15_spill] sm:$0xff] }
 0x2ca   : > { %v14139_v41 = vpop.f32.mrf.mxu2  ;;  %v14141_v22 = vpop.f32.mrf.mxu0  ;;  %v5255_v52 = vsel %vm12265_vm7, %v5250_v32, %v5254_v47  ;;  %v14152_v0 = vunpack.c.l.b16 %v5245_v50  ;;  %v3542_v39 = vor.u32 %v3541_v30, %v3538_v59  ;;  %v11064_v32 = vld [vmem:[%s12226_s20 + $0xcc] sm:$0xe]  ;;  %v14169_v48 = vadd.f32 %v13429_v14, %v13467_v26  ;;  %v4279_v50 = vld [vmem:[#allocation2 + $0x60] sm:$0x1]  ;;  %7716 = vmatpush.bf16.msrb.mxu2 %v11871_v58  ;;  %s10431_s20 = sshll.u32 %s10428_s13, 4  ;;  %s10432_s20 = int_to_ptr.hbm [resolvable:$true] %s10431_s20 }
 0x2cb   : > { %v4472_v10 = vor.u32 %v4470_v60, %v4469_v49  ;;  %v4474_v4 = vrot.slane %v4469_v49, 4  ;;  %v4225_v3 = vmax.f32 %v4193_v42, 0.0  ;;  %v5569_v44 = vunpack.c.l.b16 %v5255_v52  ;;  %s12068_s15 = sshra.s32 %s10432_s20, 4  ;;  %s12069_s15 = int_to_ptr.hbm [resolvable:$true] %s12068_s15 }
 0x2cc   : > { %v3696_v55 = vpop.f32.mrf.mxu3  ;;  %v3547_v36 = vrot.slane %v3545_v57, 5  ;;  %v14165_v49 = vadd.f32 %v13338_v9, %v13411_v24  ;;  %v3551_v62 = vrot.slane %v3549_v21, 4  ;;  %6293 = vmatpush.bf16.msrb.mxu3 %v11832_v46  ;;  %v14174_v42 = vadd.f32 %v13494_v54, %v13519_v43  ;;  %6719 = vmatpush.bf16.msrb.mxu0 %v11840_v18  ;;  %v7148_v9 = vld [vmem:[#allocation2 + $0xc] sm:$0xf]  ;;  %v14183_v43 = vld [vmem:[%s16232_s2] ss:$0 sm:$0xff]  ;;  %p12075_p3 = scmp.lt.s32.totalorder %s12069_s15, %s16236_s6 }
 0x2cd   : > { %v4473_v63 = vsel %vm13840_vm0, %v4465_v23, %v4472_v10  ;;  %v4745_v33 = vsel %vm13587_vm10, %v4474_v4, %v4744_v1  ;;  %v4366_v60 = vpack.c.bf16 %v4225_v3, %v4225_v3  ;;  %v3760_v29 = vadd.f32 %v3696_v55, %v16318_v12  ;;  %11096 = vmatmul.msk.bf16.gmra.mxu0 %vm754_vm3, %v4005_v16  ;;  %v4747_v10 = vld [vmem:[#allocation2 + $0x48] sm:$0xf]  ;;  %v7149_v12 = vld [vmem:[#allocation2 + $0x10] sm:$0xf]  ;;  %s12070_s16 = scalar_lea.hbm %s12069_s15, 64 }
 0x2ce   : > { %4743 = vst [vmem:[#allocation2 + $0x40] sm:$0xf] %v4473_v63  ;;  %v3555_v23 = vshll.u32 %v14150_v35, 16  ;;  %v3543_v59 = vrot.slane %v3542_v39, 4  ;;  %v5585_v24 = vpack.c.b16 %v5569_v44, %v14152_v0  ;;  %v3552_v14 = vor.u32 %v3551_v62, %v3547_v36  ;;  %p12071_p0 = scmp.ne.s32.totalorder %s12069_s15, %s12070_s16  ;;  %p12076_p4 = scmp.lt.s32.totalorder %s12074_s26, %s12070_s16 }
 0x2cf   : > { %4746 = vst [vmem:[#allocation2 + $0x44] sm:$0x1] %v4745_v33  ;;  %v4476_v16 = vshrl.u32 %v4366_v60, 16  ;;  %v4158_v47 = vadd.f32 %v14118_v45, %v3760_v29  ;;  %v11080_v1 = vrot.slane %v11064_v32, 9  ;;  %v4479_v57 = vshll.u32 %v4366_v60, 16 }
 0x2d0   : > { %v3557_v26 = vrot.slane %v3555_v23, 5  ;;  %v3952_v21 = vrot.slane %v14136_v6, 5  ;;  %v3553_v3 = vrot.slane %v3552_v14, 4  ;;  %v3955_v52 = vrot.slane %v14150_v35, 5  ;;  %v7150_v29 = vld [vmem:[#allocation2 + $0x14] sm:$0x1]  ;;  %p12072_p1 = pnand %p12071_p0, %p12201_p5  ;;  %p12077_p7 = por %p12076_p4, %p12075_p3 }
 0x2d1   : > { %v14178_v30 = vrot.slane %v4476_v16, 7  ;;  %v4194_v54 = vadd.f32 %v14183_v43, %v4158_v47  ;;  %11047 = vmatmul.msk.bf16.gmra.mxu3 %vm754_vm3, %v3607_v38  ;;  %v4280_v46 = vsel %vm13587_vm10, 0, %v4279_v50  ;;  %v7197_v18 = vshrl.u32 %v7148_v9, 16  ;;  %v4329_v16 = vld [vmem:[#allocation2 + $0x68] sm:$0x1] }
 0x2d2   : > { %v14190_v45 = vpop.f32.mrf.mxu2  ;;  %v14193_v4 = vpop.f32.mrf.mxu0  ;;  %v3548_v61 = vsel %vm12265_vm7, %v3543_v59, %v3547_v36  ;;  %v3953_v7 = vsel %vm12237_vm6, %v11080_v1, %v3952_v21  ;;  %4281 = vst [vmem:[#allocation2 + $0x60] sm:$0x1] %v4280_v46  ;;  %v3558_v35 = vsel %vm12265_vm7, %v3553_v3, %v3557_v26  ;;  %v3954_v44 = vrot.slane %v3952_v21, 4  ;;  %v16319_v36 = vld [vmem:[#allocation16_spill] sm:$0xff]  ;;  %v7151_v50 = vld [vmem:[#allocation2 + $0x18] sm:$0xf]  ;;  %p12073_p2 = pneg %p12072_p1 }
 0x2d3   : > { %v4481_v55 = vor.u32 %v4479_v57, %v14178_v30  ;;  %v4226_v0 = vmax.f32 %v4194_v54, 0.0  ;;  %v4482_v38 = vrot.slane %v14178_v30, 4  ;;  %v14208_v39 = vadd.f32 %v13221_v56, %v13267_v51  ;;  %v11867_v51 = vld [vmem:[#allocation3 + $0xe0] sm:$0xff]  ;;  %v4751_v46 = vld [vmem:[#allocation2 + $0x50] sm:$0x1] }
 0x2d4   : > { %v3699_v6 = vpop.f32.mrf.mxu3  ;;  %v7199_v32 = vrot.slane %v7197_v18, 4  ;;  %v14214_v62 = vunpack.c.l.b16 %v3548_v61  ;;  %v3956_v23 = vsel %vm12237_vm6, %v3954_v44, %v3955_v52  ;;  %v3989_v56 = vunpack.c.l.b16 %v3953_v7  ;;  %7030 = vmatpush.bf16.msrb.mxu1 %v11867_v51  ;;  %p12078_p8 = pnand %p12077_p7, %p12073_p2 }
 0x2d5   : > { %v4748_v58 = vsel %vm13797_vm15, %v4481_v55, %v4747_v10  ;;  %v4367_v63 = vpack.c.bf16 %v4226_v0, %v4226_v0  ;;  %v3761_v33 = vadd.f32 %v3699_v6, %v16319_v36  ;;  %v11812_v60 = vld [vmem:[#allocation2 + $0x3c] sm:$0xff]  ;;  %v7200_v47 = vshll.u32 %v7148_v9, 16 }
 0x2d6   : > { %4749 = vst [vmem:[#allocation2 + $0x48] sm:$0xf] %v4748_v58  ;;  %5482 = vmatmul.bf16.gmra.mxu1 %v11812_v60  ;;  %v3592_v1 = vunpack.c.l.b16 %v3558_v35  ;;  %v3990_v30 = vunpack.c.l.b16 %v3956_v23  ;;  %v7206_v54 = vshll.u32 %v7149_v12, 16  ;;  %v7210_v9 = vshrl.u32 %v7149_v12, 16  ;;  %v14226_v58 = vld [vmem:[#allocation2 + $0x1c] sm:$0xf] }
 0x2d7   : > { %11257 = vmatmul.msk.bf16.gmra.mxu2 %vm754_vm3, %v5585_v24  ;;  %v4484_v59 = vshrl.u32 %v4367_v63, 16  ;;  %v4487_v14 = vshll.u32 %v4367_v63, 16  ;;  %v4159_v26 = vadd.f32 %v14141_v22, %v3761_v33  ;;  %v4330_v24 = vsel %vm13626_vm12, 0, %v4329_v16 }
 0x2d8   : > { %v7202_v57 = vrot.slane %v7200_v47, 5  ;;  %4331 = vst [vmem:[#allocation2 + $0x68] sm:$0x1] %v4330_v24  ;;  %v7216_v52 = vshll.u32 %v7150_v29, 16  ;;  %v4006_v18 = vpack.c.b16 %v3990_v30, %v3989_v56  ;;  %v7208_v0 = vrot.slane %v7206_v54, 5  ;;  %v16320_v56 = vld [vmem:[#allocation17_spill] sm:$0xff] }
 0x2d9   : > { %v4486_v21 = vrot.slane %v4484_v59, 7  ;;  %v4195_v10 = vadd.f32 %v14183_v43, %v4159_v26  ;;  %v7221_v61 = vshrl.u32 %v7151_v50, 16  ;;  %v7212_v44 = vrot.slane %v7210_v9, 4  ;;  %v16321_v30 = vld [vmem:[#allocation20_spill] sm:$0xff] }
 0x2da   : > { %v14222_v3 = vpop.f32.mrf.mxu2  ;;  %v14224_v22 = vpop.f32.mrf.mxu0  ;;  %v7203_v55 = vor.u32 %v7202_v57, %v7199_v32  ;;  %v3608_v36 = vpack.c.b16 %v3592_v1, %v14214_v62  ;;  %v7224_v12 = vshll.u32 %v7151_v50, 16  ;;  %v7230_v59 = vshll.u32 %v14226_v58, 16  ;;  %v11831_v1 = vld [vmem:[#allocation3 + $0x40] sm:$0xff] }
 0x2db   : > { %v4489_v7 = vor.u32 %v4487_v14, %v4486_v21  ;;  %v4491_v6 = vrot.slane %v4486_v21, 4  ;;  %v4227_v35 = vmax.f32 %v4195_v10, 0.0  ;;  %v14229_v60 = vrot.slane %v7221_v61, 4  ;;  %v11839_v50 = vld [vmem:[#allocation3 + $0x80] sm:$0xff]  ;;  %v5726_v10 = vld [vmem:[#allocation2] sm:$0xf]  ;;  %6294 = vmatpush.bf16.msrb.mxu3 %v11831_v1 }
 0x2dc   : > { %v3701_v63 = vpop.f32.mrf.mxu3  ;;  %v7204_v33 = vrot.slane %v7203_v55, 4  ;;  %v7213_v62 = vor.u32 %v7212_v44, %v7208_v0  ;;  %v14239_v47 = vrot.slane %v7224_v12, 5  ;;  %v7218_v26 = vrot.slane %v7216_v52, 5  ;;  %6720 = vmatpush.bf16.msrb.mxu0 %v11839_v50  ;;  %v5727_v52 = vld [vmem:[#allocation2 + $0x4] sm:$0xf] }
 0x2dd   : > { %v4490_v29 = vsel %vm13840_vm0, %v4482_v38, %v4489_v7  ;;  %v4752_v32 = vsel %vm13587_vm10, %v4491_v6, %v4751_v46  ;;  %v4368_v23 = vpack.c.bf16 %v4227_v35, %v4227_v35  ;;  %v3762_v51 = vadd.f32 %v3701_v63, %v16320_v56  ;;  %11097 = vmatmul.msk.bf16.gmra.mxu0 %vm754_vm3, %v4006_v18 }
 0x2de   : > { %4750 = vst [vmem:[#allocation2 + $0x4c] sm:$0xf] %v4490_v29  ;;  %v7209_v16 = vsel %vm12265_vm7, %v7204_v33, %v7208_v0  ;;  %v14245_v24 = vadd.f32 %v16321_v30, %v13894_v28  ;;  %v7214_v54 = vrot.slane %v7213_v62, 4  ;;  %v7227_v9 = vor.u32 %v14239_v47, %v14229_v60  ;;  %v4754_v0 = vld [vmem:[#allocation2 + $0x54] sm:$0xf] }
 0x2df   : > { %4753 = vst [vmem:[#allocation2 + $0x50] sm:$0x1] %v4752_v32  ;;  %v4493_v14 = vshrl.u32 %v4368_v23, 16  ;;  %v4160_v38 = vadd.f32 %v14193_v4, %v3762_v51  ;;  %v4496_v57 = vshll.u32 %v4368_v23, 16  ;;  %v7597_v21 = vunpack.c.l.b16 %v7209_v16  ;;  %v5728_v29 = vld [vmem:[#allocation2 + $0x8] sm:$0x1] }
 0x2e0   : > { %v5775_v55 = vshrl.u32 %v5726_v10, 16  ;;  %v14255_v28 = vrot.slane %v7230_v59, 5  ;;  %v7219_v7 = vsel %vm12265_vm7, %v7214_v54, %v7218_v26  ;;  %v5778_v6 = vshll.u32 %v5726_v10, 16  ;;  %v6408_v32 = vld [vmem:[#allocation2] sm:$0xe] }
 0x2e1   : > { %v14249_v46 = vrot.slane %v4493_v14, 7  ;;  %v4196_v18 = vadd.f32 %v14183_v43, %v4160_v38  ;;  %11048 = vmatmul.msk.bf16.gmra.mxu3 %vm754_vm3, %v3608_v36  ;;  %v5784_v35 = vshll.u32 %v5727_v52, 16  ;;  %v5788_v44 = vshrl.u32 %v5727_v52, 16  ;;  %v16322_v38 = vld [vmem:[#allocation18_spill] sm:$0xff]  ;;  %v5729_v47 = vld [vmem:[#allocation2 + $0xc] sm:$0xf] }
 0x2e2   : > { %v14253_v4 = vpop.f32.mrf.mxu2  ;;  %v14257_v61 = vpop.f32.mrf.mxu0  ;;  %v7598_v12 = vunpack.c.l.b16 %v7219_v7  ;;  %v5777_v56 = vrot.slane %v5775_v55, 4  ;;  %v5780_v51 = vrot.slane %v5778_v6, 5  ;;  %v5794_v54 = vshll.u32 %v5728_v29, 16  ;;  %v4282_v6 = vld [vmem:[#allocation2 + $0x6c] sm:$0x1] }
 0x2e3   : > { %v4498_v63 = vor.u32 %v4496_v57, %v14249_v46  ;;  %v4499_v36 = vrot.slane %v14249_v46, 4  ;;  %v4228_v33 = vmax.f32 %v4196_v18, 0.0  ;;  %v5786_v16 = vrot.slane %v5784_v35, 5 }
 0x2e4   : > { %v3704_v23 = vpop.f32.mrf.mxu3  ;;  %v5790_v62 = vrot.slane %v5788_v44, 4  ;;  %v7629_v50 = vpack.c.b16 %v7598_v12, %v7597_v21  ;;  %v5781_v30 = vor.u32 %v5780_v51, %v5777_v56  ;;  %v11290_v10 = vrot.slane %v6408_v32, 9  ;;  %v4332_v56 = vld [vmem:[#allocation2 + $0x74] sm:$0x1]  ;;  %v4758_v51 = vld [vmem:[#allocation2 + $0x5c] sm:$0x1] }
 0x2e5   : > { %v4755_v59 = vsel %vm13797_vm15, %v4498_v63, %v4754_v0  ;;  %v4369_v14 = vpack.c.bf16 %v4228_v33, %v4228_v33  ;;  %v3763_v26 = vadd.f32 %v3704_v23, %v16322_v38  ;;  %v11813_v1 = vld [vmem:[#allocation2 + $0x48] sm:$0xff]  ;;  %v6474_v7 = vrot.slane %v5727_v52, 5 }
 0x2e6   : > { %4756 = vst [vmem:[#allocation2 + $0x54] sm:$0xf] %v4755_v59  ;;  %v5791_v57 = vor.u32 %v5790_v62, %v5786_v16  ;;  %5487 = vmatmul.bf16.gmra.mxu1 %v11813_v1  ;;  %v5782_v35 = vrot.slane %v5781_v30, 4  ;;  %v5796_v44 = vrot.slane %v5794_v54, 5  ;;  %v6477_v63 = vrot.slane %v5728_v29, 5 }
 0x2e7   : > { %v4501_v46 = vshrl.u32 %v4369_v14, 16  ;;  %v4504_v18 = vshll.u32 %v4369_v14, 16  ;;  %v4161_v55 = vadd.f32 %v14224_v22, %v3763_v26  ;;  %7717 = vmatmul.bf16.vlgmr.msrb.gmra.mxu2 %v7629_v50  ;;  %v6475_v32 = vsel %vm12237_vm6, %v11290_v10, %v6474_v7  ;;  %v7153_v54 = vld [vmem:[#allocation2 + $0x20] sm:$0x1] }
 0x2e8   : > { %v5792_v0 = vrot.slane %v5791_v57, 4  ;;  %v6476_v23 = vrot.slane %v6474_v7, 4  ;;  %v5787_v52 = vsel %vm12265_vm7, %v5782_v35, %v5786_v16  ;;  %v6601_v29 = vunpack.c.l.b16 %v6475_v32  ;;  %v16323_v7 = vld [vmem:[#allocation19_spill] sm:$0xff] }
 0x2e9   : > { %v4503_v33 = vrot.slane %v4501_v46, 7  ;;  %v4197_v21 = vadd.f32 %v14183_v43, %v4161_v55  ;;  %v4283_v59 = vsel %vm13587_vm10, 0, %v4282_v6  ;;  %v6175_v1 = vunpack.c.l.b16 %v5787_v52  ;;  %v16325_v52 = vld [vmem:[#allocation21_spill] sm:$0xff] }
 0x2ea   : > { %v14268_v12 = vpop.f32.mrf.mxu2  ;;  %v14272_v22 = vpop.f32.mrf.mxu0  ;;  %v5797_v62 = vsel %vm12265_vm7, %v5792_v0, %v5796_v44  ;;  %4284 = vst [vmem:[#allocation2 + $0x6c] sm:$0x1] %v4283_v59  ;;  %v6478_v57 = vsel %vm12237_vm6, %v6476_v23, %v6477_v63  ;;  %v4333_v16 = vsel %vm13626_vm12, 0, %v4332_v56  ;;  %v7228_v10 = vrot.slane %v7227_v9, 4 }
 0x2eb   : > { %v4506_v14 = vor.u32 %v4504_v18, %v4503_v33  ;;  %v4508_v38 = vrot.slane %v4503_v33, 4  ;;  %v4229_v26 = vmax.f32 %v4197_v21, 0.0  ;;  %v6176_v30 = vunpack.c.l.b16 %v5797_v62  ;;  %4334 = vst [vmem:[#allocation2 + $0x74] sm:$0x1] %v4333_v16  ;;  %v14301_v21 = vld [vmem:[#allocation2 + $0x10] sm:$0xf] }
 0x2ec   : > { %v3706_v50 = vpop.f32.mrf.mxu3  ;;  %v6602_v0 = vunpack.c.l.b16 %v6478_v57  ;;  %v7233_v44 = vsel %vm12265_vm7, %v7228_v10, %v14255_v28  ;;  %v7234_v60 = vshrl.u32 %v14226_v58, 16  ;;  %v14298_v9 = vadd.f32 %v13591_v53, %v13605_v2 }
 0x2ed   : > { %v4507_v46 = vsel %vm13840_vm0, %v4499_v36, %v4506_v14  ;;  %v4759_v18 = vsel %vm13587_vm10, %v4508_v38, %v4758_v51  ;;  %v4370_v55 = vpack.c.bf16 %v4229_v26, %v4229_v26  ;;  %v3764_v6 = vadd.f32 %v3706_v50, %v16323_v7  ;;  %v16324_v51 = vld [vmem:[#allocation23_spill] sm:$0xff]  ;;  %v14312_v14 = vld [vmem:[#allocation2 + $0x14] sm:$0x1]  ;;  %v4761_v38 = vld [vmem:[#allocation2 + $0x60] sm:$0xf] }
 0x2ee   : > { %4757 = vst [vmem:[#allocation2 + $0x58] sm:$0xf] %v4507_v46  ;;  %v6207_v35 = vpack.c.b16 %v6176_v30, %v6175_v1  ;;  %v7240_v33 = vshll.u32 %v7153_v54, 16  ;;  %v6633_v23 = vpack.c.b16 %v6602_v0, %v6601_v29  ;;  %v7236_v56 = vrot.slane %v7234_v60, 4 }
 0x2ef   : > { %4760 = vst [vmem:[#allocation2 + $0x5c] sm:$0x1] %v4759_v18  ;;  %v4510_v36 = vshrl.u32 %v4370_v55, 16  ;;  %v4162_v63 = vadd.f32 %v14257_v61, %v3764_v6  ;;  %v4513_v32 = vshll.u32 %v4370_v55, 16  ;;  %v14305_v62 = vadd.f32 %v16325_v52, %v16324_v51 }
 0x2f0   : > { %v7599_v2 = vunpack.c.l.b16 %v7233_v44  ;;  %v5799_v61 = vshrl.u32 %v5729_v47, 16  ;;  %6721 = vmatmul.bf16.vlgmr.msrb.gmra.mxu0 %v6633_v23  ;;  %v7237_v29 = vor.u32 %v7236_v56, %v14255_v28  ;;  %v5802_v1 = vshll.u32 %v5729_v47, 16  ;;  %v16326_v44 = vld [vmem:[#allocation26_spill] sm:$0xff]  ;;  %v11866_v56 = vld [vmem:[#allocation3 + $0xd8] sm:$0xff] }
 0x2f1   : > { %v14307_v58 = vrot.slane %v4510_v36, 7  ;;  %v4198_v59 = vadd.f32 %v14183_v43, %v4162_v63  ;;  %6295 = vmatmul.bf16.vlgmr.msrb.gmra.mxu3 %v6207_v35  ;;  %v5808_v50 = vshll.u32 %v14301_v21, 16  ;;  %v5812_v30 = vshrl.u32 %v14301_v21, 16  ;;  %v6409_v35 = vld [vmem:[#allocation2 + $0xc] sm:$0xe]  ;;  %7031 = vmatpush.bf16.msrb.mxu1 %v11866_v56 }
 0x2f2   : > { %v14310_v53 = vpop.f32.mrf.mxu2  ;;  %v14314_v26 = vpop.f32.mrf.mxu0  ;;  %v7242_v54 = vrot.slane %v7240_v33, 5  ;;  %v5801_v10 = vrot.slane %v5799_v61, 4  ;;  %v7238_v18 = vrot.slane %v7237_v29, 4  ;;  %v5804_v55 = vrot.slane %v5802_v1, 5 }
 0x2f3   : > { %v4515_v57 = vor.u32 %v4513_v32, %v14307_v58  ;;  %v4230_v16 = vmax.f32 %v4198_v59, 0.0  ;;  %v5810_v7 = vrot.slane %v5808_v50, 5  ;;  %v5814_v6 = vrot.slane %v5812_v30, 4 }
 0x2f4   : > { %v3709_v46 = vpop.f32.mrf.mxu3  ;;  %v5818_v36 = vshll.u32 %v14312_v14, 16  ;;  %v4516_v63 = vrot.slane %v14307_v58, 4  ;;  %v7243_v33 = vsel %vm12265_vm7, %v7238_v18, %v7242_v54  ;;  %v5805_v32 = vor.u32 %v5804_v55, %v5801_v10  ;;  %v4285_v10 = vld [vmem:[#allocation2 + $0x78] sm:$0x1] }
 0x2f5   : > { %v4762_v0 = vsel %vm13797_vm15, %v4515_v57, %v4761_v38  ;;  %v4371_v28 = vpack.c.bf16 %v4230_v16, %v4230_v16  ;;  %v3765_v60 = vadd.f32 %v3709_v46, %v16326_v44  ;;  %v11814_v47 = vld [vmem:[#allocation2 + $0x54] sm:$0xff]  ;;  %v5815_v23 = vor.u32 %v5814_v6, %v5810_v7  ;;  %v14332_v46 = vpop.f32.mrf.mxu1 }
 0x2f6   : > { %4763 = vst [vmem:[#allocation2 + $0x60] sm:$0xf] %v4762_v0  ;;  %5492 = vmatmul.bf16.gmra.mxu1 %v11814_v47  ;;  %v7600_v59 = vunpack.c.l.b16 %v7243_v33  ;;  %v11291_v61 = vrot.slane %v6409_v35, 9  ;;  %v5806_v38 = vrot.slane %v5805_v32, 4  ;;  %v5820_v1 = vrot.slane %v5818_v36, 5 }
 0x2f7   : > { %v4518_v51 = vshrl.u32 %v4371_v28, 16  ;;  %v4163_v52 = vadd.f32 %v14272_v22, %v3765_v60  ;;  %v5816_v29 = vrot.slane %v5815_v23, 4  ;;  %v6481_v50 = vrot.slane %v14301_v21, 5  ;;  %v4765_v22 = vld [vmem:[#allocation2 + $0x68] sm:$0x1] }
 0x2f8   : > { %v4521_v30 = vshll.u32 %v4371_v28, 16  ;;  %v7630_v16 = vpack.c.b16 %v7600_v59, %v7599_v2  ;;  %v5811_v55 = vsel %vm12265_vm7, %v5806_v38, %v5810_v7  ;;  %v6484_v35 = vrot.slane %v14312_v14, 5  ;;  %v4335_v60 = vld [vmem:[#allocation2 + $0x80] sm:$0x1]  ;;  %v7154_v23 = vld [vmem:[#allocation2 + $0x24] sm:$0xf] }
 0x2f9   : > { %v4520_v58 = vrot.slane %v4518_v51, 7  ;;  %v4199_v57 = vadd.f32 %v14183_v43, %v4163_v52  ;;  %v5821_v21 = vsel %vm12265_vm7, %v5816_v29, %v5820_v1  ;;  %v6483_v6 = vrot.slane %v6481_v50, 4  ;;  %v16327_v52 = vld [vmem:[#allocation29_spill] sm:$0xff] }
 0x2fa   : > { %v14330_v54 = vpop.f32.mrf.mxu2  ;;  %v14334_v18 = vpop.f32.mrf.mxu0  ;;  %7722 = vmatmul.bf16.gmra.mxu2 %v7630_v16  ;;  %v6482_v44 = vsel %vm12237_vm6, %v11291_v61, %v6481_v50  ;;  %v6177_v36 = vunpack.c.l.b16 %v5811_v55  ;;  %v6178_v33 = vunpack.c.l.b16 %v5821_v21  ;;  %v4286_v32 = vsel %vm13587_vm10, 0, %v4285_v10  ;;  %v7155_v61 = vld [vmem:[#allocation2 + $0x28] sm:$0xf]  ;;  %v5732_v38 = vld [vmem:[#allocation2 + $0x18] sm:$0xf] }
 0x2fb   : > { %v4523_v0 = vor.u32 %v4521_v30, %v4520_v58  ;;  %v4525_v28 = vrot.slane %v4520_v58, 4  ;;  %v4231_v2 = vmax.f32 %v4199_v57, 0.0  ;;  %v6485_v7 = vsel %vm12237_vm6, %v6483_v6, %v6484_v35  ;;  %4287 = vst [vmem:[#allocation2 + $0x78] sm:$0x1] %v4286_v32  ;;  %v7156_v30 = vld [vmem:[#allocation2 + $0x2c] sm:$0x1] }
 0x2fc   : > { %v3711_v47 = vpop.f32.mrf.mxu3  ;;  %v6208_v29 = vpack.c.b16 %v6178_v33, %v6177_v36  ;;  %v6603_v1 = vunpack.c.l.b16 %v6482_v44  ;;  %v6604_v50 = vunpack.c.l.b16 %v6485_v7  ;;  %v4336_v58 = vsel %vm13626_vm12, 0, %v4335_v60  ;;  %v14360_v60 = vld [vmem:[#allocation2 + $0x1c] sm:$0xf] }
 0x2fd   : > { %v4524_v14 = vsel %vm13840_vm0, %v4516_v63, %v4523_v0  ;;  %v4766_v56 = vsel %vm13587_vm10, %v4525_v28, %v4765_v22  ;;  %v4372_v51 = vpack.c.bf16 %v4231_v2, %v4231_v2  ;;  %v3766_v59 = vadd.f32 %v3711_v47, %v16327_v52  ;;  %4337 = vst [vmem:[#allocation2 + $0x80] sm:$0x1] %v4336_v58  ;;  %v4768_v47 = vld [vmem:[#allocation2 + $0x6c] sm:$0xf]  ;;  %v14362_v36 = vpop.f32.mrf.mxu1 }
 0x2fe   : > { %4764 = vst [vmem:[#allocation2 + $0x64] sm:$0xf] %v4524_v14  ;;  %v7245_v10 = vshrl.u32 %v7154_v23, 16  ;;  %v6634_v22 = vpack.c.b16 %v6604_v50, %v6603_v1  ;;  %v7248_v55 = vshll.u32 %v7154_v23, 16  ;;  %v7254_v21 = vshll.u32 %v7155_v61, 16 }
 0x2ff   : > { %4767 = vst [vmem:[#allocation2 + $0x68] sm:$0x1] %v4766_v56  ;;  %v4527_v57 = vshrl.u32 %v4372_v51, 16  ;;  %v4530_v63 = vshll.u32 %v4372_v51, 16  ;;  %v4164_v16 = vadd.f32 %v14314_v26, %v3766_v59  ;;  %v7258_v6 = vshrl.u32 %v7155_v61, 16 }
 0x300   : > { %v7247_v2 = vrot.slane %v7245_v10, 4  ;;  %v7264_v44 = vshll.u32 %v7156_v30, 16  ;;  %6726 = vmatmul.bf16.gmra.mxu0 %v6634_v22  ;;  %v7250_v33 = vrot.slane %v7248_v55, 5  ;;  %v7256_v7 = vrot.slane %v7254_v21, 5  ;;  %v6410_v22 = vld [vmem:[#allocation2 + $0x18] sm:$0xe] }
 0x301   : > { %v14355_v35 = vrot.slane %v4527_v57, 7  ;;  %v4200_v0 = vadd.f32 %v14183_v43, %v4164_v16  ;;  %6300 = vmatmul.bf16.gmra.mxu3 %v6208_v29  ;;  %v7260_v32 = vrot.slane %v7258_v6, 4  ;;  %v5823_v23 = vshrl.u32 %v5732_v38, 16 }
 0x302   : > { %v14358_v28 = vpop.f32.mrf.mxu2  ;;  %v14364_v26 = vpop.f32.mrf.mxu0  ;;  %v7266_v52 = vrot.slane %v7264_v44, 5  ;;  %v7251_v61 = vor.u32 %v7250_v33, %v7247_v2  ;;  %v5826_v50 = vshll.u32 %v5732_v38, 16  ;;  %v5832_v10 = vshll.u32 %v14360_v60, 16  ;;  %v5734_v2 = vld [vmem:[#allocation2 + $0x20] sm:$0x1] }
 0x303   : > { %16328 = vst [vmem:[#allocation11_spill] sm:$0xff] %v14358_v28  ;;  %v4532_v14 = vor.u32 %v4530_v63, %v14355_v35  ;;  %v4533_v56 = vrot.slane %v14355_v35, 4  ;;  %v4232_v51 = vmax.f32 %v4200_v0, 0.0  ;;  %v7261_v29 = vor.u32 %v7260_v32, %v7256_v7 }
 0x304   : > { %v3714_v59 = vpop.f32.mrf.mxu3  ;;  %v5825_v1 = vrot.slane %v5823_v23, 4  ;;  %v7252_v63 = vrot.slane %v7251_v61, 4  ;;  %v5828_v21 = vrot.slane %v5826_v50, 5  ;;  %v5836_v6 = vshrl.u32 %v14360_v60, 16 }
 0x305   : > { %v4769_v58 = vsel %vm13797_vm15, %v4532_v14, %v4768_v47  ;;  %v4373_v30 = vpack.c.bf16 %v4232_v51, %v4232_v51  ;;  %v3767_v57 = vadd.f32 %v3714_v59, %v14208_v39  ;;  %v11815_v16 = vld [vmem:[#allocation2 + $0x60] sm:$0xff]  ;;  %v7262_v55 = vrot.slane %v7261_v29, 4  ;;  %v4772_v29 = vld [vmem:[#allocation2 + $0x74] sm:$0x1] }
 0x306   : > { %4770 = vst [vmem:[#allocation2 + $0x6c] sm:$0xf] %v4769_v58  ;;  %5497 = vmatmul.bf16.gmra.mxu1 %v11815_v16  ;;  %v5834_v44 = vrot.slane %v5832_v10, 5  ;;  %v7257_v39 = vsel %vm12265_vm7, %v7252_v63, %v7256_v7  ;;  %v5829_v33 = vor.u32 %v5828_v21, %v5825_v1  ;;  %v5838_v32 = vrot.slane %v5836_v6, 4  ;;  %v14383_v1 = vpop.f32.mrf.mxu1 }
 0x307   : > { %v4535_v35 = vshrl.u32 %v4373_v30, 16  ;;  %v4538_v0 = vshll.u32 %v4373_v30, 16  ;;  %v4165_v38 = vadd.f32 %v14334_v18, %v3767_v57  ;;  %v7267_v47 = vsel %vm12265_vm7, %v7262_v55, %v7266_v52  ;;  %16330 = vst [vmem:[#allocation13_spill] sm:$0xff] %v14383_v1 }
 0x308   : > { %v7601_v51 = vunpack.c.l.b16 %v7257_v39  ;;  %v7602_v59 = vunpack.c.l.b16 %v7267_v47  ;;  %v5830_v50 = vrot.slane %v5829_v33, 4  ;;  %v5839_v58 = vor.u32 %v5838_v32, %v5834_v44  ;;  %v4288_v47 = vld [vmem:[#allocation2 + $0x84] sm:$0x1]  ;;  %v4338_v33 = vld [vmem:[#allocation2 + $0x8c] sm:$0x1] }
 0x309   : > { %v4537_v23 = vrot.slane %v4535_v35, 7  ;;  %v4201_v14 = vadd.f32 %v14183_v43, %v4165_v38  ;;  %v5842_v30 = vshll.u32 %v5734_v2, 16  ;;  %v11292_v57 = vrot.slane %v6410_v22, 9 }
 0x30a   : > { %v14379_v61 = vpop.f32.mrf.mxu2  ;;  %v14381_v18 = vpop.f32.mrf.mxu0  ;;  %v7631_v52 = vpack.c.b16 %v7602_v59, %v7601_v51  ;;  %v5835_v55 = vsel %vm12265_vm7, %v5830_v50, %v5834_v44  ;;  %v5840_v21 = vrot.slane %v5839_v58, 4  ;;  %v6488_v35 = vrot.slane %v14360_v60, 5  ;;  %v16331_v60 = vld [vmem:[#allocation22_spill] sm:$0xff]  ;;  %v7158_v50 = vld [vmem:[#allocation2 + $0x34] sm:$0xf] }
 0x30b   : > { %16329 = vst [vmem:[#allocation12_spill] sm:$0xff] %v14379_v61  ;;  %v4540_v7 = vor.u32 %v4538_v0, %v4537_v23  ;;  %v4542_v16 = vrot.slane %v4537_v23, 4  ;;  %v4233_v10 = vmax.f32 %v4201_v14, 0.0  ;;  %v5844_v6 = vrot.slane %v5842_v30, 5 }
 0x30c   : > { %v3716_v63 = vpop.f32.mrf.mxu3  ;;  %7727 = vmatmul.bf16.gmra.mxu2 %v7631_v52  ;;  %v6179_v32 = vunpack.c.l.b16 %v5835_v55  ;;  %v6490_v23 = vrot.slane %v6488_v35, 4  ;;  %v14397_v14 = vadd.f32 %v16331_v60, %v13986_v40  ;;  %v6491_v30 = vrot.slane %v5734_v2, 5 }
 0x30d   : > { %v4541_v38 = vsel %vm13840_vm0, %v4533_v56, %v4540_v7  ;;  %v4773_v22 = vsel %vm13587_vm10, %v4542_v16, %v4772_v29  ;;  %v4374_v0 = vpack.c.bf16 %v4233_v10, %v4233_v10  ;;  %v3768_v39 = vadd.f32 %v3716_v63, %v14245_v24  ;;  %v7157_v56 = vld [vmem:[#allocation2 + $0x30] sm:$0xf]  ;;  %v4775_v10 = vld [vmem:[#allocation2 + $0x78] sm:$0xf] }
 0x30e   : > { %4771 = vst [vmem:[#allocation2 + $0x70] sm:$0xf] %v4541_v38  ;;  %v5845_v44 = vsel %vm12265_vm7, %v5840_v21, %v5844_v6  ;;  %v6489_v24 = vsel %vm12237_vm6, %v11292_v57, %v6488_v35  ;;  %v4289_v7 = vsel %vm13587_vm10, 0, %v4288_v47  ;;  %v4339_v16 = vsel %vm13626_vm12, 0, %v4338_v33  ;;  %v7159_v47 = vld [vmem:[#allocation2 + $0x38] sm:$0x1] }
 0x30f   : > { %4774 = vst [vmem:[#allocation2 + $0x74] sm:$0x1] %v4773_v22  ;;  %v4544_v51 = vshrl.u32 %v4374_v0, 16  ;;  %v4166_v59 = vadd.f32 %v14364_v26, %v3768_v39  ;;  %v6180_v29 = vunpack.c.l.b16 %v5845_v44  ;;  %v4547_v58 = vshll.u32 %v4374_v0, 16 }
 0x310   : > { %4290 = vst [vmem:[#allocation2 + $0x84] sm:$0x1] %v4289_v7  ;;  %v7269_v55 = vshrl.u32 %v7157_v56, 16  ;;  %v6492_v57 = vsel %vm12237_vm6, %v6490_v23, %v6491_v30  ;;  %v7272_v21 = vshll.u32 %v7157_v56, 16  ;;  %v7278_v6 = vshll.u32 %v7158_v50, 16 }
 0x311   : > { %v14406_v40 = vrot.slane %v4544_v51, 7  ;;  %v4202_v52 = vadd.f32 %v14183_v43, %v4166_v59  ;;  %v6209_v63 = vpack.c.b16 %v6180_v29, %v6179_v32  ;;  %4340 = vst [vmem:[#allocation2 + $0x8c] sm:$0x1] %v4339_v16  ;;  %v7282_v35 = vshrl.u32 %v7158_v50, 16  ;;  %v5735_v59 = vld [vmem:[#allocation2 + $0x24] sm:$0xf] }
 0x312   : > { %v14409_v26 = vpop.f32.mrf.mxu2  ;;  %v14413_v2 = vpop.f32.mrf.mxu0  ;;  %v6605_v0 = vunpack.c.l.b16 %v6489_v24  ;;  %v6606_v39 = vunpack.c.l.b16 %v6492_v57  ;;  %v7271_v32 = vrot.slane %v7269_v55, 4  ;;  %v7274_v60 = vrot.slane %v7272_v21, 5  ;;  %v14421_v7 = vld [vmem:[#allocation2 + $0x28] sm:$0xf] }
 0x313   : > { %16332 = vst [vmem:[#allocation14_spill] sm:$0xff] %v14409_v26  ;;  %v4549_v38 = vor.u32 %v4547_v58, %v14406_v40  ;;  %v4234_v22 = vmax.f32 %v4202_v52, 0.0  ;;  %6305 = vmatmul.bf16.gmra.mxu3 %v6209_v63  ;;  %v14416_v44 = vpop.f32.mrf.mxu1  ;;  %v7280_v51 = vrot.slane %v7278_v6, 5  ;;  %v7284_v23 = vrot.slane %v7282_v35, 4  ;;  %v11865_v55 = vld [vmem:[#allocation3 + $0xd0] sm:$0xff] }
 0x314   : > { %v3719_v33 = vpop.f32.mrf.mxu3  ;;  %v6635_v50 = vpack.c.b16 %v6606_v39, %v6605_v0  ;;  %v4550_v24 = vrot.slane %v14406_v40, 4  ;;  %v7275_v16 = vor.u32 %v7274_v60, %v7271_v32  ;;  %v7288_v63 = vshll.u32 %v7159_v47, 16  ;;  %7032 = vmatpush.bf16.msrb.mxu1 %v11865_v55  ;;  %v4779_v32 = vld [vmem:[#allocation2 + $0x80] sm:$0x1]  ;;  %v5737_v55 = vld [vmem:[#allocation2 + $0x2c] sm:$0x1] }
 0x315   : > { %v4776_v56 = vsel %vm13797_vm15, %v4549_v38, %v4775_v10  ;;  %v4375_v29 = vpack.c.bf16 %v4234_v22, %v4234_v22  ;;  %v3769_v58 = vadd.f32 %v3719_v33, %v14305_v62  ;;  %v11816_v30 = vld [vmem:[#allocation2 + $0x6c] sm:$0xff]  ;;  %v7285_v52 = vor.u32 %v7284_v23, %v7280_v51 }
 0x316   : > { %4777 = vst [vmem:[#allocation2 + $0x78] sm:$0xf] %v4776_v56  ;;  %6731 = vmatmul.bf16.gmra.mxu0 %v6635_v50  ;;  %5502 = vmatmul.bf16.gmra.mxu1 %v11816_v30  ;;  %v5847_v10 = vshrl.u32 %v5735_v59, 16  ;;  %v7276_v35 = vrot.slane %v7275_v16, 4  ;;  %v7290_v62 = vrot.slane %v7288_v63, 5  ;;  %v5850_v22 = vshll.u32 %v5735_v59, 16 }
 0x317   : > { %v4552_v57 = vshrl.u32 %v4375_v29, 16  ;;  %v4555_v21 = vshll.u32 %v4375_v29, 16  ;;  %v4167_v6 = vadd.f32 %v14381_v18, %v3769_v58  ;;  %v7286_v38 = vrot.slane %v7285_v52, 4 }
 0x318   : > { %v5849_v33 = vrot.slane %v5847_v10, 4  ;;  %v5856_v47 = vshll.u32 %v14421_v7, 16  ;;  %v7281_v60 = vsel %vm12265_vm7, %v7276_v35, %v7280_v51  ;;  %v5852_v56 = vrot.slane %v5850_v22, 5 }
 0x319   : > { %v4554_v0 = vrot.slane %v4552_v57, 7  ;;  %v4203_v40 = vadd.f32 %v14183_v43, %v4167_v6  ;;  %v7291_v18 = vsel %vm12265_vm7, %v7286_v38, %v7290_v62  ;;  %v5860_v59 = vshrl.u32 %v14421_v7, 16  ;;  %v6411_v62 = vld [vmem:[#allocation2 + $0x24] sm:$0xe] }
 0x31a   : > { %v14426_v39 = vpop.f32.mrf.mxu2  ;;  %v14433_v23 = vpop.f32.mrf.mxu0  ;;  %v7603_v30 = vunpack.c.l.b16 %v7281_v60  ;;  %v7604_v63 = vunpack.c.l.b16 %v7291_v18  ;;  %v5853_v57 = vor.u32 %v5852_v56, %v5849_v33  ;;  %v5858_v6 = vrot.slane %v5856_v47, 5  ;;  %v16334_v60 = vld [vmem:[#allocation27_spill] sm:$0xff]  ;;  %v16335_v18 = vld [vmem:[#allocation24_spill] sm:$0xff] }
 0x31b   : > { %16333 = vst [vmem:[#allocation15_spill] sm:$0xff] %v14426_v39  ;;  %v4557_v29 = vor.u32 %v4555_v21, %v4554_v0  ;;  %v4559_v50 = vrot.slane %v4554_v0, 4  ;;  %v4235_v58 = vmax.f32 %v4203_v40, 0.0  ;;  %v14436_v52 = vpop.f32.mrf.mxu1  ;;  %v5862_v51 = vrot.slane %v5860_v59, 4  ;;  %v16336_v59 = vld [vmem:[#allocation25_spill] sm:$0xff] }
 0x31c   : > { %v3721_v16 = vpop.f32.mrf.mxu3  ;;  %v7632_v22 = vpack.c.b16 %v7604_v63, %v7603_v30  ;;  %v5854_v0 = vrot.slane %v5853_v57, 4  ;;  %v3117_v1 = vadd.f32 %v16335_v18, %v16334_v60  ;;  %v5866_v56 = vshll.u32 %v5737_v55, 16 }
 0x31d   : > { %v4558_v10 = vsel %vm13840_vm0, %v4550_v24, %v4557_v29  ;;  %v4780_v35 = vsel %vm13587_vm10, %v4559_v50, %v4779_v32  ;;  %v4376_v38 = vpack.c.bf16 %v4235_v58, %v4235_v58  ;;  %v3770_v21 = vadd.f32 %v3721_v16, %v14397_v14  ;;  %v4291_v24 = vld [vmem:[#allocation2 + $0x90] sm:$0x1] }
 0x31e   : > { %4778 = vst [vmem:[#allocation2 + $0x7c] sm:$0xf] %v4558_v10  ;;  %v5863_v40 = vor.u32 %v5862_v51, %v5858_v6  ;;  %v14448_v32 = vadd.f32 %v16336_v59, %v14165_v49  ;;  %7732 = vmatmul.bf16.gmra.mxu2 %v7632_v22  ;;  %v5859_v14 = vsel %vm12265_vm7, %v5854_v0, %v5858_v6  ;;  %v11293_v50 = vrot.slane %v6411_v62, 9  ;;  %v4341_v51 = vld [vmem:[#allocation2 + $0x98] sm:$0x1] }
 0x31f   : > { %4781 = vst [vmem:[#allocation2 + $0x80] sm:$0x1] %v4780_v35  ;;  %v4561_v33 = vshrl.u32 %v4376_v38, 16  ;;  %v4168_v47 = vadd.f32 %v14413_v2, %v3770_v21  ;;  %v6495_v58 = vrot.slane %v14421_v7, 5  ;;  %v4564_v16 = vshll.u32 %v4376_v38, 16 }
 0x320   : > { %v5864_v29 = vrot.slane %v5863_v40, 4  ;;  %v5868_v2 = vrot.slane %v5866_v56, 5  ;;  %v4782_v10 = vld [vmem:[#allocation2 + $0x84] sm:$0xf]  ;;  %v6498_v21 = vrot.slane %v5737_v55, 5  ;;  %v4292_v6 = vsel %vm13587_vm10, 0, %v4291_v24 }
 0x321   : > { %v14453_v30 = vrot.slane %v4561_v33, 7  ;;  %v4204_v63 = vadd.f32 %v14183_v43, %v4168_v47  ;;  %v6496_v49 = vsel %vm12237_vm6, %v11293_v50, %v6495_v58  ;;  %v6497_v35 = vrot.slane %v6495_v58, 4  ;;  %4293 = vst [vmem:[#allocation2 + $0x90] sm:$0x1] %v4292_v6  ;;  %v7160_v40 = vld [vmem:[#allocation2 + $0x3c] sm:$0xf] }
 0x322   : > { %v14456_v57 = vpop.f32.mrf.mxu2  ;;  %v14462_v62 = vpop.f32.mrf.mxu0  ;;  %v5869_v22 = vsel %vm12265_vm7, %v5864_v29, %v5868_v2  ;;  %v6181_v0 = vunpack.c.l.b16 %v5859_v14  ;;  %v6607_v33 = vunpack.c.l.b16 %v6496_v49  ;;  %v4342_v56 = vsel %vm13626_vm12, 0, %v4341_v51  ;;  %v5738_v24 = vld [vmem:[#allocation2 + $0x30] sm:$0xf]  ;;  %v7162_v2 = vld [vmem:[#allocation2 + $0x44] sm:$0x1] }
 0x323   : > { %16337 = vst [vmem:[#allocation16_spill] sm:$0xff] %v14456_v57  ;;  %v4566_v7 = vor.u32 %v4564_v16, %v14453_v30  ;;  %v4236_v38 = vmax.f32 %v4204_v63, 0.0  ;;  %v6182_v60 = vunpack.c.l.b16 %v5869_v22  ;;  %v6499_v18 = vsel %vm12237_vm6, %v6497_v35, %v6498_v21  ;;  %v14469_v47 = vpop.f32.mrf.mxu1  ;;  %v7161_v16 = vld [vmem:[#allocation2 + $0x40] sm:$0xf]  ;;  %v16338_v21 = vld [vmem:[#allocation31_spill] sm:$0xff]  ;;  %v16339_v6 = vld [vmem:[#allocation28_spill] sm:$0xff] }
 0x324   : > { %v3724_v55 = vpop.f32.mrf.mxu3  ;;  %v6608_v29 = vunpack.c.l.b16 %v6499_v18  ;;  %4343 = vst [vmem:[#allocation2 + $0x98] sm:$0x1] %v4342_v56  ;;  %v7293_v49 = vshrl.u32 %v7160_v40, 16  ;;  %v7296_v35 = vshll.u32 %v7160_v40, 16  ;;  %v14477_v22 = vadd.f32 %v16339_v6, %v16338_v21 }
 0x325   : > { %v4783_v59 = vsel %vm13797_vm15, %v4566_v7, %v4782_v10  ;;  %v4377_v50 = vpack.c.bf16 %v4236_v38, %v4236_v38  ;;  %v3771_v14 = vadd.f32 %v3724_v55, %v3117_v1  ;;  %v11817_v58 = vld [vmem:[#allocation2 + $0x78] sm:$0xff]  ;;  %v6210_v63 = vpack.c.b16 %v6182_v60, %v6181_v0 }
 0x326   : > { %4784 = vst [vmem:[#allocation2 + $0x84] sm:$0xf] %v4783_v59  ;;  %v6636_v39 = vpack.c.b16 %v6608_v29, %v6607_v33  ;;  %5507 = vmatmul.bf16.gmra.mxu1 %v11817_v58  ;;  %v7295_v1 = vrot.slane %v7293_v49, 4  ;;  %v7298_v7 = vrot.slane %v7296_v35, 5  ;;  %v7302_v38 = vshll.u32 %v7161_v16, 16 }
 0x327   : > { %v4569_v51 = vshrl.u32 %v4377_v50, 16  ;;  %v4572_v57 = vshll.u32 %v4377_v50, 16  ;;  %v4169_v10 = vadd.f32 %v14433_v23, %v3771_v14  ;;  %6310 = vmatmul.bf16.gmra.mxu3 %v6210_v63  ;;  %v7306_v18 = vshrl.u32 %v7161_v16, 16  ;;  %v4786_v59 = vld [vmem:[#allocation2 + $0x8c] sm:$0x1] }
 0x328   : > { %6736 = vmatmul.bf16.gmra.mxu0 %v6636_v39  ;;  %v7312_v40 = vshll.u32 %v7162_v2, 16  ;;  %v5871_v56 = vshrl.u32 %v5738_v24, 16  ;;  %v7299_v21 = vor.u32 %v7298_v7, %v7295_v1  ;;  %v7304_v50 = vrot.slane %v7302_v38, 5  ;;  %v7177_v19 = vld [vmem:[#allocation2 + $0x80] sm:$0x1] }
 0x329   : > { %v4571_v55 = vrot.slane %v4569_v51, 7  ;;  %v4205_v0 = vadd.f32 %v14183_v43, %v4169_v10  ;;  %v7308_v33 = vrot.slane %v7306_v18, 4  ;;  %v5874_v23 = vshll.u32 %v5738_v24, 16  ;;  %v5740_v18 = vld [vmem:[#allocation2 + $0x38] sm:$0x1] }
 0x32a   : > { %v14481_v60 = vpop.f32.mrf.mxu2  ;;  %v14483_v29 = vpop.f32.mrf.mxu0  ;;  %v4567_v14 = vrot.slane %v14453_v30, 4  ;;  %v7300_v43 = vrot.slane %v7299_v21, 4  ;;  %v5873_v35 = vrot.slane %v5871_v56, 4  ;;  %v5739_v30 = vld [vmem:[#allocation2 + $0x34] sm:$0xf]  ;;  %v7314_v38 = vrot.slane %v7312_v40, 5 }
 0x32b   : > { %16340 = vst [vmem:[#allocation17_spill] sm:$0xff] %v14481_v60  ;;  %v4574_v58 = vor.u32 %v4572_v57, %v4571_v55  ;;  %v4576_v63 = vrot.slane %v4571_v55, 4  ;;  %v4237_v16 = vmax.f32 %v4205_v0, 0.0  ;;  %v14486_v39 = vpop.f32.mrf.mxu1  ;;  %v7309_v2 = vor.u32 %v7308_v33, %v7304_v50  ;;  %v14503_v40 = vld [vmem:[%s16232_s2] ss:$0 sm:$0xff] }
 0x32c   : > { %v3726_v49 = vpop.f32.mrf.mxu3  ;;  %16341 = vst [vmem:[#allocation20_spill] sm:$0xff] %v14486_v39  ;;  %v5876_v6 = vrot.slane %v5874_v23, 5  ;;  %v7305_v57 = vsel %vm12265_vm7, %v7300_v43, %v7304_v50  ;;  %v6412_v23 = vld [vmem:[#allocation2 + $0x30] sm:$0xe]  ;;  %vm10341_vm3 = vcmask 1043459  }
 0x32d   : > { %v4575_v51 = vsel %vm13840_vm0, %v4567_v14, %v4574_v58  ;;  %v4787_v10 = vsel %vm13587_vm10, %v4576_v63, %v4786_v59  ;;  %v4378_v1 = vpack.c.bf16 %v4237_v16, %v4237_v16  ;;  %v3772_v24 = vadd.f32 %v3726_v49, %v14448_v32  ;;  %v4789_v43 = vld [vmem:[#allocation2 + $0x90] sm:$0xf] }
 0x32e   : > { %4785 = vst [vmem:[#allocation2 + $0x88] sm:$0xf] %v4575_v51  ;;  %v7310_v7 = vrot.slane %v7309_v2, 4  ;;  %v5877_v55 = vor.u32 %v5876_v6, %v5873_v35  ;;  %v7605_v33 = vunpack.c.l.b16 %v7305_v57  ;;  %v5880_v14 = vshll.u32 %v5739_v30, 16 }
 0x32f   : > { %4788 = vst [vmem:[#allocation2 + $0x8c] sm:$0x1] %v4787_v10  ;;  %v4578_v0 = vshrl.u32 %v4378_v1, 16  ;;  %v4581_v56 = vshll.u32 %v4378_v1, 16  ;;  %v4170_v21 = vadd.f32 %v14462_v62, %v3772_v24  ;;  %v5884_v58 = vshrl.u32 %v5739_v30, 16 }
 0x330   : > { %v7315_v59 = vsel %vm12265_vm7, %v7310_v7, %v7314_v38  ;;  %v5878_v32 = vrot.slane %v5877_v55, 4  ;;  %v5890_v49 = vshll.u32 %v5740_v18, 16  ;;  %v5882_v2 = vrot.slane %v5880_v14, 5  ;;  %v16343_v7 = vld [vmem:[#allocation30_spill] sm:$0xff] }
 0x331   : > { %v14498_v63 = vrot.slane %v4578_v0, 7  ;;  %v4206_v50 = vadd.f32 %v14503_v40, %v4170_v21  ;;  %v7606_v16 = vunpack.c.l.b16 %v7315_v59  ;;  %v5886_v35 = vrot.slane %v5884_v58, 4 }
 0x332   : > { %v14506_v62 = vpop.f32.mrf.mxu2  ;;  %v11294_v6 = vrot.slane %v6412_v23, 9  ;;  %v6502_v51 = vrot.slane %v5739_v30, 5  ;;  %v14508_v10 = vpop.f32.mrf.mxu0  ;;  %v3120_v38 = vadd.f32 %v16343_v7, %v14169_v48  ;;  %v5883_v0 = vsel %vm12265_vm7, %v5878_v32, %v5882_v2  ;;  %v4294_v30 = vld [vmem:[#allocation2 + $0x9c] sm:$0x1] }
 0x333   : > { %16342 = vst [vmem:[#allocation18_spill] sm:$0xff] %v14506_v62  ;;  %v4583_v1 = vor.u32 %v4581_v56, %v14498_v63  ;;  %v4238_v24 = vmax.f32 %v4206_v50, 0.0  ;;  %v7633_v57 = vpack.c.b16 %v7606_v16, %v7605_v33  ;;  %v4584_v55 = vrot.slane %v14498_v63, 4  ;;  %v14518_v14 = vpop.f32.mrf.mxu1  ;;  %v4344_v63 = vld [vmem:[#allocation2 + $0xa4] sm:$0x1] }
 0x334   : > { %v5887_v21 = vor.u32 %v5886_v35, %v5882_v2  ;;  %v6503_v59 = vsel %vm12237_vm6, %v11294_v6, %v6502_v51  ;;  %v3729_v23 = vpop.f32.mrf.mxu3  ;;  %v5892_v58 = vrot.slane %v5890_v49, 5  ;;  %v6504_v48 = vrot.slane %v6502_v51, 4  ;;  %v7163_v6 = vld [vmem:[#allocation2 + $0x48] sm:$0xf] }
 0x335   : > { %v4790_v56 = vsel %vm13797_vm15, %v4583_v1, %v4789_v43  ;;  %v4379_v33 = vpack.c.bf16 %v4238_v24, %v4238_v24  ;;  %7737 = vmatmul.bf16.gmra.mxu2 %v7633_v57  ;;  %v11818_v50 = vld [vmem:[#allocation2 + $0x84] sm:$0xff]  ;;  %v6183_v32 = vunpack.c.l.b16 %v5883_v0  ;;  %v6505_v2 = vrot.slane %v5740_v18, 5  ;;  %v7164_v43 = vld [vmem:[#allocation2 + $0x4c] sm:$0xf] }
 0x336   : > { %4791 = vst [vmem:[#allocation2 + $0x90] sm:$0xf] %v4790_v56  ;;  %v5888_v16 = vrot.slane %v5887_v21, 4  ;;  %v3773_v35 = vadd.f32 %v3729_v23, %v14477_v22  ;;  %v6609_v60 = vunpack.c.l.b16 %v6503_v59  ;;  %v4295_v11 = vsel %vm13587_vm10, 0, %v4294_v30  ;;  %5512 = vmatmul.bf16.gmra.mxu1 %v11818_v50  ;;  %v4793_v59 = vld [vmem:[#allocation2 + $0x98] sm:$0x1] }
 0x337   : > { %v4586_v7 = vshrl.u32 %v4379_v33, 16  ;;  %v4589_v62 = vshll.u32 %v4379_v33, 16  ;;  %v6506_v51 = vsel %vm12237_vm6, %v6504_v48, %v6505_v2  ;;  %4296 = vst [vmem:[#allocation2 + $0x9c] sm:$0x1] %v4295_v11  ;;  %v4345_v22 = vsel %vm13626_vm12, 0, %v4344_v63 }
 0x338   : > { %v5893_v49 = vsel %vm12265_vm7, %v5888_v16, %v5892_v58  ;;  %v4171_v1 = vadd.f32 %v14483_v29, %v3773_v35  ;;  %v6610_v57 = vunpack.c.l.b16 %v6506_v51  ;;  %4346 = vst [vmem:[#allocation2 + $0xa4] sm:$0x1] %v4345_v22  ;;  %v7317_v0 = vshrl.u32 %v7163_v6, 16  ;;  %v7165_v63 = vld [vmem:[#allocation2 + $0x50] sm:$0x1]  ;;  %v11864_v16 = vld [vmem:[#allocation3 + $0xc8] sm:$0xff] }
 0x339   : > { %v4588_v18 = vrot.slane %v4586_v7, 7  ;;  %v6184_v24 = vunpack.c.l.b16 %v5893_v49  ;;  %v7320_v30 = vshll.u32 %v7163_v6, 16  ;;  %v7326_v56 = vshll.u32 %v7164_v43, 16  ;;  %7033 = vmatpush.bf16.msrb.mxu1 %v11864_v16  ;;  %v5743_v16 = vld [vmem:[#allocation2 + $0x44] sm:$0x1] }
 0x33a   : > { %v14532_v21 = vpop.f32.mrf.mxu2  ;;  %v4207_v23 = vadd.f32 %v14503_v40, %v4171_v1  ;;  %v7330_v33 = vshrl.u32 %v7164_v43, 16  ;;  %v14535_v58 = vpop.f32.mrf.mxu0  ;;  %v6637_v50 = vpack.c.b16 %v6610_v57, %v6609_v60  ;;  %v7319_v49 = vrot.slane %v7317_v0, 4  ;;  %v16347_v57 = vld [vmem:[#allocation32_spill] sm:$0xff] }
 0x33b   : > { %16344 = vst [vmem:[#allocation19_spill] sm:$0xff] %v14532_v21  ;;  %v4591_v29 = vor.u32 %v4589_v62, %v4588_v18  ;;  %v4593_v11 = vrot.slane %v4588_v18, 4  ;;  %v6211_v48 = vpack.c.b16 %v6184_v24, %v6183_v32  ;;  %v14537_v7 = vpop.f32.mrf.mxu1  ;;  %v7322_v51 = vrot.slane %v7320_v30, 5  ;;  %v5741_v21 = vld [vmem:[#allocation2 + $0x3c] sm:$0xf]  ;;  %v16346_v24 = vld [vmem:[#allocation34_spill] sm:$0xff] }
 0x33c   : > { %v4239_v2 = vmax.f32 %v4207_v23, 0.0  ;;  %v3731_v35 = vpop.f32.mrf.mxu3  ;;  %16345 = vst [vmem:[#allocation23_spill] sm:$0xff] %v14537_v7  ;;  %v7328_v22 = vrot.slane %v7326_v56, 5  ;;  %6741 = vmatmul.bf16.gmra.mxu0 %v6637_v50  ;;  %v7332_v60 = vrot.slane %v7330_v33, 4  ;;  %v7336_v18 = vshll.u32 %v7165_v63, 16 }
 0x33d   : > { %v4592_v6 = vsel %vm13840_vm0, %v4584_v55, %v4591_v29  ;;  %v4794_v43 = vsel %vm13587_vm10, %v4593_v11, %v4793_v59  ;;  %6315 = vmatmul.bf16.gmra.mxu3 %v6211_v48  ;;  %v3774_v62 = vadd.f32 %v3731_v35, %v3120_v38  ;;  %v7323_v1 = vor.u32 %v7322_v51, %v7319_v49  ;;  %v5742_v30 = vld [vmem:[#allocation2 + $0x40] sm:$0xf] }
 0x33e   : > { %4792 = vst [vmem:[#allocation2 + $0x94] sm:$0xf] %v4592_v6  ;;  %v4380_v32 = vpack.c.bf16 %v4239_v2, %v4239_v2  ;;  %v14545_v0 = vadd.f32 %v16347_v57, %v16346_v24  ;;  %v7333_v55 = vor.u32 %v7332_v60, %v7328_v22  ;;  %v5895_v56 = vshrl.u32 %v5741_v21, 16 }
 0x33f   : > { %4795 = vst [vmem:[#allocation2 + $0x98] sm:$0x1] %v4794_v43  ;;  %v4172_v23 = vadd.f32 %v14508_v10, %v3774_v62  ;;  %v5898_v59 = vshll.u32 %v5741_v21, 16  ;;  %v7324_v38 = vrot.slane %v7323_v1, 4  ;;  %v7338_v33 = vrot.slane %v7336_v18, 5  ;;  %v16349_v18 = vld [vmem:[#allocation33_spill] sm:$0xff] }
 0x340   : > { %v4595_v29 = vshrl.u32 %v4380_v32, 16  ;;  %v4598_v11 = vshll.u32 %v4380_v32, 16  ;;  %v7334_v50 = vrot.slane %v7333_v55, 4  ;;  %v5897_v63 = vrot.slane %v5895_v56, 4  ;;  %v4796_v43 = vld [vmem:[#allocation2 + $0x9c] sm:$0xf] }
 0x341   : > { %v4208_v48 = vadd.f32 %v14503_v40, %v4172_v23  ;;  %v5900_v2 = vrot.slane %v5898_v59, 5  ;;  %v7329_v10 = vsel %vm12265_vm7, %v7324_v38, %v7328_v22  ;;  %v5904_v51 = vshll.u32 %v5742_v30, 16  ;;  %v6413_v1 = vld [vmem:[#allocation2 + $0x3c] sm:$0xe] }
 0x342   : > { %v14549_v35 = vpop.f32.mrf.mxu2  ;;  %v14551_v49 = vrot.slane %v4595_v29, 7  ;;  %v5908_v6 = vshrl.u32 %v5742_v30, 16  ;;  %v14555_v21 = vpop.f32.mrf.mxu0  ;;  %v7339_v60 = vsel %vm12265_vm7, %v7334_v50, %v7338_v33  ;;  %v3122_v24 = vadd.f32 %v16349_v18, %v14174_v42  ;;  %v4297_v42 = vld [vmem:[#allocation2 + $0xa8] sm:$0x1] }
 0x343   : > { %16348 = vst [vmem:[#allocation21_spill] sm:$0xff] %v14549_v35  ;;  %v4240_v62 = vmax.f32 %v4208_v48, 0.0  ;;  %v5901_v32 = vor.u32 %v5900_v2, %v5897_v63  ;;  %v7607_v23 = vunpack.c.l.b16 %v7329_v10  ;;  %v7608_v55 = vunpack.c.l.b16 %v7339_v60  ;;  %v14562_v59 = vpop.f32.mrf.mxu1 }
 0x344   : > { %v4600_v57 = vor.u32 %v4598_v11, %v14551_v49  ;;  %v5906_v22 = vrot.slane %v5904_v51, 5  ;;  %v3734_v56 = vpop.f32.mrf.mxu3  ;;  %v5910_v35 = vrot.slane %v5908_v6, 4  ;;  %v5914_v48 = vshll.u32 %v5743_v16, 16 }
 0x345   : > { %v4381_v29 = vpack.c.bf16 %v4240_v62, %v4240_v62  ;;  %v5902_v38 = vrot.slane %v5901_v32, 4  ;;  %v11819_v7 = vld [vmem:[#allocation2 + $0x90] sm:$0xff]  ;;  %v7634_v50 = vpack.c.b16 %v7608_v55, %v7607_v23  ;;  %v11295_v63 = vrot.slane %v6413_v1, 9 }
 0x346   : > { %v4797_v33 = vsel %vm13797_vm15, %v4600_v57, %v4796_v43  ;;  %v6509_v2 = vrot.slane %v5742_v30, 5  ;;  %v4601_v11 = vrot.slane %v14551_v49, 4  ;;  %v5911_v60 = vor.u32 %v5910_v35, %v5906_v22  ;;  %5517 = vmatmul.bf16.gmra.mxu1 %v11819_v7  ;;  %v4347_v62 = vld [vmem:[#allocation2 + $0xb0] sm:$0x1]  ;;  %v7166_v49 = vld [vmem:[#allocation2 + $0x54] sm:$0xf] }
 0x347   : > { %4798 = vst [vmem:[#allocation2 + $0x9c] sm:$0xf] %v4797_v33  ;;  %v4603_v10 = vshrl.u32 %v4381_v29, 16  ;;  %v5907_v51 = vsel %vm12265_vm7, %v5902_v38, %v5906_v22  ;;  %v4606_v6 = vshll.u32 %v4381_v29, 16  ;;  %7742 = vmatmul.bf16.gmra.mxu2 %v7634_v50  ;;  %v5916_v32 = vrot.slane %v5914_v48, 5 }
 0x348   : > { %v6510_v43 = vsel %vm12237_vm6, %v11295_v63, %v6509_v2  ;;  %v6511_v18 = vrot.slane %v6509_v2, 4  ;;  %v5912_v30 = vrot.slane %v5911_v60, 4  ;;  %v6185_v57 = vunpack.c.l.b16 %v5907_v51  ;;  %v4800_v33 = vld [vmem:[#allocation2 + $0xa4] sm:$0x1]  ;;  %v16351_v60 = vld [vmem:[#allocation9_spill] sm:$0xff] }
 0x349   : > { %v4605_v1 = vrot.slane %v4603_v10, 7  ;;  %v6512_v23 = vrot.slane %v5743_v16, 5  ;;  %v6611_v26 = vunpack.c.l.b16 %v6510_v43  ;;  %v3775_v35 = vadd.f32 %v3734_v56, %v14545_v0  ;;  %v7167_v10 = vld [vmem:[#allocation2 + $0x58] sm:$0xf] }
 0x34a   : > { %v14571_v55 = vpop.f32.mrf.mxu2  ;;  %v4298_v7 = vsel %vm13587_vm10, 0, %v4297_v42  ;;  %v4348_v22 = vsel %vm13626_vm12, 0, %v4347_v62  ;;  %v5917_v48 = vsel %vm12265_vm7, %v5912_v30, %v5916_v32  ;;  %v14582_v50 = vpop.f32.mrf.mxu0  ;;  %v7341_v51 = vshrl.u32 %v7166_v49, 16 }
 0x34b   : > { %16350 = vst [vmem:[#allocation26_spill] sm:$0xff] %v14571_v55  ;;  %v4608_v29 = vor.u32 %v4606_v6, %v4605_v1  ;;  %v4610_v38 = vrot.slane %v4605_v1, 4  ;;  %v6513_v16 = vsel %vm12237_vm6, %v6511_v18, %v6512_v23  ;;  %v6186_v63 = vunpack.c.l.b16 %v5917_v48  ;;  %v14585_v42 = vpop.f32.mrf.mxu1  ;;  %v7168_v18 = vld [vmem:[#allocation2 + $0x5c] sm:$0x1]  ;;  %v5744_v1 = vld [vmem:[#allocation2 + $0x48] sm:$0xf] }
 0x34c   : > { %4299 = vst [vmem:[#allocation2 + $0xa8] sm:$0x1] %v4298_v7  ;;  %v6612_v2 = vunpack.c.l.b16 %v6513_v16  ;;  %v4173_v0 = vadd.f32 %v14535_v58, %v3775_v35  ;;  %v3736_v56 = vpop.f32.mrf.mxu3  ;;  %v14589_v62 = vadd.f32 %v14332_v46, %v16351_v60  ;;  %v7343_v35 = vrot.slane %v7341_v51, 4 }
 0x34d   : > { %4349 = vst [vmem:[#allocation2 + $0xb0] sm:$0x1] %v4348_v22  ;;  %v4609_v6 = vsel %vm13840_vm0, %v4601_v11, %v4608_v29  ;;  %v4801_v32 = vsel %vm13587_vm10, %v4610_v38, %v4800_v33  ;;  %v3776_v43 = vadd.f32 %v3736_v56, %v3122_v24  ;;  %v6212_v58 = vpack.c.b16 %v6186_v63, %v6185_v57  ;;  %v14597_v33 = vld [vmem:[#allocation2 + $0x4c] sm:$0xf]  ;;  %v16353_v56 = vld [vmem:[#allocation37_spill] sm:$0xff] }
 0x34e   : > { %4799 = vst [vmem:[#allocation2 + $0xa0] sm:$0xf] %v4609_v6  ;;  %v6638_v30 = vpack.c.b16 %v6612_v2, %v6611_v26  ;;  %v4209_v23 = vadd.f32 %v14503_v40, %v4173_v0  ;;  %v7344_v46 = vshll.u32 %v7166_v49, 16  ;;  %v7350_v22 = vshll.u32 %v7167_v10, 16 }
 0x34f   : > { %4802 = vst [vmem:[#allocation2 + $0xa4] sm:$0x1] %v4801_v32  ;;  %v4174_v7 = vadd.f32 %v14555_v21, %v3776_v43  ;;  %v7354_v48 = vshrl.u32 %v7167_v10, 16  ;;  %6320 = vmatmul.bf16.gmra.mxu3 %v6212_v58  ;;  %v7360_v29 = vshll.u32 %v7168_v18, 16  ;;  %v5919_v24 = vshrl.u32 %v5744_v1, 16  ;;  %v16354_v10 = vld [vmem:[#allocation35_spill] sm:$0xff] }
 0x350   : > { %6746 = vmatmul.bf16.gmra.mxu0 %v6638_v30  ;;  %v4241_v11 = vmax.f32 %v4209_v23, 0.0  ;;  %v5922_v38 = vshll.u32 %v5744_v1, 16  ;;  %v7346_v26 = vrot.slane %v7344_v46, 5  ;;  %v7352_v16 = vrot.slane %v7350_v22, 5  ;;  %v14604_v43 = vld [vmem:[#allocation2 + $0x50] sm:$0x1] }
 0x351   : > { %v4210_v57 = vadd.f32 %v14503_v40, %v4174_v7  ;;  %v7356_v63 = vrot.slane %v7354_v48, 4  ;;  %v5921_v21 = vrot.slane %v5919_v24, 4  ;;  %v3123_v51 = vadd.f32 %v16354_v10, %v16353_v56 }
 0x352   : > { %v14600_v2 = vpop.f32.mrf.mxu2  ;;  %v4382_v0 = vpack.c.bf16 %v4241_v11, %v4241_v11  ;;  %v5924_v49 = vrot.slane %v5922_v38, 5  ;;  %v7347_v6 = vor.u32 %v7346_v26, %v7343_v35  ;;  %v5928_v18 = vshll.u32 %v14597_v33, 16  ;;  %v14610_v38 = vpop.f32.mrf.mxu0 }
 0x353   : > { %16352 = vst [vmem:[#allocation29_spill] sm:$0xff] %v14600_v2  ;;  %v4242_v60 = vmax.f32 %v4210_v57, 0.0  ;;  %v7357_v32 = vor.u32 %v7356_v63, %v7352_v16  ;;  %v7362_v58 = vrot.slane %v7360_v29, 5  ;;  %v5932_v23 = vshrl.u32 %v14597_v33, 16  ;;  %v14608_v46 = vpop.f32.mrf.mxu1  ;;  %v4803_v10 = vld [vmem:[#allocation2 + $0xa8] sm:$0xf] }
 0x354   : > { %v4612_v1 = vshrl.u32 %v4382_v0, 16  ;;  %v5925_v30 = vor.u32 %v5924_v49, %v5921_v21  ;;  %v3739_v7 = vpop.f32.mrf.mxu3  ;;  %v7348_v48 = vrot.slane %v7347_v6, 4  ;;  %v5930_v24 = vrot.slane %v5928_v18, 5  ;;  %v6414_v6 = vld [vmem:[#allocation2 + $0x48] sm:$0xe] }
 0x355   : > { %v4383_v22 = vpack.c.bf16 %v4242_v60, %v4242_v60  ;;  %v7358_v11 = vrot.slane %v7357_v32, 4  ;;  %v11820_v35 = vld [vmem:[#allocation2 + $0x9c] sm:$0xff]  ;;  %v4615_v26 = vshll.u32 %v4382_v0, 16  ;;  %v5934_v63 = vrot.slane %v5932_v23, 4 }
 0x356   : > { %v4614_v57 = vrot.slane %v4612_v1, 7  ;;  %v5938_v56 = vshll.u32 %v14604_v43, 16  ;;  %v7353_v21 = vsel %vm12265_vm7, %v7348_v48, %v7352_v16  ;;  %v5926_v60 = vrot.slane %v5925_v30, 4  ;;  %5522 = vmatmul.bf16.gmra.mxu1 %v11820_v35  ;;  %v4807_v48 = vld [vmem:[#allocation2 + $0xb0] sm:$0x1] }
 0x357   : > { %v4620_v29 = vshrl.u32 %v4383_v22, 16  ;;  %v7363_v49 = vsel %vm12265_vm7, %v7358_v11, %v7362_v58  ;;  %v4623_v18 = vshll.u32 %v4383_v22, 16  ;;  %v7609_v2 = vunpack.c.l.b16 %v7353_v21 }
 0x358   : > { %v4617_v32 = vor.u32 %v4615_v26, %v4614_v57  ;;  %v7610_v55 = vunpack.c.l.b16 %v7363_v49  ;;  %v4618_v1 = vrot.slane %v4614_v57, 4  ;;  %v5931_v23 = vsel %vm12265_vm7, %v5926_v60, %v5930_v24  ;;  %v7169_v49 = vld [vmem:[#allocation2 + $0x60] sm:$0xf] }
 0x359   : > { %v4622_v0 = vrot.slane %v4620_v29, 7  ;;  %v5935_v61 = vor.u32 %v5934_v63, %v5930_v24  ;;  %v5940_v58 = vrot.slane %v5938_v56, 5  ;;  %v11296_v30 = vrot.slane %v6414_v6, 9  ;;  %v16356_v63 = vld [vmem:[#allocation36_spill] sm:$0xff]  ;;  %v7170_v6 = vld [vmem:[#allocation2 + $0x64] sm:$0xf] }
 0x35a   : > { %v4804_v16 = vsel %vm13797_vm15, %v4617_v32, %v4803_v10  ;;  %v7635_v39 = vpack.c.b16 %v7610_v55, %v7609_v2  ;;  %v6516_v26 = vrot.slane %v14597_v33, 5  ;;  %v14622_v57 = vpop.f32.mrf.mxu2  ;;  %v6187_v29 = vunpack.c.l.b16 %v5931_v23  ;;  %v4350_v2 = vld [vmem:[#allocation2 + $0xbc] sm:$0x1] }
 0x35b   : > { %4805 = vst [vmem:[#allocation2 + $0xa8] sm:$0xf] %v4804_v16  ;;  %v4625_v11 = vor.u32 %v4623_v18, %v4622_v0  ;;  %v4627_v35 = vrot.slane %v4622_v0, 4  ;;  %v5936_v22 = vrot.slane %v5935_v61, 4  ;;  %v3777_v21 = vadd.f32 %v3739_v7, %v3123_v51  ;;  %v14628_v56 = vpop.f32.mrf.mxu1  ;;  %v7171_v0 = vld [vmem:[#allocation2 + $0x68] sm:$0x1]  ;;  %v14642_v16 = vpop.f32.mrf.mxu0 }
 0x35c   : > { %16355 = vst [vmem:[#allocation22_spill] sm:$0xff] %v14622_v57  ;;  %7747 = vmatmul.bf16.gmra.mxu2 %v7635_v39  ;;  %v4301_v24 = vsel %vm13587_vm10, 0, %v4300_v37  ;;  %v3124_v10 = vadd.f32 %v16356_v63, %v14298_v9  ;;  %v3741_v55 = vpop.f32.mrf.mxu3  ;;  %v6517_v37 = vsel %vm12237_vm6, %v11296_v30, %v6516_v26  ;;  %v6518_v51 = vrot.slane %v6516_v26, 4 }
 0x35d   : > { %v4626_v61 = vsel %vm13840_vm0, %v4618_v1, %v4625_v11  ;;  %v4808_v33 = vsel %vm13587_vm10, %v4627_v35, %v4807_v48  ;;  %v5941_v39 = vsel %vm12265_vm7, %v5936_v22, %v5940_v58  ;;  %4302 = vst [vmem:[#allocation2 + $0xb4] sm:$0x1] %v4301_v24  ;;  %v6519_v7 = vrot.slane %v14604_v43, 5 }
 0x35e   : > { %4806 = vst [vmem:[#allocation2 + $0xac] sm:$0xf] %v4626_v61  ;;  %v6188_v9 = vunpack.c.l.b16 %v5941_v39  ;;  %v4175_v60 = vadd.f32 %v14582_v50, %v3777_v21  ;;  %v6613_v32 = vunpack.c.l.b16 %v6517_v37  ;;  %v3778_v18 = vadd.f32 %v3741_v55, %v3124_v10  ;;  %v5747_v50 = vld [vmem:[#allocation2 + $0x54] sm:$0xf]  ;;  %v11863_v21 = vld [vmem:[#allocation3 + $0xc0] sm:$0xff] }
 0x35f   : > { %4809 = vst [vmem:[#allocation2 + $0xb0] sm:$0x1] %v4808_v33  ;;  %v4351_v1 = vsel %vm13626_vm12, 0, %v4350_v2  ;;  %v7365_v23 = vshrl.u32 %v7169_v49, 16  ;;  %v6520_v58 = vsel %vm12237_vm6, %v6518_v51, %v6519_v7  ;;  %v7368_v43 = vshll.u32 %v7169_v49, 16  ;;  %7034 = vmatpush.bf16.msrb.mxu1 %v11863_v21  ;;  %v16358_v51 = vld [vmem:[#allocation38_spill] sm:$0xff] }
 0x360   : > { %v6213_v48 = vpack.c.b16 %v6188_v9, %v6187_v29  ;;  %v4211_v30 = vadd.f32 %v14503_v40, %v4175_v60  ;;  %4352 = vst [vmem:[#allocation2 + $0xbc] sm:$0x1] %v4351_v1  ;;  %v6614_v11 = vunpack.c.l.b16 %v6520_v58  ;;  %v4176_v35 = vadd.f32 %v14610_v38, %v3778_v18  ;;  %v14648_v29 = vld [vmem:[#allocation2 + $0x58] sm:$0xf]  ;;  %v16357_v38 = vld [vmem:[#allocation40_spill] sm:$0xff] }
 0x361   : > { %v7367_v22 = vrot.slane %v7365_v23, 4  ;;  %v7374_v26 = vshll.u32 %v7170_v6, 16  ;;  %v7370_v63 = vrot.slane %v7368_v43, 5  ;;  %v7378_v10 = vshrl.u32 %v7170_v6, 16 }
 0x362   : > { %6325 = vmatmul.bf16.gmra.mxu3 %v6213_v48  ;;  %v4243_v24 = vmax.f32 %v4211_v30, 0.0  ;;  %v7384_v55 = vshll.u32 %v7171_v0, 16  ;;  %v6639_v2 = vpack.c.b16 %v6614_v11, %v6613_v32  ;;  %v4212_v61 = vadd.f32 %v14503_v40, %v4176_v35  ;;  %v14660_v48 = vpop.f32.mrf.mxu2  ;;  %v5749_v35 = vld [vmem:[#allocation2 + $0x5c] sm:$0x1] }
 0x363   : > { %v7376_v33 = vrot.slane %v7374_v26, 5  ;;  %v5943_v39 = vshrl.u32 %v5747_v50, 16  ;;  %v7371_v37 = vor.u32 %v7370_v63, %v7367_v22  ;;  %v7380_v9 = vrot.slane %v7378_v10, 4  ;;  %v14657_v18 = vpop.f32.mrf.mxu1  ;;  %16359 = vst [vmem:[#allocation27_spill] sm:$0xff] %v14660_v48 }
 0x364   : > { %v4384_v49 = vpack.c.bf16 %v4243_v24, %v4243_v24  ;;  %v14653_v7 = vadd.f32 %v16358_v51, %v16357_v38  ;;  %v14655_v60 = vpop.f32.mrf.mxu3  ;;  %6751 = vmatmul.bf16.gmra.mxu0 %v6639_v2  ;;  %v4244_v6 = vmax.f32 %v4212_v61, 0.0  ;;  %v5946_v32 = vshll.u32 %v5747_v50, 16  ;;  %v6415_v61 = vld [vmem:[#allocation2 + $0x54] sm:$0xe] }
 0x365   : > { %v5945_v1 = vrot.slane %v5943_v39, 4  ;;  %v5952_v0 = vshll.u32 %v14648_v29, 16  ;;  %v11821_v23 = vld [vmem:[#allocation2 + $0xa8] sm:$0xff]  ;;  %v7372_v30 = vrot.slane %v7371_v37, 4  ;;  %v7381_v43 = vor.u32 %v7380_v9, %v7376_v33  ;;  %v4810_v39 = vld [vmem:[#allocation2 + $0xb4] sm:$0xf] }
 0x366   : > { %v4629_v58 = vshrl.u32 %v4384_v49, 16  ;;  %v7386_v11 = vrot.slane %v7384_v55, 5  ;;  %v4632_v22 = vshll.u32 %v4384_v49, 16  ;;  %v4385_v26 = vpack.c.bf16 %v4244_v6, %v4244_v6  ;;  %5527 = vmatmul.bf16.gmra.mxu1 %v11821_v23  ;;  %v4144_v55 = vpop.f32.mrf.mxu0 }
 0x367   : > { %v5948_v21 = vrot.slane %v5946_v32, 5  ;;  %v5956_v24 = vshrl.u32 %v14648_v29, 16  ;;  %v7377_v50 = vsel %vm12265_vm7, %v7372_v30, %v7376_v33  ;;  %v7382_v10 = vrot.slane %v7381_v43, 4 }
 0x368   : > { %v4631_v63 = vrot.slane %v4629_v58, 7  ;;  %v5954_v2 = vrot.slane %v5952_v0, 5  ;;  %v4637_v38 = vshrl.u32 %v4385_v26, 16  ;;  %v4640_v51 = vshll.u32 %v4385_v26, 16  ;;  %v4814_v0 = vld [vmem:[#allocation2 + $0xbc] sm:$0x1] }
 0x369   : > { %v5949_v37 = vor.u32 %v5948_v21, %v5945_v1  ;;  %v5962_v9 = vshll.u32 %v5749_v35, 16  ;;  %v7387_v49 = vsel %vm12265_vm7, %v7382_v10, %v7386_v11  ;;  %v7611_v6 = vunpack.c.l.b16 %v7377_v50 }
 0x36a   : > { %v4634_v48 = vor.u32 %v4632_v22, %v4631_v63  ;;  %v5958_v32 = vrot.slane %v5956_v24, 4  ;;  %v4635_v23 = vrot.slane %v4631_v63, 4  ;;  %v4639_v58 = vrot.slane %v4637_v38, 7  ;;  %v4303_v63 = vld [vmem:[#allocation2 + $0xc0] sm:$0x1] }
 0x36b   : > { %v7612_v57 = vunpack.c.l.b16 %v7387_v49  ;;  %v5950_v28 = vrot.slane %v5949_v37, 4  ;;  %v11297_v43 = vrot.slane %v6415_v61, 9  ;;  %v6523_v1 = vrot.slane %v14648_v29, 5  ;;  %v14670_v21 = vpop.f32.mrf.mxu1  ;;  %v4353_v61 = vld [vmem:[#allocation2 + $0xc8] sm:$0x1] }
 0x36c   : > { %v4811_v33 = vsel %vm13797_vm15, %v4634_v48, %v4810_v39  ;;  %v5959_v30 = vor.u32 %v5958_v32, %v5954_v2  ;;  %v3746_v26 = vpop.f32.mrf.mxu3  ;;  %v4642_v22 = vor.u32 %v4640_v51, %v4639_v58  ;;  %v4644_v11 = vrot.slane %v4639_v58, 4  ;;  %v16360_v48 = vld [vmem:[#allocation39_spill] sm:$0xff] }
 0x36d   : > { %4812 = vst [vmem:[#allocation2 + $0xb4] sm:$0xf] %v4811_v33  ;;  %v7636_v50 = vpack.c.b16 %v7612_v57, %v7611_v6  ;;  %v5955_v24 = vsel %vm12265_vm7, %v5950_v28, %v5954_v2  ;;  %v5964_v38 = vrot.slane %v5962_v9, 5  ;;  %v6525_v37 = vrot.slane %v6523_v1, 4  ;;  %v7172_v28 = vld [vmem:[#allocation2 + $0x6c] sm:$0xf]  ;;  %v14682_v2 = vpop.f32.mrf.mxu2 }
 0x36e   : > { %v5960_v10 = vrot.slane %v5959_v30, 4  ;;  %v3126_v39 = vadd.f32 %v16360_v48, %v14589_v62  ;;  %v4643_v29 = vsel %vm13840_vm0, %v4635_v23, %v4642_v22  ;;  %v4815_v49 = vsel %vm13587_vm10, %v4644_v11, %v4814_v0  ;;  %16361 = vst [vmem:[#allocation24_spill] sm:$0xff] %v14682_v2  ;;  %v7173_v23 = vld [vmem:[#allocation2 + $0x70] sm:$0xf]  ;;  %v7174_v22 = vld [vmem:[#allocation2 + $0x74] sm:$0x1] }
 0x36f   : > { %7752 = vmatmul.bf16.gmra.mxu2 %v7636_v50  ;;  %v6524_v57 = vsel %vm12237_vm6, %v11297_v43, %v6523_v1  ;;  %v6526_v51 = vrot.slane %v5749_v35, 5  ;;  %4813 = vst [vmem:[#allocation2 + $0xb8] sm:$0xf] %v4643_v29  ;;  %v6189_v62 = vunpack.c.l.b16 %v5955_v24  ;;  %v3779_v6 = vadd.f32 %v14655_v60, %v14653_v7  ;;  %v11886_v60 = vld [vmem:[#allocation3 + $0x178] sm:$0xff] }
 0x370   : > { %v5965_v9 = vsel %vm12265_vm7, %v5960_v10, %v5964_v38  ;;  %v4304_v32 = vsel %vm13587_vm10, 0, %v4303_v63  ;;  %4816 = vst [vmem:[#allocation2 + $0xbc] sm:$0x1] %v4815_v49  ;;  %v3780_v33 = vadd.f32 %v3746_v26, %v3126_v39  ;;  %v4354_v0 = vsel %vm13626_vm12, 0, %v4353_v61  ;;  %v14695_v10 = vpop.f32.mrf.mxu0  ;;  %v5750_v38 = vld [vmem:[#allocation2 + $0x60] sm:$0xf]  ;;  %8135 = vmatpush.bf16.msra.mxu3 %v11886_v60 }
 0x371   : > { %v6190_v58 = vunpack.c.l.b16 %v5965_v9  ;;  %v6527_v35 = vsel %vm12237_vm6, %v6525_v37, %v6526_v51  ;;  %v6615_v30 = vunpack.c.l.b16 %v6524_v57  ;;  %v4177_v1 = vadd.f32 %v14642_v16, %v3779_v6  ;;  %4305 = vst [vmem:[#allocation2 + $0xc0] sm:$0x1] %v4304_v32  ;;  %v14698_v39 = vld [vmem:[#allocation2 + $0x64] sm:$0xf] }
 0x372   : > { %v6616_v43 = vunpack.c.l.b16 %v6527_v35  ;;  %v7389_v7 = vshrl.u32 %v7172_v28, 16  ;;  %v4178_v50 = vadd.f32 %v4144_v55, %v3780_v33  ;;  %4355 = vst [vmem:[#allocation2 + $0xc8] sm:$0x1] %v4354_v0  ;;  %v7392_v24 = vshll.u32 %v7172_v28, 16 }
 0x373   : > { %v6214_v11 = vpack.c.b16 %v6190_v58, %v6189_v62  ;;  %v7398_v63 = vshll.u32 %v7173_v23, 16  ;;  %v4213_v17 = vadd.f32 %v14503_v40, %v4177_v1  ;;  %v7402_v48 = vshrl.u32 %v7173_v23, 16  ;;  %v14702_v61 = vpop.f32.mrf.mxu1 }
 0x374   : > { %v6640_v26 = vpack.c.b16 %v6616_v43, %v6615_v30  ;;  %v7391_v37 = vrot.slane %v7389_v7, 4  ;;  %v14700_v16 = vpop.f32.mrf.mxu3  ;;  %v4214_v55 = vadd.f32 %v14503_v40, %v4178_v50  ;;  %v7394_v29 = vrot.slane %v7392_v24, 5 }
 0x375   : > { %6330 = vmatmul.bf16.gmra.mxu3 %v6214_v11  ;;  %v7400_v49 = vrot.slane %v7398_v63, 5  ;;  %v7408_v57 = vshll.u32 %v7174_v22, 16  ;;  %v4245_v51 = vmax.f32 %v4213_v17, 0.0  ;;  %v7404_v28 = vrot.slane %v7402_v48, 4  ;;  %v14707_v60 = vpop.f32.mrf.mxu2  ;;  %v11926_v11 = vld [vmem:[#allocation3 + $0x238] sm:$0xff] }
 0x376   : > { %6756 = vmatmul.bf16.gmra.mxu0 %v6640_v26  ;;  %v5967_v9 = vshrl.u32 %v5750_v38, 16  ;;  %v5970_v62 = vshll.u32 %v5750_v38, 16  ;;  %v4246_v6 = vmax.f32 %v4214_v55, 0.0  ;;  %v7395_v32 = vor.u32 %v7394_v29, %v7391_v37  ;;  %v11822_v35 = vld [vmem:[#allocation2 + $0xb4] sm:$0xff]  ;;  %16362 = vst [vmem:[#allocation25_spill] sm:$0xff] %v14707_v60  ;;  %9558 = vmatpush.bf16.msra.mxu2 %v11926_v11  ;;  %v16369_v60 = vld [vmem:[#allocation10_spill] sm:$0xff] }
 0x377   : > { %v7410_v23 = vrot.slane %v7408_v57, 5  ;;  %v5976_v58 = vshll.u32 %v14698_v39, 16  ;;  %v4386_v33 = vpack.c.bf16 %v4245_v51, %v4245_v51  ;;  %v7405_v0 = vor.u32 %v7404_v28, %v7400_v49  ;;  %5532 = vmatmul.bf16.gmra.mxu1 %v11822_v35  ;;  %v5752_v38 = vld [vmem:[#allocation2 + $0x68] sm:$0x1]  ;;  %v11910_v17 = vld [vmem:[#allocation3 + $0x1b8] sm:$0xff] }
 0x378   : > { %v5969_v30 = vrot.slane %v5967_v9, 4  ;;  %v5972_v43 = vrot.slane %v5970_v62, 5  ;;  %v4387_v1 = vpack.c.bf16 %v4246_v6, %v4246_v6  ;;  %v7396_v40 = vrot.slane %v7395_v32, 4  ;;  %v11918_v57 = vld [vmem:[#allocation3 + $0x1f8] sm:$0xff]  ;;  %8450 = vmatpush.bf16.msra.mxu0 %v11910_v17 }
 0x379   : > { %v5978_v7 = vrot.slane %v5976_v58, 5  ;;  %v5980_v22 = vshrl.u32 %v14698_v39, 16  ;;  %v4646_v50 = vshrl.u32 %v4386_v33, 16  ;;  %v4649_v24 = vshll.u32 %v4386_v33, 16  ;;  %v4817_v58 = vld [vmem:[#allocation2 + $0xc0] sm:$0xf]  ;;  %9132 = vmatpush.bf16.msra.mxu1 %v11918_v57 }
 0x37a   : > { %v7406_v63 = vrot.slane %v7405_v0, 4  ;;  %v5973_v26 = vor.u32 %v5972_v43, %v5969_v30  ;;  %v4654_v37 = vshrl.u32 %v4387_v1, 16  ;;  %v4657_v48 = vshll.u32 %v4387_v1, 16  ;;  %v14717_v43 = vpop.f32.mrf.mxu0  ;;  %v16365_v1 = vld [vmem:[#allocation41_spill] sm:$0xff]  ;;  %v4821_v11 = vld [vmem:[#allocation2 + $0xc8] sm:$0x1] }
 0x37b   : > { %v7401_v55 = vsel %vm12265_vm7, %v7396_v40, %v7400_v49  ;;  %v5982_v29 = vrot.slane %v5980_v22, 4  ;;  %v4648_v51 = vrot.slane %v4646_v50, 7  ;;  %v14715_v32 = vpop.f32.mrf.mxu1  ;;  %v5986_v30 = vshll.u32 %v5752_v38, 16  ;;  %v6416_v49 = vld [vmem:[#allocation2 + $0x60] sm:$0xe]  ;;  %16364 = vst [vmem:[#allocation28_spill] sm:$0xff] %v14717_v43 }
 0x37c   : > { %v7411_v28 = vsel %vm12265_vm7, %v7406_v63, %v7410_v23  ;;  %v7613_v9 = vunpack.c.l.b16 %v7401_v55  ;;  %v5974_v62 = vrot.slane %v5973_v26, 4  ;;  %v14713_v6 = vpop.f32.mrf.mxu3  ;;  %v4656_v35 = vrot.slane %v4654_v37, 7 }
 0x37d   : > { %16363 = vst [vmem:[#allocation31_spill] sm:$0xff] %v14713_v6  ;;  %v7614_v33 = vunpack.c.l.b16 %v7411_v28  ;;  %v5983_v0 = vor.u32 %v5982_v29, %v5978_v7  ;;  %v5647_v40 = vadd.f32 %v16365_v1, %v14362_v36  ;;  %v4651_v23 = vor.u32 %v4649_v24, %v4648_v51  ;;  %v7181_v6 = vld [vmem:[#allocation2 + $0x90] sm:$0xf] }
 0x37e   : > { %v4652_v22 = vrot.slane %v4648_v51, 4  ;;  %v5979_v50 = vsel %vm12265_vm7, %v5974_v62, %v5978_v7  ;;  %v4659_v63 = vor.u32 %v4657_v48, %v4656_v35  ;;  %v4661_v26 = vrot.slane %v4656_v35, 4  ;;  %v7175_v48 = vld [vmem:[#allocation2 + $0x78] sm:$0xf]  ;;  %v7176_v51 = vld [vmem:[#allocation2 + $0x7c] sm:$0xf] }
 0x37f   : > { %v7637_v17 = vpack.c.b16 %v7614_v33, %v7613_v9  ;;  %v5984_v37 = vrot.slane %v5983_v0, 4  ;;  %v4818_v55 = vsel %vm13797_vm15, %v4651_v23, %v4817_v58  ;;  %v5988_v29 = vrot.slane %v5986_v30, 5  ;;  %v14737_v33 = vpop.f32.mrf.mxu2 }
 0x380   : > { %v11298_v28 = vrot.slane %v6416_v49, 9  ;;  %v6530_v57 = vrot.slane %v14698_v39, 5  ;;  %4819 = vst [vmem:[#allocation2 + $0xc0] sm:$0xf] %v4818_v55  ;;  %v4660_v36 = vsel %vm13840_vm0, %v4652_v22, %v4659_v63  ;;  %v4822_v24 = vsel %vm13587_vm10, %v4661_v26, %v4821_v11  ;;  %v5754_v26 = vld [vmem:[#allocation2 + $0x70] sm:$0xf] }
 0x381   : > { %7757 = vmatmul.bf16.gmra.mxu2 %v7637_v17  ;;  %v14731_v7 = vadd.f32 %v14700_v16, %v5647_v40  ;;  %4820 = vst [vmem:[#allocation2 + $0xc4] sm:$0xf] %v4660_v36  ;;  %v5989_v20 = vsel %vm12265_vm7, %v5984_v37, %v5988_v29  ;;  %v6533_v62 = vrot.slane %v5752_v38, 5  ;;  %v6191_v58 = vunpack.c.l.b16 %v5979_v50  ;;  %v5753_v16 = vld [vmem:[#allocation2 + $0x6c] sm:$0xf] }
 0x382   : > { %v6531_v39 = vsel %vm12237_vm6, %v11298_v28, %v6530_v57  ;;  %v6532_v9 = vrot.slane %v6530_v57, 4  ;;  %4823 = vst [vmem:[#allocation2 + $0xc8] sm:$0x1] %v4822_v24  ;;  %v6192_v8 = vunpack.c.l.b16 %v5989_v20  ;;  %v7413_v30 = vshrl.u32 %v7175_v48, 16  ;;  %v5755_v55 = vld [vmem:[#allocation2 + $0x74] sm:$0x1] }
 0x383   : > { %v6617_v35 = vunpack.c.l.b16 %v6531_v39  ;;  %16366 = vst [vmem:[#allocation30_spill] sm:$0xff] %v14737_v33  ;;  %v7416_v49 = vshll.u32 %v7175_v48, 16  ;;  %v7422_v1 = vshll.u32 %v7176_v51, 16  ;;  %v14741_v23 = vpop.f32.mrf.mxu1  ;;  %v7426_v38 = vshrl.u32 %v7176_v51, 16  ;;  %v16367_v28 = vld [vmem:[#allocation43_spill] sm:$0xff]  ;;  %v14745_v48 = vpop.f32.mrf.mxu0 }
 0x384   : > { %v6534_v0 = vsel %vm12237_vm6, %v6532_v9, %v6533_v62  ;;  %v6301_v40 = vpop.f32.mrf.mxu3  ;;  %v6215_v22 = vpack.c.b16 %v6192_v8, %v6191_v58  ;;  %v7432_v63 = vshll.u32 %v7177_v19, 16  ;;  %v7415_v50 = vrot.slane %v7413_v30, 4  ;;  %v11847_v39 = vld [vmem:[#allocation2 + $0xc] sm:$0xff] }
 0x385   : > { %v6618_v11 = vunpack.c.l.b16 %v6534_v0  ;;  %v7418_v17 = vrot.slane %v7416_v49, 5  ;;  %v7424_v37 = vrot.slane %v7422_v1, 5  ;;  %v5991_v29 = vshrl.u32 %v5753_v16, 16  ;;  %v6417_v58 = vld [vmem:[#allocation2 + $0x6c] sm:$0xe] }
 0x386   : > { %v5652_v57 = vadd.f32 %v16367_v28, %v14416_v44  ;;  %6335 = vmatmul.bf16.gmra.mxu3 %v6215_v22  ;;  %v7428_v24 = vrot.slane %v7426_v38, 4  ;;  %v5994_v20 = vshll.u32 %v5753_v16, 16  ;;  %v6000_v51 = vshll.u32 %v5754_v26, 16 }
 0x387   : > { %v6641_v36 = vpack.c.b16 %v6618_v11, %v6617_v35  ;;  %v7419_v9 = vor.u32 %v7418_v17, %v7415_v50  ;;  %v5993_v62 = vrot.slane %v5991_v29, 4  ;;  %v6004_v19 = vshrl.u32 %v5754_v26, 16  ;;  %7035 = vmatmul.bf16.vlgmr.msrb.gmra.mxu1 %v11847_v39 }
 0x388   : > { %v7429_v8 = vor.u32 %v7428_v24, %v7424_v37  ;;  %v7434_v0 = vrot.slane %v7432_v63, 5  ;;  %v5996_v30 = vrot.slane %v5994_v20, 5  ;;  %v6010_v49 = vshll.u32 %v5755_v55, 16 }
 0x389   : > { %6761 = vmatmul.bf16.gmra.mxu0 %v6641_v36  ;;  %v7420_v1 = vrot.slane %v7419_v9, 4  ;;  %v6002_v44 = vrot.slane %v6000_v51, 5  ;;  %v6006_v22 = vrot.slane %v6004_v19, 4  ;;  %v6537_v35 = vrot.slane %v5754_v26, 5  ;;  %v7178_v19 = vld [vmem:[#allocation2 + $0x84] sm:$0xf] }
 0x38a   : > { %v7430_v11 = vrot.slane %v7429_v8, 4  ;;  %v5997_v38 = vor.u32 %v5996_v30, %v5993_v62  ;;  %v6012_v28 = vrot.slane %v6010_v49, 5  ;;  %v11299_v16 = vrot.slane %v6417_v58, 9  ;;  %v7179_v8 = vld [vmem:[#allocation2 + $0x88] sm:$0xf] }
 0x38b   : > { %v7425_v50 = vsel %vm12265_vm7, %v7420_v1, %v7424_v37  ;;  %v6007_v17 = vor.u32 %v6006_v22, %v6002_v44  ;;  %v6539_v29 = vrot.slane %v6537_v35, 4  ;;  %v6540_v33 = vrot.slane %v5755_v55, 5  ;;  %v14749_v36 = vpop.f32.mrf.mxu1  ;;  %v14761_v55 = vpop.f32.mrf.mxu2  ;;  %v7180_v22 = vld [vmem:[#allocation2 + $0x8c] sm:$0x1] }
 0x38c   : > { %v7435_v63 = vsel %vm12265_vm7, %v7430_v11, %v7434_v0  ;;  %v7615_v24 = vunpack.c.l.b16 %v7425_v50  ;;  %v5998_v20 = vrot.slane %v5997_v38, 4  ;;  %v6538_v26 = vsel %vm12237_vm6, %v11299_v16, %v6537_v35  ;;  %v14755_v39 = vpop.f32.mrf.mxu3  ;;  %16368 = vst [vmem:[#allocation34_spill] sm:$0xff] %v14761_v55  ;;  %v5756_v0 = vld [vmem:[#allocation2 + $0x78] sm:$0xf]  ;;  %v14767_v38 = vpop.f32.mrf.mxu0 }
 0x38d   : > { %v7616_v9 = vunpack.c.l.b16 %v7435_v63  ;;  %v6008_v62 = vrot.slane %v6007_v17, 4  ;;  %v6541_v37 = vsel %vm12237_vm6, %v6539_v29, %v6540_v33  ;;  %v14759_v51 = vadd.f32 %v6301_v40, %v5652_v57  ;;  %v14769_v17 = vld [vmem:[#allocation2 + $0x7c] sm:$0xf]  ;;  %v11885_v29 = vld [vmem:[#allocation3 + $0x170] sm:$0xff] }
 0x38e   : > { %v6003_v58 = vsel %vm12265_vm7, %v5998_v20, %v6002_v44  ;;  %v6619_v1 = vunpack.c.l.b16 %v6538_v26  ;;  %v6620_v11 = vunpack.c.l.b16 %v6541_v37  ;;  %v7437_v33 = vshrl.u32 %v7178_v19, 16  ;;  %v5758_v37 = vld [vmem:[#allocation2 + $0x80] sm:$0x1]  ;;  %8136 = vmatpush.bf16.msra.mxu3 %v11885_v29 }
 0x38f   : > { %v7638_v30 = vpack.c.b16 %v7616_v9, %v7615_v24  ;;  %v6013_v49 = vsel %vm12265_vm7, %v6008_v62, %v6012_v28  ;;  %v7440_v40 = vshll.u32 %v7178_v19, 16  ;;  %v6193_v57 = vunpack.c.l.b16 %v6003_v58 }
 0x390   : > { %v6194_v35 = vunpack.c.l.b16 %v6013_v49  ;;  %v7446_v16 = vshll.u32 %v7179_v8, 16  ;;  %v7450_v50 = vshrl.u32 %v7179_v8, 16  ;;  %v6015_v44 = vshrl.u32 %v5756_v0, 16 }
 0x391   : > { %7762 = vmatmul.bf16.gmra.mxu2 %v7638_v30  ;;  %v7439_v63 = vrot.slane %v7437_v33, 4  ;;  %v7442_v24 = vrot.slane %v7440_v40, 5  ;;  %v7456_v20 = vshll.u32 %v7180_v22, 16  ;;  %v6018_v28 = vshll.u32 %v5756_v0, 16  ;;  %v11848_v0 = vld [vmem:[#allocation2 + $0x18] sm:$0xff] }
 0x392   : > { %v6216_v26 = vpack.c.b16 %v6194_v35, %v6193_v57  ;;  %v7448_v9 = vrot.slane %v7446_v16, 5  ;;  %v7452_v62 = vrot.slane %v7450_v50, 4  ;;  %v6017_v49 = vrot.slane %v6015_v44, 4  ;;  %v6418_v50 = vld [vmem:[#allocation2 + $0x78] sm:$0xe] }
 0x393   : > { %v14771_v55 = vpop.f32.mrf.mxu1  ;;  %v7443_v19 = vor.u32 %v7442_v24, %v7439_v63  ;;  %v6020_v58 = vrot.slane %v6018_v28, 5  ;;  %v6024_v8 = vshll.u32 %v14769_v17, 16  ;;  %v6028_v30 = vshrl.u32 %v14769_v17, 16  ;;  %v14778_v43 = vpop.f32.mrf.mxu2 }
 0x394   : > { %v5657_v33 = vadd.f32 %v16369_v60, %v14469_v47  ;;  %v6642_v40 = vpack.c.b16 %v6620_v11, %v6619_v1  ;;  %v7453_v22 = vor.u32 %v7452_v62, %v7448_v9  ;;  %v6034_v16 = vshll.u32 %v5758_v37, 16  ;;  %16370 = vst [vmem:[#allocation32_spill] sm:$0xff] %v14778_v43  ;;  %v11925_v60 = vld [vmem:[#allocation3 + $0x230] sm:$0xff] }
 0x395   : > { %v6026_v35 = vrot.slane %v6024_v8, 5  ;;  %v6030_v57 = vrot.slane %v6028_v30, 4  ;;  %v6544_v44 = vrot.slane %v14769_v17, 5  ;;  %v7444_v63 = vrot.slane %v7443_v19, 4  ;;  %v11909_v1 = vld [vmem:[#allocation3 + $0x1b0] sm:$0xff]  ;;  %9559 = vmatpush.bf16.msra.mxu2 %v11925_v60 }
 0x396   : > { %6340 = vmatmul.bf16.gmra.mxu3 %v6216_v26  ;;  %v6306_v29 = vpop.f32.mrf.mxu3  ;;  %v7454_v24 = vrot.slane %v7453_v22, 4  ;;  %v7458_v28 = vrot.slane %v7456_v20, 5  ;;  %v6021_v2 = vor.u32 %v6020_v58, %v6017_v49  ;;  %v11917_v11 = vld [vmem:[#allocation3 + $0x1f0] sm:$0xff]  ;;  %v14786_v20 = vpop.f32.mrf.mxu0  ;;  %v6036_v49 = vrot.slane %v6034_v16, 5  ;;  %v7182_v30 = vld [vmem:[#allocation2 + $0x94] sm:$0xf]  ;;  %8451 = vmatpush.bf16.msra.mxu0 %v11909_v1 }
 0x397   : > { %v6031_v47 = vor.u32 %v6030_v57, %v6026_v35  ;;  %7040 = vmatmul.bf16.gmra.mxu1 %v11848_v0  ;;  %v7449_v26 = vsel %vm12265_vm7, %v7444_v63, %v7448_v9  ;;  %v14784_v62 = vadd.f32 %v6306_v29, %v5657_v33  ;;  %16372 = vst [vmem:[#allocation9_spill] sm:$0xff] %v14786_v20  ;;  %v6546_v58 = vrot.slane %v6544_v44, 4 }
 0x398   : > { %v7459_v17 = vsel %vm12265_vm7, %v7454_v24, %v7458_v28  ;;  %v11300_v22 = vrot.slane %v6418_v50, 9  ;;  %v7461_v57 = vshrl.u32 %v7181_v6, 16  ;;  %9133 = vmatpush.bf16.msra.mxu1 %v11917_v11  ;;  %v7617_v9 = vunpack.c.l.b16 %v7449_v26  ;;  %v5759_v28 = vld [vmem:[#allocation2 + $0x84] sm:$0xf]  ;;  %v7183_v26 = vld [vmem:[#allocation2 + $0x98] sm:$0x1] }
 0x399   : > { %6766 = vmatmul.bf16.gmra.mxu0 %v6642_v40  ;;  %16371 = vst [vmem:[#allocation33_spill] sm:$0xff] %v14784_v62  ;;  %v7618_v19 = vunpack.c.l.b16 %v7459_v17  ;;  %v6032_v8 = vrot.slane %v6031_v47, 4  ;;  %v6022_v40 = vrot.slane %v6021_v2, 4  ;;  %v6547_v29 = vrot.slane %v5758_v37, 5  ;;  %v14794_v47 = vld [vmem:[#allocation2 + $0x88] sm:$0xf] }
 0x39a   : > { %v7464_v63 = vshll.u32 %v7181_v6, 16  ;;  %v6545_v24 = vsel %vm12237_vm6, %v11300_v22, %v6544_v44  ;;  %v7470_v16 = vshll.u32 %v7182_v30, 16  ;;  %v7474_v1 = vshrl.u32 %v7182_v30, 16  ;;  %v7185_v62 = vld [vmem:[#allocation2 + $0xa0] sm:$0xf] }
 0x39b   : > { %v14788_v0 = vpop.f32.mrf.mxu1  ;;  %v6037_v33 = vsel %vm12265_vm7, %v6032_v8, %v6036_v49  ;;  %v7639_v60 = vpack.c.b16 %v7618_v19, %v7617_v9  ;;  %v6027_v2 = vsel %vm12265_vm7, %v6022_v40, %v6026_v35  ;;  %v6548_v50 = vsel %vm12237_vm6, %v6546_v58, %v6547_v29  ;;  %v14803_v9 = vpop.f32.mrf.mxu2 }
 0x39c   : > { %v6196_v11 = vunpack.c.l.b16 %v6037_v33  ;;  %v7463_v17 = vrot.slane %v7461_v57, 4  ;;  %v7466_v37 = vrot.slane %v7464_v63, 5  ;;  %v7472_v6 = vrot.slane %v7470_v16, 5  ;;  %16374 = vst [vmem:[#allocation35_spill] sm:$0xff] %v14803_v9  ;;  %v5761_v63 = vld [vmem:[#allocation2 + $0x8c] sm:$0x1] }
 0x39d   : > { %v7476_v44 = vrot.slane %v7474_v1, 4  ;;  %v6039_v49 = vshrl.u32 %v5759_v28, 16  ;;  %v6042_v22 = vshll.u32 %v5759_v28, 16  ;;  %v6048_v43 = vshll.u32 %v14794_v47, 16 }
 0x39e   : > { %v14800_v8 = vpop.f32.mrf.mxu3  ;;  %v6195_v19 = vunpack.c.l.b16 %v6027_v2  ;;  %v6052_v35 = vshrl.u32 %v14794_v47, 16  ;;  %v6622_v58 = vunpack.c.l.b16 %v6548_v50  ;;  %v7480_v40 = vshll.u32 %v7183_v26, 16  ;;  %v14810_v28 = vpop.f32.mrf.mxu0 }
 0x39f   : > { %16373 = vst [vmem:[#allocation37_spill] sm:$0xff] %v14800_v8  ;;  %v7477_v30 = vor.u32 %v7476_v44, %v7472_v6  ;;  %v14806_v33 = vrot.slane %v6048_v43, 5  ;;  %v6621_v29 = vunpack.c.l.b16 %v6545_v24  ;;  %v7467_v8 = vor.u32 %v7466_v37, %v7463_v17  ;;  %v11849_v24 = vld [vmem:[#allocation2 + $0x24] sm:$0xff]  ;;  %v7184_v17 = vld [vmem:[#allocation2 + $0x9c] sm:$0xf] }
 0x3a0   : > { %v6217_v57 = vpack.c.b16 %v6196_v11, %v6195_v19  ;;  %v6054_v16 = vrot.slane %v6052_v35, 4  ;;  %v6041_v2 = vrot.slane %v6039_v49, 4  ;;  %v6044_v20 = vrot.slane %v6042_v22, 5 }
 0x3a1   : > { %7767 = vmatmul.bf16.gmra.mxu2 %v7639_v60  ;;  %v7478_v60 = vrot.slane %v7477_v30, 4  ;;  %v6643_v50 = vpack.c.b16 %v6622_v58, %v6621_v29  ;;  %v7482_v26 = vrot.slane %v7480_v40, 5  ;;  %v6058_v43 = vshll.u32 %v5761_v63, 16  ;;  %v14820_v29 = vld [vmem:[#allocation2 + $0x94] sm:$0xf] }
 0x3a2   : > { %v6055_v9 = vor.u32 %v6054_v16, %v14806_v33  ;;  %v6551_v11 = vrot.slane %v14794_v47, 5  ;;  %v7468_v44 = vrot.slane %v7467_v8, 4  ;;  %v6045_v35 = vor.u32 %v6044_v20, %v6041_v2  ;;  %v6419_v20 = vld [vmem:[#allocation2 + $0x84] sm:$0xe] }
 0x3a3   : > { %v14808_v1 = vpop.f32.mrf.mxu1  ;;  %v7483_v19 = vsel %vm12265_vm7, %v7478_v60, %v7482_v26  ;;  %v7494_v37 = vshll.u32 %v7185_v62, 16  ;;  %v5662_v49 = vadd.f32 %v13924_v25, %v14518_v14  ;;  %v6060_v30 = vrot.slane %v6058_v43, 5  ;;  %v14822_v16 = vpop.f32.mrf.mxu2 }
 0x3a4   : > { %v6056_v22 = vrot.slane %v6055_v9, 4  ;;  %v7473_v58 = vsel %vm12265_vm7, %v7468_v44, %v7472_v6  ;;  %v6553_v40 = vrot.slane %v6551_v11, 4  ;;  %v7620_v8 = vunpack.c.l.b16 %v7483_v19  ;;  %16375 = vst [vmem:[#allocation36_spill] sm:$0xff] %v14822_v16 }
 0x3a5   : > { %v7488_v25 = vshll.u32 %v7184_v17, 16  ;;  %v6046_v14 = vrot.slane %v6045_v35, 4  ;;  %v14828_v9 = vrot.slane %v7494_v37, 5  ;;  %v7619_v26 = vunpack.c.l.b16 %v7473_v58  ;;  %v7186_v58 = vld [vmem:[#allocation2 + $0xa4] sm:$0x1] }
 0x3a6   : > { %6345 = vmatmul.bf16.gmra.mxu3 %v6217_v57  ;;  %v7498_v57 = vshrl.u32 %v7185_v62, 16  ;;  %v6061_v62 = vsel %vm12265_vm7, %v6056_v22, %v6060_v30  ;;  %v6554_v43 = vrot.slane %v5761_v63, 5  ;;  %v14833_v44 = vpop.f32.mrf.mxu0  ;;  %v6076_v35 = vshrl.u32 %v14820_v29, 16 }
 0x3a7   : > { %7045 = vmatmul.bf16.gmra.mxu1 %v11849_v24  ;;  %v6072_v24 = vshll.u32 %v14820_v29, 16  ;;  %16378 = vst [vmem:[#allocation39_spill] sm:$0xff] %v14833_v44  ;;  %v6051_v19 = vsel %vm12265_vm7, %v6046_v14, %v14806_v33  ;;  %v7490_v22 = vrot.slane %v7488_v25, 5  ;;  %v6198_v63 = vunpack.c.l.b16 %v6061_v62 }
 0x3a8   : > { %v7500_v6 = vrot.slane %v7498_v57, 4  ;;  %v6555_v37 = vsel %vm12237_vm6, %v6553_v40, %v6554_v43  ;;  %v6078_v14 = vrot.slane %v6076_v35, 4 }
 0x3a9   : > { %6771 = vmatmul.bf16.gmra.mxu0 %v6643_v50  ;;  %v7485_v50 = vshrl.u32 %v7184_v17, 16  ;;  %v7640_v17 = vpack.c.b16 %v7620_v8, %v7619_v26  ;;  %v6197_v8 = vunpack.c.l.b16 %v6051_v19  ;;  %v6624_v26 = vunpack.c.l.b16 %v6555_v37 }
 0x3aa   : > { %v6311_v47 = vpop.f32.mrf.mxu3  ;;  %v7501_v16 = vor.u32 %v7500_v6, %v14828_v9 }
 0x3ab   : > { %v14824_v60 = vadd.f32 %v6311_v47, %v5662_v49  ;;  %v14826_v2 = vpop.f32.mrf.mxu1  ;;  %v11301_v49 = vrot.slane %v6419_v20, 9  ;;  %v5762_v47 = vld [vmem:[#allocation2 + $0x90] sm:$0xf]  ;;  %v7487_v57 = vrot.slane %v7485_v50, 4  ;;  %v14844_v20 = vrot.slane %v6072_v24, 5 }
 0x3ac   : > { %16377 = vst [vmem:[#allocation38_spill] sm:$0xff] %v14826_v2  ;;  %v6063_v44 = vshrl.u32 %v5762_v47, 16  ;;  %v6066_v33 = vshll.u32 %v5762_v47, 16  ;;  %v7504_v2 = vshll.u32 %v7186_v58, 16  ;;  %v6218_v50 = vpack.c.b16 %v6198_v63, %v6197_v8  ;;  %v11908_v8 = vld [vmem:[#allocation3 + $0x1a8] sm:$0xff] }
 0x3ad   : > { %16376 = vst [vmem:[#allocation40_spill] sm:$0xff] %v14824_v60  ;;  %v6552_v30 = vsel %vm12237_vm6, %v11301_v49, %v6551_v11  ;;  %v11884_v60 = vld [vmem:[#allocation3 + $0x168] sm:$0xff]  ;;  %v7491_v40 = vor.u32 %v7490_v22, %v7487_v57  ;;  %v7502_v62 = vrot.slane %v7501_v16, 4  ;;  %v5764_v11 = vld [vmem:[#allocation2 + $0x98] sm:$0x1]  ;;  %v14848_v49 = vpop.f32.mrf.mxu2  ;;  %v6079_v35 = vor.u32 %v6078_v14, %v14844_v20  ;;  %v11850_v57 = vld [vmem:[#allocation2 + $0x30] sm:$0xff]  ;;  %8452 = vmatpush.bf16.msra.mxu0 %v11908_v8 }
 0x3ae   : > { %8137 = vmatpush.bf16.msra.mxu3 %v11884_v60  ;;  %v6623_v25 = vunpack.c.l.b16 %v6552_v30  ;;  %16380 = vst [vmem:[#allocation43_spill] sm:$0xff] %v14848_v49  ;;  %v6065_v47 = vrot.slane %v6063_v44, 4  ;;  %v6068_v24 = vrot.slane %v6066_v33, 5  ;;  %v7506_v37 = vrot.slane %v7504_v2, 5  ;;  %v14854_v16 = vpop.f32.mrf.mxu0  ;;  %v7187_v44 = vld [vmem:[#allocation2 + $0xa8] sm:$0xf] }
 0x3af   : > { %v6558_v58 = vrot.slane %v14820_v29, 5  ;;  %v7492_v60 = vrot.slane %v7491_v40, 4  ;;  %v6082_v22 = vshll.u32 %v5764_v11, 16  ;;  %16381 = vst [vmem:[#allocation10_spill] sm:$0xff] %v14854_v16  ;;  %v11924_v14 = vld [vmem:[#allocation3 + $0x228] sm:$0xff]  ;;  %v7512_v16 = vshll.u32 %v7187_v44, 16 }
 0x3b0   : > { %v6644_v19 = vpack.c.b16 %v6624_v26, %v6623_v25  ;;  %v7507_v63 = vsel %vm12265_vm7, %v7502_v62, %v7506_v37  ;;  %v6069_v29 = vor.u32 %v6068_v24, %v6065_v47  ;;  %v6080_v26 = vrot.slane %v6079_v35, 4  ;;  %v11916_v40 = vld [vmem:[#allocation3 + $0x1e8] sm:$0xff]  ;;  %v6420_v25 = vld [vmem:[#allocation2 + $0x90] sm:$0xe]  ;;  %9560 = vmatpush.bf16.msra.mxu2 %v11924_v14 }
 0x3b1   : > { %7772 = vmatmul.bf16.gmra.mxu2 %v7640_v17  ;;  %v7188_v17 = vld [vmem:[#allocation2 + $0xac] sm:$0xf]  ;;  %v7497_v2 = vsel %vm12265_vm7, %v7492_v60, %v14828_v9  ;;  %v14863_v49 = vld [vmem:[#allocation2 + $0xa0] sm:$0xf]  ;;  %v7622_v62 = vunpack.c.l.b16 %v7507_v63  ;;  %9134 = vmatpush.bf16.msra.mxu1 %v11916_v40  ;;  %v6561_v47 = vrot.slane %v5764_v11, 5 }
 0x3b2   : > { %v14850_v6 = vpop.f32.mrf.mxu3  ;;  %v7518_v30 = vshll.u32 %v7188_v17, 16  ;;  %v7522_v33 = vshrl.u32 %v7188_v17, 16  ;;  %v6084_v17 = vrot.slane %v6082_v22, 5  ;;  %v7621_v9 = vunpack.c.l.b16 %v7497_v2 }
 0x3b3   : > { %v14846_v43 = vpop.f32.mrf.mxu1  ;;  %v6096_v60 = vshll.u32 %v14863_v49, 16  ;;  %v6100_v63 = vshrl.u32 %v14863_v49, 16  ;;  %v11302_v22 = vrot.slane %v6420_v25, 9 }
 0x3b4   : > { %16379 = vst [vmem:[#allocation41_spill] sm:$0xff] %v14846_v43  ;;  %v5765_v43 = vld [vmem:[#allocation2 + $0x9c] sm:$0xf]  ;;  %v14867_v24 = vrot.slane %v7518_v30, 5  ;;  %v7524_v35 = vrot.slane %v7522_v33, 4  ;;  %v7641_v40 = vpack.c.b16 %v7622_v62, %v7621_v9 }
 0x3b5   : > { %v6090_v8 = vshll.u32 %v5765_v43, 16  ;;  %v7189_v33 = vld [vmem:[#allocation2 + $0xb0] sm:$0x1]  ;;  %v14885_v62 = vrot.slane %v6096_v60, 5  ;;  %v6102_v9 = vrot.slane %v6100_v63, 4 }
 0x3b6   : > { %6350 = vmatmul.bf16.gmra.mxu3 %v6218_v50  ;;  %v5667_v50 = vadd.f32 %v14006_v15, %v14562_v59  ;;  %v6070_v15 = vrot.slane %v6069_v29, 4  ;;  %v6085_v59 = vsel %vm12265_vm7, %v6080_v26, %v6084_v17  ;;  %v7514_v26 = vrot.slane %v7512_v16, 5 }
 0x3b7   : > { %7050 = vmatmul.bf16.gmra.mxu1 %v11850_v57  ;;  %v7509_v57 = vshrl.u32 %v7187_v44, 16  ;;  %v6087_v44 = vshrl.u32 %v5765_v43, 16  ;;  %v6200_v17 = vunpack.c.l.b16 %v6085_v59  ;;  %v7525_v25 = vor.u32 %v7524_v35, %v14867_v24  ;;  %v5767_v59 = vld [vmem:[#allocation2 + $0xa4] sm:$0x1] }
 0x3b8   : > { %v14875_v2 = vpop.f32.mrf.mxu2  ;;  %v6075_v11 = vsel %vm12265_vm7, %v6070_v15, %v14844_v20  ;;  %v6559_v43 = vsel %vm12237_vm6, %v11302_v22, %v6558_v58  ;;  %v7528_v15 = vshll.u32 %v7189_v33, 16  ;;  %v6103_v60 = vor.u32 %v6102_v9, %v14885_v62  ;;  %v7191_v22 = vld [vmem:[#allocation2 + $0xb8] sm:$0xf]  ;;  %v7190_v9 = vld [vmem:[#allocation2 + $0xb4] sm:$0xf] }
 0x3b9   : > { %6776 = vmatmul.bf16.gmra.mxu0 %v6644_v19  ;;  %v6560_v19 = vrot.slane %v6558_v58, 4  ;;  %16383 = vst [vmem:[#allocation48_spill] sm:$0xff] %v14875_v2  ;;  %v7511_v29 = vrot.slane %v7509_v57, 4  ;;  %v6199_v20 = vunpack.c.l.b16 %v6075_v11  ;;  %v6089_v2 = vrot.slane %v6087_v44, 4  ;;  %v11851_v44 = vld [vmem:[#allocation2 + $0x3c] sm:$0xff] }
 0x3ba   : > { %v6092_v57 = vrot.slane %v6090_v8, 5  ;;  %v6625_v35 = vunpack.c.l.b16 %v6559_v43  ;;  %v5669_v58 = vadd.f32 %v14045_v27, %v14585_v42  ;;  %v6106_v33 = vshll.u32 %v5767_v59, 16  ;;  %v14899_v43 = vld [vmem:[#allocation2 + $0xac] sm:$0xf] }
 0x3bb   : > { %v14865_v37 = vpop.f32.mrf.mxu1  ;;  %v6562_v14 = vsel %vm12237_vm6, %v6560_v19, %v6561_v47  ;;  %v14887_v47 = vpop.f32.mrf.mxu0  ;;  %v7515_v16 = vor.u32 %v7514_v26, %v7511_v29  ;;  %v6565_v26 = vrot.slane %v14863_v49, 5  ;;  %v7542_v27 = vshll.u32 %v7191_v22, 16 }
 0x3bc   : > { %16382 = vst [vmem:[#allocation47_spill] sm:$0xff] %v14865_v37  ;;  %v6626_v19 = vunpack.c.l.b16 %v6562_v14  ;;  %v7530_v14 = vrot.slane %v7528_v15, 5  ;;  %v6093_v11 = vor.u32 %v6092_v57, %v6089_v2  ;;  %v7546_v42 = vshrl.u32 %v7191_v22, 16 }
 0x3bd   : > { %v7516_v29 = vrot.slane %v7515_v16, 4  ;;  %v6104_v2 = vrot.slane %v6103_v60, 4  ;;  %v6108_v57 = vrot.slane %v6106_v33, 5  ;;  %v6124_v22 = vshrl.u32 %v14899_v43, 16 }
 0x3be   : > { %v6645_v63 = vpack.c.b16 %v6626_v19, %v6625_v35  ;;  %v6094_v15 = vrot.slane %v6093_v11, 4  ;;  %v6567_v35 = vrot.slane %v6565_v26, 4  ;;  %v7533_v60 = vshrl.u32 %v7190_v9, 16 }
 0x3bf   : > { %v7521_v49 = vsel %vm12265_vm7, %v7516_v29, %v14867_v24  ;;  %v6109_v11 = vsel %vm12265_vm7, %v6104_v2, %v6108_v57  ;;  %v6568_v33 = vrot.slane %v5767_v59, 5  ;;  %v5672_v59 = vadd.f32 %v14073_v13, %v14608_v46  ;;  %v6422_v46 = vld [vmem:[#allocation2 + $0xa8] sm:$0xe] }
 0x3c0   : > { %v6316_v30 = vpop.f32.mrf.mxu3  ;;  %v14901_v19 = vpop.f32.mrf.mxu2  ;;  %v7623_v24 = vunpack.c.l.b16 %v7521_v49  ;;  %v6099_v29 = vsel %vm12265_vm7, %v6094_v15, %v14885_v62  ;;  %v7535_v49 = vrot.slane %v7533_v60, 4  ;;  %v14928_v15 = vld [vmem:[#allocation2 + $0xb0] sm:$0x1]  ;;  %v11907_v60 = vld [vmem:[#allocation3 + $0x1a0] sm:$0xff] }
 0x3c1   : > { %v14880_v37 = vadd.f32 %v6316_v30, %v5667_v50  ;;  %7777 = vmatmul.bf16.gmra.mxu2 %v7641_v40  ;;  %v6219_v30 = vpack.c.b16 %v6200_v17, %v6199_v20  ;;  %v7526_v40 = vrot.slane %v7525_v25, 4  ;;  %16386 = vst [vmem:[#allocation51_spill] sm:$0xff] %v14901_v19  ;;  %v11923_v20 = vld [vmem:[#allocation3 + $0x220] sm:$0xff]  ;;  %v5768_v19 = vld [vmem:[#allocation2 + $0xa8] sm:$0xf]  ;;  %8453 = vmatpush.bf16.msra.mxu0 %v11907_v60 }
 0x3c2   : > { %9561 = vmatpush.bf16.msra.mxu2 %v11923_v20  ;;  %v6569_v20 = vsel %vm12237_vm6, %v6567_v35, %v6568_v33  ;;  %v6111_v57 = vshrl.u32 %v5768_v19, 16  ;;  %v11921_v60 = vld [vmem:[#allocation3 + $0x210] sm:$0xff] }
 0x3c3   : > { %v14889_v50 = vpop.f32.mrf.mxu1  ;;  %v7531_v25 = vsel %vm12265_vm7, %v7526_v40, %v7530_v14  ;;  %v7536_v14 = vshll.u32 %v7190_v9, 16  ;;  %v6628_v35 = vunpack.c.l.b16 %v6569_v20  ;;  %v6130_v20 = vshll.u32 %v14928_v15, 16 }
 0x3c4   : > { %16384 = vst [vmem:[#allocation49_spill] sm:$0xff] %v14889_v50  ;;  %v7624_v16 = vunpack.c.l.b16 %v7531_v25  ;;  %v7194_v50 = vld [vmem:[#allocation2 + $0xc4] sm:$0xf] }
 0x3c6   : > { %6355 = vmatmul.bf16.gmra.mxu3 %v6219_v30  ;;  %v6421_v30 = vld [vmem:[#allocation2 + $0x9c] sm:$0xe] }
 0x3c7   : > { %7055 = vmatmul.bf16.gmra.mxu1 %v11851_v44  ;;  %v14912_v44 = vrot.slane %v7542_v27, 5  ;;  %v11303_v25 = vrot.slane %v6421_v30, 9  ;;  %v6126_v27 = vrot.slane %v6124_v22, 4  ;;  %v6201_v30 = vunpack.c.l.b16 %v6099_v29 }
 0x3c8   : > { %v6318_v8 = vpop.f32.mrf.mxu3 }
 0x3c9   : > { %6781 = vmatmul.bf16.gmra.mxu0 %v6645_v63  ;;  %v14895_v17 = vadd.f32 %v6318_v8, %v5669_v58  ;;  %v6120_v58 = vshll.u32 %v14899_v43, 16  ;;  %v14910_v63 = vpop.f32.mrf.mxu0  ;;  %v7548_v8 = vrot.slane %v7546_v42, 4  ;;  %v6202_v42 = vunpack.c.l.b16 %v6109_v11 }
 0x3ca   : > { %16388 = vst [vmem:[#allocation53_spill] sm:$0xff] %v14910_v63  ;;  %v7192_v63 = vld [vmem:[#allocation2 + $0xbc] sm:$0x1]  ;;  %v6566_v62 = vsel %vm12237_vm6, %v11303_v25, %v6565_v26  ;;  %v14930_v11 = vpop.f32.mrf.mxu2 }
 0x3cb   : > { %16385 = vst [vmem:[#allocation50_spill] sm:$0xff] %v14895_v17  ;;  %v14906_v40 = vpop.f32.mrf.mxu1  ;;  %v14921_v9 = vrot.slane %v6120_v58, 5  ;;  %v7538_v17 = vrot.slane %v7536_v14, 5  ;;  %v7549_v2 = vor.u32 %v7548_v8, %v14912_v44  ;;  %v7552_v22 = vshll.u32 %v7192_v63, 16  ;;  %v11922_v14 = vld [vmem:[#allocation3 + $0x218] sm:$0xff] }
 0x3cc   : > { %16387 = vst [vmem:[#allocation52_spill] sm:$0xff] %v14906_v40  ;;  %v7642_v40 = vpack.c.b16 %v7624_v16, %v7623_v24  ;;  %v6114_v16 = vshll.u32 %v5768_v19, 16  ;;  %v11883_v24 = vld [vmem:[#allocation3 + $0x160] sm:$0xff]  ;;  %v6627_v33 = vunpack.c.l.b16 %v6566_v62  ;;  %v6113_v63 = vrot.slane %v6111_v57, 4  ;;  %9562 = vmatpush.bf16.msra.mxu2 %v11922_v14  ;;  %v7193_v62 = vld [vmem:[#allocation2 + $0xc0] sm:$0xf] }
 0x3cd   : > { %16389 = vst [vmem:[#allocation54_spill] sm:$0xff] %v14930_v11  ;;  %v6127_v13 = vor.u32 %v6126_v27, %v14921_v9  ;;  %v7539_v19 = vor.u32 %v7538_v17, %v7535_v49  ;;  %v7550_v29 = vrot.slane %v7549_v2, 4  ;;  %8138 = vmatpush.bf16.msra.mxu3 %v11883_v24  ;;  %v11852_v11 = vld [vmem:[#allocation2 + $0x48] sm:$0xff]  ;;  %v16392_v49 = vrot.slane %v14899_v43, 5 }
 0x3ce   : > { %v6116_v25 = vrot.slane %v6114_v16, 5  ;;  %v6646_v27 = vpack.c.b16 %v6628_v35, %v6627_v33  ;;  %v7570_v24 = vshrl.u32 %v7194_v50, 16  ;;  %v11882_v35 = vld [vmem:[#allocation3 + $0x158] sm:$0xff]  ;;  %v11304_v33 = vrot.slane %v6422_v46, 9 }
 0x3cf   : > { %v6128_v17 = vrot.slane %v6127_v13, 4  ;;  %v6574_v2 = vrot.slane %v16392_v49, 4  ;;  %v7540_v57 = vrot.slane %v7539_v19, 4 }
 0x3d0   : > { %v6117_v14 = vor.u32 %v6116_v25, %v6113_v63  ;;  %9563 = vmatpush.bf16.msra.mxu2 %v11921_v60 }
 0x3d1   : > { %7782 = vmatmul.bf16.gmra.mxu2 %v7642_v40  ;;  %v6220_v40 = vpack.c.b16 %v6202_v42, %v6201_v30  ;;  %v5674_v42 = vadd.f32 %v14115_v31, %v14628_v56  ;;  %v7566_v30 = vshll.u32 %v7194_v50, 16  ;;  %v6575_v31 = vrot.slane %v14928_v15, 5  ;;  %v14948_v56 = vld [vmem:[#allocation2 + $0xb8] sm:$0xf]  ;;  %8139 = vmatpush.bf16.msra.mxu3 %v11882_v35  ;;  %v11881_v50 = vld [vmem:[#allocation3 + $0x150] sm:$0xff] }
 0x3d2   : > { %v6321_v58 = vpop.f32.mrf.mxu3  ;;  %v7545_v19 = vsel %vm12265_vm7, %v7540_v57, %v14912_v44  ;;  %v11920_v44 = vld [vmem:[#allocation3 + $0x208] sm:$0xff]  ;;  %v7572_v57 = vrot.slane %v7570_v24, 4  ;;  %v6144_v35 = vshll.u32 %v14948_v56, 16 }
 0x3d3   : > { %v14932_v8 = vadd.f32 %v6321_v58, %v5672_v59  ;;  %v14936_v26 = vpop.f32.mrf.mxu1  ;;  %v14939_v59 = vpop.f32.mrf.mxu0  ;;  %v7554_v58 = vrot.slane %v7552_v22, 5  ;;  %v11906_v22 = vld [vmem:[#allocation3 + $0x198] sm:$0xff]  ;;  %v6576_v46 = vsel %vm12237_vm6, %v6574_v2, %v6575_v31  ;;  %v16396_v2 = vrot.slane %v14899_v43, 5  ;;  %v11880_v24 = vld [vmem:[#allocation3 + $0x148] sm:$0xff] }
 0x3d4   : > { %16390 = vst [vmem:[#allocation55_spill] sm:$0xff] %v14936_v26  ;;  %8454 = vmatpush.bf16.msra.mxu0 %v11906_v22  ;;  %v14965_v22 = vpop.f32.mrf.mxu2  ;;  %9564 = vmatpush.bf16.msra.mxu2 %v11920_v44  ;;  %v5677_v44 = vadd.f32 %v14139_v41, %v14657_v18 }
 0x3d5   : > { %16391 = vst [vmem:[#allocation56_spill] sm:$0xff] %v14939_v59  ;;  %v7555_v16 = vsel %vm12265_vm7, %v7550_v29, %v7554_v58  ;;  %v7560_v29 = vshll.u32 %v7193_v62, 16  ;;  %v11905_v58 = vld [vmem:[#allocation3 + $0x190] sm:$0xff]  ;;  %v6573_v60 = vsel %vm12237_vm6, %v11304_v33, %v16396_v2  ;;  %8140 = vmatpush.bf16.msra.mxu3 %v11881_v50 }
 0x3d6   : > { %6360 = vmatmul.bf16.gmra.mxu3 %v6220_v40  ;;  %v6132_v40 = vrot.slane %v6130_v20, 5  ;;  %v7626_v63 = vunpack.c.l.b16 %v7555_v16  ;;  %v11915_v20 = vld [vmem:[#allocation3 + $0x1e0] sm:$0xff]  ;;  %16395 = vst [vmem:[#allocation59_spill] sm:$0xff] %v14965_v22  ;;  %v7625_v16 = vunpack.c.l.b16 %v7545_v19  ;;  %v6630_v22 = vunpack.c.l.b16 %v6576_v46 }
 0x3d7   : > { %7060 = vmatmul.bf16.gmra.mxu1 %v11852_v11  ;;  %v5771_v11 = vld [vmem:[#allocation2 + $0xb4] sm:$0xf]  ;;  %v7562_v31 = vrot.slane %v7560_v29, 5  ;;  %v14977_v29 = vrot.slane %v6144_v35, 5 }
 0x3d8   : > { %v6133_v15 = vsel %vm12265_vm7, %v6128_v17, %v6132_v40  ;;  %v7195_v17 = vld [vmem:[#allocation2 + $0xc8] sm:$0x1]  ;;  %v6135_v40 = vshrl.u32 %v5771_v11, 16  ;;  %9135 = vmatpush.bf16.msra.mxu1 %v11915_v20  ;;  %8455 = vmatpush.bf16.msra.mxu0 %v11905_v58  ;;  %v7643_v26 = vpack.c.b16 %v7626_v63, %v7625_v16  ;;  %v8571_v20 = vld [vmem:[#allocation2 + $0x18] sm:$0xf]  ;;  %v6629_v58 = vunpack.c.l.b16 %v6573_v60 }
 0x3d9   : > { %6786 = vmatmul.bf16.gmra.mxu0 %v6646_v27  ;;  %v7557_v27 = vshrl.u32 %v7193_v62, 16  ;;  %v14961_v62 = vrot.slane %v7566_v30, 5  ;;  %v6204_v19 = vunpack.c.l.b16 %v6133_v15  ;;  %8141 = vmatpush.bf16.msra.mxu3 %v11880_v24  ;;  %v8620_v15 = vshrl.u32 %v8571_v20, 16  ;;  %v6423_v60 = vld [vmem:[#allocation2 + $0xb4] sm:$0xe]  ;;  %v11879_v24 = vld [vmem:[#allocation3 + $0x140] sm:$0xff] }
 0x3da   : > { %v6323_v13 = vpop.f32.mrf.mxu3  ;;  %v6137_v63 = vrot.slane %v6135_v40, 4  ;;  %v8623_v46 = vshll.u32 %v8571_v20, 16 }
 0x3db   : > { %v14953_v49 = vadd.f32 %v6323_v13, %v5674_v42  ;;  %v14959_v25 = vpop.f32.mrf.mxu1  ;;  %v6148_v42 = vshrl.u32 %v14948_v56, 16  ;;  %v6118_v13 = vrot.slane %v6117_v14, 4  ;;  %v7559_v30 = vrot.slane %v7557_v27, 4  ;;  %v14974_v43 = vpop.f32.mrf.mxu0 }
 0x3dc   : > { %16394 = vst [vmem:[#allocation58_spill] sm:$0xff] %v14959_v25  ;;  %v11904_v25 = vld [vmem:[#allocation3 + $0x188] sm:$0xff]  ;;  %v7573_v33 = vor.u32 %v7572_v57, %v14961_v62  ;;  %v7576_v27 = vshll.u32 %v7195_v17, 16  ;;  %v6647_v57 = vpack.c.b16 %v6630_v22, %v6629_v58  ;;  %v8625_v20 = vrot.slane %v8623_v46, 5 }
 0x3dd   : > { %16393 = vst [vmem:[#allocation57_spill] sm:$0xff] %v14953_v49  ;;  %v6138_v49 = vshll.u32 %v5771_v11, 16  ;;  %v6123_v14 = vsel %vm12265_vm7, %v6118_v13, %v14921_v9  ;;  %v11919_v11 = vld [vmem:[#allocation3 + $0x200] sm:$0xff]  ;;  %v6150_v50 = vrot.slane %v6148_v42, 4  ;;  %v7563_v59 = vor.u32 %v7562_v31, %v7559_v30  ;;  %8456 = vmatpush.bf16.msra.mxu0 %v11904_v25  ;;  %8142 = vmatpush.bf16.msra.mxu3 %v11879_v24  ;;  %v8574_v58 = vld [vmem:[#allocation2 + $0x24] sm:$0xf] }
 0x3de   : > { %v6203_v2 = vunpack.c.l.b16 %v6123_v14  ;;  %v14979_v9 = vld [vmem:[#allocation2 + $0x1c] sm:$0xf]  ;;  %9565 = vmatpush.bf16.msra.mxu2 %v11919_v11  ;;  %v7574_v17 = vrot.slane %v7573_v33, 4  ;;  %v6579_v31 = vrot.slane %v14948_v56, 5  ;;  %v11853_v11 = vld [vmem:[#allocation2 + $0x54] sm:$0xff]  ;;  %v5679_v33 = vadd.f32 %v14190_v45, %v14670_v21 }
 0x3df   : > { %v6140_v16 = vrot.slane %v6138_v49, 5  ;;  %v5773_v13 = vld [vmem:[#allocation2 + $0xbc] sm:$0x1]  ;;  %v7578_v49 = vrot.slane %v7576_v27, 5  ;;  %v6151_v40 = vor.u32 %v6150_v50, %v14977_v29  ;;  %v8629_v41 = vshll.u32 %v14979_v9, 16  ;;  %v14992_v27 = vpop.f32.mrf.mxu2 }
 0x3e0   : > { %v11903_v14 = vld [vmem:[#allocation3 + $0x180] sm:$0xff]  ;;  %v7564_v18 = vrot.slane %v7563_v59, 4  ;;  %v6154_v22 = vshll.u32 %v5773_v13, 16  ;;  %16397 = vst [vmem:[#allocation60_spill] sm:$0xff] %v14992_v27  ;;  %v11305_v50 = vrot.slane %v6423_v60, 9  ;;  %v6581_v21 = vrot.slane %v6579_v31, 4 }
 0x3e1   : > { %7787 = vmatmul.bf16.gmra.mxu2 %v7643_v26  ;;  %v6221_v26 = vpack.c.b16 %v6204_v19, %v6203_v2  ;;  %v6141_v30 = vor.u32 %v6140_v16, %v6137_v63  ;;  %v8622_v19 = vrot.slane %v8620_v15, 4  ;;  %8457 = vmatpush.bf16.msra.mxu0 %v11903_v14  ;;  %v7579_v59 = vsel %vm12265_vm7, %v7574_v17, %v7578_v49  ;;  %v14999_v2 = vld [vmem:[#allocation2 + $0x20] sm:$0x1]  ;;  %v15006_v17 = vld [vmem:[#allocation2 + $0x28] sm:$0xf] }
 0x3e2   : > { %v7569_v56 = vsel %vm12265_vm7, %v7564_v18, %v14961_v62  ;;  %v6152_v63 = vrot.slane %v6151_v40, 4  ;;  %v6582_v16 = vrot.slane %v5773_v13, 5  ;;  %v8631_v15 = vrot.slane %v8629_v41, 5 }
 0x3e3   : > { %v14983_v35 = vpop.f32.mrf.mxu1  ;;  %v6142_v45 = vrot.slane %v6141_v30, 4  ;;  %v8633_v46 = vshrl.u32 %v14979_v9, 16  ;;  %v8647_v60 = vshll.u32 %v8574_v58, 16  ;;  %v7627_v62 = vunpack.c.l.b16 %v7569_v56  ;;  %v15021_v56 = vld [vmem:[#allocation2 + $0x2c] sm:$0x1] }
 0x3e4   : > { %v7628_v24 = vunpack.c.l.b16 %v7579_v59  ;;  %v8639_v49 = vshll.u32 %v14999_v2, 16  ;;  %v6580_v18 = vsel %vm12237_vm6, %v11305_v50, %v6579_v31 }
 0x3e5   : > { %v6326_v42 = vpop.f32.mrf.mxu3  ;;  %v8635_v13 = vrot.slane %v8633_v46, 4  ;;  %v6147_v30 = vsel %vm12265_vm7, %v6142_v45, %v14977_v29  ;;  %v8649_v46 = vrot.slane %v8647_v60, 5  ;;  %v8653_v29 = vshll.u32 %v15006_v17, 16 }
 0x3e6   : > { %v14986_v25 = vadd.f32 %v6326_v42, %v5677_v44  ;;  %6365 = vmatmul.bf16.gmra.mxu3 %v6221_v26  ;;  %v15002_v44 = vpop.f32.mrf.mxu0  ;;  %v8626_v26 = vor.u32 %v8625_v20, %v8622_v19  ;;  %v8644_v42 = vshrl.u32 %v8574_v58, 16  ;;  %v6583_v19 = vsel %vm12237_vm6, %v6581_v21, %v6582_v16 }
 0x3e7   : > { %7065 = vmatmul.bf16.gmra.mxu1 %v11853_v11  ;;  %v8636_v20 = vor.u32 %v8635_v13, %v8631_v15  ;;  %v7644_v45 = vpack.c.b16 %v7628_v24, %v7627_v62  ;;  %v8641_v50 = vrot.slane %v8639_v49, 5  ;;  %v8655_v16 = vrot.slane %v8653_v29, 5  ;;  %v9253_v29 = vld [vmem:[#allocation2 + $0x18] sm:$0xe] }
 0x3e8   : > { %v8646_v58 = vrot.slane %v8644_v42, 4  ;;  %v8627_v59 = vrot.slane %v8626_v26, 4  ;;  %v15027_v42 = vpop.f32.mrf.mxu2  ;;  %v6205_v26 = vunpack.c.l.b16 %v6147_v30  ;;  %v6632_v60 = vunpack.c.l.b16 %v6583_v19 }
 0x3e9   : > { %6791 = vmatmul.bf16.gmra.mxu0 %v6647_v57  ;;  %v6156_v57 = vrot.slane %v6154_v22, 5  ;;  %v8637_v31 = vrot.slane %v8636_v20, 4  ;;  %v8577_v22 = vld [vmem:[#allocation2 + $0x30] sm:$0xf]  ;;  %16398 = vst [vmem:[#allocation61_spill] sm:$0xff] %v15027_v42  ;;  %v8663_v62 = vshll.u32 %v15021_v56, 16  ;;  %v6631_v19 = vunpack.c.l.b16 %v6580_v18 }
 0x3ea   : > { %v8671_v20 = vshll.u32 %v8577_v22, 16  ;;  %v9322_v18 = vrot.slane %v14999_v2, 5  ;;  %v11642_v42 = vrot.slane %v9253_v29, 9 }
 0x3eb   : > { %v15004_v14 = vpop.f32.mrf.mxu1  ;;  %v6157_v41 = vsel %vm12265_vm7, %v6152_v63, %v6156_v57  ;;  %v8657_v63 = vshrl.u32 %v15006_v17, 16  ;;  %v8642_v13 = vsel %vm12265_vm7, %v8637_v31, %v8641_v50  ;;  %v11991_v31 = vld [vmem:[#allocation2 + $0x10] sm:$0xf] }
 0x3ec   : > { %v6206_v57 = vunpack.c.l.b16 %v6157_v41  ;;  %v15032_v24 = vunpack.c.l.b16 %v8642_v13  ;;  %v8668_v41 = vshrl.u32 %v8577_v22, 16  ;;  %v7896_v50 = vrot.slane %v11991_v31, 5 }
 0x3ed   : > { %v6328_v40 = vpop.f32.mrf.mxu3  ;;  %v8659_v21 = vrot.slane %v8657_v63, 4  ;;  %v16400_v63 = vrot.slane %v14979_v9, 5 }
 0x3ee   : > { %v15017_v11 = vadd.f32 %v6328_v40, %v5679_v33  ;;  %v8632_v33 = vsel %vm12265_vm7, %v8627_v59, %v8631_v15  ;;  %v8650_v40 = vor.u32 %v8649_v46, %v8646_v58  ;;  %v5682_v15 = vadd.f32 %v14222_v3, %v14702_v61  ;;  %v15038_v46 = vpop.f32.mrf.mxu0 }
 0x3ef   : > { %v8660_v49 = vor.u32 %v8659_v21, %v8655_v16  ;;  %v15036_v58 = vunpack.c.l.b16 %v8632_v33  ;;  %v6222_v30 = vpack.c.b16 %v6206_v57, %v6205_v26  ;;  %v8665_v33 = vrot.slane %v8663_v62, 5  ;;  %v11854_v57 = vld [vmem:[#allocation2 + $0x60] sm:$0xff]  ;;  %v15049_v21 = vld [vmem:[#allocation2 + $0x34] sm:$0xf] }
 0x3f0   : > { %v8651_v59 = vrot.slane %v8650_v40, 4  ;;  %v6648_v40 = vpack.c.b16 %v6632_v60, %v6631_v19  ;;  %v8670_v26 = vrot.slane %v8668_v41, 4  ;;  %v15057_v60 = vld [vmem:[#allocation2 + $0x38] sm:$0x1]  ;;  %v8677_v41 = vshll.u32 %v15049_v21, 16 }
 0x3f1   : > { %7792 = vmatmul.bf16.gmra.mxu2 %v7644_v45  ;;  %16399 = vst [vmem:[#allocation62_spill] sm:$0xff] %v15036_v58  ;;  %v9321_v45 = vrot.slane %v16400_v63, 4  ;;  %v8661_v61 = vrot.slane %v8660_v49, 4  ;;  %v8673_v63 = vrot.slane %v8671_v20, 5  ;;  %v7898_v49 = vrot.slane %v7896_v50, 4 }
 0x3f2   : > { %v8656_v3 = vsel %vm12265_vm7, %v8651_v59, %v8655_v16  ;;  %v8681_v20 = vshrl.u32 %v15049_v21, 16  ;;  %v16402_v59 = vrot.slane %v14979_v9, 5  ;;  %v11992_v19 = vld [vmem:[#allocation2 + $0x14] sm:$0x1] }
 0x3f3   : > { %v8666_v27 = vsel %vm12265_vm7, %v8661_v61, %v8665_v33  ;;  %v9323_v16 = vsel %vm12237_vm6, %v9321_v45, %v9322_v18  ;;  %v15059_v2 = vunpack.c.l.b16 %v8656_v3  ;;  %v7899_v29 = vrot.slane %v11992_v19, 5  ;;  %v15071_v61 = vpop.f32.mrf.mxu2  ;;  %v11914_v19 = vld [vmem:[#allocation3 + $0x1d8] sm:$0xff] }
 0x3f4   : > { %v15042_v13 = vpop.f32.mrf.mxu1  ;;  %v15061_v62 = vunpack.c.l.b16 %v8666_v27  ;;  %v8674_v3 = vor.u32 %v8673_v63, %v8670_v26  ;;  %16403 = vst [vmem:[#allocation64_spill] sm:$0xff] %v15071_v61  ;;  %v9447_v27 = vunpack.c.l.b16 %v9323_v16  ;;  %v8679_v33 = vrot.slane %v8677_v41, 5  ;;  %9136 = vmatpush.bf16.msra.mxu1 %v11914_v19 }
 0x3f5   : > { %16401 = vst [vmem:[#allocation63_spill] sm:$0xff] %v15059_v2  ;;  %v8687_v18 = vshll.u32 %v15057_v60, 16  ;;  %v5684_v26 = vadd.f32 %v14253_v4, %v14715_v32 }
 0x3f6   : > { %6370 = vmatmul.bf16.gmra.mxu3 %v6222_v30  ;;  %v7830_v30 = vld [vmem:[#allocation2 + $0xc] sm:$0xe]  ;;  %v15080_v63 = vpop.f32.mrf.mxu0  ;;  %v8675_v16 = vrot.slane %v8674_v3, 4 }
 0x3f7   : > { %7070 = vmatmul.bf16.gmra.mxu1 %v11854_v57  ;;  %v8580_v57 = vld [vmem:[#allocation2 + $0x3c] sm:$0xf]  ;;  %v11466_v9 = vrot.slane %v7830_v30, 9 }
 0x3f8   : > { %v6331_v31 = vpop.f32.mrf.mxu3  ;;  %v8692_v41 = vshrl.u32 %v8580_v57, 16  ;;  %v8680_v4 = vsel %vm12265_vm7, %v8675_v16, %v8679_v33 }
 0x3f9   : > { %6796 = vmatmul.bf16.gmra.mxu0 %v6648_v40  ;;  %v15053_v22 = vadd.f32 %v6331_v31, %v5682_v15  ;;  %v9320_v15 = vsel %vm12237_vm6, %v11642_v42, %v16402_v59  ;;  %v8683_v40 = vrot.slane %v8681_v20, 4  ;;  %v7900_v42 = vsel %vm12237_vm6, %v7898_v49, %v7899_v29 }
 0x3fa   : > { %v9446_v31 = vunpack.c.l.b16 %v9320_v15  ;;  %v8695_v20 = vshll.u32 %v8580_v57, 16  ;;  %v7897_v15 = vsel %vm12237_vm6, %v11466_v9, %v7896_v50  ;;  %v8689_v49 = vrot.slane %v8687_v18, 5  ;;  %v9254_v18 = vld [vmem:[#allocation2 + $0x24] sm:$0xe] }
 0x3fb   : > { %v8684_v58 = vor.u32 %v8683_v40, %v8679_v33  ;;  %v8024_v2 = vunpack.c.l.b16 %v7900_v42  ;;  %v9326_v40 = vrot.slane %v15006_v17, 5  ;;  %v8023_v3 = vunpack.c.l.b16 %v7897_v15  ;;  %v15099_v33 = vpop.f32.mrf.mxu2 }
 0x3fc   : > { %v15076_v59 = vpop.f32.mrf.mxu1  ;;  %v9478_v61 = vpack.c.b16 %v9447_v27, %v9446_v31  ;;  %v8694_v57 = vrot.slane %v8692_v41, 4  ;;  %v8697_v50 = vrot.slane %v8695_v20, 5  ;;  %v15093_v31 = vld [vmem:[#allocation2 + $0x40] sm:$0xf]  ;;  %v6802_v17 = vadd.f32 %v14695_v10, %v14731_v7  ;;  %16406 = vst [vmem:[#allocation67_spill] sm:$0xff] %v15099_v33  ;;  %v11855_v10 = vld [vmem:[#allocation2 + $0x6c] sm:$0xff] }
 0x3fd   : > { %v8685_v30 = vrot.slane %v8684_v58, 4  ;;  %v15095_v58 = vunpack.c.l.b16 %v8680_v4  ;;  %v9328_v9 = vrot.slane %v9326_v40, 4  ;;  %v8701_v41 = vshll.u32 %v15093_v31, 16  ;;  %v8583_v33 = vld [vmem:[#allocation2 + $0x48] sm:$0xf] }
 0x3fe   : > { %v8705_v20 = vshrl.u32 %v15093_v31, 16  ;;  %v9329_v15 = vrot.slane %v15021_v56, 5  ;;  %v8698_v7 = vor.u32 %v8697_v50, %v8694_v57 }
 0x3ff   : > { %v8690_v32 = vsel %vm12265_vm7, %v8685_v30, %v8689_v49  ;;  %16405 = vst [vmem:[#allocation66_spill] sm:$0xff] %v15095_v58  ;;  %v5687_v49 = vadd.f32 %v14268_v12, %v14741_v23  ;;  %v8703_v4 = vrot.slane %v8701_v41, 5  ;;  %v7831_v12 = vld [vmem:[#allocation2 + $0x18] sm:$0xe] }
 0x400   : > { %v6333_v45 = vpop.f32.mrf.mxu3  ;;  %v15091_v27 = vunpack.c.l.b16 %v8690_v32  ;;  %v15112_v32 = vpop.f32.mrf.mxu0  ;;  %v8699_v23 = vrot.slane %v8698_v7, 4  ;;  %v11467_v58 = vrot.slane %v7831_v12, 9  ;;  %v8716_v7 = vshrl.u32 %v8583_v33, 16 }
 0x401   : > { %v15084_v29 = vadd.f32 %v6333_v45, %v5684_v26  ;;  %9566 = vmatmul.bf16.vlgmr.msra.gmra.mxu2 %v9478_v61  ;;  %v8055_v45 = vpack.c.b16 %v8024_v2, %v8023_v3  ;;  %v11993_v61 = vld [vmem:[#allocation2 + $0x1c] sm:$0xf]  ;;  %v15101_v26 = vld [vmem:[#allocation2 + $0x44] sm:$0x1]  ;;  %v11643_v3 = vrot.slane %v9254_v18, 9  ;;  %v9333_v12 = vrot.slane %v15049_v21, 5 }
 0x402   : > { %16404 = vst [vmem:[#allocation65_spill] sm:$0xff] %v15091_v27  ;;  %v7903_v42 = vrot.slane %v11993_v61, 5  ;;  %v11887_v2 = vld [vmem:[#allocation2 + $0x18] sm:$0xff]  ;;  %v9330_v61 = vsel %vm12237_vm6, %v9328_v9, %v9329_v15  ;;  %v8711_v16 = vshll.u32 %v15101_v26, 16  ;;  %v8704_v9 = vsel %vm12265_vm7, %v8699_v23, %v8703_v4 }
 0x403   : > { %v9327_v57 = vsel %vm12237_vm6, %v11643_v3, %v9326_v40  ;;  %v9449_v41 = vunpack.c.l.b16 %v9330_v61  ;;  %v8719_v3 = vshll.u32 %v8583_v33, 16  ;;  %v15133_v23 = vunpack.c.l.b16 %v8704_v9  ;;  %v15146_v9 = vld [vmem:[#allocation2 + $0x4c] sm:$0xf]  ;;  %v15152_v33 = vld [vmem:[#allocation2 + $0x50] sm:$0x1] }
 0x404   : > { %v7036_v19 = vpop.f32.mrf.mxu1  ;;  %v8713_v15 = vrot.slane %v8711_v16, 5  ;;  %v15129_v61 = vpop.f32.mrf.mxu2  ;;  %v6804_v21 = vadd.f32 %v14745_v48, %v14759_v51 }
 0x405   : > { %v15108_v30 = vadd.f32 %v7036_v19, %v6802_v17  ;;  %v7905_v17 = vrot.slane %v7903_v42, 4  ;;  %16407 = vst [vmem:[#allocation68_spill] sm:$0xff] %v15129_v61  ;;  %v8735_v61 = vshll.u32 %v15152_v33, 16 }
 0x406   : > { %8143 = vmatmul.bf16.vlgmr.msra.gmra.mxu3 %v8055_v45  ;;  %v8707_v45 = vrot.slane %v8705_v20, 4  ;;  %16408 = vst [vmem:[#allocation69_spill] sm:$0xff] %v15133_v23 }
 0x407   : > { %7075 = vmatmul.bf16.gmra.mxu1 %v11855_v10  ;;  %v9448_v10 = vunpack.c.l.b16 %v9327_v57 }
 0x408   : > { %v8708_v50 = vor.u32 %v8707_v45, %v8703_v4  ;;  %v7904_v4 = vsel %vm12237_vm6, %v11467_v58, %v7903_v42  ;;  %v8718_v42 = vrot.slane %v8716_v7, 4  ;;  %v8729_v7 = vshrl.u32 %v15146_v9, 16 }
 0x409   : > { %8458 = vmatmul.bf16.vlgmr.msra.gmra.mxu0 %v11887_v2  ;;  %v6336_v56 = vpop.f32.mrf.mxu3  ;;  %v11994_v2 = vld [vmem:[#allocation2 + $0x20] sm:$0x1]  ;;  %v9479_v45 = vpack.c.b16 %v9449_v41, %v9448_v10  ;;  %v8025_v58 = vunpack.c.l.b16 %v7904_v4  ;;  %v16410_v10 = vld [vmem:[#allocation44_spill] sm:$0xff]  ;;  %v8725_v4 = vshll.u32 %v15146_v9, 16 }
 0x40a   : > { %v15117_v19 = vadd.f32 %v6336_v56, %v5687_v49  ;;  %v7906_v18 = vrot.slane %v11994_v2, 5  ;;  %v8709_v20 = vrot.slane %v8708_v50, 4  ;;  %v15142_v2 = vpop.f32.mrf.mxu0 }
 0x40b   : > { %v8727_v51 = vrot.slane %v8725_v4, 5 }
 0x40c   : > { %v7907_v49 = vsel %vm12237_vm6, %v7905_v17, %v7906_v18  ;;  %v15125_v56 = vpop.f32.mrf.mxu1  ;;  %v8714_v40 = vsel %vm12265_vm7, %v8709_v20, %v8713_v15  ;;  %v5689_v17 = vadd.f32 %v14310_v53, %v14749_v36  ;;  %v8721_v18 = vrot.slane %v8719_v3, 5  ;;  %v11995_v53 = vld [vmem:[#allocation2 + $0x28] sm:$0xf] }
 0x40d   : > { %v15135_v16 = vunpack.c.l.b16 %v8714_v40  ;;  %v8026_v57 = vunpack.c.l.b16 %v7907_v49  ;;  %v9335_v15 = vrot.slane %v9333_v12, 4  ;;  %v7910_v36 = vrot.slane %v11995_v53, 5  ;;  %v9255_v40 = vld [vmem:[#allocation2 + $0x30] sm:$0xe]  ;;  %v11888_v3 = vld [vmem:[#allocation2 + $0x24] sm:$0xff] }
 0x40e   : > { %v5654_v49 = vadd.f32 %v16410_v10, %v14436_v52  ;;  %v5692_v52 = vadd.f32 %v14330_v54, %v14771_v55  ;;  %v11644_v53 = vrot.slane %v9255_v40, 9  ;;  %v7832_v54 = vld [vmem:[#allocation2 + $0x24] sm:$0xe]  ;;  %v11996_v40 = vld [vmem:[#allocation2 + $0x2c] sm:$0x1] }
 0x40f   : > { %16409 = vst [vmem:[#allocation70_spill] sm:$0xff] %v15135_v16  ;;  %v8056_v20 = vpack.c.b16 %v8026_v57, %v8025_v58  ;;  %v8722_v58 = vor.u32 %v8721_v18, %v8718_v42  ;;  %v7913_v4 = vrot.slane %v11996_v40, 5 }
 0x410   : > { %v6379_v48 = vadd.f32 %v14755_v39, %v5654_v49  ;;  %v9334_v39 = vsel %vm12237_vm6, %v11644_v53, %v9333_v12  ;;  %v11913_v53 = vld [vmem:[#allocation3 + $0x1d0] sm:$0xff] }
 0x411   : > { %v6338_v50 = vpop.f32.mrf.mxu3  ;;  %9571 = vmatmul.bf16.gmra.mxu2 %v9479_v45  ;;  %v8723_v55 = vrot.slane %v8722_v58, 4  ;;  %9137 = vmatpush.bf16.msra.mxu1 %v11913_v53  ;;  %v16418_v53 = vld [vmem:[#allocation20_spill] sm:$0xff] }
 0x412   : > { %v15144_v41 = vadd.f32 %v6338_v50, %v5689_v17  ;;  %v9336_v17 = vrot.slane %v15057_v60, 5  ;;  %v11856_v50 = vld [vmem:[#allocation2 + $0x78] sm:$0xff]  ;;  %v15165_v60 = vpop.f32.mrf.mxu2 }
 0x413   : > { %16411 = vst [vmem:[#allocation44_spill] sm:$0xff] %v15165_v60  ;;  %v11468_v60 = vrot.slane %v7832_v54, 9 }
 0x414   : > { %v7041_v45 = vpop.f32.mrf.mxu1  ;;  %v9337_v10 = vsel %vm12237_vm6, %v9335_v15, %v9336_v17  ;;  %v8586_v15 = vld [vmem:[#allocation2 + $0x54] sm:$0xf]  ;;  %v8728_v17 = vsel %vm12265_vm7, %v8723_v55, %v8727_v51  ;;  %v9340_v55 = vrot.slane %v15093_v31, 5  ;;  %v16417_v31 = vld [vmem:[#allocation9_spill] sm:$0xff] }
 0x415   : > { %v15157_v57 = vadd.f32 %v7041_v45, %v6804_v21  ;;  %v7912_v45 = vrot.slane %v7910_v36, 4  ;;  %v9451_v49 = vunpack.c.l.b16 %v9337_v10  ;;  %v8740_v40 = vshrl.u32 %v8586_v15, 16 }
 0x416   : > { %8148 = vmatmul.bf16.gmra.mxu3 %v8056_v20  ;;  %v8731_v20 = vrot.slane %v8729_v7, 4  ;;  %v6805_v7 = vadd.f32 %v14767_v38, %v6379_v48  ;;  %v8743_v23 = vshll.u32 %v8586_v15, 16  ;;  %v7911_v48 = vsel %vm12237_vm6, %v11468_v60, %v7910_v36 }
 0x417   : > { %7080 = vmatmul.bf16.gmra.mxu1 %v11856_v50  ;;  %v7914_v12 = vsel %vm12237_vm6, %v7912_v45, %v7913_v4  ;;  %v16414_v45 = vld [vmem:[#allocation11_spill] sm:$0xff]  ;;  %v8027_v15 = vunpack.c.l.b16 %v7911_v48  ;;  %v8742_v36 = vrot.slane %v8740_v40, 4  ;;  %v16421_v4 = vld [vmem:[#allocation37_spill] sm:$0xff] }
 0x418   : > { %v8732_v18 = vor.u32 %v8731_v20, %v8727_v51  ;;  %v8028_v54 = vunpack.c.l.b16 %v7914_v12  ;;  %v8745_v60 = vrot.slane %v8743_v23, 5  ;;  %v16416_v12 = vld [vmem:[#allocation33_spill] sm:$0xff] }
 0x419   : > { %8463 = vmatmul.bf16.gmra.mxu0 %v11888_v3  ;;  %v6341_v21 = vpop.f32.mrf.mxu3  ;;  %v15171_v3 = vpop.f32.mrf.mxu0 }
 0x41a   : > { %v15167_v42 = vadd.f32 %v6341_v21, %v5692_v52  ;;  %v8733_v50 = vrot.slane %v8732_v18, 4  ;;  %v8737_v52 = vrot.slane %v8735_v61, 5  ;;  %v9450_v21 = vunpack.c.l.b16 %v9334_v39 }
 0x41b   : > { %v15184_v61 = vunpack.c.l.b16 %v8728_v17  ;;  %v5694_v39 = vadd.f32 %v16414_v45, %v14788_v0  ;;  %v15197_v17 = vld [vmem:[#allocation2 + $0x58] sm:$0xf]  ;;  %v11997_v0 = vld [vmem:[#allocation2 + $0x34] sm:$0xf]  ;;  %v9256_v45 = vld [vmem:[#allocation2 + $0x3c] sm:$0xe] }
 0x41c   : > { %v7043_v58 = vpop.f32.mrf.mxu1  ;;  %v8738_v20 = vsel %vm12265_vm7, %v8733_v50, %v8737_v52  ;;  %v9480_v38 = vpack.c.b16 %v9451_v49, %v9450_v21  ;;  %v8057_v50 = vpack.c.b16 %v8028_v54, %v8027_v15  ;;  %v9342_v52 = vrot.slane %v9340_v55, 4  ;;  %v11889_v54 = vld [vmem:[#allocation2 + $0x30] sm:$0xff] }
 0x41d   : > { %v15178_v10 = vadd.f32 %v7043_v58, %v6805_v7  ;;  %16412 = vst [vmem:[#allocation71_spill] sm:$0xff] %v15184_v61  ;;  %v15186_v51 = vunpack.c.l.b16 %v8738_v20  ;;  %v15195_v7 = vpop.f32.mrf.mxu2  ;;  %v7917_v21 = vrot.slane %v11997_v0, 5  ;;  %v6806_v58 = vadd.f32 %v16417_v31, %v16416_v12  ;;  %v16419_v20 = vld [vmem:[#allocation45_spill] sm:$0xff]  ;;  %v11857_v12 = vld [vmem:[#allocation2 + $0x84] sm:$0xff] }
 0x41e   : > { %16415 = vst [vmem:[#allocation11_spill] sm:$0xff] %v15195_v7  ;;  %v8749_v23 = vshll.u32 %v15197_v17, 16  ;;  %v8753_v40 = vshrl.u32 %v15197_v17, 16  ;;  %v9343_v15 = vrot.slane %v15101_v26, 5  ;;  %v8746_v31 = vor.u32 %v8745_v60, %v8742_v36  ;;  %v7833_v36 = vld [vmem:[#allocation2 + $0x30] sm:$0xe] }
 0x41f   : > { %16413 = vst [vmem:[#allocation72_spill] sm:$0xff] %v15186_v51  ;;  %v11645_v51 = vrot.slane %v9256_v45, 9 }
 0x420   : > { %v8751_v61 = vrot.slane %v8749_v23, 5  ;;  %v9344_v16 = vsel %vm12237_vm6, %v9342_v52, %v9343_v15  ;;  %v8747_v60 = vrot.slane %v8746_v31, 4  ;;  %v11998_v23 = vld [vmem:[#allocation2 + $0x38] sm:$0x1] }
 0x421   : > { %v6343_v18 = vpop.f32.mrf.mxu3  ;;  %9576 = vmatmul.bf16.gmra.mxu2 %v9480_v38  ;;  %v5659_v38 = vadd.f32 %v16419_v20, %v16418_v53  ;;  %v15207_v48 = vpop.f32.mrf.mxu0  ;;  %v16422_v20 = vld [vmem:[#allocation12_spill] sm:$0xff]  ;;  %v7920_v45 = vrot.slane %v11998_v23, 5 }
 0x422   : > { %v15193_v49 = vadd.f32 %v6343_v18, %v5694_v39  ;;  %v15203_v18 = vld [vmem:[#allocation2 + $0x5c] sm:$0x1]  ;;  %v5697_v7 = vadd.f32 %v16422_v20, %v14808_v1 }
 0x423   : > { %v6381_v53 = vadd.f32 %v16421_v4, %v5659_v38  ;;  %v8759_v27 = vshll.u32 %v15203_v18, 16  ;;  %v9341_v4 = vsel %vm12237_vm6, %v11645_v51, %v9340_v55  ;;  %v9453_v38 = vunpack.c.l.b16 %v9344_v16 }
 0x424   : > { %v7046_v39 = vpop.f32.mrf.mxu1 }
 0x425   : > { %v15210_v0 = vadd.f32 %v7046_v39, %v6806_v58  ;;  %v7919_v58 = vrot.slane %v7917_v21, 4  ;;  %v6807_v52 = vadd.f32 %v14810_v28, %v6381_v53  ;;  %v15225_v20 = vpop.f32.mrf.mxu2 }
 0x426   : > { %8153 = vmatmul.bf16.gmra.mxu3 %v8057_v50  ;;  %v8755_v50 = vrot.slane %v8753_v40, 4  ;;  %v8752_v40 = vsel %vm12265_vm7, %v8747_v60, %v8751_v61  ;;  %16423 = vst [vmem:[#allocation9_spill] sm:$0xff] %v15225_v20  ;;  %v16433_v20 = vld [vmem:[#allocation46_spill] sm:$0xff] }
 0x427   : > { %16420 = vst [vmem:[#allocation33_spill] sm:$0xff] %v15210_v0  ;;  %7085 = vmatmul.bf16.gmra.mxu1 %v11857_v12  ;;  %v8761_v12 = vrot.slane %v8759_v27, 5  ;;  %v7921_v51 = vsel %vm12237_vm6, %v7919_v58, %v7920_v45  ;;  %v15235_v27 = vunpack.c.l.b16 %v8752_v40  ;;  %v9347_v45 = vrot.slane %v15146_v9, 5  ;;  %v16432_v9 = vld [vmem:[#allocation23_spill] sm:$0xff] }
 0x428   : > { %v8756_v1 = vor.u32 %v8755_v50, %v8751_v61  ;;  %v8030_v23 = vunpack.c.l.b16 %v7921_v51  ;;  %v16431_v51 = vld [vmem:[#allocation39_spill] sm:$0xff] }
 0x429   : > { %8468 = vmatmul.bf16.gmra.mxu0 %v11889_v54  ;;  %v6346_v26 = vpop.f32.mrf.mxu3  ;;  %v8589_v54 = vld [vmem:[#allocation2 + $0x60] sm:$0xf]  ;;  %16425 = vst [vmem:[#allocation45_spill] sm:$0xff] %v15235_v27  ;;  %v15241_v58 = vpop.f32.mrf.mxu0 }
 0x42a   : > { %v15218_v39 = vadd.f32 %v6346_v26, %v5697_v7  ;;  %v8757_v15 = vrot.slane %v8756_v1, 4  ;;  %v9452_v7 = vunpack.c.l.b16 %v9341_v4  ;;  %v11469_v26 = vrot.slane %v7833_v36, 9  ;;  %v16427_v4 = vld [vmem:[#allocation38_spill] sm:$0xff] }
 0x42b   : > { %v8764_v50 = vshrl.u32 %v8589_v54, 16  ;;  %v8767_v28 = vshll.u32 %v8589_v54, 16  ;;  %v16428_v36 = vld [vmem:[#allocation14_spill] sm:$0xff] }
 0x42c   : > { %v7048_v55 = vpop.f32.mrf.mxu1  ;;  %v8762_v16 = vsel %vm12265_vm7, %v8757_v15, %v8761_v12  ;;  %v9481_v53 = vpack.c.b16 %v9453_v38, %v9452_v7  ;;  %v7918_v61 = vsel %vm12237_vm6, %v11469_v26, %v7917_v21  ;;  %v5699_v1 = vadd.f32 %v16428_v36, %v16427_v4  ;;  %v15248_v12 = vld [vmem:[#allocation2 + $0x64] sm:$0xf]  ;;  %v16430_v4 = vld [vmem:[#allocation40_spill] sm:$0xff]  ;;  %v15254_v38 = vld [vmem:[#allocation2 + $0x68] sm:$0x1] }
 0x42d   : > { %v15229_v31 = vadd.f32 %v7048_v55, %v6807_v52  ;;  %v15237_v60 = vunpack.c.l.b16 %v8762_v16  ;;  %v8029_v21 = vunpack.c.l.b16 %v7918_v61  ;;  %v8766_v40 = vrot.slane %v8764_v50, 4  ;;  %v11999_v55 = vld [vmem:[#allocation2 + $0x40] sm:$0xf] }
 0x42e   : > { %v8769_v15 = vrot.slane %v8767_v28, 5  ;;  %v9349_v26 = vrot.slane %v9347_v45, 4  ;;  %v7924_v16 = vrot.slane %v11999_v55, 5  ;;  %v6808_v36 = vadd.f32 %v16431_v51, %v16430_v4  ;;  %v11890_v28 = vld [vmem:[#allocation2 + $0x3c] sm:$0xff] }
 0x42f   : > { %16424 = vst [vmem:[#allocation20_spill] sm:$0xff] %v15229_v31  ;;  %v8058_v7 = vpack.c.b16 %v8030_v23, %v8029_v21  ;;  %v9257_v31 = vld [vmem:[#allocation2 + $0x48] sm:$0xe]  ;;  %v8773_v61 = vshll.u32 %v15248_v12, 16  ;;  %v8777_v50 = vshrl.u32 %v15248_v12, 16  ;;  %v16435_v4 = vld [vmem:[#allocation41_spill] sm:$0xff] }
 0x430   : > { %16426 = vst [vmem:[#allocation37_spill] sm:$0xff] %v15237_v60  ;;  %v8770_v21 = vor.u32 %v8769_v15, %v8766_v40  ;;  %v11646_v60 = vrot.slane %v9257_v31, 9 }
 0x431   : > { %v6348_v52 = vpop.f32.mrf.mxu3  ;;  %9581 = vmatmul.bf16.gmra.mxu2 %v9481_v53  ;;  %v5664_v53 = vadd.f32 %v16433_v20, %v16432_v9  ;;  %v16436_v20 = vld [vmem:[#allocation15_spill] sm:$0xff]  ;;  %v15264_v9 = vpop.f32.mrf.mxu2  ;;  %v8775_v27 = vrot.slane %v8773_v61, 5 }
 0x432   : > { %v15246_v54 = vadd.f32 %v6348_v52, %v5699_v1  ;;  %v9350_v1 = vrot.slane %v15152_v33, 5  ;;  %v11858_v52 = vld [vmem:[#allocation2 + $0x90] sm:$0xff]  ;;  %v5702_v51 = vadd.f32 %v16436_v20, %v16435_v4  ;;  %16437 = vst [vmem:[#allocation14_spill] sm:$0xff] %v15264_v9  ;;  %v8783_v33 = vshll.u32 %v15254_v38, 16  ;;  %v15269_v40 = vpop.f32.mrf.mxu0  ;;  %v12000_v4 = vld [vmem:[#allocation2 + $0x44] sm:$0x1] }
 0x433   : > { %v6383_v55 = vadd.f32 %v14850_v6, %v5664_v53  ;;  %16438 = vst [vmem:[#allocation40_spill] sm:$0xff] %v15269_v40  ;;  %v9348_v15 = vsel %vm12237_vm6, %v11646_v60, %v9347_v45  ;;  %v7834_v53 = vld [vmem:[#allocation2 + $0x3c] sm:$0xe]  ;;  %v8771_v61 = vrot.slane %v8770_v21, 4  ;;  %v7927_v20 = vrot.slane %v12000_v4, 5  ;;  %v11912_v45 = vld [vmem:[#allocation3 + $0x1c8] sm:$0xff] }
 0x434   : > { %16429 = vst [vmem:[#allocation12_spill] sm:$0xff] %v15246_v54  ;;  %v7051_v0 = vpop.f32.mrf.mxu1  ;;  %v8779_v54 = vrot.slane %v8777_v50, 4  ;;  %v9454_v40 = vunpack.c.l.b16 %v9348_v15  ;;  %9138 = vmatpush.bf16.msra.mxu1 %v11912_v45  ;;  %v6810_v45 = vadd.f32 %v14887_v47, %v14880_v37 }
 0x435   : > { %v15259_v23 = vadd.f32 %v7051_v0, %v6808_v36  ;;  %v7926_v36 = vrot.slane %v7924_v16, 4 }
 0x436   : > { %8158 = vmatmul.bf16.gmra.mxu3 %v8058_v7  ;;  %v9351_v7 = vsel %vm12237_vm6, %v9349_v26, %v9350_v1  ;;  %v8592_v26 = vld [vmem:[#allocation2 + $0x6c] sm:$0xf]  ;;  %v16439_v1 = vld [vmem:[#allocation10_spill] sm:$0xff] }
 0x437   : > { %16434 = vst [vmem:[#allocation38_spill] sm:$0xff] %v15259_v23  ;;  %7090 = vmatmul.bf16.gmra.mxu1 %v11858_v52  ;;  %v9455_v31 = vunpack.c.l.b16 %v9351_v7  ;;  %v6809_v50 = vadd.f32 %v16439_v1, %v6383_v55  ;;  %v8776_v52 = vsel %vm12265_vm7, %v8771_v61, %v8775_v27  ;;  %v8785_v23 = vrot.slane %v8783_v33, 5 }
 0x438   : > { %v8788_v7 = vshrl.u32 %v8592_v26, 16  ;;  %v8791_v4 = vshll.u32 %v8592_v26, 16  ;;  %v15286_v33 = vunpack.c.l.b16 %v8776_v52 }
 0x439   : > { %8473 = vmatmul.bf16.gmra.mxu0 %v11890_v28  ;;  %v6351_v0 = vpop.f32.mrf.mxu3  ;;  %v8780_v28 = vor.u32 %v8779_v54, %v8775_v27  ;;  %v9482_v55 = vpack.c.b16 %v9455_v31, %v9454_v40  ;;  %v15293_v1 = vpop.f32.mrf.mxu2 }
 0x43a   : > { %v15271_v6 = vadd.f32 %v6351_v0, %v5702_v51  ;;  %v11470_v51 = vrot.slane %v7834_v53, 9  ;;  %v7928_v0 = vsel %vm12237_vm6, %v7926_v36, %v7927_v20  ;;  %16441 = vst [vmem:[#allocation23_spill] sm:$0xff] %v15286_v33  ;;  %v16443_v53 = vld [vmem:[#allocation47_spill] sm:$0xff]  ;;  %v16444_v36 = vld [vmem:[#allocation16_spill] sm:$0xff]  ;;  %v9354_v20 = vrot.slane %v15197_v17, 5  ;;  %v15301_v52 = vpop.f32.mrf.mxu0 }
 0x43b   : > { %v8781_v9 = vrot.slane %v8780_v28, 4  ;;  %v5704_v61 = vadd.f32 %v16444_v36, %v16443_v53  ;;  %v8032_v28 = vunpack.c.l.b16 %v7928_v0  ;;  %16445 = vst [vmem:[#allocation41_spill] sm:$0xff] %v15293_v1  ;;  %v8790_v31 = vrot.slane %v8788_v7, 4  ;;  %v15305_v53 = vld [vmem:[#allocation2 + $0x74] sm:$0x1] }
 0x43c   : > { %v7053_v60 = vpop.f32.mrf.mxu1  ;;  %v7925_v27 = vsel %vm12237_vm6, %v11470_v51, %v7924_v16  ;;  %v8793_v26 = vrot.slane %v8791_v4, 5  ;;  %v9356_v0 = vrot.slane %v9354_v20, 4  ;;  %v11891_v4 = vld [vmem:[#allocation2 + $0x48] sm:$0xff] }
 0x43d   : > { %v15280_v21 = vadd.f32 %v7053_v60, %v6809_v50  ;;  %v8786_v54 = vsel %vm12265_vm7, %v8781_v9, %v8785_v23  ;;  %v8031_v16 = vunpack.c.l.b16 %v7925_v27  ;;  %v15299_v50 = vld [vmem:[#allocation2 + $0x70] sm:$0xf]  ;;  %v12001_v60 = vld [vmem:[#allocation2 + $0x4c] sm:$0xf]  ;;  %v9357_v27 = vrot.slane %v15203_v18, 5 }
 0x43e   : > { %v15288_v15 = vunpack.c.l.b16 %v8786_v54  ;;  %v7931_v17 = vrot.slane %v12001_v60, 5  ;;  %v9258_v54 = vld [vmem:[#allocation2 + $0x54] sm:$0xe]  ;;  %v8797_v36 = vshll.u32 %v15299_v50, 16  ;;  %v8801_v7 = vshrl.u32 %v15299_v50, 16  ;;  %v16448_v60 = vld [vmem:[#allocation17_spill] sm:$0xff] }
 0x43f   : > { %16440 = vst [vmem:[#allocation39_spill] sm:$0xff] %v15280_v21  ;;  %v8059_v51 = vpack.c.b16 %v8032_v28, %v8031_v16  ;;  %v11859_v28 = vld [vmem:[#allocation2 + $0x9c] sm:$0xff]  ;;  %v11647_v47 = vrot.slane %v9258_v54, 9  ;;  %v9358_v1 = vsel %vm12237_vm6, %v9356_v0, %v9357_v27  ;;  %v8595_v0 = vld [vmem:[#allocation2 + $0x78] sm:$0xf] }
 0x440   : > { %16442 = vst [vmem:[#allocation46_spill] sm:$0xff] %v15288_v15  ;;  %v16447_v16 = vld [vmem:[#allocation49_spill] sm:$0xff]  ;;  %v8799_v37 = vrot.slane %v8797_v36, 5  ;;  %v8803_v33 = vrot.slane %v8801_v7, 4  ;;  %v7933_v21 = vrot.slane %v7931_v17, 4  ;;  %v9457_v54 = vunpack.c.l.b16 %v9358_v1  ;;  %v16451_v27 = vld [vmem:[#allocation50_spill] sm:$0xff] }
 0x441   : > { %v6353_v23 = vpop.f32.mrf.mxu3  ;;  %9586 = vmatmul.bf16.gmra.mxu2 %v9482_v55  ;;  %v5707_v9 = vadd.f32 %v16448_v60, %v16447_v16  ;;  %v15321_v36 = vpop.f32.mrf.mxu2  ;;  %v16452_v7 = vld [vmem:[#allocation53_spill] sm:$0xff] }
 0x442   : > { %v15297_v40 = vadd.f32 %v6353_v23, %v5704_v61  ;;  %v8794_v23 = vor.u32 %v8793_v26, %v8790_v31  ;;  %v9355_v31 = vsel %vm12237_vm6, %v11647_v47, %v9354_v20  ;;  %v7835_v26 = vld [vmem:[#allocation2 + $0x48] sm:$0xe]  ;;  %16450 = vst [vmem:[#allocation47_spill] sm:$0xff] %v15321_v36  ;;  %v15354_v36 = vld [vmem:[#allocation2 + $0x80] sm:$0x1] }
 0x444   : > { %v7056_v55 = vpop.f32.mrf.mxu1 }
 0x445   : > { %v15310_v61 = vadd.f32 %v7056_v55, %v6810_v45  ;;  %v8795_v45 = vrot.slane %v8794_v23, 4  ;;  %v8804_v55 = vor.u32 %v8803_v33, %v8799_v37  ;;  %v15329_v23 = vpop.f32.mrf.mxu0 }
 0x446   : > { %8163 = vmatmul.bf16.gmra.mxu3 %v8059_v51  ;;  %v8807_v51 = vshll.u32 %v15305_v53, 16 }
 0x447   : > { %16446 = vst [vmem:[#allocation15_spill] sm:$0xff] %v15310_v61  ;;  %7095 = vmatmul.bf16.gmra.mxu1 %v11859_v28  ;;  %v6811_v28 = vadd.f32 %v16452_v7, %v16451_v27  ;;  %v8800_v60 = vsel %vm12265_vm7, %v8795_v45, %v8799_v37  ;;  %v9456_v61 = vunpack.c.l.b16 %v9355_v31  ;;  %v8815_v27 = vshll.u32 %v8595_v0, 16 }
 0x449   : > { %8478 = vmatmul.bf16.gmra.mxu0 %v11891_v4  ;;  %v6356_v15 = vpop.f32.mrf.mxu3  ;;  %v12002_v4 = vld [vmem:[#allocation2 + $0x50] sm:$0x1]  ;;  %v9483_v7 = vpack.c.b16 %v9457_v54, %v9456_v61 }
 0x44a   : > { %v15317_v18 = vadd.f32 %v6356_v15, %v5707_v9  ;;  %v7934_v16 = vrot.slane %v12002_v4, 5  ;;  %v8805_v15 = vrot.slane %v8804_v55, 4  ;;  %v8809_v9 = vrot.slane %v8807_v51, 5 }
 0x44b   : > { %v8812_v4 = vshrl.u32 %v8595_v0, 16  ;;  %v15337_v51 = vunpack.c.l.b16 %v8800_v60 }
 0x44c   : > { %16449 = vst [vmem:[#allocation10_spill] sm:$0xff] %v15317_v18  ;;  %v11471_v18 = vrot.slane %v7835_v26, 9  ;;  %v7935_v20 = vsel %vm12237_vm6, %v7933_v21, %v7934_v16  ;;  %v7058_v33 = vpop.f32.mrf.mxu1  ;;  %v8810_v47 = vsel %vm12265_vm7, %v8805_v15, %v8809_v9  ;;  %v16456_v26 = vld [vmem:[#allocation52_spill] sm:$0xff]  ;;  %v16457_v21 = vld [vmem:[#allocation18_spill] sm:$0xff]  ;;  %v9361_v16 = vrot.slane %v15248_v12, 5  ;;  %v15352_v12 = vpop.f32.mrf.mxu2 }
 0x44d   : > { %v15331_v1 = vadd.f32 %v7058_v33, %v6811_v28  ;;  %16454 = vst [vmem:[#allocation49_spill] sm:$0xff] %v15337_v51  ;;  %v15339_v31 = vunpack.c.l.b16 %v8810_v47  ;;  %v5709_v45 = vadd.f32 %v16457_v21, %v16456_v26  ;;  %v8034_v55 = vunpack.c.l.b16 %v7935_v20  ;;  %v12003_v33 = vld [vmem:[#allocation2 + $0x58] sm:$0xf]  ;;  %v16459_v20 = vld [vmem:[#allocation56_spill] sm:$0xff] }
 0x44e   : > { %v7932_v37 = vsel %vm12237_vm6, %v11471_v18, %v7931_v17  ;;  %v8814_v54 = vrot.slane %v8812_v4, 4  ;;  %v8817_v17 = vrot.slane %v8815_v27, 5  ;;  %v15348_v18 = vld [vmem:[#allocation2 + $0x7c] sm:$0xf]  ;;  %v9363_v9 = vrot.slane %v9361_v16, 4  ;;  %16460 = vst [vmem:[#allocation53_spill] sm:$0xff] %v15352_v12  ;;  %v15363_v12 = vpop.f32.mrf.mxu0 }
 0x44f   : > { %16453 = vst [vmem:[#allocation16_spill] sm:$0xff] %v15331_v1  ;;  %v8033_v61 = vunpack.c.l.b16 %v7932_v37  ;;  %v7938_v47 = vrot.slane %v12003_v33, 5  ;;  %v6812_v26 = vadd.f32 %v16459_v20, %v14932_v8  ;;  %v8825_v4 = vshrl.u32 %v15348_v18, 16  ;;  %v11892_v27 = vld [vmem:[#allocation2 + $0x54] sm:$0xff]  ;;  %v16462_v33 = vld [vmem:[#allocation55_spill] sm:$0xff] }
 0x450   : > { %16455 = vst [vmem:[#allocation17_spill] sm:$0xff] %v15339_v31  ;;  %v9364_v37 = vrot.slane %v15254_v38, 5  ;;  %v16463_v8 = vld [vmem:[#allocation19_spill] sm:$0xff]  ;;  %v8831_v31 = vshll.u32 %v15354_v36, 16 }
 0x451   : > { %v6358_v28 = vpop.f32.mrf.mxu3  ;;  %9591 = vmatmul.bf16.gmra.mxu2 %v9483_v7  ;;  %v8060_v60 = vpack.c.b16 %v8034_v55, %v8033_v61  ;;  %v9259_v7 = vld [vmem:[#allocation2 + $0x60] sm:$0xe]  ;;  %v8818_v61 = vor.u32 %v8817_v17, %v8814_v54  ;;  %v5712_v20 = vadd.f32 %v16463_v8, %v16462_v33  ;;  %v7836_v17 = vld [vmem:[#allocation2 + $0x54] sm:$0xe] }
 0x452   : > { %v15346_v0 = vadd.f32 %v6358_v28, %v5709_v45  ;;  %v8821_v45 = vshll.u32 %v15348_v18, 16  ;;  %v11860_v28 = vld [vmem:[#allocation2 + $0xa8] sm:$0xff]  ;;  %v11648_v1 = vrot.slane %v9259_v7, 9  ;;  %v9365_v51 = vsel %vm12237_vm6, %v9363_v9, %v9364_v37 }
 0x453   : > { %v9459_v8 = vunpack.c.l.b16 %v9365_v51 }
 0x454   : > { %16458 = vst [vmem:[#allocation50_spill] sm:$0xff] %v15346_v0  ;;  %v7061_v21 = vpop.f32.mrf.mxu1  ;;  %v8823_v15 = vrot.slane %v8821_v45, 5  ;;  %v9362_v54 = vsel %vm12237_vm6, %v11648_v1, %v9361_v16  ;;  %v8819_v45 = vrot.slane %v8818_v61, 4  ;;  %v16465_v0 = vld [vmem:[#allocation57_spill] sm:$0xff] }
 0x455   : > { %v15359_v55 = vadd.f32 %v7061_v21, %v6812_v26  ;;  %v7940_v26 = vrot.slane %v7938_v47, 4  ;;  %v6813_v9 = vadd.f32 %v14974_v43, %v16465_v0  ;;  %v11911_v61 = vld [vmem:[#allocation3 + $0x1c0] sm:$0xff]  ;;  %v15382_v43 = vpop.f32.mrf.mxu2 }
 0x456   : > { %8168 = vmatmul.bf16.gmra.mxu3 %v8060_v60  ;;  %v8827_v60 = vrot.slane %v8825_v4, 4  ;;  %v8824_v4 = vsel %vm12265_vm7, %v8819_v45, %v8823_v15  ;;  %16467 = vst [vmem:[#allocation55_spill] sm:$0xff] %v15382_v43  ;;  %9139 = vmatpush.bf16.msra.mxu1 %v11911_v61  ;;  %v12005_v61 = vld [vmem:[#allocation2 + $0x64] sm:$0xf] }
 0x457   : > { %16461 = vst [vmem:[#allocation52_spill] sm:$0xff] %v15359_v55  ;;  %7100 = vmatmul.bf16.gmra.mxu1 %v11860_v28  ;;  %v8598_v55 = vld [vmem:[#allocation2 + $0x84] sm:$0xf]  ;;  %v8833_v28 = vrot.slane %v8831_v31, 5 }
 0x458   : > { %v8828_v33 = vor.u32 %v8827_v60, %v8823_v15  ;;  %v15386_v15 = vunpack.c.l.b16 %v8824_v4 }
 0x459   : > { %8483 = vmatmul.bf16.gmra.mxu0 %v11892_v27  ;;  %v6361_v38 = vpop.f32.mrf.mxu3  ;;  %v12004_v27 = vld [vmem:[#allocation2 + $0x5c] sm:$0x1] }
 0x45a   : > { %v15368_v21 = vadd.f32 %v6361_v38, %v5712_v20  ;;  %v7941_v7 = vrot.slane %v12004_v27, 5  ;;  %v8829_v37 = vrot.slane %v8828_v33, 4  ;;  %v9458_v20 = vunpack.c.l.b16 %v9362_v54  ;;  %16468 = vst [vmem:[#allocation19_spill] sm:$0xff] %v15386_v15 }
 0x45b   : > { %v11472_v38 = vrot.slane %v7836_v17, 9  ;;  %v8836_v27 = vshrl.u32 %v8598_v55, 16  ;;  %v16470_v17 = vld [vmem:[#allocation21_spill] sm:$0xff] }
 0x45c   : > { %16464 = vst [vmem:[#allocation18_spill] sm:$0xff] %v15368_v21  ;;  %v7942_v1 = vsel %vm12237_vm6, %v7940_v26, %v7941_v7  ;;  %v7063_v16 = vpop.f32.mrf.mxu1  ;;  %v8834_v51 = vsel %vm12265_vm7, %v8829_v37, %v8833_v28  ;;  %v8839_v21 = vshll.u32 %v8598_v55, 16  ;;  %v9484_v0 = vpack.c.b16 %v9459_v8, %v9458_v20  ;;  %v16469_v26 = vld [vmem:[#allocation58_spill] sm:$0xff]  ;;  %v15395_v8 = vpop.f32.mrf.mxu0  ;;  %v15399_v20 = vld [vmem:[#allocation2 + $0x88] sm:$0xf] }
 0x45d   : > { %v15378_v60 = vadd.f32 %v7063_v16, %v6813_v9  ;;  %v7939_v31 = vsel %vm12237_vm6, %v11472_v38, %v7938_v47  ;;  %v15388_v54 = vunpack.c.l.b16 %v8834_v51  ;;  %v5714_v45 = vadd.f32 %v16470_v17, %v16469_v26  ;;  %v9260_v51 = vld [vmem:[#allocation2 + $0x6c] sm:$0xe]  ;;  %v15403_v26 = vld [vmem:[#allocation2 + $0x8c] sm:$0x1] }
 0x45e   : > { %v8036_v33 = vunpack.c.l.b16 %v7942_v1  ;;  %v9368_v7 = vrot.slane %v15299_v50, 5  ;;  %v8035_v47 = vunpack.c.l.b16 %v7939_v31  ;;  %v8838_v4 = vrot.slane %v8836_v27, 4  ;;  %v11893_v27 = vld [vmem:[#allocation2 + $0x60] sm:$0xff] }
 0x45f   : > { %16466 = vst [vmem:[#allocation56_spill] sm:$0xff] %v15378_v60  ;;  %v8841_v28 = vrot.slane %v8839_v21, 5  ;;  %v7945_v1 = vrot.slane %v12005_v61, 5  ;;  %v6814_v50 = vadd.f32 %v15002_v44, %v14986_v25  ;;  %v8845_v17 = vshll.u32 %v15399_v20, 16  ;;  %v15415_v60 = vpop.f32.mrf.mxu2 }
 0x460   : > { %v8061_v38 = vpack.c.b16 %v8036_v33, %v8035_v47  ;;  %v9370_v16 = vrot.slane %v9368_v7, 4  ;;  %v9371_v21 = vrot.slane %v15305_v53, 5  ;;  %v11861_v33 = vld [vmem:[#allocation2 + $0xb4] sm:$0xff]  ;;  %v16472_v47 = vld [vmem:[#allocation26_spill] sm:$0xff]  ;;  %v11649_v44 = vrot.slane %v9260_v51, 9  ;;  %16473 = vst [vmem:[#allocation58_spill] sm:$0xff] %v15415_v60 }
 0x461   : > { %v6363_v9 = vpop.f32.mrf.mxu3  ;;  %9596 = vmatmul.bf16.gmra.mxu2 %v9484_v0  ;;  %v5717_v61 = vadd.f32 %v16472_v47, %v14983_v35  ;;  %v8847_v25 = vrot.slane %v8845_v17, 5  ;;  %v7837_v35 = vld [vmem:[#allocation2 + $0x60] sm:$0xe] }
 0x462   : > { %v15397_v37 = vadd.f32 %v6363_v9, %v5714_v45  ;;  %v8849_v45 = vshrl.u32 %v15399_v20, 16  ;;  %v8842_v9 = vor.u32 %v8841_v28, %v8838_v4  ;;  %v9372_v55 = vsel %vm12237_vm6, %v9370_v16, %v9371_v21  ;;  %v8601_v16 = vld [vmem:[#allocation2 + $0x90] sm:$0xf] }
 0x463   : > { %v9369_v4 = vsel %vm12237_vm6, %v11649_v44, %v9368_v7  ;;  %v9461_v51 = vunpack.c.l.b16 %v9372_v55  ;;  %v8860_v44 = vshrl.u32 %v8601_v16, 16 }
 0x464   : > { %v7066_v0 = vpop.f32.mrf.mxu1  ;;  %v8851_v43 = vrot.slane %v8849_v45, 4  ;;  %v8843_v28 = vrot.slane %v8842_v9, 4  ;;  %v15421_v21 = vpop.f32.mrf.mxu0  ;;  %v6815_v45 = vadd.f32 %v15038_v46, %v15017_v11  ;;  %v9460_v60 = vunpack.c.l.b16 %v9369_v4 }
 0x465   : > { %v15408_v31 = vadd.f32 %v7066_v0, %v6814_v50  ;;  %v7947_v50 = vrot.slane %v7945_v1, 4 }
 0x466   : > { %8173 = vmatmul.bf16.gmra.mxu3 %v8061_v38  ;;  %v8855_v38 = vshll.u32 %v15403_v26, 16  ;;  %v8852_v17 = vor.u32 %v8851_v43, %v8847_v25  ;;  %v9485_v15 = vpack.c.b16 %v9461_v51, %v9460_v60  ;;  %v8862_v51 = vrot.slane %v8860_v44, 4 }
 0x467   : > { %16471 = vst [vmem:[#allocation57_spill] sm:$0xff] %v15408_v31  ;;  %7105 = vmatmul.bf16.gmra.mxu1 %v11861_v33  ;;  %v8848_v33 = vsel %vm12265_vm7, %v8843_v28, %v8847_v25  ;;  %v11473_v31 = vrot.slane %v7837_v35, 9  ;;  %v9375_v35 = vrot.slane %v15348_v18, 5  ;;  %v6816_v18 = vadd.f32 %v15080_v63, %v15053_v22  ;;  %v16478_v22 = vld [vmem:[#allocation22_spill] sm:$0xff] }
 0x468   : > { %v15435_v46 = vunpack.c.l.b16 %v8848_v33  ;;  %v5722_v63 = vadd.f32 %v16478_v22, %v15042_v13 }
 0x469   : > { %8488 = vmatmul.bf16.gmra.mxu0 %v11893_v27  ;;  %v6366_v53 = vpop.f32.mrf.mxu3  ;;  %v12006_v27 = vld [vmem:[#allocation2 + $0x68] sm:$0x1]  ;;  %v7946_v11 = vsel %vm12237_vm6, %v11473_v31, %v7945_v1  ;;  %v15446_v31 = vpop.f32.mrf.mxu2  ;;  %v9377_v33 = vrot.slane %v9375_v35, 4 }
 0x46a   : > { %v15417_v0 = vadd.f32 %v6366_v53, %v5717_v61  ;;  %v7948_v47 = vrot.slane %v12006_v27, 5  ;;  %v8853_v61 = vrot.slane %v8852_v17, 4  ;;  %v8857_v53 = vrot.slane %v8855_v38, 5  ;;  %v16475_v38 = vld [vmem:[#allocation29_spill] sm:$0xff]  ;;  %16476 = vst [vmem:[#allocation26_spill] sm:$0xff] %v15446_v31 }
 0x46b   : > { %v8863_v27 = vshll.u32 %v8601_v16, 16  ;;  %v5719_v4 = vadd.f32 %v16475_v38, %v15004_v14  ;;  %v8037_v60 = vunpack.c.l.b16 %v7946_v11  ;;  %v15448_v16 = vld [vmem:[#allocation2 + $0x94] sm:$0xf]  ;;  %v12007_v14 = vld [vmem:[#allocation2 + $0x70] sm:$0xf]  ;;  %v9378_v11 = vrot.slane %v15354_v36, 5 }
 0x46c   : > { %v7949_v7 = vsel %vm12237_vm6, %v7947_v50, %v7948_v47  ;;  %v7068_v43 = vpop.f32.mrf.mxu1  ;;  %v8858_v9 = vsel %vm12265_vm7, %v8853_v61, %v8857_v53  ;;  %v7952_v61 = vrot.slane %v12007_v14, 5  ;;  %v15456_v44 = vpop.f32.mrf.mxu0 }
 0x46d   : > { %v15429_v55 = vadd.f32 %v7068_v43, %v6815_v45  ;;  %v15437_v25 = vunpack.c.l.b16 %v8858_v9  ;;  %v8038_v50 = vunpack.c.l.b16 %v7949_v7  ;;  %v8865_v1 = vrot.slane %v8863_v27, 5  ;;  %v15452_v7 = vld [vmem:[#allocation2 + $0x98] sm:$0x1]  ;;  %v11894_v27 = vld [vmem:[#allocation2 + $0x6c] sm:$0xff] }
 0x46e   : > { %v8869_v43 = vshll.u32 %v15448_v16, 16  ;;  %v8873_v9 = vshrl.u32 %v15448_v16, 16  ;;  %v9379_v14 = vsel %vm12237_vm6, %v9377_v33, %v9378_v11  ;;  %v6817_v33 = vadd.f32 %v15112_v32, %v15084_v29 }
 0x46f   : > { %16474 = vst [vmem:[#allocation21_spill] sm:$0xff] %v15429_v55  ;;  %v8062_v45 = vpack.c.b16 %v8038_v50, %v8037_v60  ;;  %v8866_v50 = vor.u32 %v8865_v1, %v8862_v51  ;;  %v7954_v55 = vrot.slane %v7952_v61, 4  ;;  %v7838_v1 = vld [vmem:[#allocation2 + $0x6c] sm:$0xe] }
 0x470   : > { %v8875_v17 = vrot.slane %v8873_v9, 4 }
 0x471   : > { %v6368_v28 = vpop.f32.mrf.mxu3  ;;  %9601 = vmatmul.bf16.gmra.mxu2 %v9485_v15  ;;  %v9261_v15 = vld [vmem:[#allocation2 + $0x78] sm:$0xe] }
 0x472   : > { %v15444_v47 = vadd.f32 %v6368_v28, %v5719_v4  ;;  %v11862_v4 = vld [vmem:[#allocation2 + $0xc0] sm:$0xff]  ;;  %v8871_v28 = vrot.slane %v8869_v43, 5  ;;  %v11650_v60 = vrot.slane %v9261_v15, 9  ;;  %v12008_v43 = vld [vmem:[#allocation2 + $0x74] sm:$0x1] }
 0x473   : > { %v7955_v15 = vrot.slane %v12008_v43, 5  ;;  %v9382_v43 = vrot.slane %v15399_v20, 5  ;;  %v6818_v20 = vadd.f32 %v15142_v2, %v15117_v19 }
 0x474   : > { %v7071_v53 = vpop.f32.mrf.mxu1  ;;  %v9376_v51 = vsel %vm12237_vm6, %v11650_v60, %v9375_v35  ;;  %v8876_v13 = vor.u32 %v8875_v17, %v8871_v28 }
 0x475   : > { %v15459_v38 = vadd.f32 %v7071_v53, %v6816_v18  ;;  %v8867_v18 = vrot.slane %v8866_v50, 4  ;;  %v9463_v53 = vunpack.c.l.b16 %v9379_v14  ;;  %v9462_v22 = vunpack.c.l.b16 %v9376_v51  ;;  %v16481_v51 = vld [vmem:[#allocation27_spill] sm:$0xff] }
 0x476   : > { %8178 = vmatmul.bf16.gmra.mxu3 %v8062_v45  ;;  %v8879_v45 = vshll.u32 %v15452_v7, 16  ;;  %v8877_v11 = vrot.slane %v8876_v13, 4  ;;  %v7956_v35 = vsel %vm12237_vm6, %v7954_v55, %v7955_v15  ;;  %v15490_v55 = vpop.f32.mrf.mxu0 }
 0x477   : > { %16477 = vst [vmem:[#allocation29_spill] sm:$0xff] %v15459_v38  ;;  %7110 = vmatmul.bf16.gmra.mxu1 %v11862_v4  ;;  %v8872_v9 = vsel %vm12265_vm7, %v8867_v18, %v8871_v28  ;;  %v9486_v32 = vpack.c.b16 %v9463_v53, %v9462_v22  ;;  %v8040_v13 = vunpack.c.l.b16 %v7956_v35  ;;  %v9384_v35 = vrot.slane %v9382_v43, 4  ;;  %v16518_v38 = vld [vmem:[#allocation69_spill] sm:$0xff] }
 0x478   : > { %v8881_v4 = vrot.slane %v8879_v45, 5  ;;  %v15484_v45 = vunpack.c.l.b16 %v8872_v9 }
 0x479   : > { %8493 = vmatmul.bf16.gmra.mxu0 %v11894_v27  ;;  %v6371_v31 = vpop.f32.mrf.mxu3  ;;  %v8604_v27 = vld [vmem:[#allocation2 + $0x9c] sm:$0xf] }
 0x47a   : > { %v15466_v36 = vadd.f32 %v6371_v31, %v5722_v63  ;;  %v15474_v31 = vpop.f32.mrf.mxu2  ;;  %v11474_v63 = vrot.slane %v7838_v1, 9  ;;  %v8882_v60 = vsel %vm12265_vm7, %v8877_v11, %v8881_v4  ;;  %v8884_v14 = vshrl.u32 %v8604_v27, 16  ;;  %v16482_v11 = vld [vmem:[#allocation13_spill] sm:$0xff]  ;;  %v16483_v4 = vld [vmem:[#allocation42_spill] sm:$0xff] }
 0x47b   : > { %16479 = vst [vmem:[#allocation22_spill] sm:$0xff] %v15474_v31  ;;  %v8887_v29 = vshll.u32 %v8604_v27, 16  ;;  %v15486_v18 = vunpack.c.l.b16 %v8882_v60  ;;  %v5724_v1 = vadd.f32 %v16481_v51, %v15076_v59  ;;  %v5649_v22 = vadd.f32 %v16483_v4, %v16482_v11  ;;  %v16484_v60 = vld [vmem:[#allocation31_spill] sm:$0xff]  ;;  %v12009_v51 = vld [vmem:[#allocation2 + $0x7c] sm:$0xf]  ;;  %v16488_v31 = vld [vmem:[#allocation62_spill] sm:$0xff] }
 0x47c   : > { %v7073_v17 = vpop.f32.mrf.mxu1  ;;  %v7953_v28 = vsel %vm12237_vm6, %v11474_v63, %v7952_v61  ;;  %v15499_v63 = vld [vmem:[#allocation2 + $0xa0] sm:$0xf]  ;;  %v7959_v53 = vrot.slane %v12009_v51, 5 }
 0x47d   : > { %v15478_v50 = vadd.f32 %v7073_v17, %v6817_v33  ;;  %v8039_v61 = vunpack.c.l.b16 %v7953_v28  ;;  %v8886_v33 = vrot.slane %v8884_v14, 4  ;;  %v8889_v9 = vrot.slane %v8887_v29, 5  ;;  %v9262_v17 = vld [vmem:[#allocation2 + $0x84] sm:$0xe]  ;;  %v11895_v28 = vld [vmem:[#allocation2 + $0x78] sm:$0xff] }
 0x47e   : > { %v8893_v14 = vshll.u32 %v15499_v63, 16  ;;  %v8897_v29 = vshrl.u32 %v15499_v63, 16  ;;  %v11651_v19 = vrot.slane %v9262_v17, 9  ;;  %v15522_v17 = vpop.f32.mrf.mxu0 }
 0x47f   : > { %16480 = vst [vmem:[#allocation73_spill] sm:$0xff] %v15478_v50  ;;  %v8063_v59 = vpack.c.b16 %v8040_v13, %v8039_v61  ;;  %v9385_v13 = vrot.slane %v15403_v26, 5  ;;  %v8890_v11 = vor.u32 %v8889_v9, %v8886_v33 }
 0x480   : > { %v8895_v2 = vrot.slane %v8893_v14, 5  ;;  %v8899_v50 = vrot.slane %v8897_v29, 4  ;;  %v12010_v29 = vld [vmem:[#allocation2 + $0x80] sm:$0x1] }
 0x481   : > { %v6373_v15 = vpop.f32.mrf.mxu3  ;;  %9606 = vmatmul.bf16.gmra.mxu2 %v9486_v32  ;;  %v6377_v32 = vadd.f32 %v16484_v60, %v5649_v22  ;;  %v16487_v22 = vld [vmem:[#allocation24_spill] sm:$0xff]  ;;  %v9386_v51 = vsel %vm12237_vm6, %v9384_v35, %v9385_v13  ;;  %v8891_v35 = vrot.slane %v8890_v11, 4 }
 0x482   : > { %v15495_v27 = vadd.f32 %v6373_v15, %v5724_v1  ;;  %v15504_v15 = vld [vmem:[#allocation2 + $0xa4] sm:$0x1]  ;;  %v15511_v4 = vpop.f32.mrf.mxu2  ;;  %v7798_v60 = vadd.f32 %v16487_v22, %v15108_v30  ;;  %v9383_v30 = vsel %vm12237_vm6, %v11651_v19, %v9382_v43  ;;  %v8900_v13 = vor.u32 %v8899_v50, %v8895_v2 }
 0x483   : > { %16486 = vst [vmem:[#allocation13_spill] sm:$0xff] %v15511_v4  ;;  %v8903_v26 = vshll.u32 %v15504_v15, 16  ;;  %v7962_v22 = vrot.slane %v12010_v29, 5  ;;  %v9464_v4 = vunpack.c.l.b16 %v9383_v30 }
 0x484   : > { %v7076_v1 = vpop.f32.mrf.mxu1 }
 0x485   : > { %v15509_v61 = vadd.f32 %v7076_v1, %v6818_v20  ;;  %v16490_v20 = vld [vmem:[#allocation28_spill] sm:$0xff]  ;;  %v7961_v1 = vrot.slane %v7959_v53, 4 }
 0x486   : > { %8183 = vmatmul.bf16.gmra.mxu3 %v8063_v59  ;;  %v16489_v59 = vpack.c.b16 %v15032_v24, %v16488_v31  ;;  %v6803_v33 = vadd.f32 %v16490_v20, %v6377_v32  ;;  %v9465_v31 = vunpack.c.l.b16 %v9386_v51  ;;  %v6819_v32 = vadd.f32 %v15171_v3, %v15144_v41 }
 0x487   : > { %16485 = vst [vmem:[#allocation27_spill] sm:$0xff] %v15509_v61  ;;  %v8896_v20 = vsel %vm12265_vm7, %v8891_v35, %v8895_v2  ;;  %v7963_v43 = vsel %vm12237_vm6, %v7961_v1, %v7962_v22  ;;  %v9389_v1 = vrot.slane %v15448_v16, 5  ;;  %v15553_v22 = vld [vmem:[#allocation2 + $0xac] sm:$0xf]  ;;  %v6820_v16 = vadd.f32 %v15207_v48, %v15167_v42  ;;  %v16495_v42 = vld [vmem:[#allocation30_spill] sm:$0xff] }
 0x488   : > { %9140 = vmatmul.bf16.vlgmr.msra.gmra.mxu1 %v16489_v59  ;;  %v7117_v24 = vadd.f32 %v15125_v56, %v6803_v33  ;;  %v8607_v59 = vld [vmem:[#allocation2 + $0xa8] sm:$0xf]  ;;  %v9487_v33 = vpack.c.b16 %v9465_v31, %v9464_v4  ;;  %v15541_v3 = vunpack.c.l.b16 %v8896_v20  ;;  %v7800_v48 = vadd.f32 %v16495_v42, %v15157_v57 }
 0x489   : > { %8498 = vmatmul.bf16.gmra.mxu0 %v11895_v28  ;;  %v8144_v9 = vpop.f32.mrf.mxu3  ;;  %v7839_v28 = vld [vmem:[#allocation2 + $0x78] sm:$0xe]  ;;  %v8908_v19 = vshrl.u32 %v8607_v59, 16  ;;  %v8911_v51 = vshll.u32 %v8607_v59, 16  ;;  %v15555_v59 = vpop.f32.mrf.mxu0  ;;  %v9391_v20 = vrot.slane %v9389_v1, 4 }
 0x48a   : > { %v15524_v14 = vadd.f32 %v8144_v9, %v7798_v60  ;;  %v8901_v60 = vrot.slane %v8900_v13, 4  ;;  %v8905_v9 = vrot.slane %v8903_v26, 5  ;;  %v11475_v61 = vrot.slane %v7839_v28, 9  ;;  %v16492_v26 = vld [vmem:[#allocation25_spill] sm:$0xff]  ;;  %v15547_v35 = vpop.f32.mrf.mxu2 }
 0x48b   : > { %v7799_v30 = vadd.f32 %v16492_v26, %v7117_v24  ;;  %v8042_v28 = vunpack.c.l.b16 %v7963_v43  ;;  %16493 = vst [vmem:[#allocation31_spill] sm:$0xff] %v15547_v35 }
 0x48c   : > { %v7078_v50 = vpop.f32.mrf.mxu1  ;;  %v8906_v56 = vsel %vm12265_vm7, %v8901_v60, %v8905_v9  ;;  %v7960_v41 = vsel %vm12237_vm6, %v11475_v61, %v7959_v53  ;;  %v8910_v53 = vrot.slane %v8908_v19, 4  ;;  %v8913_v61 = vrot.slane %v8911_v51, 5  ;;  %v12011_v60 = vld [vmem:[#allocation2 + $0x88] sm:$0xf] }
 0x48d   : > { %v15535_v11 = vadd.f32 %v7078_v50, %v6819_v32  ;;  %v15543_v2 = vunpack.c.l.b16 %v8906_v56  ;;  %v8041_v31 = vunpack.c.l.b16 %v7960_v41  ;;  %v9263_v32 = vld [vmem:[#allocation2 + $0x90] sm:$0xe]  ;;  %v7966_v9 = vrot.slane %v12011_v60, 5  ;;  %v15559_v50 = vld [vmem:[#allocation2 + $0xb0] sm:$0x1]  ;;  %v11896_v51 = vld [vmem:[#allocation2 + $0x84] sm:$0xff] }
 0x48e   : > { %v8917_v56 = vshll.u32 %v15553_v22, 16  ;;  %v8921_v19 = vshrl.u32 %v15553_v22, 16  ;;  %v8914_v26 = vor.u32 %v8913_v61, %v8910_v53  ;;  %v8927_v29 = vshll.u32 %v15559_v50, 16  ;;  %v7840_v61 = vld [vmem:[#allocation2 + $0x84] sm:$0xe] }
 0x48f   : > { %16491 = vst [vmem:[#allocation42_spill] sm:$0xff] %v15535_v11  ;;  %v8064_v24 = vpack.c.b16 %v8042_v28, %v8041_v31  ;;  %v16496_v31 = vld [vmem:[#allocation63_spill] sm:$0xff] }
 0x490   : > { %v8919_v28 = vrot.slane %v8917_v56, 5  ;;  %v16497_v60 = vpack.c.b16 %v15061_v62, %v16496_v31  ;;  %v8610_v62 = vld [vmem:[#allocation2 + $0xb4] sm:$0xf]  ;;  %v8929_v31 = vrot.slane %v8927_v29, 5 }
 0x491   : > { %v8146_v13 = vpop.f32.mrf.mxu3  ;;  %9611 = vmatmul.bf16.gmra.mxu2 %v9487_v33  ;;  %v9392_v33 = vrot.slane %v15452_v7, 5 }
 0x492   : > { %v15551_v4 = vadd.f32 %v8146_v13, %v7799_v30  ;;  %v11652_v30 = vrot.slane %v9263_v32, 9  ;;  %v8915_v32 = vrot.slane %v8914_v26, 4  ;;  %v15578_v56 = vpop.f32.mrf.mxu2 }
 0x493   : > { %v9393_v13 = vsel %vm12237_vm6, %v9391_v20, %v9392_v33  ;;  %16498 = vst [vmem:[#allocation62_spill] sm:$0xff] %v15578_v56  ;;  %v16506_v56 = vld [vmem:[#allocation65_spill] sm:$0xff] }
 0x494   : > { %v7081_v43 = vpop.f32.mrf.mxu1  ;;  %v9390_v53 = vsel %vm12237_vm6, %v11652_v30, %v9389_v1  ;;  %v9467_v20 = vunpack.c.l.b16 %v9393_v13  ;;  %v8920_v42 = vsel %vm12265_vm7, %v8915_v32, %v8919_v28  ;;  %v15586_v30 = vpop.f32.mrf.mxu0 }
 0x495   : > { %v15564_v41 = vadd.f32 %v7081_v43, %v6820_v16  ;;  %v7968_v16 = vrot.slane %v7966_v9, 4  ;;  %v15594_v29 = vunpack.c.l.b16 %v8920_v42  ;;  %v15605_v42 = vld [vmem:[#allocation2 + $0xb8] sm:$0xf] }
 0x496   : > { %8188 = vmatmul.bf16.gmra.mxu3 %v8064_v24  ;;  %v8923_v24 = vrot.slane %v8921_v19, 4  ;;  %v6821_v19 = vadd.f32 %v15241_v58, %v15193_v49  ;;  %v8935_v49 = vshll.u32 %v8610_v62, 16 }
 0x497   : > { %16494 = vst [vmem:[#allocation24_spill] sm:$0xff] %v15564_v41 }
 0x498   : > { %9145 = vmatmul.bf16.gmra.mxu1 %v16497_v60  ;;  %v8924_v57 = vor.u32 %v8923_v24, %v8919_v28  ;;  %v9466_v60 = vunpack.c.l.b16 %v9390_v53 }
 0x499   : > { %8503 = vmatmul.bf16.gmra.mxu0 %v11896_v51  ;;  %v8149_v7 = vpop.f32.mrf.mxu3  ;;  %v12012_v51 = vld [vmem:[#allocation2 + $0x8c] sm:$0x1] }
 0x49a   : > { %v15574_v43 = vadd.f32 %v8149_v7, %v7800_v48  ;;  %v7969_v33 = vrot.slane %v12012_v51, 5  ;;  %v8925_v48 = vrot.slane %v8924_v57, 4  ;;  %v11476_v7 = vrot.slane %v7840_v61, 9 }
 0x49b   : > { %v8932_v51 = vshrl.u32 %v8610_v62, 16  ;;  %v9488_v58 = vpack.c.b16 %v9467_v20, %v9466_v60  ;;  %v9396_v57 = vrot.slane %v15499_v63, 5  ;;  %v9264_v60 = vld [vmem:[#allocation2 + $0x9c] sm:$0xe]  ;;  %v12013_v63 = vld [vmem:[#allocation2 + $0x94] sm:$0xf] }
 0x49c   : > { %v7970_v1 = vsel %vm12237_vm6, %v7968_v16, %v7969_v33  ;;  %v7083_v26 = vpop.f32.mrf.mxu1  ;;  %v8930_v24 = vsel %vm12265_vm7, %v8925_v48, %v8929_v31  ;;  %v7967_v28 = vsel %vm12237_vm6, %v11476_v7, %v7966_v9  ;;  %v16500_v16 = vld [vmem:[#allocation34_spill] sm:$0xff]  ;;  %v8937_v9 = vrot.slane %v8935_v49, 5  ;;  %v11897_v49 = vld [vmem:[#allocation2 + $0x90] sm:$0xff] }
 0x49d   : > { %v15588_v13 = vadd.f32 %v7083_v26, %v6821_v19  ;;  %v15596_v53 = vunpack.c.l.b16 %v8930_v24  ;;  %v7801_v61 = vadd.f32 %v16500_v16, %v15178_v10  ;;  %v8044_v32 = vunpack.c.l.b16 %v7970_v1  ;;  %v16501_v10 = vld [vmem:[#allocation40_spill] sm:$0xff]  ;;  %v15609_v26 = vpop.f32.mrf.mxu2  ;;  %v15611_v16 = vld [vmem:[#allocation2 + $0xbc] sm:$0x1] }
 0x49e   : > { %v8043_v20 = vunpack.c.l.b16 %v7967_v28  ;;  %v8934_v48 = vrot.slane %v8932_v51, 4  ;;  %v9398_v7 = vrot.slane %v9396_v57, 4  ;;  %v6822_v1 = vadd.f32 %v16501_v10, %v15218_v39  ;;  %16502 = vst [vmem:[#allocation25_spill] sm:$0xff] %v15609_v26  ;;  %v15618_v10 = vpop.f32.mrf.mxu0  ;;  %v16505_v19 = vld [vmem:[#allocation32_spill] sm:$0xff] }
 0x49f   : > { %16499 = vst [vmem:[#allocation28_spill] sm:$0xff] %v15588_v13  ;;  %v7973_v24 = vrot.slane %v12013_v63, 5  ;;  %v8945_v51 = vshrl.u32 %v15605_v42, 16  ;;  %v9399_v28 = vrot.slane %v15504_v15, 5  ;;  %v16504_v63 = vld [vmem:[#allocation33_spill] sm:$0xff]  ;;  %v16507_v13 = vld [vmem:[#allocation66_spill] sm:$0xff] }
 0x4a0   : > { %v8065_v31 = vpack.c.b16 %v8044_v32, %v8043_v20  ;;  %v11653_v20 = vrot.slane %v9264_v60, 9  ;;  %v7802_v26 = vadd.f32 %v16505_v19, %v16504_v63  ;;  %v8951_v15 = vshll.u32 %v15611_v16, 16  ;;  %v12014_v63 = vld [vmem:[#allocation2 + $0x98] sm:$0x1] }
 0x4a1   : > { %v8151_v33 = vpop.f32.mrf.mxu3  ;;  %9616 = vmatmul.bf16.gmra.mxu2 %v9488_v58  ;;  %v9400_v35 = vsel %vm12237_vm6, %v9398_v7, %v9399_v28  ;;  %v8947_v11 = vrot.slane %v8945_v51, 4  ;;  %v7976_v7 = vrot.slane %v12014_v63, 5  ;;  %v8613_v28 = vld [vmem:[#allocation2 + $0xc0] sm:$0xf] }
 0x4a2   : > { %v15603_v62 = vadd.f32 %v8151_v33, %v7801_v61  ;;  %v8941_v61 = vshll.u32 %v15605_v42, 16  ;;  %v8938_v33 = vor.u32 %v8937_v9, %v8934_v48  ;;  %v7975_v48 = vrot.slane %v7973_v24, 4 }
 0x4a3   : > { %v9397_v60 = vsel %vm12237_vm6, %v11653_v20, %v9396_v57  ;;  %v8959_v63 = vshll.u32 %v8613_v28, 16 }
 0x4a4   : > { %v7086_v58 = vpop.f32.mrf.mxu1  ;;  %v8943_v39 = vrot.slane %v8941_v61, 5  ;;  %v8939_v61 = vrot.slane %v8938_v33, 4  ;;  %v7977_v57 = vsel %vm12237_vm6, %v7975_v48, %v7976_v7  ;;  %v16514_v48 = vld [vmem:[#allocation35_spill] sm:$0xff] }
 0x4a5   : > { %v15616_v32 = vadd.f32 %v7086_v58, %v6822_v1  ;;  %v7841_v58 = vld [vmem:[#allocation2 + $0x90] sm:$0xe]  ;;  %v15642_v41 = vpop.f32.mrf.mxu2 }
 0x4a6   : > { %8193 = vmatmul.bf16.gmra.mxu3 %v8065_v31  ;;  %v16508_v31 = vpack.c.b16 %v16506_v56, %v16507_v13  ;;  %v8948_v19 = vor.u32 %v8947_v11, %v8943_v39  ;;  %v8944_v13 = vsel %vm12265_vm7, %v8939_v61, %v8943_v39  ;;  %v8046_v61 = vunpack.c.l.b16 %v7977_v57  ;;  %v12015_v57 = vld [vmem:[#allocation2 + $0xa0] sm:$0xf] }
 0x4a7   : > { %16503 = vst [vmem:[#allocation30_spill] sm:$0xff] %v15616_v32  ;;  %v16509_v32 = vld [vmem:[#allocation12_spill] sm:$0xff]  ;;  %v15646_v39 = vunpack.c.l.b16 %v8944_v13 }
 0x4a8   : > { %9150 = vmatmul.bf16.gmra.mxu1 %v16508_v31  ;;  %v6823_v56 = vadd.f32 %v15301_v52, %v16509_v32  ;;  %v8949_v51 = vrot.slane %v8948_v19, 4  ;;  %v8953_v31 = vrot.slane %v8951_v15, 5  ;;  %v9403_v19 = vrot.slane %v15553_v22, 5 }
 0x4a9   : > { %8508 = vmatmul.bf16.gmra.mxu0 %v11897_v49  ;;  %v8154_v1 = vpop.f32.mrf.mxu3  ;;  %v9469_v49 = vunpack.c.l.b16 %v9400_v35  ;;  %v8956_v35 = vshrl.u32 %v8613_v28, 16  ;;  %16511 = vst [vmem:[#allocation34_spill] sm:$0xff] %v15646_v39  ;;  %v6824_v22 = vadd.f32 %v15329_v23, %v15271_v6  ;;  %v16515_v6 = vld [vmem:[#allocation38_spill] sm:$0xff]  ;;  %v16516_v23 = vld [vmem:[#allocation36_spill] sm:$0xff] }
 0x4aa   : > { %v15628_v9 = vadd.f32 %v8154_v1, %v7802_v26  ;;  %v9468_v26 = vunpack.c.l.b16 %v9397_v60  ;;  %v11477_v1 = vrot.slane %v7841_v58, 9  ;;  %v8954_v11 = vsel %vm12265_vm7, %v8949_v51, %v8953_v31  ;;  %v16513_v60 = vld [vmem:[#allocation20_spill] sm:$0xff]  ;;  %v15659_v31 = vld [vmem:[#allocation2 + $0xc4] sm:$0xf] }
 0x4ab   : > { %v15648_v15 = vunpack.c.l.b16 %v8954_v11  ;;  %v7803_v58 = vadd.f32 %v16514_v48, %v16513_v60  ;;  %v8958_v13 = vrot.slane %v8956_v35, 4  ;;  %v8961_v51 = vrot.slane %v8959_v63, 5  ;;  %v15663_v60 = vld [vmem:[#allocation2 + $0xc8] sm:$0x1]  ;;  %v11898_v35 = vld [vmem:[#allocation2 + $0x9c] sm:$0xff] }
 0x4ac   : > { %v7088_v20 = vpop.f32.mrf.mxu1  ;;  %v9489_v52 = vpack.c.b16 %v9469_v49, %v9468_v26  ;;  %v7974_v32 = vsel %vm12237_vm6, %v11477_v1, %v7973_v24  ;;  %v9265_v1 = vld [vmem:[#allocation2 + $0xa8] sm:$0xe]  ;;  %v7980_v11 = vrot.slane %v12015_v57, 5  ;;  %v8965_v48 = vshll.u32 %v15659_v31, 16 }
 0x4ad   : > { %v15638_v33 = vadd.f32 %v7088_v20, %v6823_v56  ;;  %16512 = vst [vmem:[#allocation40_spill] sm:$0xff] %v15648_v15  ;;  %v15655_v56 = vpop.f32.mrf.mxu0  ;;  %v8045_v24 = vunpack.c.l.b16 %v7974_v32  ;;  %v9405_v20 = vrot.slane %v9403_v19, 4  ;;  %v9406_v63 = vrot.slane %v15559_v50, 5  ;;  %v15678_v50 = vpop.f32.mrf.mxu2 }
 0x4ae   : > { %v7804_v57 = vadd.f32 %v16516_v23, %v16515_v6  ;;  %v8975_v15 = vshll.u32 %v15663_v60, 16 }
 0x4af   : > { %16510 = vst [vmem:[#allocation63_spill] sm:$0xff] %v15638_v33  ;;  %v8066_v26 = vpack.c.b16 %v8046_v61, %v8045_v24  ;;  %v8962_v61 = vor.u32 %v8961_v51, %v8958_v13  ;;  %v8967_v24 = vrot.slane %v8965_v48, 5  ;;  %v9407_v28 = vsel %vm12237_vm6, %v9405_v20, %v9406_v63  ;;  %v16517_v33 = vld [vmem:[#allocation70_spill] sm:$0xff] }
 0x4b0   : > { %v16519_v39 = vpack.c.b16 %v16517_v33, %v16518_v38  ;;  %v7982_v13 = vrot.slane %v7980_v11, 4  ;;  %v9471_v20 = vunpack.c.l.b16 %v9407_v28  ;;  %v12016_v63 = vld [vmem:[#allocation2 + $0xa4] sm:$0x1]  ;;  %v6825_v33 = vadd.f32 %v15363_v12, %v15297_v40 }
 0x4b1   : > { %v8156_v7 = vpop.f32.mrf.mxu3  ;;  %9621 = vmatmul.bf16.gmra.mxu2 %v9489_v52  ;;  %v8963_v48 = vrot.slane %v8962_v61, 4  ;;  %v7983_v6 = vrot.slane %v12016_v63, 5  ;;  %v8977_v23 = vrot.slane %v8975_v15, 5  ;;  %v16520_v15 = vld [vmem:[#allocation39_spill] sm:$0xff] }
 0x4b2   : > { %v15657_v49 = vadd.f32 %v8156_v7, %v7803_v58  ;;  %v8969_v58 = vshrl.u32 %v15659_v31, 16  ;;  %v11654_v7 = vrot.slane %v9265_v1, 9 }
 0x4b4   : > { %v7091_v52 = vpop.f32.mrf.mxu1  ;;  %v9404_v1 = vsel %vm12237_vm6, %v11654_v7, %v9403_v19  ;;  %v7984_v19 = vsel %vm12237_vm6, %v7982_v13, %v7983_v6  ;;  %v9410_v13 = vrot.slane %v15605_v42, 5 }
 0x4b5   : > { %v15668_v32 = vadd.f32 %v7091_v52, %v6824_v22  ;;  %v7842_v52 = vld [vmem:[#allocation2 + $0x9c] sm:$0xe]  ;;  %v15684_v38 = vpop.f32.mrf.mxu0 }
 0x4b6   : > { %8198 = vmatmul.bf16.gmra.mxu3 %v8066_v26  ;;  %v8971_v26 = vrot.slane %v8969_v58, 4 }
 0x4b8   : > { %9155 = vmatmul.bf16.gmra.mxu1 %v16519_v39  ;;  %v8968_v39 = vsel %vm12265_vm7, %v8963_v48, %v8967_v24  ;;  %v8048_v48 = vunpack.c.l.b16 %v7984_v19 }
 0x4b9   : > { %8513 = vmatmul.bf16.gmra.mxu0 %v11898_v35  ;;  %v8159_v22 = vpop.f32.mrf.mxu3  ;;  %v8972_v35 = vor.u32 %v8971_v26, %v8967_v24  ;;  %v15698_v12 = vunpack.c.l.b16 %v8968_v39  ;;  %v9412_v39 = vrot.slane %v9410_v13, 4 }
 0x4ba   : > { %v15680_v51 = vadd.f32 %v8159_v22, %v7804_v57  ;;  %v9470_v57 = vunpack.c.l.b16 %v9404_v1  ;;  %v11478_v22 = vrot.slane %v7842_v52, 9  ;;  %v16521_v1 = vld [vmem:[#allocation43_spill] sm:$0xff] }
 0x4bb   : > { %v8973_v58 = vrot.slane %v8972_v35, 4  ;;  %v7805_v52 = vadd.f32 %v16521_v1, %v16520_v15 }
 0x4bc   : > { %v7093_v61 = vpop.f32.mrf.mxu1  ;;  %v9490_v26 = vpack.c.b16 %v9471_v20, %v9470_v57  ;;  %v7981_v40 = vsel %vm12237_vm6, %v11478_v22, %v7980_v11  ;;  %v9266_v57 = vld [vmem:[#allocation2 + $0xb4] sm:$0xe]  ;;  %v12017_v22 = vld [vmem:[#allocation2 + $0xac] sm:$0xf] }
 0x4bd   : > { %v15692_v7 = vadd.f32 %v7093_v61, %v6825_v33  ;;  %v8978_v28 = vsel %vm12265_vm7, %v8973_v58, %v8977_v23  ;;  %v8047_v20 = vunpack.c.l.b16 %v7981_v40  ;;  %v15709_v33 = vpop.f32.mrf.mxu2  ;;  %v16522_v58 = vld [vmem:[#allocation10_spill] sm:$0xff]  ;;  %v7987_v19 = vrot.slane %v12017_v22, 5  ;;  %v15713_v42 = vpop.f32.mrf.mxu0  ;;  %v12018_v22 = vld [vmem:[#allocation2 + $0xb0] sm:$0x1] }
 0x4be   : > { %v15700_v24 = vunpack.c.l.b16 %v8978_v28  ;;  %v6826_v23 = vadd.f32 %v15395_v8, %v16522_v58  ;;  %v11899_v28 = vld [vmem:[#allocation2 + $0xa8] sm:$0xff]  ;;  %v11655_v40 = vrot.slane %v9266_v57, 9  ;;  %v7990_v63 = vrot.slane %v12018_v22, 5 }
 0x4bf   : > { %v8067_v11 = vpack.c.b16 %v8048_v48, %v8047_v20  ;;  %v16524_v48 = vld [vmem:[#allocation71_spill] sm:$0xff] }
 0x4c0   : > { %v9411_v20 = vsel %vm12237_vm6, %v11655_v40, %v9410_v13  ;;  %v7843_v58 = vld [vmem:[#allocation2 + $0xa8] sm:$0xe] }
 0x4c1   : > { %v8161_v35 = vpop.f32.mrf.mxu3  ;;  %9626 = vmatmul.bf16.gmra.mxu2 %v9490_v26  ;;  %v9413_v26 = vrot.slane %v15611_v16, 5  ;;  %v16526_v16 = vld [vmem:[#allocation50_spill] sm:$0xff]  ;;  %v9472_v57 = vunpack.c.l.b16 %v9411_v20 }
 0x4c2   : > { %v15707_v6 = vadd.f32 %v8161_v35, %v7805_v52  ;;  %v16523_v52 = vld [vmem:[#allocation72_spill] sm:$0xff]  ;;  %v7989_v35 = vrot.slane %v7987_v19, 4 }
 0x4c3   : > { %v9414_v1 = vsel %vm12237_vm6, %v9412_v39, %v9413_v26  ;;  %v16525_v8 = vpack.c.b16 %v16523_v52, %v16524_v48 }
 0x4c4   : > { %v7096_v61 = vpop.f32.mrf.mxu1  ;;  %v7991_v39 = vsel %vm12237_vm6, %v7989_v35, %v7990_v63  ;;  %v9267_v63 = vld [vmem:[#allocation2 + $0xc0] sm:$0xe]  ;;  %v12019_v35 = vld [vmem:[#allocation2 + $0xb8] sm:$0xf] }
 0x4c5   : > { %v15716_v15 = vadd.f32 %v7096_v61, %v6826_v23  ;;  %v6827_v23 = vadd.f32 %v15421_v21, %v16526_v16  ;;  %v15727_v61 = vpop.f32.mrf.mxu2  ;;  %v15735_v40 = vpop.f32.mrf.mxu0 }
 0x4c6   : > { %8203 = vmatmul.bf16.gmra.mxu3 %v8067_v11  ;;  %v9473_v11 = vunpack.c.l.b16 %v9414_v1  ;;  %v8050_v1 = vunpack.c.l.b16 %v7991_v39 }
 0x4c8   : > { %9160 = vmatmul.bf16.gmra.mxu1 %v16525_v8  ;;  %v9491_v48 = vpack.c.b16 %v9473_v11, %v9472_v57  ;;  %v9417_v8 = vrot.slane %v15659_v31, 5  ;;  %v11900_v11 = vld [vmem:[#allocation2 + $0xb4] sm:$0xff]  ;;  %v11656_v31 = vrot.slane %v9267_v63, 9  ;;  %v6829_v63 = vadd.f32 %v15490_v55, %v15397_v37 }
 0x4c9   : > { %8518 = vmatmul.bf16.gmra.mxu0 %v11899_v28  ;;  %v11479_v28 = vrot.slane %v7843_v58, 9  ;;  %v16527_v58 = vld [vmem:[#allocation18_spill] sm:$0xff]  ;;  %v6830_v55 = vadd.f32 %v15522_v17, %v15417_v0 }
 0x4ca   : > { %v9419_v20 = vrot.slane %v9417_v8, 4  ;;  %v6828_v16 = vadd.f32 %v15456_v44, %v16527_v58 }
 0x4cb   : > { %v7988_v13 = vsel %vm12237_vm6, %v11479_v28, %v7987_v19  ;;  %v9420_v19 = vrot.slane %v15663_v60, 5  ;;  %v7844_v60 = vld [vmem:[#allocation2 + $0xb4] sm:$0xe] }
 0x4cc   : > { %v7098_v26 = vpop.f32.mrf.mxu1  ;;  %v8049_v21 = vunpack.c.l.b16 %v7988_v13  ;;  %v16529_v13 = vld [vmem:[#allocation45_spill] sm:$0xff] }
 0x4cd   : > { %v15731_v52 = vadd.f32 %v7098_v26, %v6827_v23  ;;  %v7994_v23 = vrot.slane %v12019_v35, 5  ;;  %v15743_v28 = vpop.f32.mrf.mxu2  ;;  %v9421_v39 = vsel %vm12237_vm6, %v9419_v20, %v9420_v19 }
 0x4ce   : > { %v8068_v22 = vpack.c.b16 %v8050_v1, %v8049_v21  ;;  %v15750_v21 = vpop.f32.mrf.mxu0  ;;  %v9475_v58 = vunpack.c.l.b16 %v9421_v39 }
 0x4cf   : > { %v7996_v1 = vrot.slane %v7994_v23, 4 }
 0x4d1   : > { %9631 = vmatmul.bf16.gmra.mxu2 %v9491_v48  ;;  %v16528_v48 = vld [vmem:[#allocation37_spill] sm:$0xff] }
 0x4d2   : > { %v16530_v44 = vpack.c.b16 %v16528_v48, %v16529_v13 }
 0x4d4   : > { %v7101_v26 = vpop.f32.mrf.mxu1 }
 0x4d5   : > { %v15741_v57 = vadd.f32 %v7101_v26, %v6828_v16  ;;  %v12020_v16 = vld [vmem:[#allocation2 + $0xbc] sm:$0x1] }
 0x4d6   : > { %8208 = vmatmul.bf16.gmra.mxu3 %v8068_v22  ;;  %v9418_v22 = vsel %vm12237_vm6, %v11656_v31, %v9417_v8  ;;  %v7997_v35 = vrot.slane %v12020_v16, 5  ;;  %v15762_v31 = vpop.f32.mrf.mxu2  ;;  %v15764_v16 = vpop.f32.mrf.mxu0 }
 0x4d7   : > { %v9474_v26 = vunpack.c.l.b16 %v9418_v22  ;;  %v12021_v22 = vld [vmem:[#allocation2 + $0xc4] sm:$0xf] }
 0x4d8   : > { %9165 = vmatmul.bf16.gmra.mxu1 %v16530_v44  ;;  %v7998_v20 = vsel %vm12237_vm6, %v7996_v1, %v7997_v35  ;;  %v8001_v1 = vrot.slane %v12021_v22, 5  ;;  %v11901_v35 = vld [vmem:[#allocation2 + $0xc0] sm:$0xff] }
 0x4d9   : > { %8523 = vmatmul.bf16.gmra.mxu0 %v11900_v11  ;;  %v11480_v11 = vrot.slane %v7844_v60, 9  ;;  %v9492_v13 = vpack.c.b16 %v9475_v58, %v9474_v26  ;;  %v8052_v8 = vunpack.c.l.b16 %v7998_v20  ;;  %v7845_v20 = vld [vmem:[#allocation2 + $0xc0] sm:$0xe] }
 0x4da   : > { %v11481_v0 = vrot.slane %v7845_v20, 9  ;;  %v16539_v20 = vld [vmem:[#allocation49_spill] sm:$0xff] }
 0x4db   : > { %v7995_v44 = vsel %vm12237_vm6, %v11480_v11, %v7994_v23  ;;  %v16533_v23 = vld [vmem:[#allocation46_spill] sm:$0xff]  ;;  %v8003_v11 = vrot.slane %v8001_v1, 4 }
 0x4dc   : > { %v7103_v19 = vpop.f32.mrf.mxu1  ;;  %v8051_v39 = vunpack.c.l.b16 %v7995_v44  ;;  %v6831_v44 = vadd.f32 %v15555_v59, %v15444_v47 }
 0x4dd   : > { %v15758_v48 = vadd.f32 %v7103_v19, %v6829_v63  ;;  %v16534_v63 = vld [vmem:[#allocation23_spill] sm:$0xff] }
 0x4de   : > { %v8069_v37 = vpack.c.b16 %v8052_v8, %v8051_v39  ;;  %v16535_v26 = vpack.c.b16 %v16533_v23, %v16534_v63  ;;  %v12022_v19 = vld [vmem:[#allocation2 + $0xc8] sm:$0x1]  ;;  %v15777_v39 = vpop.f32.mrf.mxu0  ;;  %v11902_v23 = vld [vmem:[#allocation2 + $0xcc] sm:$0xff]  ;;  %v6832_v63 = vadd.f32 %v15586_v30, %v15466_v36 }
 0x4df   : > { %16531 = vst [vmem:[#allocation33_spill] sm:$0xff] %v15758_v48  ;;  %v16542_v36 = vld [vmem:[#allocation19_spill] sm:$0xff] }
 0x4e0   : > { %v16543_v30 = vpack.c.b16 %v15388_v54, %v16542_v36 }
 0x4e1   : > { %9636 = vmatmul.bf16.gmra.mxu2 %v9492_v13  ;;  %v8004_v13 = vrot.slane %v12022_v19, 5 }
 0x4e3   : > { %v8005_v17 = vsel %vm12237_vm6, %v8003_v11, %v8004_v13  ;;  %v16538_v11 = vld [vmem:[#allocation17_spill] sm:$0xff] }
 0x4e4   : > { %v7106_v60 = vpop.f32.mrf.mxu1  ;;  %v8054_v22 = vunpack.c.l.b16 %v8005_v17  ;;  %v16540_v19 = vpack.c.b16 %v16538_v11, %v16539_v20 }
 0x4e5   : > { %v15768_v58 = vadd.f32 %v7106_v60, %v6830_v55  ;;  %v8002_v55 = vsel %vm12237_vm6, %v11481_v0, %v8001_v1  ;;  %v6833_v1 = vadd.f32 %v15618_v10, %v15495_v27  ;;  %v15805_v10 = vpop.f32.mrf.mxu3 }
 0x4e6   : > { %8213 = vmatmul.bf16.gmra.mxu3 %v8069_v37  ;;  %v8053_v60 = vunpack.c.l.b16 %v8002_v55  ;;  %v8539_v55 = vadd.f32 %v15655_v56, %v15524_v14  ;;  %v8540_v14 = vadd.f32 %v15684_v38, %v15551_v4 }
 0x4e7   : > { %16532 = vst [vmem:[#allocation32_spill] sm:$0xff] %v15768_v58 }
 0x4e8   : > { %9170 = vmatmul.bf16.gmra.mxu1 %v16535_v26  ;;  %v15787_v26 = vpop.f32.mrf.mxu0 }
 0x4e9   : > { %8528 = vmatmul.bf16.gmra.mxu0 %v11901_v35  ;;  %v8070_v35 = vpack.c.b16 %v8054_v22, %v8053_v60  ;;  %v8541_v60 = vadd.f32 %v15713_v42, %v15574_v43  ;;  %v15819_v43 = vld [vmem:[%s16235_s5] ss:$0 sm:$0xff] }
 0x4ea   : > { %v15826_v38 = vrot.slane %v15819_v43, 2  ;;  %v15829_v36 = vrot.slane %v15819_v43, 1 }
 0x4ec   : > { %v7108_v8 = vpop.f32.mrf.mxu1 }
 0x4ed   : > { %v15779_v37 = vadd.f32 %v7108_v8, %v6831_v44  ;;  %v15799_v8 = vpop.f32.mrf.mxu2 }
 0x4ef   : > { %16536 = vst [vmem:[#allocation65_spill] sm:$0xff] %v15779_v37 }
 0x4f4   : > { %v7111_v47 = vpop.f32.mrf.mxu1 }
 0x4f5   : > { %v15785_v59 = vadd.f32 %v7111_v47, %v6832_v63  ;;  %v16544_v47 = vpack.c.b16 %v15437_v25, %v15435_v46  ;;  %v8542_v46 = vadd.f32 %v15735_v40, %v15603_v62 }
 0x4f6   : > { %8218 = vmatmul.bf16.gmra.mxu3 %v8070_v35 }
 0x4f7   : > { %16537 = vst [vmem:[#allocation66_spill] sm:$0xff] %v15785_v59 }
 0x4f8   : > { %9175 = vmatmul.bf16.gmra.mxu1 %v16540_v19 }
 0x4f9   : > { %8533 = vmatmul.bf16.gmra.mxu0 %v11902_v23  ;;  %v15807_v23 = vpop.f32.mrf.mxu2 }
 0x4fc   : > { %v7113_v13 = vpop.f32.mrf.mxu1 }
 0x4fd   : > { %v15794_v44 = vadd.f32 %v7113_v13, %v6833_v1 }
 0x4ff   : > { %16541 = vst [vmem:[#allocation12_spill] sm:$0xff] %v15794_v44 }
 0x505   : > { %v9141_v0 = vpop.f32.mrf.mxu1 }
 0x506   : > { %v9221_v22 = vadd.f32 %v9141_v0, %v8539_v55 }
 0x508   : > { %9180 = vmatmul.bf16.gmra.mxu1 %v16543_v30  ;;  %v9647_v63 = vadd.f32 %v15642_v41, %v9221_v22  ;;  %v15821_v41 = vpop.f32.mrf.mxu0 }
 0x50d   : > { %v9143_v17 = vpop.f32.mrf.mxu1 }
 0x515   : > { %v9146_v35 = vpop.f32.mrf.mxu1 }
 0x516   : > { %v9223_v27 = vadd.f32 %v9146_v35, %v8541_v60 }
 0x518   : > { %v9649_v54 = vadd.f32 %v15709_v33, %v9223_v27  ;;  %9185 = vmatmul.bf16.gmra.mxu1 %v16544_v47  ;;  %v9222_v33 = vadd.f32 %v9143_v17, %v8540_v14  ;;  %v15831_v17 = vpop.f32.mrf.mxu3  ;;  %v15835_v27 = vpop.f32.mrf.mxu2  ;;  %v15838_v47 = vrot.slane %v15819_v43, 4 }
 0x51a   : > { %v9679_v11 = vadd.f32 %v9649_v54, %v9647_v63  ;;  %v9648_v62 = vadd.f32 %v15678_v50, %v9222_v33 }
 0x51c   : > { %v9711_v56 = vrot.slane %v9679_v11, 2  ;;  %v9712_v42 = vrot.slane %v9679_v11, 4  ;;  %v9713_v20 = vrot.slane %v9679_v11, 6  ;;  %v11690_v19 = vrot.slane %v9679_v11, 9 }
 0x51d   : > { %v9148_v25 = vpop.f32.mrf.mxu1 }
 0x51e   : > { %v11691_v1 = vrot.slane %v9711_v56, 9  ;;  %v11692_v13 = vrot.slane %v9712_v42, 9  ;;  %v11693_v0 = vrot.slane %v9713_v20, 9  ;;  %v9999_v4 = vadd.f32 %v11690_v19, %v9679_v11 }
 0x51f   : > { %v9224_v30 = vadd.f32 %v9148_v25, %v8542_v46  ;;  %v15841_v11 = vrot.slane %v15826_v38, 1 }
 0x520   : > { %v10000_v55 = vadd.f32 %v11691_v1, %v9711_v56  ;;  %v10001_v22 = vadd.f32 %v11692_v13, %v9712_v42  ;;  %v10002_v60 = vadd.f32 %v11693_v0, %v9713_v20  ;;  %v10063_v35 = vmul.f32 0.25, %v9999_v4  ;;  %v15852_v4 = vpop.f32.mrf.mxu0  ;;  %v15862_v58 = vpop.f32.mrf.mxu3 }
 0x521   : > { %v9650_v40 = vadd.f32 %v15727_v61, %v9224_v30  ;;  %v15847_v61 = vrot.slane %v15819_v43, 6  ;;  %v15850_v0 = vrot.slane %v15838_v47, 1 }
 0x522   : > { %v10064_v63 = vmul.f32 0.25, %v10000_v55  ;;  %v10065_v54 = vmul.f32 0.25, %v10001_v22  ;;  %v10145_v14 = vadd.f32 %v15819_v43, %v10063_v35  ;;  %v10066_v42 = vmul.f32 0.25, %v10002_v60 }
 0x523   : > { %v9680_v56 = vadd.f32 %v9650_v40, %v9648_v62 }
 0x524   : > { %v10146_v20 = vadd.f32 %v15829_v36, %v10064_v63  ;;  %v10147_v50 = vadd.f32 %v15826_v38, %v10065_v54  ;;  %v10273_v30 = vperm.slane %v10145_v14, 0  ;;  %v10148_v35 = vadd.f32 %v15841_v11, %v10066_v42 }
 0x525   : > { %v9714_v19 = vrot.slane %v9680_v56, 2  ;;  %v9715_v33 = vrot.slane %v9680_v56, 4  ;;  %v9716_v46 = vrot.slane %v9680_v56, 6  ;;  %v9151_v25 = vpop.f32.mrf.mxu1  ;;  %v11694_v13 = vrot.slane %v9680_v56, 9 }
 0x526   : > { %v10274_v1 = vperm.slane %v10146_v20, 0  ;;  %v10275_v62 = vperm.slane %v10147_v50, 0  ;;  %v15856_v63 = vrot.slane %v15847_v61, 1  ;;  %v16545_v54 = vpack.c.b16 %v15486_v18, %v15484_v45 }
 0x527   : > { %v11695_v55 = vrot.slane %v9714_v19, 9  ;;  %v11696_v22 = vrot.slane %v9715_v33, 9  ;;  %v11697_v60 = vrot.slane %v9716_v46, 9  ;;  %v10003_v40 = vadd.f32 %v11694_v13, %v9680_v56  ;;  %v15865_v13 = vpop.f32.mrf.mxu2 }
 0x528   : > { %9190 = vmatmul.bf16.gmra.mxu1 %v16545_v54  ;;  %v10338_v20 = vsel %vm10337_vm1, %v10274_v1, %v10273_v30  ;;  %v10276_v18 = vperm.slane %v10148_v35, 0 }
 0x529   : > { %v10004_v44 = vadd.f32 %v11695_v55, %v9714_v19  ;;  %v10005_v37 = vadd.f32 %v11696_v22, %v9715_v33  ;;  %v10006_v59 = vadd.f32 %v11697_v60, %v9716_v46  ;;  %v10067_v14 = vmul.f32 0.25, %v10003_v40  ;;  %v15876_v22 = vpop.f32.mrf.mxu0 }
 0x52a   : > { %v10340_v48 = vsel %vm10339_vm2, %v10275_v62, %v10338_v20  ;;  %v8543_v40 = vadd.f32 %v15750_v21, %v15628_v9  ;;  %v8545_v20 = vadd.f32 %v15777_v39, %v15680_v51  ;;  %v16546_v21 = vpack.c.b16 %v15543_v2, %v15541_v3 }
 0x52b   : > { %v10068_v42 = vmul.f32 0.25, %v10004_v44  ;;  %v10069_v50 = vmul.f32 0.25, %v10005_v37  ;;  %v10070_v56 = vmul.f32 0.25, %v10006_v59  ;;  %v10149_v45 = vadd.f32 %v15838_v47, %v10067_v14  ;;  %v15888_v14 = vpop.f32.mrf.mxu3 }
 0x52c   : > { %v10342_v59 = vsel %vm10341_vm3, %v10276_v18, %v10340_v48  ;;  %v9225_v48 = vadd.f32 %v9151_v25, %v8543_v40  ;;  %v8544_v51 = vadd.f32 %v15764_v16, %v15657_v49 }
 0x52d   : > { %v10150_v19 = vadd.f32 %v15850_v0, %v10068_v42  ;;  %v10151_v33 = vadd.f32 %v15847_v61, %v10069_v50  ;;  %v10152_v46 = vadd.f32 %v15856_v63, %v10070_v56  ;;  %v9153_v1 = vpop.f32.mrf.mxu1  ;;  %v10277_v37 = vperm.slane %v10149_v45, 0 }
 0x52e   : > { %v9651_v45 = vadd.f32 %v15743_v28, %v9225_v48  ;;  %v8546_v28 = vadd.f32 %v15787_v26, %v15707_v6 }
 0x52f   : > { %v10278_v44 = vperm.slane %v10150_v19, 0  ;;  %v10279_v30 = vperm.slane %v10151_v33, 0  ;;  %v10344_v55 = vsel %vm10343_vm4, %v10277_v37, %v10342_v59  ;;  %v10280_v60 = vperm.slane %v10152_v46, 0  ;;  %v15890_v50 = vpop.f32.mrf.mxu2 }
 0x530   : > { %v9226_v37 = vadd.f32 %v9153_v1, %v8544_v51 }
 0x531   : > { %v10346_v35 = vsel %vm10345_vm5, %v10278_v44, %v10344_v55  ;;  %v15897_v19 = vpop.f32.mrf.mxu0 }
 0x532   : > { %v10348_v62 = vsel %vm10347_vm8, %v10279_v30, %v10346_v35  ;;  %v9652_v40 = vadd.f32 %v15762_v31, %v9226_v37 }
 0x533   : > { %v10350_v54 = vsel %vm10349_vm9, %v10280_v60, %v10348_v62  ;;  %v15903_v2 = vpop.f32.mrf.mxu3 }
 0x534   : > { %10408 = vst [vmem:[%s15883_s28] sm:$0xff] %v10350_v54 }
 0x535   : > { %v9156_v42 = vpop.f32.mrf.mxu1 }
 0x536   : > { %v9227_v56 = vadd.f32 %v9156_v42, %v8545_v20 }
 0x537   : > { %v15905_v60 = vpop.f32.mrf.mxu2 }
 0x538   : > { %v9653_v9 = vadd.f32 %v15799_v8, %v9227_v56  ;;  %9195 = vmatmul.bf16.gmra.mxu1 %v16546_v21 }
 0x53a   : > { %v9681_v18 = vadd.f32 %v9653_v9, %v9651_v45  ;;  %v15912_v45 = vpop.f32.mrf.mxu0 }
 0x53c   : > { %v9717_v39 = vrot.slane %v9681_v18, 2  ;;  %v9718_v25 = vrot.slane %v9681_v18, 4  ;;  %v9719_v33 = vrot.slane %v9681_v18, 6  ;;  %v11698_v46 = vrot.slane %v9681_v18, 9 }
 0x53d   : > { %v9158_v59 = vpop.f32.mrf.mxu1 }
 0x53e   : > { %v11699_v8 = vrot.slane %v9717_v39, 9  ;;  %v11700_v44 = vrot.slane %v9718_v25, 9  ;;  %v11701_v30 = vrot.slane %v9719_v33, 9  ;;  %v10007_v3 = vadd.f32 %v11698_v46, %v9681_v18 }
 0x53f   : > { %v9228_v55 = vadd.f32 %v9158_v59, %v8546_v28 }
 0x540   : > { %v10008_v35 = vadd.f32 %v11699_v8, %v9717_v39  ;;  %v10009_v49 = vadd.f32 %v11700_v44, %v9718_v25  ;;  %v10010_v16 = vadd.f32 %v11701_v30, %v9719_v33  ;;  %v10071_v62 = vmul.f32 0.25, %v10007_v3  ;;  %v15918_v44 = vpop.f32.mrf.mxu3 }
 0x541   : > { %v9654_v1 = vadd.f32 %v15807_v23, %v9228_v55  ;;  %v16547_v8 = vpack.c.b16 %v15596_v53, %v15594_v29 }
 0x542   : > { %v10072_v54 = vmul.f32 0.25, %v10008_v35  ;;  %v10073_v6 = vmul.f32 0.25, %v10009_v49  ;;  %v10153_v26 = vadd.f32 %v15819_v43, %v10071_v62  ;;  %v10074_v20 = vmul.f32 0.25, %v10010_v16  ;;  %v15921_v49 = vpop.f32.mrf.mxu2 }
 0x543   : > { %v9682_v48 = vadd.f32 %v9654_v1, %v9652_v40 }
 0x544   : > { %v10154_v42 = vadd.f32 %v15829_v36, %v10072_v54  ;;  %v10155_v56 = vadd.f32 %v15826_v38, %v10073_v6  ;;  %v10281_v25 = vperm.slane %v10153_v26, 0  ;;  %v10156_v37 = vadd.f32 %v15841_v11, %v10074_v20  ;;  %v16548_v54 = vld [vmem:[#allocation15_spill] sm:$0xff]  ;;  %v16549_v6 = vld [vmem:[#allocation48_spill] sm:$0xff] }
 0x545   : > { %v9720_v9 = vrot.slane %v9682_v48, 2  ;;  %v9721_v21 = vrot.slane %v9682_v48, 4  ;;  %v9722_v18 = vrot.slane %v9682_v48, 6  ;;  %v9161_v51 = vpop.f32.mrf.mxu1  ;;  %v11702_v31 = vrot.slane %v9682_v48, 9 }
 0x546   : > { %v10282_v39 = vperm.slane %v10154_v42, 0  ;;  %v10283_v28 = vperm.slane %v10155_v56, 0  ;;  %v7806_v26 = vadd.f32 %v16549_v6, %v16548_v54  ;;  %v10284_v53 = vperm.slane %v10156_v37, 0 }
 0x547   : > { %v11703_v23 = vrot.slane %v9720_v9, 9  ;;  %v11704_v33 = vrot.slane %v9721_v21, 9  ;;  %v11705_v46 = vrot.slane %v9722_v18, 9  ;;  %v10011_v59 = vadd.f32 %v11702_v31, %v9682_v48 }
 0x548   : > { %9200 = vmatmul.bf16.gmra.mxu1 %v16547_v8  ;;  %v10351_v30 = vsel %vm10337_vm1, %v10282_v39, %v10281_v25  ;;  %v16551_v39 = vld [vmem:[#allocation54_spill] sm:$0xff] }
 0x549   : > { %v10012_v3 = vadd.f32 %v11703_v23, %v9720_v9  ;;  %v10013_v55 = vadd.f32 %v11704_v33, %v9721_v21  ;;  %v10014_v35 = vadd.f32 %v11705_v46, %v9722_v18  ;;  %v10075_v16 = vmul.f32 0.25, %v10011_v59  ;;  %v16550_v18 = vld [vmem:[#allocation52_spill] sm:$0xff]  ;;  %v15933_v23 = vpop.f32.mrf.mxu0 }
 0x54a   : > { %v10352_v48 = vsel %vm10339_vm2, %v10283_v28, %v10351_v30  ;;  %v8232_v21 = vadd.f32 %v15805_v10, %v7806_v26  ;;  %v7808_v31 = vadd.f32 %v16551_v39, %v16550_v18 }
 0x54b   : > { %v10076_v62 = vmul.f32 0.25, %v10012_v3  ;;  %v10077_v40 = vmul.f32 0.25, %v10013_v55  ;;  %v10078_v1 = vmul.f32 0.25, %v10014_v35  ;;  %v10157_v29 = vadd.f32 %v15838_v47, %v10075_v16  ;;  %v15941_v55 = vpop.f32.mrf.mxu3  ;;  %v15944_v16 = vpop.f32.mrf.mxu2 }
 0x54c   : > { %v10353_v33 = vsel %vm10341_vm3, %v10284_v53, %v10352_v48  ;;  %v8234_v28 = vadd.f32 %v15862_v58, %v7808_v31  ;;  %v8547_v3 = vadd.f32 %v15821_v41, %v8232_v21  ;;  %v16552_v58 = vld [vmem:[#allocation16_spill] sm:$0xff]  ;;  %v16555_v53 = vld [vmem:[#allocation59_spill] sm:$0xff]  ;;  %v16557_v21 = vld [vmem:[#allocation34_spill] sm:$0xff] }
 0x54d   : > { %v10158_v20 = vadd.f32 %v15850_v0, %v10076_v62  ;;  %v10159_v42 = vadd.f32 %v15847_v61, %v10077_v40  ;;  %v10160_v56 = vadd.f32 %v15856_v63, %v10078_v1  ;;  %v9163_v9 = vpop.f32.mrf.mxu1  ;;  %v10285_v25 = vperm.slane %v10157_v29, 0  ;;  %v16553_v1 = vld [vmem:[#allocation51_spill] sm:$0xff]  ;;  %v16554_v29 = vld [vmem:[#allocation56_spill] sm:$0xff] }
 0x54e   : > { %v9229_v62 = vadd.f32 %v9161_v51, %v8547_v3  ;;  %v8549_v40 = vadd.f32 %v15876_v22, %v8234_v28  ;;  %v7807_v54 = vadd.f32 %v16553_v1, %v16552_v58  ;;  %v7809_v41 = vadd.f32 %v16555_v53, %v16554_v29  ;;  %v9268_v29 = vld [vmem:[#allocation2 + $0xcc] sm:$0xe] }
 0x54f   : > { %v10286_v46 = vperm.slane %v10158_v20, 0  ;;  %v10287_v37 = vperm.slane %v10159_v42, 0  ;;  %v10354_v59 = vsel %vm10343_vm4, %v10285_v25, %v10353_v33  ;;  %v10288_v8 = vperm.slane %v10160_v56, 0  ;;  %v16556_v56 = vld [vmem:[#allocation40_spill] sm:$0xff] }
 0x550   : > { %v8233_v48 = vadd.f32 %v15831_v17, %v7807_v54  ;;  %v9655_v20 = vadd.f32 %v15835_v27, %v9229_v62  ;;  %v16558_v18 = vpack.c.b16 %v16556_v56, %v16557_v21  ;;  %v8235_v22 = vadd.f32 %v15888_v14, %v7809_v41 }
 0x551   : > { %v10355_v30 = vsel %vm10345_vm5, %v10286_v46, %v10354_v59  ;;  %v15959_v51 = vpop.f32.mrf.mxu0 }
 0x552   : > { %v10356_v10 = vsel %vm10347_vm8, %v10287_v37, %v10355_v30  ;;  %v8548_v31 = vadd.f32 %v15852_v4, %v8233_v48 }
 0x553   : > { %v10357_v35 = vsel %vm10349_vm9, %v10288_v8, %v10356_v10  ;;  %v15962_v37 = vpop.f32.mrf.mxu3  ;;  %v15965_v59 = vpop.f32.mrf.mxu2 }
 0x554   : > { %10409 = vst [vmem:[%s15883_s28 + $0x8] sm:$0xff] %v10357_v35  ;;  %v9230_v27 = vadd.f32 %v9163_v9, %v8548_v31 }
 0x555   : > { %v9166_v6 = vpop.f32.mrf.mxu1 }
 0x556   : > { %v9231_v26 = vadd.f32 %v9166_v6, %v8549_v40  ;;  %v9656_v58 = vadd.f32 %v15865_v13, %v9230_v27  ;;  %v15969_v6 = vld [vmem:[#allocation2 + $0xd0] sm:$0xf] }
 0x558   : > { %v9657_v42 = vadd.f32 %v15890_v50, %v9231_v26  ;;  %9205 = vmatmul.bf16.gmra.mxu1 %v16558_v18  ;;  %v8550_v50 = vadd.f32 %v15897_v19, %v8235_v22  ;;  %v9424_v18 = vrot.slane %v15969_v6, 5 }
 0x559   : > { %v15971_v19 = vpop.f32.mrf.mxu0 }
 0x55a   : > { %v9683_v39 = vadd.f32 %v9657_v42, %v9655_v20  ;;  %v11657_v42 = vrot.slane %v9268_v29, 9  ;;  %v16563_v29 = vld [vmem:[#allocation64_spill] sm:$0xff] }
 0x55b   : > { %v15981_v27 = vpop.f32.mrf.mxu3 }
 0x55c   : > { %v9723_v25 = vrot.slane %v9683_v39, 2  ;;  %v9724_v17 = vrot.slane %v9683_v39, 4  ;;  %v9725_v33 = vrot.slane %v9683_v39, 6  ;;  %v11706_v46 = vrot.slane %v9683_v39, 9 }
 0x55d   : > { %v9168_v28 = vpop.f32.mrf.mxu1 }
 0x55e   : > { %v11707_v8 = vrot.slane %v9723_v25, 9  ;;  %v11708_v30 = vrot.slane %v9724_v17, 9  ;;  %v11709_v14 = vrot.slane %v9725_v33, 9  ;;  %v10015_v10 = vadd.f32 %v11706_v46, %v9683_v39 }
 0x55f   : > { %v9232_v3 = vadd.f32 %v9168_v28, %v8550_v50 }
 0x560   : > { %v10016_v35 = vadd.f32 %v11707_v8, %v9723_v25  ;;  %v10017_v62 = vadd.f32 %v11708_v30, %v9724_v17  ;;  %v10018_v4 = vadd.f32 %v11709_v14, %v9725_v33  ;;  %v10079_v40 = vmul.f32 0.25, %v10015_v10  ;;  %v16559_v17 = vld [vmem:[#allocation57_spill] sm:$0xff]  ;;  %v16560_v33 = vld [vmem:[#allocation60_spill] sm:$0xff]  ;;  %v15983_v30 = vpop.f32.mrf.mxu2 }
 0x561   : > { %v9658_v1 = vadd.f32 %v15905_v60, %v9232_v3  ;;  %v7810_v46 = vadd.f32 %v16560_v33, %v16559_v17 }
 0x562   : > { %v10080_v54 = vmul.f32 0.25, %v10016_v35  ;;  %v10081_v9 = vmul.f32 0.25, %v10017_v62  ;;  %v10161_v26 = vadd.f32 %v15819_v43, %v10079_v40  ;;  %v10082_v53 = vmul.f32 0.25, %v10018_v4  ;;  %v8618_v62 = vld [vmem:[#allocation2 + $0xd4] sm:$0x1] }
 0x563   : > { %v9684_v48 = vadd.f32 %v9658_v1, %v9656_v58  ;;  %v16561_v35 = vpack.c.b16 %v15700_v24, %v15698_v12  ;;  %v9425_v4 = vsel %vm12237_vm6, %v11657_v42, %v9424_v18  ;;  %v16008_v5 = vpop.f32.mrf.mxu3 }
 0x564   : > { %v10162_v41 = vadd.f32 %v15829_v36, %v10080_v54  ;;  %v10163_v20 = vadd.f32 %v15826_v38, %v10081_v9  ;;  %v10289_v22 = vperm.slane %v10161_v26, 0  ;;  %v10164_v14 = vadd.f32 %v15841_v11, %v10082_v53  ;;  %v16562_v26 = vld [vmem:[#allocation29_spill] sm:$0xff] }
 0x565   : > { %v9726_v56 = vrot.slane %v9684_v48, 2  ;;  %v9727_v13 = vrot.slane %v9684_v48, 4  ;;  %v9728_v21 = vrot.slane %v9684_v48, 6  ;;  %v15976_v60 = vpop.f32.mrf.mxu1  ;;  %v11710_v25 = vrot.slane %v9684_v48, 9 }
 0x566   : > { %v10290_v39 = vperm.slane %v10162_v41, 0  ;;  %v10291_v31 = vperm.slane %v10163_v20, 0  ;;  %v9426_v54 = vrot.slane %v9424_v18, 4  ;;  %v8236_v9 = vadd.f32 %v15903_v2, %v7810_v46  ;;  %v8616_v20 = vld [vmem:[#allocation2 + $0xcc] sm:$0xf] }
 0x567   : > { %v11711_v50 = vrot.slane %v9726_v56, 9  ;;  %v11712_v28 = vrot.slane %v9727_v13, 9  ;;  %v11713_v8 = vrot.slane %v9728_v21, 9  ;;  %v10019_v3 = vadd.f32 %v11710_v25, %v9684_v48 }
 0x568   : > { %v10358_v10 = vsel %vm10337_vm1, %v10290_v39, %v10289_v22  ;;  %9210 = vmatmul.bf16.gmra.mxu1 %v16561_v35  ;;  %v7812_v53 = vadd.f32 %v16563_v29, %v16562_v26  ;;  %v9427_v39 = vrot.slane %v8618_v62, 5  ;;  %v10292_v25 = vperm.slane %v10164_v14, 0 }
 0x569   : > { %v10020_v40 = vadd.f32 %v11711_v50, %v9726_v56  ;;  %v10021_v58 = vadd.f32 %v11712_v28, %v9727_v13  ;;  %v10022_v1 = vadd.f32 %v11713_v8, %v9728_v21  ;;  %v10359_v41 = vsel %vm10339_vm2, %v10291_v31, %v10358_v10  ;;  %v15997_v21 = vpop.f32.mrf.mxu0 }
 0x56a   : > { %v10083_v48 = vmul.f32 0.25, %v10019_v3  ;;  %v9476_v56 = vunpack.c.l.b16 %v9425_v4  ;;  %v8980_v13 = vshrl.u32 %v8616_v20, 16  ;;  %v9428_v31 = vsel %vm12237_vm6, %v9426_v54, %v9427_v39 }
 0x56b   : > { %v10084_v22 = vmul.f32 0.25, %v10020_v40  ;;  %v10085_v12 = vmul.f32 0.25, %v10021_v58  ;;  %v10086_v24 = vmul.f32 0.25, %v10022_v1  ;;  %v8238_v46 = vadd.f32 %v15941_v55, %v7812_v53  ;;  %v16012_v53 = vpop.f32.mrf.mxu2 }
 0x56c   : > { %v10165_v42 = vadd.f32 %v15838_v47, %v10083_v48  ;;  %v10360_v50 = vsel %vm10341_vm3, %v10292_v25, %v10359_v41  ;;  %v9477_v8 = vunpack.c.l.b16 %v9428_v31  ;;  %v8982_v3 = vrot.slane %v8980_v13, 4 }
 0x56d   : > { %v10166_v2 = vadd.f32 %v15850_v0, %v10084_v22  ;;  %v10167_v18 = vadd.f32 %v15847_v61, %v10085_v12  ;;  %v10168_v17 = vadd.f32 %v15856_v63, %v10086_v24  ;;  %v9173_v33 = vpop.f32.mrf.mxu1  ;;  %v8983_v35 = vshll.u32 %v8616_v20, 16 }
 0x56e   : > { %v10293_v28 = vperm.slane %v10165_v42, 0  ;;  %v9493_v58 = vpack.c.b16 %v9477_v8, %v9476_v56  ;;  %v8989_v1 = vshll.u32 %v15969_v6, 16  ;;  %v8993_v26 = vshrl.u32 %v15969_v6, 16  ;;  %v16564_v42 = vld [vmem:[#allocation21_spill] sm:$0xff] }
 0x56f   : > { %v10294_v14 = vperm.slane %v10166_v2, 0  ;;  %v10295_v10 = vperm.slane %v10167_v18, 0  ;;  %v10296_v4 = vperm.slane %v10168_v17, 0  ;;  %v8985_v55 = vrot.slane %v8983_v35, 5  ;;  %v16565_v6 = vld [vmem:[#allocation61_spill] sm:$0xff] }
 0x570   : > { %v10361_v40 = vsel %vm10343_vm4, %v10293_v28, %v10360_v50  ;;  %v8999_v29 = vshll.u32 %v8618_v62, 16  ;;  %v8551_v48 = vadd.f32 %v15912_v45, %v8236_v9  ;;  %9641 = vmatmul.bf16.gmra.mxu2 %v9493_v58  ;;  %v8991_v20 = vrot.slane %v8989_v1, 5  ;;  %v16566_v17 = vld [vmem:[#allocation73_spill] sm:$0xff]  ;;  %v16567_v45 = vld [vmem:[#allocation67_spill] sm:$0xff] }
 0x571   : > { %v10362_v54 = vsel %vm10345_vm5, %v10294_v14, %v10361_v40  ;;  %v8986_v12 = vor.u32 %v8985_v55, %v8982_v3  ;;  %v8995_v24 = vrot.slane %v8993_v26, 4  ;;  %v8553_v25 = vadd.f32 %v15959_v51, %v8238_v46  ;;  %v16025_v28 = vpop.f32.mrf.mxu0  ;;  %v16034_v40 = vpop.f32.mrf.mxu3 }
 0x572   : > { %v10363_v41 = vsel %vm10347_vm8, %v10295_v10, %v10362_v54  ;;  %v9233_v39 = vadd.f32 %v15976_v60, %v8551_v48  ;;  %v7811_v62 = vadd.f32 %v16565_v6, %v16564_v42  ;;  %v9001_v18 = vrot.slane %v8999_v29, 5 }
 0x573   : > { %v10364_v22 = vsel %vm10349_vm9, %v10296_v4, %v10363_v41  ;;  %v8987_v13 = vrot.slane %v8986_v12, 4  ;;  %v8996_v2 = vor.u32 %v8995_v24, %v8991_v20  ;;  %v7813_v9 = vadd.f32 %v16567_v45, %v16566_v17  ;;  %v16037_v58 = vpop.f32.mrf.mxu2 }
 0x574   : > { %10410 = vst [vmem:[%s15883_s28 + $0x10] sm:$0xff] %v10364_v22  ;;  %v8237_v50 = vadd.f32 %v15918_v44, %v7811_v62  ;;  %v9659_v46 = vadd.f32 %v15921_v49, %v9233_v39 }
 0x575   : > { %v9176_v56 = vpop.f32.mrf.mxu1  ;;  %v8992_v60 = vsel %vm12265_vm7, %v8987_v13, %v8991_v20  ;;  %v8997_v8 = vrot.slane %v8996_v2, 4  ;;  %v8239_v51 = vadd.f32 %v15962_v37, %v7813_v9 }
 0x576   : > { %v9235_v31 = vadd.f32 %v9176_v56, %v8553_v25  ;;  %v9050_v3 = vunpack.c.l.b16 %v8992_v60  ;;  %v8552_v44 = vadd.f32 %v15933_v23, %v8237_v50 }
 0x577   : > { %v9002_v10 = vsel %vm12265_vm7, %v8997_v8, %v9001_v18  ;;  %v8554_v37 = vadd.f32 %v15971_v19, %v8239_v51 }
 0x578   : > { %v9661_v14 = vadd.f32 %v15965_v59, %v9235_v31  ;;  %v9051_v4 = vunpack.c.l.b16 %v9002_v10  ;;  %v9234_v49 = vadd.f32 %v9173_v33, %v8552_v44 }
 0x579   : > { %v8504_v25 = vpop.f32.mrf.mxu0  ;;  %v8191_v17 = vpop.f32.mrf.mxu3 }
 0x57a   : > { %v9685_v35 = vadd.f32 %v9661_v14, %v9659_v46  ;;  %v9067_v59 = vpack.c.b16 %v9051_v4, %v9050_v3  ;;  %v9660_v42 = vadd.f32 %v15944_v16, %v9234_v49 }
 0x57c   : > { %v9729_v1 = vrot.slane %v9685_v35, 2  ;;  %v9730_v54 = vrot.slane %v9685_v35, 4  ;;  %v9731_v55 = vrot.slane %v9685_v35, 6  ;;  %v11714_v26 = vrot.slane %v9685_v35, 9  ;;  %9215 = vmatmul.bf16.gmra.mxu1 %v9067_v59 }
 0x57d   : > { %v9178_v29 = vpop.f32.mrf.mxu1 }
 0x57e   : > { %v11715_v34 = vrot.slane %v9729_v1, 9  ;;  %v11716_v41 = vrot.slane %v9730_v54, 9  ;;  %v11717_v48 = vrot.slane %v9731_v55, 9  ;;  %v9236_v20 = vadd.f32 %v9178_v29, %v8554_v37  ;;  %v16568_v29 = vld [vmem:[#allocation27_spill] sm:$0xff] }
 0x57f   : > { %v10023_v22 = vadd.f32 %v11714_v26, %v9685_v35 }
 0x580   : > { %v10024_v12 = vadd.f32 %v11715_v34, %v9729_v1  ;;  %v10025_v24 = vadd.f32 %v11716_v41, %v9730_v54  ;;  %v10026_v23 = vadd.f32 %v11717_v48, %v9731_v55  ;;  %v9662_v39 = vadd.f32 %v15983_v30, %v9236_v20  ;;  %v9612_v30 = vpop.f32.mrf.mxu2  ;;  %v16569_v34 = vld [vmem:[#allocation68_spill] sm:$0xff] }
 0x581   : > { %v10087_v6 = vmul.f32 0.25, %v10023_v22  ;;  %v8506_v37 = vpop.f32.mrf.mxu0  ;;  %v7814_v41 = vadd.f32 %v16569_v34, %v16568_v29 }
 0x582   : > { %v10088_v19 = vmul.f32 0.25, %v10024_v12  ;;  %v10089_v33 = vmul.f32 0.25, %v10025_v24  ;;  %v9686_v56 = vadd.f32 %v9662_v39, %v9660_v42  ;;  %v10090_v13 = vmul.f32 0.25, %v10026_v23 }
 0x583   : > { %v10169_v62 = vadd.f32 %v15819_v43, %v10087_v6  ;;  %v8240_v42 = vadd.f32 %v15981_v27, %v7814_v41  ;;  %v16570_v6 = vld [vmem:[#allocation24_spill] sm:$0xff] }
 0x584   : > { %v10170_v2 = vadd.f32 %v15829_v36, %v10088_v19  ;;  %v10171_v18 = vadd.f32 %v15826_v38, %v10089_v33  ;;  %v9732_v45 = vrot.slane %v9686_v56, 2  ;;  %v9733_v9 = vrot.slane %v9686_v56, 4  ;;  %v16571_v19 = vld [vmem:[#allocation11_spill] sm:$0xff] }
 0x585   : > { %v9734_v31 = vrot.slane %v9686_v56, 6  ;;  %v9181_v50 = vpop.f32.mrf.mxu1  ;;  %v11718_v8 = vrot.slane %v9686_v56, 9  ;;  %v10297_v16 = vperm.slane %v10169_v62, 0  ;;  %v10172_v10 = vadd.f32 %v15841_v11, %v10090_v13 }
 0x586   : > { %v10298_v60 = vperm.slane %v10170_v2, 0  ;;  %v11719_v51 = vrot.slane %v9732_v45, 9  ;;  %v11720_v46 = vrot.slane %v9733_v9, 9  ;;  %v10299_v3 = vperm.slane %v10171_v18, 0 }
 0x587   : > { %v11721_v14 = vrot.slane %v9734_v31, 9  ;;  %v10027_v35 = vadd.f32 %v11718_v8, %v9686_v56  ;;  %v10300_v22 = vperm.slane %v10172_v10, 0  ;;  %v7816_v33 = vadd.f32 %v16571_v19, %v16570_v6  ;;  %v16057_v56 = vpop.f32.mrf.mxu3  ;;  %v16572_v10 = vld [vmem:[#allocation42_spill] sm:$0xff] }
 0x588   : > { %v10365_v4 = vsel %vm10337_vm1, %v10298_v60, %v10297_v16  ;;  %v10028_v44 = vadd.f32 %v11719_v51, %v9732_v45  ;;  %v10029_v1 = vadd.f32 %v11720_v46, %v9733_v9  ;;  %v9614_v9 = vpop.f32.mrf.mxu2  ;;  %v8555_v16 = vadd.f32 %v15997_v21, %v8240_v42 }
 0x589   : > { %v10030_v54 = vadd.f32 %v11721_v14, %v9734_v31  ;;  %v10091_v55 = vmul.f32 0.25, %v10027_v35  ;;  %v10366_v48 = vsel %vm10339_vm2, %v10299_v3, %v10365_v4  ;;  %v8242_v45 = vadd.f32 %v16034_v40, %v7816_v33  ;;  %v16573_v3 = vld [vmem:[#allocation44_spill] sm:$0xff]  ;;  %v16069_v4 = vpop.f32.mrf.mxu0 }
 0x58a   : > { %v10092_v49 = vmul.f32 0.25, %v10028_v44  ;;  %v10093_v26 = vmul.f32 0.25, %v10029_v1  ;;  %v10367_v13 = vsel %vm10341_vm3, %v10300_v22, %v10366_v48  ;;  %v9237_v46 = vadd.f32 %v9181_v50, %v8555_v16 }
 0x58b   : > { %v10094_v59 = vmul.f32 0.25, %v10030_v54  ;;  %v10173_v20 = vadd.f32 %v15838_v47, %v10091_v55  ;;  %v8557_v14 = vadd.f32 %v8504_v25, %v8242_v45  ;;  %v7815_v35 = vadd.f32 %v16573_v3, %v16572_v10  ;;  %v16574_v54 = vld [vmem:[#allocation28_spill] sm:$0xff]  ;;  %v16575_v55 = vld [vmem:[#allocation9_spill] sm:$0xff] }
 0x58c   : > { %v10174_v12 = vadd.f32 %v15850_v0, %v10092_v49  ;;  %v10175_v24 = vadd.f32 %v15847_v61, %v10093_v26  ;;  %v7817_v49 = vadd.f32 %v16575_v55, %v16574_v54  ;;  %v9663_v26 = vadd.f32 %v16012_v53, %v9237_v46 }
 0x58d   : > { %v10176_v23 = vadd.f32 %v15856_v63, %v10094_v59  ;;  %v9183_v39 = vpop.f32.mrf.mxu1  ;;  %v10301_v62 = vperm.slane %v10173_v20, 0  ;;  %v8241_v1 = vadd.f32 %v16008_v5, %v7815_v35 }
 0x58e   : > { %v10302_v2 = vperm.slane %v10174_v12, 0  ;;  %v10303_v18 = vperm.slane %v10175_v24, 0  ;;  %v8243_v59 = vadd.f32 %v8191_v17, %v7817_v49 }
 0x58f   : > { %v10368_v31 = vsel %vm10343_vm4, %v10301_v62, %v10367_v13  ;;  %v10304_v60 = vperm.slane %v10176_v23, 0  ;;  %v16075_v29 = vpop.f32.mrf.mxu3  ;;  %v8556_v34 = vadd.f32 %v16025_v28, %v8241_v1 }
 0x590   : > { %v10369_v8 = vsel %vm10345_vm5, %v10302_v2, %v10368_v31  ;;  %v16077_v50 = vpop.f32.mrf.mxu2  ;;  %v8558_v5 = vadd.f32 %v8506_v37, %v8243_v59 }
 0x591   : > { %v10370_v27 = vsel %vm10347_vm8, %v10303_v18, %v10369_v8  ;;  %v9238_v12 = vadd.f32 %v9183_v39, %v8556_v34 }
 0x592   : > { %v10371_v51 = vsel %vm10349_vm9, %v10304_v60, %v10370_v27 }
 0x593   : > { %10411 = vst [vmem:[%s15883_s28 + $0x18] sm:$0xff] %v10371_v51  ;;  %v9664_v28 = vadd.f32 %v16037_v58, %v9238_v12 }
 0x595   : > { %v9186_v40 = vpop.f32.mrf.mxu1 }
 0x596   : > { %v9239_v44 = vadd.f32 %v9186_v40, %v8557_v14 }
 0x597   : > { %v8199_v37 = vpop.f32.mrf.mxu3 }
 0x598   : > { %v9665_v21 = vadd.f32 %v9612_v30, %v9239_v44  ;;  %v16080_v30 = vpop.f32.mrf.mxu0  ;;  %v16084_v60 = vpop.f32.mrf.mxu2 }
 0x59a   : > { %v9687_v25 = vadd.f32 %v9665_v21, %v9663_v26 }
 0x59c   : > { %v9735_v41 = vrot.slane %v9687_v25, 2  ;;  %v9736_v48 = vrot.slane %v9687_v25, 4  ;;  %v9737_v20 = vrot.slane %v9687_v25, 6  ;;  %v11722_v22 = vrot.slane %v9687_v25, 9 }
 0x59d   : > { %v9188_v24 = vpop.f32.mrf.mxu1 }
 0x59e   : > { %v11723_v23 = vrot.slane %v9735_v41, 9  ;;  %v11724_v42 = vrot.slane %v9736_v48, 9  ;;  %v11725_v6 = vrot.slane %v9737_v20, 9  ;;  %v10031_v53 = vadd.f32 %v11722_v22, %v9687_v25  ;;  %v16577_v22 = vld [vmem:[#allocation14_spill] sm:$0xff] }
 0x59f   : > { %v9240_v17 = vadd.f32 %v9188_v24, %v8558_v5 }
 0x5a0   : > { %v10032_v19 = vadd.f32 %v11723_v23, %v9735_v41  ;;  %v10033_v33 = vadd.f32 %v11724_v42, %v9736_v48  ;;  %v10034_v62 = vadd.f32 %v11725_v6, %v9737_v20  ;;  %v10095_v13 = vmul.f32 0.25, %v10031_v53  ;;  %v8514_v55 = vpop.f32.mrf.mxu0  ;;  %v16576_v20 = vld [vmem:[#allocation30_spill] sm:$0xff]  ;;  %v8201_v23 = vpop.f32.mrf.mxu3 }
 0x5a1   : > { %v9666_v2 = vadd.f32 %v9614_v9, %v9240_v17  ;;  %v7818_v12 = vadd.f32 %v16577_v22, %v16576_v20 }
 0x5a2   : > { %v10096_v18 = vmul.f32 0.25, %v10032_v19  ;;  %v10097_v45 = vmul.f32 0.25, %v10033_v33  ;;  %v10177_v39 = vadd.f32 %v15819_v43, %v10095_v13  ;;  %v10098_v8 = vmul.f32 0.25, %v10034_v62  ;;  %v9622_v62 = vpop.f32.mrf.mxu2  ;;  %v16578_v13 = vld [vmem:[#allocation47_spill] sm:$0xff] }
 0x5a3   : > { %v9688_v31 = vadd.f32 %v9666_v2, %v9664_v28  ;;  %v8244_v33 = vadd.f32 %v16057_v56, %v7818_v12  ;;  %v7820_v28 = vadd.f32 %v16578_v13, %v15668_v32 }
 0x5a4   : > { %v10178_v27 = vadd.f32 %v15829_v36, %v10096_v18  ;;  %v10179_v16 = vadd.f32 %v15826_v38, %v10097_v45  ;;  %v10305_v58 = vperm.slane %v10177_v39, 0  ;;  %v10180_v1 = vadd.f32 %v15841_v11, %v10098_v8 }
 0x5a5   : > { %v9738_v51 = vrot.slane %v9688_v31, 2  ;;  %v9739_v46 = vrot.slane %v9688_v31, 4  ;;  %v9740_v14 = vrot.slane %v9688_v31, 6  ;;  %v11726_v10 = vrot.slane %v9688_v31, 9  ;;  %v9191_v3 = vpop.f32.mrf.mxu1 }
 0x5a6   : > { %v10306_v9 = vperm.slane %v10178_v27, 0  ;;  %v10307_v54 = vperm.slane %v10179_v16, 0  ;;  %v10308_v42 = vperm.slane %v10180_v1, 0 }
 0x5a7   : > { %v11727_v35 = vrot.slane %v9738_v51, 9  ;;  %v11728_v40 = vrot.slane %v9739_v46, 9  ;;  %v11729_v44 = vrot.slane %v9740_v14, 9  ;;  %v10035_v43 = vadd.f32 %v11726_v10, %v9688_v31 }
 0x5a8   : > { %v10372_v49 = vsel %vm10337_vm1, %v10306_v9, %v10305_v58  ;;  %v8246_v31 = vadd.f32 %v8199_v37, %v7820_v28  ;;  %v8516_v56 = vpop.f32.mrf.mxu0  ;;  %v16579_v58 = vld [vmem:[#allocation63_spill] sm:$0xff]  ;;  %v16580_v9 = vld [vmem:[#allocation41_spill] sm:$0xff]  ;;  %v16126_v28 = vld [vmem:[%s16235_s5] ss:$0 sm:$0xff] }
 0x5a9   : > { %v10036_v26 = vadd.f32 %v11727_v35, %v9738_v51  ;;  %v10037_v21 = vadd.f32 %v11728_v40, %v9739_v46  ;;  %v10038_v59 = vadd.f32 %v11729_v44, %v9740_v14  ;;  %v10099_v25 = vmul.f32 0.25, %v10035_v43  ;;  %v16581_v43 = vld [vmem:[#allocation53_spill] sm:$0xff] }
 0x5aa   : > { %v10373_v5 = vsel %vm10339_vm2, %v10307_v54, %v10372_v49  ;;  %v8559_v46 = vadd.f32 %v16069_v4, %v8244_v33  ;;  %v8561_v10 = vadd.f32 %v8514_v55, %v8246_v31  ;;  %v7819_v35 = vadd.f32 %v16580_v9, %v16579_v58  ;;  %v16112_v54 = vpop.f32.mrf.mxu3  ;;  %v9624_v49 = vpop.f32.mrf.mxu2 }
 0x5ab   : > { %v10100_v34 = vmul.f32 0.25, %v10036_v26  ;;  %v10101_v41 = vmul.f32 0.25, %v10037_v21  ;;  %v10102_v48 = vmul.f32 0.25, %v10038_v59  ;;  %v10181_v24 = vadd.f32 %v15838_v47, %v10099_v25 }
 0x5ac   : > { %v10374_v18 = vsel %vm10341_vm3, %v10308_v42, %v10373_v5  ;;  %v9241_v32 = vadd.f32 %v9191_v3, %v8559_v46  ;;  %v8245_v44 = vadd.f32 %v16075_v29, %v7819_v35  ;;  %v7821_v1 = vadd.f32 %v16581_v43, %v15692_v7 }
 0x5ad   : > { %v10182_v6 = vadd.f32 %v15850_v0, %v10100_v34  ;;  %v10183_v53 = vadd.f32 %v15847_v61, %v10101_v41  ;;  %v10184_v17 = vadd.f32 %v15856_v63, %v10102_v48  ;;  %v9193_v19 = vpop.f32.mrf.mxu1  ;;  %v10309_v2 = vperm.slane %v10181_v24, 0 }
 0x5ae   : > { %v9667_v4 = vadd.f32 %v16077_v50, %v9241_v32  ;;  %v8247_v21 = vadd.f32 %v8201_v23, %v7821_v1  ;;  %v8560_v3 = vadd.f32 %v16080_v30, %v8245_v44 }
 0x5af   : > { %v10310_v45 = vperm.slane %v10182_v6, 0  ;;  %v10311_v39 = vperm.slane %v10183_v53, 0  ;;  %v10375_v8 = vsel %vm10343_vm4, %v10309_v2, %v10374_v18  ;;  %v10312_v27 = vperm.slane %v10184_v17, 0 }
 0x5b0   : > { %v16116_v48 = vpop.f32.mrf.mxu0  ;;  %v9242_v29 = vadd.f32 %v9193_v19, %v8560_v3  ;;  %v8562_v20 = vadd.f32 %v8516_v56, %v8247_v21  ;;  %v16582_v3 = vld [vmem:[#allocation55_spill] sm:$0xff] }
 0x5b1   : > { %v10376_v16 = vsel %vm10345_vm5, %v10310_v45, %v10375_v8 }
 0x5b2   : > { %v10377_v51 = vsel %vm10347_vm8, %v10311_v39, %v10376_v16  ;;  %v16118_v17 = vpop.f32.mrf.mxu3  ;;  %v9668_v30 = vadd.f32 %v16084_v60, %v9242_v29 }
 0x5b3   : > { %v10378_v14 = vsel %vm10349_vm9, %v10312_v27, %v10377_v51 }
 0x5b4   : > { %10412 = vst [vmem:[%s15883_s28 + $0x20] sm:$0xff] %v10378_v14 }
 0x5b5   : > { %v9196_v40 = vpop.f32.mrf.mxu1 }
 0x5b6   : > { %v9243_v37 = vadd.f32 %v9196_v40, %v8561_v10 }
 0x5b8   : > { %v9669_v26 = vadd.f32 %v9622_v62, %v9243_v37  ;;  %v16121_v62 = vpop.f32.mrf.mxu2  ;;  %v8521_v14 = vpop.f32.mrf.mxu0 }
 0x5ba   : > { %v9689_v59 = vadd.f32 %v9669_v26, %v9667_v4  ;;  %v8209_v4 = vpop.f32.mrf.mxu3 }
 0x5bc   : > { %v9741_v55 = vrot.slane %v9689_v59, 2  ;;  %v9742_v25 = vrot.slane %v9689_v59, 4  ;;  %v9743_v34 = vrot.slane %v9689_v59, 6  ;;  %v11730_v41 = vrot.slane %v9689_v59, 9 }
 0x5bd   : > { %v9198_v22 = vpop.f32.mrf.mxu1 }
 0x5be   : > { %v11731_v7 = vrot.slane %v9741_v55, 9  ;;  %v11732_v12 = vrot.slane %v9742_v25, 9  ;;  %v11733_v5 = vrot.slane %v9743_v34, 9  ;;  %v10039_v24 = vadd.f32 %v11730_v41, %v9689_v59 }
 0x5bf   : > { %v9244_v42 = vadd.f32 %v9198_v22, %v8562_v20 }
 0x5c0   : > { %v10040_v50 = vadd.f32 %v11731_v7, %v9741_v55  ;;  %v10041_v6 = vadd.f32 %v11732_v12, %v9742_v25  ;;  %v10042_v23 = vadd.f32 %v11733_v5, %v9743_v34  ;;  %v10103_v53 = vmul.f32 0.25, %v10039_v24  ;;  %v9629_v25 = vpop.f32.mrf.mxu2  ;;  %v16583_v24 = vld [vmem:[#allocation26_spill] sm:$0xff] }
 0x5c1   : > { %v9670_v33 = vadd.f32 %v9624_v49, %v9244_v42  ;;  %v7822_v55 = vadd.f32 %v16582_v3, %v15716_v15  ;;  %v7824_v42 = vadd.f32 %v16583_v24, %v15741_v57 }
 0x5c2   : > { %v10104_v13 = vmul.f32 0.25, %v10040_v50  ;;  %v10105_v19 = vmul.f32 0.25, %v10041_v6  ;;  %v10185_v2 = vadd.f32 %v16126_v28, %v10103_v53  ;;  %v10106_v45 = vmul.f32 0.25, %v10042_v23 }
 0x5c3   : > { %v9690_v18 = vadd.f32 %v9670_v33, %v9668_v30  ;;  %v8248_v5 = vadd.f32 %v16112_v54, %v7822_v55  ;;  %v8250_v53 = vadd.f32 %v8209_v4, %v7824_v42  ;;  %v8524_v33 = vpop.f32.mrf.mxu0 }
 0x5c4   : > { %v10186_v39 = vadd.f32 %v15829_v36, %v10104_v13  ;;  %v10187_v31 = vadd.f32 %v15826_v38, %v10105_v19  ;;  %v10313_v46 = vperm.slane %v10185_v2, 0  ;;  %v10188_v35 = vadd.f32 %v15841_v11, %v10106_v45 }
 0x5c5   : > { %v9744_v8 = vrot.slane %v9690_v18, 2  ;;  %v9745_v60 = vrot.slane %v9690_v18, 4  ;;  %v9746_v27 = vrot.slane %v9690_v18, 6  ;;  %v11734_v16 = vrot.slane %v9690_v18, 9  ;;  %v9201_v51 = vpop.f32.mrf.mxu1 }
 0x5c6   : > { %v10314_v56 = vperm.slane %v10186_v39, 0  ;;  %v10315_v40 = vperm.slane %v10187_v31, 0  ;;  %v10316_v29 = vperm.slane %v10188_v35, 0  ;;  %v8565_v45 = vadd.f32 %v8524_v33, %v8250_v53  ;;  %v16584_v39 = vld [vmem:[#allocation58_spill] sm:$0xff] }
 0x5c7   : > { %v11735_v32 = vrot.slane %v9744_v8, 9  ;;  %v11736_v10 = vrot.slane %v9745_v60, 9  ;;  %v11737_v58 = vrot.slane %v9746_v27, 9  ;;  %v10043_v9 = vadd.f32 %v11734_v16, %v9690_v18 }
 0x5c8   : > { %v10379_v37 = vsel %vm10337_vm1, %v10314_v56, %v10313_v46  ;;  %v8563_v18 = vadd.f32 %v16116_v48, %v8248_v5  ;;  %v7823_v31 = vadd.f32 %v16584_v39, %v15731_v52  ;;  %v16585_v56 = vld [vmem:[#allocation33_spill] sm:$0xff] }
 0x5c9   : > { %v10044_v44 = vadd.f32 %v11735_v32, %v9744_v8  ;;  %v10045_v43 = vadd.f32 %v11736_v10, %v9745_v60  ;;  %v10046_v1 = vadd.f32 %v11737_v58, %v9746_v27  ;;  %v10107_v49 = vmul.f32 0.25, %v10043_v9  ;;  %v8211_v8 = vpop.f32.mrf.mxu3  ;;  %v9632_v27 = vpop.f32.mrf.mxu2  ;;  %v16586_v32 = vld [vmem:[#allocation22_spill] sm:$0xff] }
 0x5ca   : > { %v10380_v34 = vsel %vm10339_vm2, %v10315_v40, %v10379_v37  ;;  %v9245_v57 = vadd.f32 %v9201_v51, %v8563_v18  ;;  %v8249_v46 = vadd.f32 %v16118_v17, %v7823_v31  ;;  %v7825_v10 = vadd.f32 %v16586_v32, %v16585_v56 }
 0x5cb   : > { %v10108_v26 = vmul.f32 0.25, %v10044_v44  ;;  %v10109_v21 = vmul.f32 0.25, %v10045_v43  ;;  %v10110_v59 = vmul.f32 0.25, %v10046_v1  ;;  %v10189_v41 = vadd.f32 %v15838_v47, %v10107_v49  ;;  %v8526_v40 = vpop.f32.mrf.mxu0 }
 0x5cc   : > { %v10381_v50 = vsel %vm10341_vm3, %v10316_v29, %v10380_v34  ;;  %v9671_v58 = vadd.f32 %v16121_v62, %v9245_v57  ;;  %v8251_v9 = vadd.f32 %v8211_v8, %v7825_v10  ;;  %v8564_v51 = vadd.f32 %v8521_v14, %v8249_v46 }
 0x5cd   : > { %v10190_v20 = vadd.f32 %v15850_v0, %v10108_v26  ;;  %v10191_v22 = vadd.f32 %v15847_v61, %v10109_v21  ;;  %v10192_v7 = vadd.f32 %v15856_v63, %v10110_v59  ;;  %v9203_v12 = vpop.f32.mrf.mxu1  ;;  %v10317_v15 = vperm.slane %v10189_v41, 0 }
 0x5ce   : > { %v9246_v1 = vadd.f32 %v9203_v12, %v8564_v51  ;;  %v8566_v49 = vadd.f32 %v8526_v40, %v8251_v9 }
 0x5cf   : > { %v10318_v6 = vperm.slane %v10190_v20, 0  ;;  %v10319_v23 = vperm.slane %v10191_v22, 0  ;;  %v10382_v30 = vsel %vm10343_vm4, %v10317_v15, %v10381_v50  ;;  %v10320_v13 = vperm.slane %v10192_v7, 0 }
 0x5d0   : > { %v9672_v22 = vadd.f32 %v9629_v25, %v9246_v1 }
 0x5d1   : > { %v10383_v19 = vsel %vm10345_vm5, %v10318_v6, %v10382_v30  ;;  %v8214_v3 = vpop.f32.mrf.mxu3  ;;  %v9634_v34 = vpop.f32.mrf.mxu2 }
 0x5d2   : > { %v10384_v2 = vsel %vm10347_vm8, %v10319_v23, %v10383_v19 }
 0x5d3   : > { %v10385_v54 = vsel %vm10349_vm9, %v10320_v13, %v10384_v2  ;;  %v8529_v6 = vpop.f32.mrf.mxu0 }
 0x5d4   : > { %10413 = vst [vmem:[%s15883_s28 + $0x28] sm:$0xff] %v10385_v54 }
 0x5d5   : > { %v9206_v60 = vpop.f32.mrf.mxu1 }
 0x5d6   : > { %v9247_v16 = vadd.f32 %v9206_v60, %v8565_v45 }
 0x5d8   : > { %v9673_v48 = vadd.f32 %v9632_v27, %v9247_v16 }
 0x5d9   : > { %v8216_v31 = vpop.f32.mrf.mxu3  ;;  %v9637_v56 = vpop.f32.mrf.mxu2 }
 0x5da   : > { %v9691_v35 = vadd.f32 %v9673_v48, %v9671_v58 }
 0x5dc   : > { %v9747_v37 = vrot.slane %v9691_v35, 2  ;;  %v9748_v44 = vrot.slane %v9691_v35, 4  ;;  %v9749_v43 = vrot.slane %v9691_v35, 6  ;;  %v11738_v52 = vrot.slane %v9691_v35, 9 }
 0x5dd   : > { %v9208_v4 = vpop.f32.mrf.mxu1 }
 0x5de   : > { %v11739_v26 = vrot.slane %v9747_v37, 9  ;;  %v11740_v21 = vrot.slane %v9748_v44, 9  ;;  %v11741_v17 = vrot.slane %v9749_v43, 9  ;;  %v10047_v59 = vadd.f32 %v11738_v52, %v9691_v35 }
 0x5df   : > { %v9248_v55 = vadd.f32 %v9208_v4, %v8566_v49 }
 0x5e0   : > { %v10048_v62 = vadd.f32 %v11739_v26, %v9747_v37  ;;  %v10049_v41 = vadd.f32 %v11740_v21, %v9748_v44  ;;  %v10050_v29 = vadd.f32 %v11741_v17, %v9749_v43  ;;  %v10111_v20 = vmul.f32 0.25, %v10047_v59  ;;  %v8531_v43 = vpop.f32.mrf.mxu0 }
 0x5e1   : > { %v9674_v14 = vadd.f32 %v9634_v34, %v9248_v55  ;;  %v16587_v55 = vld [vmem:[#allocation32_spill] sm:$0xff]  ;;  %v16588_v34 = vld [vmem:[#allocation13_spill] sm:$0xff] }
 0x5e2   : > { %v10112_v7 = vmul.f32 0.25, %v10048_v62  ;;  %v10113_v5 = vmul.f32 0.25, %v10049_v41  ;;  %v10193_v24 = vadd.f32 %v16126_v28, %v10111_v20  ;;  %v10114_v42 = vmul.f32 0.25, %v10050_v29  ;;  %v8219_v41 = vpop.f32.mrf.mxu3 }
 0x5e3   : > { %v9692_v12 = vadd.f32 %v9674_v14, %v9672_v22  ;;  %v7826_v62 = vadd.f32 %v16588_v34, %v16587_v55  ;;  %v9639_v22 = vpop.f32.mrf.mxu2  ;;  %v16589_v14 = vld [vmem:[#allocation66_spill] sm:$0xff] }
 0x5e4   : > { %v10194_v15 = vadd.f32 %v15829_v36, %v10112_v7  ;;  %v10195_v50 = vadd.f32 %v15826_v38, %v10113_v5  ;;  %v10321_v13 = vperm.slane %v10193_v24, 0  ;;  %v10196_v57 = vadd.f32 %v15841_v11, %v10114_v42  ;;  %v16590_v7 = vld [vmem:[#allocation62_spill] sm:$0xff] }
 0x5e5   : > { %v9750_v23 = vrot.slane %v9692_v12, 2  ;;  %v9751_v53 = vrot.slane %v9692_v12, 4  ;;  %v9752_v30 = vrot.slane %v9692_v12, 6  ;;  %v11742_v33 = vrot.slane %v9692_v12, 9  ;;  %v9211_v39 = vpop.f32.mrf.mxu1 }
 0x5e6   : > { %v10322_v19 = vperm.slane %v10194_v15, 0  ;;  %v10323_v45 = vperm.slane %v10195_v50, 0  ;;  %v10324_v35 = vperm.slane %v10196_v57, 0  ;;  %v8252_v20 = vadd.f32 %v8214_v3, %v7826_v62 }
 0x5e7   : > { %v11743_v2 = vrot.slane %v9750_v23, 9  ;;  %v11744_v25 = vrot.slane %v9751_v53, 9  ;;  %v11745_v18 = vrot.slane %v9752_v30, 9  ;;  %v10051_v54 = vadd.f32 %v11742_v33, %v9692_v12 }
 0x5e8   : > { %v10386_v8 = vsel %vm10337_vm1, %v10322_v19, %v10321_v13  ;;  %v7828_v5 = vadd.f32 %v16590_v7, %v16589_v14  ;;  %v8534_v12 = vpop.f32.mrf.mxu0  ;;  %v8567_v42 = vadd.f32 %v8529_v6, %v8252_v20 }
 0x5e9   : > { %v10052_v60 = vadd.f32 %v11743_v2, %v9750_v23  ;;  %v10053_v27 = vadd.f32 %v11744_v25, %v9751_v53  ;;  %v10054_v16 = vadd.f32 %v11745_v18, %v9752_v30  ;;  %v10115_v46 = vmul.f32 0.25, %v10051_v54  ;;  %v16591_v23 = vld [vmem:[#allocation65_spill] sm:$0xff]  ;;  %v16592_v53 = vld [vmem:[#allocation31_spill] sm:$0xff]  ;;  %v16593_v18 = vld [vmem:[#allocation12_spill] sm:$0xff] }
 0x5ea   : > { %v10387_v48 = vsel %vm10339_vm2, %v10323_v45, %v10386_v8  ;;  %v8254_v24 = vadd.f32 %v8219_v41, %v7828_v5  ;;  %v9249_v50 = vadd.f32 %v9211_v39, %v8567_v42  ;;  %v7827_v30 = vadd.f32 %v16592_v53, %v16591_v23  ;;  %v8221_v13 = vpop.f32.mrf.mxu3  ;;  %v16594_v54 = vld [vmem:[#allocation25_spill] sm:$0xff] }
 0x5eb   : > { %v10116_v32 = vmul.f32 0.25, %v10052_v60  ;;  %v10117_v10 = vmul.f32 0.25, %v10053_v27  ;;  %v10118_v58 = vmul.f32 0.25, %v10054_v16  ;;  %v10197_v9 = vadd.f32 %v15838_v47, %v10115_v46 }
 0x5ec   : > { %v10388_v52 = vsel %vm10341_vm3, %v10324_v35, %v10387_v48  ;;  %v8569_v15 = vadd.f32 %v8534_v12, %v8254_v24  ;;  %v8253_v25 = vadd.f32 %v8216_v31, %v7827_v30  ;;  %v7829_v3 = vadd.f32 %v16594_v54, %v16593_v18 }
 0x5ed   : > { %v10198_v40 = vadd.f32 %v15850_v0, %v10116_v32  ;;  %v10199_v51 = vadd.f32 %v15847_v61, %v10117_v10  ;;  %v10200_v37 = vadd.f32 %v15856_v63, %v10118_v58  ;;  %v10325_v44 = vperm.slane %v10197_v9, 0  ;;  %v9213_v59 = vpop.f32.mrf.mxu1 }
 0x5ee   : > { %v9675_v57 = vadd.f32 %v9637_v56, %v9249_v50  ;;  %v8255_v8 = vadd.f32 %v8221_v13, %v7829_v3  ;;  %v8568_v16 = vadd.f32 %v8531_v43, %v8253_v25 }
 0x5ef   : > { %v10326_v1 = vperm.slane %v10198_v40, 0  ;;  %v10327_v49 = vperm.slane %v10199_v51, 0  ;;  %v10389_v4 = vsel %vm10343_vm4, %v10325_v44, %v10388_v52  ;;  %v10328_v26 = vperm.slane %v10200_v37, 0 }
 0x5f0   : > { %v8536_v60 = vpop.f32.mrf.mxu0  ;;  %v9250_v58 = vadd.f32 %v9213_v59, %v8568_v16 }
 0x5f1   : > { %v10390_v21 = vsel %vm10345_vm5, %v10326_v1, %v10389_v4  ;;  %v8570_v10 = vadd.f32 %v8536_v60, %v8255_v8 }
 0x5f2   : > { %v10391_v17 = vsel %vm10347_vm8, %v10327_v49, %v10390_v21  ;;  %v9676_v49 = vadd.f32 %v9639_v22, %v9250_v58 }
 0x5f3   : > { %v10392_v29 = vsel %vm10349_vm9, %v10328_v26, %v10391_v17  ;;  %v9642_v19 = vpop.f32.mrf.mxu2 }
 0x5f4   : > { %10414 = vst [vmem:[%s15883_s28 + $0x30] sm:$0xff] %v10392_v29 }
 0x5f9   : > { %v9216_v33 = vpop.f32.mrf.mxu1 }
 0x5fa   : > { %v9251_v2 = vadd.f32 %v9216_v33, %v8569_v15 }
 0x5fb   : > { %v9644_v1 = vpop.f32.mrf.mxu2 }
 0x5fc   : > { %v9677_v45 = vadd.f32 %v9642_v19, %v9251_v2 }
 0x5fe   : > { %v9693_v27 = vadd.f32 %v9677_v45, %v9675_v57 }
 0x600   : > { %v9753_v6 = vrot.slane %v9693_v27, 2  ;;  %v9754_v46 = vrot.slane %v9693_v27, 4  ;;  %v9755_v39 = vrot.slane %v9693_v27, 6  ;;  %v11746_v32 = vrot.slane %v9693_v27, 9 }
 0x601   : > { %v9218_v48 = vpop.f32.mrf.mxu1 }
 0x602   : > { %v11747_v9 = vrot.slane %v9753_v6, 9  ;;  %v11748_v35 = vrot.slane %v9754_v46, 9  ;;  %v11749_v40 = vrot.slane %v9755_v39, 9  ;;  %v10055_v31 = vadd.f32 %v11746_v32, %v9693_v27 }
 0x603   : > { %v9252_v51 = vadd.f32 %v9218_v48, %v8570_v10 }
 0x604   : > { %v10056_v37 = vadd.f32 %v11747_v9, %v9753_v6  ;;  %v10057_v44 = vadd.f32 %v11748_v35, %v9754_v46  ;;  %v10058_v56 = vadd.f32 %v11749_v40, %v9755_v39  ;;  %v10119_v52 = vmul.f32 0.25, %v10055_v31 }
 0x605   : > { %v9678_v4 = vadd.f32 %v9644_v1, %v9252_v51 }
 0x606   : > { %v10120_v43 = vmul.f32 0.25, %v10056_v37  ;;  %v10121_v26 = vmul.f32 0.25, %v10057_v44  ;;  %v10201_v21 = vadd.f32 %v16126_v28, %v10119_v52  ;;  %v10122_v59 = vmul.f32 0.25, %v10058_v56 }
 0x607   : > { %v9694_v17 = vadd.f32 %v9678_v4, %v9676_v49 }
 0x608   : > { %v10202_v55 = vadd.f32 %v15829_v36, %v10120_v43  ;;  %v10203_v34 = vadd.f32 %v15826_v38, %v10121_v26  ;;  %v10329_v14 = vperm.slane %v10201_v21, 0  ;;  %v10204_v42 = vadd.f32 %v15841_v11, %v10122_v59 }
 0x609   : > { %v9756_v62 = vrot.slane %v9694_v17, 2  ;;  %v9757_v41 = vrot.slane %v9694_v17, 4  ;;  %v9758_v29 = vrot.slane %v9694_v17, 6  ;;  %v11750_v20 = vrot.slane %v9694_v17, 9 }
 0x60a   : > { %v10330_v7 = vperm.slane %v10202_v55, 0  ;;  %v10331_v28 = vperm.slane %v10203_v34, 0  ;;  %v10332_v19 = vperm.slane %v10204_v42, 0 }
 0x60b   : > { %v11751_v5 = vrot.slane %v9756_v62, 9  ;;  %v11752_v22 = vrot.slane %v9757_v41, 9  ;;  %v11753_v24 = vrot.slane %v9758_v29, 9  ;;  %v10059_v12 = vadd.f32 %v11750_v20, %v9694_v17 }
 0x60c   : > { %v10393_v15 = vsel %vm10337_vm1, %v10330_v7, %v10329_v14 }
 0x60d   : > { %v10060_v36 = vadd.f32 %v11751_v5, %v9756_v62  ;;  %v10061_v50 = vadd.f32 %v11752_v22, %v9757_v41  ;;  %v10062_v38 = vadd.f32 %v11753_v24, %v9758_v29  ;;  %v10123_v23 = vmul.f32 0.25, %v10059_v12 }
 0x60e   : > { %v10394_v13 = vsel %vm10339_vm2, %v10331_v28, %v10393_v15 }
 0x60f   : > { %v10124_v53 = vmul.f32 0.25, %v10060_v36  ;;  %v10125_v30 = vmul.f32 0.25, %v10061_v50  ;;  %v10126_v33 = vmul.f32 0.25, %v10062_v38  ;;  %v10205_v11 = vadd.f32 %v15838_v47, %v10123_v23 }
 0x610   : > { %v10395_v3 = vsel %vm10341_vm3, %v10332_v19, %v10394_v13 }
 0x611   : > { %v10206_v2 = vadd.f32 %v15850_v0, %v10124_v53  ;;  %v10207_v25 = vadd.f32 %v15847_v61, %v10125_v30  ;;  %v10208_v18 = vadd.f32 %v15856_v63, %v10126_v33  ;;  %v10333_v54 = vperm.slane %v10205_v11, 0 }
 0x613   : > { %v10334_v57 = vperm.slane %v10206_v2, 0  ;;  %v10335_v45 = vperm.slane %v10207_v25, 0  ;;  %v10396_v8 = vsel %vm10343_vm4, %v10333_v54, %v10395_v3  ;;  %v10336_v47 = vperm.slane %v10208_v18, 0 }
 0x615   : > { %v10397_v60 = vsel %vm10345_vm5, %v10334_v57, %v10396_v8 }
 0x616   : > { %v10398_v61 = vsel %vm10347_vm8, %v10335_v45, %v10397_v60 }
 0x617   : > { %v10399_v0 = vsel %vm10349_vm9, %v10336_v47, %v10398_v61 }
 0x618   : > { %10415 = vst [vmem:[%s15883_s28 + $0x38] sm:$0xff] %v10399_v0 }
 0x619   : > { %12081 = shalt.err (!%p12078_p8)
}
 0x61a   : > { %s12126_s19 = smov 128   ;;  %s12127_s28 = smov 8  }
 0x61b   : > { %11936 = dma.vmem_to_hbm [thread:$0]  (%p12201_p5), %s10430_s25, 1024, %s10432_s20, %s10417_s14, %s12126_s19, %s12126_s19, %s12127_s28  }
 0x61c PF: > { %p11948_p9 = scmp.ge.s32.totalorder %s12120_s24, 2  ;;  %s10446_s10 = sand.u32 1, %s12108_s21  }
 0x61d   : > { %s10447_s11 = scalar_lea.sflag [#allocation5], %s10446_s10 }
 0x61e   : > { %p11943_p10 = pnand %p11948_p9, %p12205_p6 }
 0x620   : > { %p11944_p11 = pneg %p11943_p10 }
 0x622   : > { %12103 = dma.done.wait (%p11944_p11), %s10447_s11, 1024  }
 0x623   : > { %12105 = vsyncadd (%p11944_p11), %s10447_s11, 4294966272  ;;  %p17_p12 = scmp.ge.s32.totalorder %s12188_s27, 4   ;;  %s16595_s21 = smov %s12112_s22 }
 0x624   : > { %s16596_s22 = smov %s12116_s23  ;;  %s16597_s23 = smov %s12199_s30 }
 0x625   : > { %s16598_s24 = smov %s12188_s27  ;;  %19 = sbr.rel (!%p17_p12) target bundleno = 4 (0x4), region = 105 }
 0x62a   :  { %10453 = vsyncpa [#allocation4], 1 }
 0x62b   :  { %10455 = vsyncpa [#allocation4 + $0x1], 1 }
 0x62c   :  { %10456 = vsyncpa [#allocation5], 1 }
 0x62d   :  { %10458 = vsyncpa [#allocation5 + $0x1], 1 }

</bundles_post_ra>
